<compile_context>
chip_gen: v7x
topology: tpu7x:2x2x1
jax: 0.10.0
libtpu: 0.0.40
codegen_flags: <defaults>
</compile_context>

<pallas_src>
import numpy as np
import jax
import jax.numpy as jnp
from jax.experimental import pallas as pl
from jax.experimental.pallas import tpu as pltpu


# ---------------- fused Pallas kernel ----------------

def _net_kernel(p1_ref, w1_ref, b1_ref, w2_ref, b2_ref, w3_ref, b3_ref,
                o_ref, pad_ref):
    # p1_ref : (B*4*HWp, 9*Cin)  im2col rows, ordered (b, hp, wp, h2, w2)
    # w1_ref : (9*Cin, C1)   b1_ref: (1, C1)
    # w2_ref : (9, C1, C2)   per-tap 3x3 weights   b2_ref: (1, C2)
    # w3_ref : (C2, 10)      b3_ref: (1, 10)
    # o_ref  : (B, 10)
    # pad_ref: (B, H2+2, W2+2, C1) zero-padded pooled activations (VMEM scratch)
    B, Hp2, Wp2, C1 = pad_ref.shape
    H2, W2 = Hp2 - 2, Wp2 - 2
    HWp = H2 * W2
    C2 = w2_ref.shape[-1]

    # ---- conv11 as a single im2col GEMM + bias + ReLU ----
    y = jnp.dot(p1_ref[...], w1_ref[...], preferred_element_type=jnp.float32)
    y = jnp.maximum(y + b1_ref[...], 0.0)                  # (B*4*HWp, C1)

    # ---- pool1 (2x2 avg) on the VPU: rows are pre-grouped into 4 planes ----
    y = y.reshape(B, 4, HWp, C1).sum(axis=1) * 0.25        # (B, HWp, C1)

    # ---- conv21 (3x3, pad 1) straight from VMEM: padded scratch + 9 taps ----
    pad_ref[...] = jnp.zeros_like(pad_ref)
    pad_ref[:, 1:H2 + 1, 1:W2 + 1, :] = y.reshape(B, H2, W2, C1)

    acc = None
    for dy in range(3):
        for dx in range(3):
            xs = pad_ref[:, dy:dy + H2, dx:dx + W2, :].reshape(B * HWp, C1)
            d = jnp.dot(xs, w2_ref[dy * 3 + dx],
                        preferred_element_type=jnp.float32)
            acc = d if acc is None else acc + d
    acc = jnp.maximum(acc + b2_ref[...], 0.0)               # (B*HWp, C2)

    # ---- conv52 (1x1) + pool2 + pool5: all linear -> mean first, then GEMM ----
    gap = jnp.mean(acc.reshape(B, HWp, C2), axis=1)         # (B, C2)
    o_ref[...] = (jnp.dot(gap, w3_ref[...], preferred_element_type=jnp.float32)
                  + b3_ref[...]).astype(o_ref.dtype)


# ---------------- wrapper (layout-only glue + pallas_call) ----------------

def _im2col_3x3_pool_order(x):
    """(N,H,W,C) -> (N*4*(H/2)*(W/2), 9*C) im2col rows for a 3x3 pad-1 conv,
    ordered (b, hp, wp, h2, w2) so each 2x2 pooling block forms 4 equal
    contiguous planes (lets the kernel pool with a layout-preserving reshape)."""
    N, H, W, C = x.shape
    xp = jnp.pad(x, ((0, 0), (1, 1), (1, 1), (0, 0)))
    cols = [xp[:, dy:dy + H, dx:dx + W, :] for dy in range(3) for dx in range(3)]
    p = jnp.concatenate(cols, axis=-1)                      # (N, H, W, 9*C)
    p = p.reshape(N, H // 2, 2, W // 2, 2, 9 * C)           # (b,h2,hp,w2,wp,k)
    p = p.transpose(0, 2, 4, 1, 3, 5)                       # (b,hp,wp,h2,w2,k)
    return p.reshape(N * 4 * (H // 2) * (W // 2), 9 * C)


def net_pallas(x_nchw, params, *, block_n=8):
    x = jnp.transpose(x_nchw, (0, 2, 3, 1)).astype(jnp.float32)  # NCHW -> NHWC
    N, H1, W1, Cin = x.shape
    # pool5 = AvgPool2d(8,8) + view(-1, 10) in the module implies 32x32 inputs.
    assert H1 == 32 and W1 == 32, "Net's pool5/view implies 32x32 spatial input"
    H2, W2 = H1 // 2, W1 // 2

    C1 = params['w1'].shape[-1]          # 64
    C2 = params['w2'].shape[-1]          # 128
    ncls = params['w3'].shape[-1]        # 10

    # Images per grid step; B == N or B % 8 == 0 keeps BlockSpecs legal.
    B = block_n if (N % block_n == 0) else N
    grid = (N // B,)

    p1 = _im2col_3x3_pool_order(x)                       # (N*4*H2*W2, 9*Cin)
    w1 = params['w1'].reshape(9 * Cin, C1)
    w2 = params['w2'].reshape(9, C1, C2)                 # tap-major (dy*3+dx)

    rows_per_img = 4 * H2 * W2                           # = H1*W1

    return pl.pallas_call(
        _net_kernel,
        out_shape=jax.ShapeDtypeStruct((N, ncls), jnp.float32),
        grid=grid,
        in_specs=[
            pl.BlockSpec((B * rows_per_img, 9 * Cin), lambda i: (i, 0)),
            pl.BlockSpec((9 * Cin, C1), lambda i: (0, 0)),
            pl.BlockSpec((1, C1), lambda i: (0, 0)),
            pl.BlockSpec((9, C1, C2), lambda i: (0, 0, 0)),
            pl.BlockSpec((1, C2), lambda i: (0, 0)),
            pl.BlockSpec((C2, ncls), lambda i: (0, 0)),
            pl.BlockSpec((1, ncls), lambda i: (0, 0)),
        ],
        out_specs=pl.BlockSpec((B, ncls), lambda i: (i, 0)),
        scratch_shapes=[pltpu.VMEM((B, H2 + 2, W2 + 2, C1), jnp.float32)],
        compiler_params=pltpu.CompilerParams(
            dimension_semantics=("parallel",),
            vmem_limit_bytes=32 * 1024 * 1024),
    )(p1, w1, params['b1'], w2, params['b2'], params['w3'], params['b3'])


@jax.jit
def net_forward(x_nchw, params):
    return net_pallas(x_nchw, params)


# ---------------- params + pure-JAX reference ----------------

def init_params(key):
    k = jax.random.split(key, 6)
    # Conv weights stored HWIO (kh, kw, cin, cout); deterministic synthetic init.
    w1 = jax.random.normal(k[0], (3, 3, 3, 64), jnp.float32) * 0.10
    b1 = jax.random.normal(k[1], (1, 64), jnp.float32) * 0.10
    w2 = jax.random.normal(k[2], (3, 3, 64, 128), jnp.float32) * 0.05
    b2 = jax.random.normal(k[3], (1, 128), jnp.float32) * 0.05
    w3 = jax.random.normal(k[4], (128, 10), jnp.float32) * 0.05
    b3 = jax.random.normal(k[5], (1, 10), jnp.float32) * 0.05
    return dict(w1=w1, b1=b1, w2=w2, b2=b2, w3=w3, b3=b3)


def ref_forward(x_nchw, params):
    x = jnp.transpose(x_nchw, (0, 2, 3, 1))

    def conv3x3(x, w_hwio, b):
        y = jax.lax.conv_general_dilated(
            x, w_hwio, window_strides=(1, 1), padding='SAME',
            dimension_numbers=('NHWC', 'HWIO', 'NHWC'))
        return y + b.reshape(1, 1, 1, -1)

    def pool2(x):
        N, H, W, C = x.shape
        return x.reshape(N, H // 2, 2, W // 2, 2, C).mean(axis=(2, 4))

    y = jax.nn.relu(conv3x3(x, params['w1'], params['b1']))
    y = pool2(y)
    y = jax.nn.relu(conv3x3(y, params['w2'], params['b2']))
    y = pool2(y)
    y = jnp.einsum('nhwc,co->nhwo', y, params['w3']) + params['b3'].reshape(1, 1, 1, -1)
    return y.mean(axis=(1, 2))


if __name__ == "__main__":
    key = jax.random.PRNGKey(0)
    pkey, xkey = jax.random.split(key)
    params = init_params(pkey)
    # The module's pool5=AvgPool2d(8,8) + view(-1,10) implies 32x32 spatial input.
    x = jax.random.normal(xkey, (2, 3, 32, 32), jnp.float32)   # NCHW like PyTorch
    out = jax.block_until_ready(net_forward(x, params))
    assert out.shape == (2, 10), out.shape
    ref = ref_forward(x, params)
    np.testing.assert_allclose(np.asarray(out), np.asarray(ref), rtol=1e-3, atol=1e-3)
    print("KERNEL_OK")
</pallas_src>

<mosaic_0001>
module attributes {stable_mosaic.version = 11 : i64} {
  func.func @_net_kernel(%arg0: i32, %arg1: memref<2048x27xf32, #tpu.memory_space<vmem>>, %arg2: memref<27x64xf32, #tpu.memory_space<vmem>>, %arg3: memref<1x64xf32, #tpu.memory_space<vmem>>, %arg4: memref<9x64x128xf32, #tpu.memory_space<vmem>>, %arg5: memref<1x128xf32, #tpu.memory_space<vmem>>, %arg6: memref<128x10xf32, #tpu.memory_space<vmem>>, %arg7: memref<1x10xf32, #tpu.memory_space<vmem>>, %arg8: memref<2x10xf32, #tpu.memory_space<vmem>>, %arg9: memref<2x18x18x64xf32, #tpu.memory_space<vmem>>) attributes {dimension_semantics = [#tpu.dimension_semantics<parallel>], iteration_bounds = array<i64: 1>, scalar_prefetch = 0 : i64, scratch_operands = 1 : i64, tpu.core_type = #tpu.core_type<tc>, window_params = [{transform_indices = @transform_0, window_bounds = array<i64: 2048, 27>}, {pipeline_mode = #tpu.pipeline_mode<synchronous>, transform_indices = @transform_1, window_bounds = array<i64: 27, 64>}, {pipeline_mode = #tpu.pipeline_mode<synchronous>, transform_indices = @transform_2, window_bounds = array<i64: 1, 64>}, {pipeline_mode = #tpu.pipeline_mode<synchronous>, transform_indices = @transform_3, window_bounds = array<i64: 9, 64, 128>}, {pipeline_mode = #tpu.pipeline_mode<synchronous>, transform_indices = @transform_4, window_bounds = array<i64: 1, 128>}, {pipeline_mode = #tpu.pipeline_mode<synchronous>, transform_indices = @transform_5, window_bounds = array<i64: 128, 10>}, {pipeline_mode = #tpu.pipeline_mode<synchronous>, transform_indices = @transform_6, window_bounds = array<i64: 1, 10>}, {transform_indices = @transform_7, window_bounds = array<i64: 2, 10>}]} {
    %c0 = arith.constant 0 : index
    %c0_0 = arith.constant 0 : index
    %0 = vector.load %arg1[%c0, %c0_0] : memref<2048x27xf32, #tpu.memory_space<vmem>>, vector<2048x27xf32>
    %c0_1 = arith.constant 0 : index
    %c0_2 = arith.constant 0 : index
    %1 = vector.load %arg2[%c0_1, %c0_2] : memref<27x64xf32, #tpu.memory_space<vmem>>, vector<27x64xf32>
    %cst = arith.constant dense<0.000000e+00> : vector<2048x64xf32>
    %2 = tpu.matmul %0, %1, %cst {dimension_numbers = #tpu.dot_dimension_numbers<[1], [0], [0], [1], [0, 0, 1, 1], [], []>} : vector<2048x27xf32>, vector<27x64xf32>, vector<2048x64xf32> -> vector<2048x64xf32>
    %c0_3 = arith.constant 0 : index
    %c0_4 = arith.constant 0 : index
    %3 = vector.load %arg3[%c0_3, %c0_4] : memref<1x64xf32, #tpu.memory_space<vmem>>, vector<1x64xf32>
    %4 = vector.broadcast %3 : vector<1x64xf32> to vector<2048x64xf32>
    %5 = arith.addf %2, %4 : vector<2048x64xf32>
    %cst_5 = arith.constant 0.000000e+00 : f32
    %6 = vector.broadcast %cst_5 : f32 to vector<2048x64xf32>
    %7 = arith.maximumf %5, %6 : vector<2048x64xf32>
    %8 = vector.shape_cast %7 : vector<2048x64xf32> to vector<2x4x256x64xf32>
    %cst_6 = arith.constant dense<0.000000e+00> : vector<2x256x64xf32>
    %9 = vector.multi_reduction <add>, %8, %cst_6 [1] : vector<2x4x256x64xf32> to vector<2x256x64xf32>
    %cst_7 = arith.constant 2.500000e-01 : f32
    %10 = vector.broadcast %cst_7 : f32 to vector<2x256x64xf32>
    %11 = arith.mulf %9, %10 : vector<2x256x64xf32>
    %cst_8 = arith.constant 0.000000e+00 : f32
    %12 = vector.broadcast %cst_8 : f32 to vector<2x18x18x64xf32>
    %c0_9 = arith.constant 0 : index
    %c0_10 = arith.constant 0 : index
    %c0_11 = arith.constant 0 : index
    %c0_12 = arith.constant 0 : index
    %13 = vector.load %arg9[%c0_9, %c0_10, %c0_11, %c0_12] : memref<2x18x18x64xf32, #tpu.memory_space<vmem>>, vector<2x18x18x64xf32>
    tpu.vector_store %arg9[%c0_9, %c0_10, %c0_11, %c0_12], %12 {strides = array<i32>} : memref<2x18x18x64xf32, #tpu.memory_space<vmem>>, vector<2x18x18x64xf32>,
    %14 = vector.shape_cast %11 : vector<2x256x64xf32> to vector<2x16x16x64xf32>
    %c0_13 = arith.constant 0 : index
    %c1 = arith.constant 1 : index
    %c1_14 = arith.constant 1 : index
    %c0_15 = arith.constant 0 : index
    %15 = vector.load %arg9[%c0_13, %c1, %c1_14, %c0_15] : memref<2x18x18x64xf32, #tpu.memory_space<vmem>>, vector<2x16x16x64xf32>
    tpu.vector_store %arg9[%c0_13, %c1, %c1_14, %c0_15], %14 {strides = array<i32>} : memref<2x18x18x64xf32, #tpu.memory_space<vmem>>, vector<2x16x16x64xf32>,
    %c0_16 = arith.constant 0 : index
    %c0_17 = arith.constant 0 : index
    %c0_18 = arith.constant 0 : index
    %c0_19 = arith.constant 0 : index
    %16 = vector.load %arg9[%c0_16, %c0_17, %c0_18, %c0_19] : memref<2x18x18x64xf32, #tpu.memory_space<vmem>>, vector<2x16x16x64xf32>
    %17 = vector.shape_cast %16 : vector<2x16x16x64xf32> to vector<512x64xf32>
    %c0_20 = arith.constant 0 : index
    %c0_21 = arith.constant 0 : index
    %c0_22 = arith.constant 0 : index
    %18 = vector.load %arg4[%c0_20, %c0_21, %c0_22] : memref<9x64x128xf32, #tpu.memory_space<vmem>>, vector<1x64x128xf32>
    %19 = vector.shape_cast %18 : vector<1x64x128xf32> to vector<64x128xf32>
    %cst_23 = arith.constant dense<0.000000e+00> : vector<512x128xf32>
    %20 = tpu.matmul %17, %19, %cst_23 {dimension_numbers = #tpu.dot_dimension_numbers<[1], [0], [0], [1], [0, 0, 1, 1], [], []>} : vector<512x64xf32>, vector<64x128xf32>, vector<512x128xf32> -> vector<512x128xf32>
    %c0_24 = arith.constant 0 : index
    %c0_25 = arith.constant 0 : index
    %c1_26 = arith.constant 1 : index
    %c0_27 = arith.constant 0 : index
    %21 = vector.load %arg9[%c0_24, %c0_25, %c1_26, %c0_27] : memref<2x18x18x64xf32, #tpu.memory_space<vmem>>, vector<2x16x16x64xf32>
    %22 = vector.shape_cast %21 : vector<2x16x16x64xf32> to vector<512x64xf32>
    %c1_28 = arith.constant 1 : index
    %c0_29 = arith.constant 0 : index
    %c0_30 = arith.constant 0 : index
    %23 = vector.load %arg4[%c1_28, %c0_29, %c0_30] : memref<9x64x128xf32, #tpu.memory_space<vmem>>, vector<1x64x128xf32>
    %24 = vector.shape_cast %23 : vector<1x64x128xf32> to vector<64x128xf32>
    %cst_31 = arith.constant dense<0.000000e+00> : vector<512x128xf32>
    %25 = tpu.matmul %22, %24, %cst_31 {dimension_numbers = #tpu.dot_dimension_numbers<[1], [0], [0], [1], [0, 0, 1, 1], [], []>} : vector<512x64xf32>, vector<64x128xf32>, vector<512x128xf32> -> vector<512x128xf32>
    %26 = arith.addf %20, %25 : vector<512x128xf32>
    %c0_32 = arith.constant 0 : index
    %c0_33 = arith.constant 0 : index
    %c2 = arith.constant 2 : index
    %c0_34 = arith.constant 0 : index
    %27 = vector.load %arg9[%c0_32, %c0_33, %c2, %c0_34] : memref<2x18x18x64xf32, #tpu.memory_space<vmem>>, vector<2x16x16x64xf32>
    %28 = vector.shape_cast %27 : vector<2x16x16x64xf32> to vector<512x64xf32>
    %c2_35 = arith.constant 2 : index
    %c0_36 = arith.constant 0 : index
    %c0_37 = arith.constant 0 : index
    %29 = vector.load %arg4[%c2_35, %c0_36, %c0_37] : memref<9x64x128xf32, #tpu.memory_space<vmem>>, vector<1x64x128xf32>
    %30 = vector.shape_cast %29 : vector<1x64x128xf32> to vector<64x128xf32>
    %cst_38 = arith.constant dense<0.000000e+00> : vector<512x128xf32>
    %31 = tpu.matmul %28, %30, %cst_38 {dimension_numbers = #tpu.dot_dimension_numbers<[1], [0], [0], [1], [0, 0, 1, 1], [], []>} : vector<512x64xf32>, vector<64x128xf32>, vector<512x128xf32> -> vector<512x128xf32>
    %32 = arith.addf %26, %31 : vector<512x128xf32>
    %c0_39 = arith.constant 0 : index
    %c1_40 = arith.constant 1 : index
    %c0_41 = arith.constant 0 : index
    %c0_42 = arith.constant 0 : index
    %33 = vector.load %arg9[%c0_39, %c1_40, %c0_41, %c0_42] : memref<2x18x18x64xf32, #tpu.memory_space<vmem>>, vector<2x16x16x64xf32>
    %34 = vector.shape_cast %33 : vector<2x16x16x64xf32> to vector<512x64xf32>
    %c3 = arith.constant 3 : index
    %c0_43 = arith.constant 0 : index
    %c0_44 = arith.constant 0 : index
    %35 = vector.load %arg4[%c3, %c0_43, %c0_44] : memref<9x64x128xf32, #tpu.memory_space<vmem>>, vector<1x64x128xf32>
    %36 = vector.shape_cast %35 : vector<1x64x128xf32> to vector<64x128xf32>
    %cst_45 = arith.constant dense<0.000000e+00> : vector<512x128xf32>
    %37 = tpu.matmul %34, %36, %cst_45 {dimension_numbers = #tpu.dot_dimension_numbers<[1], [0], [0], [1], [0, 0, 1, 1], [], []>} : vector<512x64xf32>, vector<64x128xf32>, vector<512x128xf32> -> vector<512x128xf32>
    %38 = arith.addf %32, %37 : vector<512x128xf32>
    %c0_46 = arith.constant 0 : index
    %c1_47 = arith.constant 1 : index
    %c1_48 = arith.constant 1 : index
    %c0_49 = arith.constant 0 : index
    %39 = vector.load %arg9[%c0_46, %c1_47, %c1_48, %c0_49] : memref<2x18x18x64xf32, #tpu.memory_space<vmem>>, vector<2x16x16x64xf32>
    %40 = vector.shape_cast %39 : vector<2x16x16x64xf32> to vector<512x64xf32>
    %c4 = arith.constant 4 : index
    %c0_50 = arith.constant 0 : index
    %c0_51 = arith.constant 0 : index
    %41 = vector.load %arg4[%c4, %c0_50, %c0_51] : memref<9x64x128xf32, #tpu.memory_space<vmem>>, vector<1x64x128xf32>
    %42 = vector.shape_cast %41 : vector<1x64x128xf32> to vector<64x128xf32>
    %cst_52 = arith.constant dense<0.000000e+00> : vector<512x128xf32>
    %43 = tpu.matmul %40, %42, %cst_52 {dimension_numbers = #tpu.dot_dimension_numbers<[1], [0], [0], [1], [0, 0, 1, 1], [], []>} : vector<512x64xf32>, vector<64x128xf32>, vector<512x128xf32> -> vector<512x128xf32>
    %44 = arith.addf %38, %43 : vector<512x128xf32>
    %c0_53 = arith.constant 0 : index
    %c1_54 = arith.constant 1 : index
    %c2_55 = arith.constant 2 : index
    %c0_56 = arith.constant 0 : index
    %45 = vector.load %arg9[%c0_53, %c1_54, %c2_55, %c0_56] : memref<2x18x18x64xf32, #tpu.memory_space<vmem>>, vector<2x16x16x64xf32>
    %46 = vector.shape_cast %45 : vector<2x16x16x64xf32> to vector<512x64xf32>
    %c5 = arith.constant 5 : index
    %c0_57 = arith.constant 0 : index
    %c0_58 = arith.constant 0 : index
    %47 = vector.load %arg4[%c5, %c0_57, %c0_58] : memref<9x64x128xf32, #tpu.memory_space<vmem>>, vector<1x64x128xf32>
    %48 = vector.shape_cast %47 : vector<1x64x128xf32> to vector<64x128xf32>
    %cst_59 = arith.constant dense<0.000000e+00> : vector<512x128xf32>
    %49 = tpu.matmul %46, %48, %cst_59 {dimension_numbers = #tpu.dot_dimension_numbers<[1], [0], [0], [1], [0, 0, 1, 1], [], []>} : vector<512x64xf32>, vector<64x128xf32>, vector<512x128xf32> -> vector<512x128xf32>
    %50 = arith.addf %44, %49 : vector<512x128xf32>
    %c0_60 = arith.constant 0 : index
    %c2_61 = arith.constant 2 : index
    %c0_62 = arith.constant 0 : index
    %c0_63 = arith.constant 0 : index
    %51 = vector.load %arg9[%c0_60, %c2_61, %c0_62, %c0_63] : memref<2x18x18x64xf32, #tpu.memory_space<vmem>>, vector<2x16x16x64xf32>
    %52 = vector.shape_cast %51 : vector<2x16x16x64xf32> to vector<512x64xf32>
    %c6 = arith.constant 6 : index
    %c0_64 = arith.constant 0 : index
    %c0_65 = arith.constant 0 : index
    %53 = vector.load %arg4[%c6, %c0_64, %c0_65] : memref<9x64x128xf32, #tpu.memory_space<vmem>>, vector<1x64x128xf32>
    %54 = vector.shape_cast %53 : vector<1x64x128xf32> to vector<64x128xf32>
    %cst_66 = arith.constant dense<0.000000e+00> : vector<512x128xf32>
    %55 = tpu.matmul %52, %54, %cst_66 {dimension_numbers = #tpu.dot_dimension_numbers<[1], [0], [0], [1], [0, 0, 1, 1], [], []>} : vector<512x64xf32>, vector<64x128xf32>, vector<512x128xf32> -> vector<512x128xf32>
    %56 = arith.addf %50, %55 : vector<512x128xf32>
    %c0_67 = arith.constant 0 : index
    %c2_68 = arith.constant 2 : index
    %c1_69 = arith.constant 1 : index
    %c0_70 = arith.constant 0 : index
    %57 = vector.load %arg9[%c0_67, %c2_68, %c1_69, %c0_70] : memref<2x18x18x64xf32, #tpu.memory_space<vmem>>, vector<2x16x16x64xf32>
    %58 = vector.shape_cast %57 : vector<2x16x16x64xf32> to vector<512x64xf32>
    %c7 = arith.constant 7 : index
    %c0_71 = arith.constant 0 : index
    %c0_72 = arith.constant 0 : index
    %59 = vector.load %arg4[%c7, %c0_71, %c0_72] : memref<9x64x128xf32, #tpu.memory_space<vmem>>, vector<1x64x128xf32>
    %60 = vector.shape_cast %59 : vector<1x64x128xf32> to vector<64x128xf32>
    %cst_73 = arith.constant dense<0.000000e+00> : vector<512x128xf32>
    %61 = tpu.matmul %58, %60, %cst_73 {dimension_numbers = #tpu.dot_dimension_numbers<[1], [0], [0], [1], [0, 0, 1, 1], [], []>} : vector<512x64xf32>, vector<64x128xf32>, vector<512x128xf32> -> vector<512x128xf32>
    %62 = arith.addf %56, %61 : vector<512x128xf32>
    %c0_74 = arith.constant 0 : index
    %c2_75 = arith.constant 2 : index
    %c2_76 = arith.constant 2 : index
    %c0_77 = arith.constant 0 : index
    %63 = vector.load %arg9[%c0_74, %c2_75, %c2_76, %c0_77] : memref<2x18x18x64xf32, #tpu.memory_space<vmem>>, vector<2x16x16x64xf32>
    %64 = vector.shape_cast %63 : vector<2x16x16x64xf32> to vector<512x64xf32>
    %c8 = arith.constant 8 : index
    %c0_78 = arith.constant 0 : index
    %c0_79 = arith.constant 0 : index
    %65 = vector.load %arg4[%c8, %c0_78, %c0_79] : memref<9x64x128xf32, #tpu.memory_space<vmem>>, vector<1x64x128xf32>
    %66 = vector.shape_cast %65 : vector<1x64x128xf32> to vector<64x128xf32>
    %cst_80 = arith.constant dense<0.000000e+00> : vector<512x128xf32>
    %67 = tpu.matmul %64, %66, %cst_80 {dimension_numbers = #tpu.dot_dimension_numbers<[1], [0], [0], [1], [0, 0, 1, 1], [], []>} : vector<512x64xf32>, vector<64x128xf32>, vector<512x128xf32> -> vector<512x128xf32>
    %68 = arith.addf %62, %67 : vector<512x128xf32>
    %c0_81 = arith.constant 0 : index
    %c0_82 = arith.constant 0 : index
    %69 = vector.load %arg5[%c0_81, %c0_82] : memref<1x128xf32, #tpu.memory_space<vmem>>, vector<1x128xf32>
    %70 = vector.broadcast %69 : vector<1x128xf32> to vector<512x128xf32>
    %71 = arith.addf %68, %70 : vector<512x128xf32>
    %cst_83 = arith.constant 0.000000e+00 : f32
    %72 = vector.broadcast %cst_83 : f32 to vector<512x128xf32>
    %73 = arith.maximumf %71, %72 : vector<512x128xf32>
    %74 = vector.shape_cast %73 : vector<512x128xf32> to vector<2x256x128xf32>
    %cst_84 = arith.constant dense<0.000000e+00> : vector<2x128xf32>
    %75 = vector.multi_reduction <add>, %74, %cst_84 [1] : vector<2x256x128xf32> to vector<2x128xf32>
    %cst_85 = arith.constant 2.560000e+02 : f32
    %76 = vector.broadcast %cst_85 : f32 to vector<2x128xf32>
    %77 = arith.divf %75, %76 : vector<2x128xf32>
    %c0_86 = arith.constant 0 : index
    %c0_87 = arith.constant 0 : index
    %78 = vector.load %arg6[%c0_86, %c0_87] : memref<128x10xf32, #tpu.memory_space<vmem>>, vector<128x10xf32>
    %cst_88 = arith.constant dense<0.000000e+00> : vector<2x10xf32>
    %79 = tpu.matmul %77, %78, %cst_88 {dimension_numbers = #tpu.dot_dimension_numbers<[1], [0], [0], [1], [0, 0, 1, 1], [], []>} : vector<2x128xf32>, vector<128x10xf32>, vector<2x10xf32> -> vector<2x10xf32>
    %c0_89 = arith.constant 0 : index
    %c0_90 = arith.constant 0 : index
    %80 = vector.load %arg7[%c0_89, %c0_90] : memref<1x10xf32, #tpu.memory_space<vmem>>, vector<1x10xf32>
    %81 = vector.broadcast %80 : vector<1x10xf32> to vector<2x10xf32>
    %82 = arith.addf %79, %81 : vector<2x10xf32>
    %c0_91 = arith.constant 0 : index
    %c0_92 = arith.constant 0 : index
    %83 = vector.load %arg8[%c0_91, %c0_92] : memref<2x10xf32, #tpu.memory_space<vmem>>, vector<2x10xf32>
    tpu.vector_store %arg8[%c0_91, %c0_92], %82 {strides = array<i32>} : memref<2x10xf32, #tpu.memory_space<vmem>>, vector<2x10xf32>,
    return
  }
  func.func @transform_0(%arg0: i32) -> (i32, i32) {
    %c0_i32 = arith.constant 0 : i32
    %c0_i32_0 = arith.constant 0 : i32
    return %arg0, %c0_i32 : i32, i32
  }
  func.func @transform_1(%arg0: i32) -> (i32, i32) {
    %c0_i32 = arith.constant 0 : i32
    %c0_i32_0 = arith.constant 0 : i32
    %c0_i32_1 = arith.constant 0 : i32
    return %c0_i32, %c0_i32_0 : i32, i32
  }
  func.func @transform_2(%arg0: i32) -> (i32, i32) {
    %c0_i32 = arith.constant 0 : i32
    %c0_i32_0 = arith.constant 0 : i32
    %c0_i32_1 = arith.constant 0 : i32
    return %c0_i32, %c0_i32_0 : i32, i32
  }
  func.func @transform_3(%arg0: i32) -> (i32, i32, i32) {
    %c0_i32 = arith.constant 0 : i32
    %c0_i32_0 = arith.constant 0 : i32
    %c0_i32_1 = arith.constant 0 : i32
    %c0_i32_2 = arith.constant 0 : i32
    return %c0_i32, %c0_i32_0, %c0_i32_1 : i32, i32, i32
  }
  func.func @transform_4(%arg0: i32) -> (i32, i32) {
    %c0_i32 = arith.constant 0 : i32
    %c0_i32_0 = arith.constant 0 : i32
    %c0_i32_1 = arith.constant 0 : i32
    return %c0_i32, %c0_i32_0 : i32, i32
  }
  func.func @transform_5(%arg0: i32) -> (i32, i32) {
    %c0_i32 = arith.constant 0 : i32
    %c0_i32_0 = arith.constant 0 : i32
    %c0_i32_1 = arith.constant 0 : i32
    return %c0_i32, %c0_i32_0 : i32, i32
  }
  func.func @transform_6(%arg0: i32) -> (i32, i32) {
    %c0_i32 = arith.constant 0 : i32
    %c0_i32_0 = arith.constant 0 : i32
    %c0_i32_1 = arith.constant 0 : i32
    return %c0_i32, %c0_i32_0 : i32, i32
  }
  func.func @transform_7(%arg0: i32) -> (i32, i32) {
    %c0_i32 = arith.constant 0 : i32
    %c0_i32_0 = arith.constant 0 : i32
    return %arg0, %c0_i32 : i32, i32
  }
}

</mosaic_0001>

<bundles_post_ra>
// kernel: net_forward.1
= control target key start
LH: loop header
LB: loop body
LE: loop exit
PB: predicated region body
PF: predicated region fallthrough
CT: control target
= control target key end

     0   :  { %vm1063_vm0 = vcmask 1042432   ;;  %vm294_vm1 = vcmask 220160   ;;  %vm13969_vm2 = vmmov 1   ;;  %s18035_s0 = inlined_call_operand.vmem [shape: f32[2048,27], index: 0, kind: input, shape index: {}]   ;;  %s18036_s1 = inlined_call_operand.vmem [shape: f32[27,64], index: 1, kind: input, shape index: {}]   ;;  %s18037_s2 = inlined_call_operand.vmem [shape: f32[1,64], index: 2, kind: input, shape index: {}]   ;;  %s18038_s3 = inlined_call_operand.vmem [shape: f32[9,64,128], index: 3, kind: input, shape index: {}]   ;;  %s18039_s4 = inlined_call_operand.vmem [shape: f32[1,128], index: 4, kind: input, shape index: {}]   ;;  %s18040_s5 = inlined_call_operand.vmem [shape: f32[128,10], index: 5, kind: input, shape index: {}]   ;;  %s18041_s6 = inlined_call_operand.vmem [shape: f32[1,10], index: 6, kind: input, shape index: {}]   ;;  %s18042_s7 = inlined_call_operand.hbm [shape: f32[2,10], index: 7, kind: output, shape index: {}]  }
   0x1   :  { %v283_v0 = vld [vmem:[%s18036_s1] sm:$0xff]  ;;  %v284_v1 = vld [vmem:[%s18036_s1 + $0x8] sm:$0xff]  ;;  %v285_v2 = vld [vmem:[%s18036_s1 + $0x10] sm:$0xff] }
   0x2   :  { %v13239_v3 = vpack.c.bf16 %v284_v1, %v283_v0  ;;  %v286_v4 = vld [vmem:[%s18036_s1 + $0x18] sm:$0x7]  ;;  %v27_v5 = vld [vmem:[%s18035_s0] sm:$0xff]  ;;  %vm13244_vm3 = vmpackc.low %vm1063_vm0, %vm13969_vm2 }
   0x3   :  { %v13243_v6 = vpack.c.bf16 %v286_v4, %v285_v2  ;;  %11812 = vmatprep.mubr.msk.f32.mxu0 %vm294_vm1, %v27_v5  ;;  %v28_v7 = vld [vmem:[%s18035_s0 + $0x8] sm:$0xff]  ;;  %v29_v8 = vld [vmem:[%s18035_s0 + $0x10] sm:$0xff]  ;;  %v30_v9 = vld [vmem:[%s18035_s0 + $0x18] sm:$0xff] }
   0x4   :  { %13240 = vmatprep.subr.bf16.mxu0 %v13239_v3  ;;  %v31_v10 = vld [vmem:[%s18035_s0 + $0x20] sm:$0xff]  ;;  %v32_v11 = vld [vmem:[%s18035_s0 + $0x28] sm:$0xff]  ;;  %v33_v12 = vld [vmem:[%s18035_s0 + $0x30] sm:$0xff] }
   0x5   :  { %13242 = vmatpush3.bf16.msra.mxu0 %v13239_v3  ;;  %v34_v13 = vld [vmem:[%s18035_s0 + $0x38] sm:$0xff]  ;;  %v35_v14 = vld [vmem:[%s18035_s0 + $0x40] sm:$0xff]  ;;  %v36_v15 = vld [vmem:[%s18035_s0 + $0x48] sm:$0xff] }
   0x6   :  { %13245 = vmatprep.subr.msk.bf16.mxu0 %vm13244_vm3, %v13243_v6  ;;  %v37_v16 = vld [vmem:[%s18035_s0 + $0x50] sm:$0xff] }
   0x9   :  { %13248 = vmatpush3.bf16.msk.msra.mxu0 %vm13244_vm3, %v13243_v6 }
   0xc   :  { %11813 = vmatmul.mubr.msk.f32.vlgmr.msra.gmra.mrb[0].mxu0 %vm294_vm1, %v28_v7 }
   0xd   :  { %11815 = vmatprep.mubr.msk.f32.mxu0 %vm294_vm1, %v29_v8 }
  0x10   :  { %11816 = vmatmul.mubr.msk.f32.gmra.mrb[2].mxu0 %vm294_vm1, %v30_v9 }
  0x11   :  { %11818 = vmatprep.mubr.msk.f32.mxu0 %vm294_vm1, %v31_v10 }
  0x14   :  { %11819 = vmatmul.mubr.msk.f32.gmra.mrb[4].mxu0 %vm294_vm1, %v32_v11 }
  0x15   :  { %11821 = vmatprep.mubr.msk.f32.mxu0 %vm294_vm1, %v33_v12 }
  0x18   :  { %11822 = vmatmul.mubr.msk.f32.gmra.mrb[6].mxu0 %vm294_vm1, %v34_v13 }
  0x19   :  { %11824 = vmatprep.mubr.msk.f32.mxu0 %vm294_vm1, %v35_v14 }
  0x1a   :  { %12 = vsyncpa [#allocation4], 0  ;;  %v38_v17 = vld [vmem:[%s18035_s0 + $0x58] sm:$0xff]  ;;  %v39_v18 = vld [vmem:[%s18035_s0 + $0x60] sm:$0xff]  ;;  %vm2668_vm4 = vcmask 523264   ;;  %vm3183_vm5 = vcmask 517120  }
  0x1b   :  { %v40_v19 = vld [vmem:[%s18035_s0 + $0x68] sm:$0xff]  ;;  %v41_v20 = vld [vmem:[%s18035_s0 + $0x70] sm:$0xff]  ;;  %v42_v21 = vld [vmem:[%s18035_s0 + $0x78] sm:$0xff]  ;;  %vm13972_vm6 = vmmov 0   ;;  %vm9890_vm7 = vcmask 1041409   ;;  %s13973_s20 = smov [#allocation3]  }
  0x1c   :  { %11825 = vmatmul.mubr.msk.f32.gmra.mrb[8].mxu0 %vm294_vm1, %v36_v15  ;;  %v43_v22 = vld [vmem:[%s18035_s0 + $0x80] sm:$0xff]  ;;  %v44_v23 = vld [vmem:[%s18035_s0 + $0x88] sm:$0xff]  ;;  %v45_v24 = vld [vmem:[%s18035_s0 + $0x90] sm:$0xff]  ;;  %s9971_s21 = sshll.u32 %s13973_s20, 4  ;;  %vm9963_vm8 = vcmask 74752   ;;  %s9972_s21 = int_to_ptr.vmem [resolvable:$true] %s9971_s21 }
  0x1d   :  { %11827 = vmatprep.mubr.msk.f32.mxu0 %vm294_vm1, %v37_v16  ;;  %v46_v25 = vld [vmem:[%s18035_s0 + $0x98] sm:$0xff]  ;;  %v47_v26 = vld [vmem:[%s18035_s0 + $0xa0] sm:$0xff]  ;;  %v48_v27 = vld [vmem:[%s18035_s0 + $0xa8] sm:$0xff]  ;;  %s13945_s22 = scalar_lea.vmem %s9972_s21, 32  ;;  %p13950_p1 = scmp.lt.s32.totalorder %s9972_s21, %s9972_s21 }
  0x1e   :  { %v49_v28 = vld [vmem:[%s18035_s0 + $0xb0] sm:$0xff]  ;;  %v50_v29 = vld [vmem:[%s18035_s0 + $0xb8] sm:$0xff]  ;;  %v51_v30 = vld [vmem:[%s18035_s0 + $0xc0] sm:$0xff]  ;;  %p13946_p0 = scmp.ne.s32.totalorder %s9972_s21, %s13945_s22  ;;  %p13951_p2 = scmp.lt.s32.totalorder %s13945_s22, %s13945_s22 }
  0x1f   :  { %v52_v31 = vld [vmem:[%s18035_s0 + $0xc8] sm:$0xff]  ;;  %v53_v32 = vld [vmem:[%s18035_s0 + $0xd0] sm:$0xff]  ;;  %v54_v33 = vld [vmem:[%s18035_s0 + $0xd8] sm:$0xff] }
  0x20   :  { %11828 = vmatmul.mubr.msk.f32.gmra.mrb[10].mxu0 %vm294_vm1, %v38_v17  ;;  %v55_v34 = vld [vmem:[%s18035_s0 + $0xe0] sm:$0xff]  ;;  %v56_v35 = vld [vmem:[%s18035_s0 + $0xe8] sm:$0xff]  ;;  %v57_v36 = vld [vmem:[%s18035_s0 + $0xf0] sm:$0xff]  ;;  %p13952_p3 = por %p13951_p2, %p13950_p1 }
  0x21   :  { %11830 = vmatprep.mubr.msk.f32.mxu0 %vm294_vm1, %v39_v18  ;;  %v58_v37 = vld [vmem:[%s18035_s0 + $0xf8] sm:$0xff]  ;;  %v59_v38 = vld [vmem:[%s18035_s0 + $0x100] sm:$0xff]  ;;  %v60_v39 = vld [vmem:[%s18035_s0 + $0x108] sm:$0xff] }
  0x22   :  { %v61_v40 = vld [vmem:[%s18035_s0 + $0x110] sm:$0xff]  ;;  %v62_v41 = vld [vmem:[%s18035_s0 + $0x118] sm:$0xff]  ;;  %v63_v42 = vld [vmem:[%s18035_s0 + $0x120] sm:$0xff]  ;;  %p13953_p4 = pnand %p13952_p3, %p13946_p0 }
  0x23   :  { %v64_v43 = vld [vmem:[%s18035_s0 + $0x128] sm:$0xff]  ;;  %v65_v44 = vld [vmem:[%s18035_s0 + $0x130] sm:$0xff]  ;;  %v66_v45 = vld [vmem:[%s18035_s0 + $0x138] sm:$0xff] }
  0x24   :  { %11831 = vmatmul.mubr.msk.f32.gmra.mrb[12].mxu0 %vm294_vm1, %v40_v19  ;;  %v67_v46 = vld [vmem:[%s18035_s0 + $0x140] sm:$0xff]  ;;  %v68_v47 = vld [vmem:[%s18035_s0 + $0x148] sm:$0xff]  ;;  %v69_v48 = vld [vmem:[%s18035_s0 + $0x150] sm:$0xff] }
  0x25   :  { %11833 = vmatprep.mubr.msk.f32.mxu0 %vm294_vm1, %v41_v20  ;;  %v70_v49 = vld [vmem:[%s18035_s0 + $0x158] sm:$0xff]  ;;  %v71_v50 = vld [vmem:[%s18035_s0 + $0x160] sm:$0xff]  ;;  %v72_v51 = vld [vmem:[%s18035_s0 + $0x168] sm:$0xff] }
  0x26   :  { %v73_v52 = vld [vmem:[%s18035_s0 + $0x170] sm:$0xff]  ;;  %v74_v53 = vld [vmem:[%s18035_s0 + $0x178] sm:$0xff]  ;;  %v75_v54 = vld [vmem:[%s18035_s0 + $0x180] sm:$0xff] }
  0x27   :  { %v76_v55 = vld [vmem:[%s18035_s0 + $0x188] sm:$0xff]  ;;  %v77_v56 = vld [vmem:[%s18035_s0 + $0x190] sm:$0xff]  ;;  %v78_v57 = vld [vmem:[%s18035_s0 + $0x198] sm:$0xff] }
  0x28   :  { %11834 = vmatmul.mubr.msk.f32.gmra.mrb[14].mxu0 %vm294_vm1, %v42_v21  ;;  %v79_v58 = vld [vmem:[%s18035_s0 + $0x1a0] sm:$0xff]  ;;  %v80_v59 = vld [vmem:[%s18035_s0 + $0x1a8] sm:$0xff]  ;;  %v81_v60 = vld [vmem:[%s18035_s0 + $0x1b0] sm:$0xff] }
  0x29   :  { %11836 = vmatprep.mubr.msk.f32.mxu0 %vm294_vm1, %v43_v22  ;;  %v82_v61 = vld [vmem:[%s18035_s0 + $0x1b8] sm:$0xff]  ;;  %v83_v62 = vld [vmem:[%s18035_s0 + $0x1c0] sm:$0xff]  ;;  %v84_v63 = vld [vmem:[%s18035_s0 + $0x1c8] sm:$0xff] }
  0x2a   :  { %v85_v0 = vld [vmem:[%s18035_s0 + $0x1d0] sm:$0xff]  ;;  %v86_v1 = vld [vmem:[%s18035_s0 + $0x1d8] sm:$0xff]  ;;  %v87_v2 = vld [vmem:[%s18035_s0 + $0x1e0] sm:$0xff] }
  0x2b   :  { %v88_v3 = vld [vmem:[%s18035_s0 + $0x1e8] sm:$0xff]  ;;  %v89_v4 = vld [vmem:[%s18035_s0 + $0x1f0] sm:$0xff]  ;;  %v90_v5 = vld [vmem:[%s18035_s0 + $0x1f8] sm:$0xff] }
  0x2c   :  { %11837 = vmatmul.mubr.msk.f32.gmra.mrb[16].mxu0 %vm294_vm1, %v44_v23  ;;  %v91_v6 = vld [vmem:[%s18035_s0 + $0x200] sm:$0xff]  ;;  %v92_v7 = vld [vmem:[%s18035_s0 + $0x208] sm:$0xff]  ;;  %v93_v8 = vld [vmem:[%s18035_s0 + $0x210] sm:$0xff] }
  0x2d   :  { %11839 = vmatprep.mubr.msk.f32.mxu0 %vm294_vm1, %v45_v24  ;;  %v94_v9 = vld [vmem:[%s18035_s0 + $0x218] sm:$0xff]  ;;  %v95_v10 = vld [vmem:[%s18035_s0 + $0x220] sm:$0xff]  ;;  %v96_v11 = vld [vmem:[%s18035_s0 + $0x228] sm:$0xff] }
  0x2e   :  { %v97_v12 = vld [vmem:[%s18035_s0 + $0x230] sm:$0xff]  ;;  %v98_v13 = vld [vmem:[%s18035_s0 + $0x238] sm:$0xff]  ;;  %v99_v14 = vld [vmem:[%s18035_s0 + $0x240] sm:$0xff] }
  0x2f   :  { %v100_v15 = vld [vmem:[%s18035_s0 + $0x248] sm:$0xff]  ;;  %v101_v16 = vld [vmem:[%s18035_s0 + $0x250] sm:$0xff]  ;;  %v102_v17 = vld [vmem:[%s18035_s0 + $0x258] sm:$0xff] }
  0x30   :  { %11840 = vmatmul.mubr.msk.f32.gmra.mrb[18].mxu0 %vm294_vm1, %v46_v25  ;;  %v103_v18 = vld [vmem:[%s18035_s0 + $0x260] sm:$0xff]  ;;  %v104_v19 = vld [vmem:[%s18035_s0 + $0x268] sm:$0xff]  ;;  %v105_v20 = vld [vmem:[%s18035_s0 + $0x270] sm:$0xff] }
  0x31   :  { %11842 = vmatprep.mubr.msk.f32.mxu0 %vm294_vm1, %v47_v26  ;;  %v106_v21 = vld [vmem:[%s18035_s0 + $0x278] sm:$0xff]  ;;  %v107_v22 = vld [vmem:[%s18035_s0 + $0x280] sm:$0xff]  ;;  %v108_v23 = vld [vmem:[%s18035_s0 + $0x288] sm:$0xff] }
  0x32   :  { %v109_v24 = vld [vmem:[%s18035_s0 + $0x290] sm:$0xff]  ;;  %v110_v25 = vld [vmem:[%s18035_s0 + $0x298] sm:$0xff]  ;;  %v111_v26 = vld [vmem:[%s18035_s0 + $0x2a0] sm:$0xff] }
  0x34   :  { %11843 = vmatmul.mubr.msk.f32.gmra.mrb[20].mxu0 %vm294_vm1, %v48_v27  ;;  %v112_v27 = vld [vmem:[%s18035_s0 + $0x2a8] sm:$0xff] }
  0x35   :  { %11845 = vmatprep.mubr.msk.f32.mxu0 %vm294_vm1, %v49_v28  ;;  %v113_v28 = vld [vmem:[%s18035_s0 + $0x2b0] sm:$0xff] }
  0x38   :  { %11846 = vmatmul.mubr.msk.f32.gmra.mrb[22].mxu0 %vm294_vm1, %v50_v29  ;;  %v114_v29 = vld [vmem:[%s18035_s0 + $0x2b8] sm:$0xff] }
  0x39   :  { %11848 = vmatprep.mubr.msk.f32.mxu0 %vm294_vm1, %v51_v30  ;;  %v115_v30 = vld [vmem:[%s18035_s0 + $0x2c0] sm:$0xff] }
  0x3c   :  { %11849 = vmatmul.mubr.msk.f32.gmra.mrb[24].mxu0 %vm294_vm1, %v52_v31  ;;  %v116_v31 = vld [vmem:[%s18035_s0 + $0x2c8] sm:$0xff] }
  0x3d   :  { %11851 = vmatprep.mubr.msk.f32.mxu0 %vm294_vm1, %v53_v32  ;;  %v117_v32 = vld [vmem:[%s18035_s0 + $0x2d0] sm:$0xff] }
  0x40   :  { %11852 = vmatmul.mubr.msk.f32.gmra.mrb[26].mxu0 %vm294_vm1, %v54_v33  ;;  %v118_v33 = vld [vmem:[%s18035_s0 + $0x2d8] sm:$0xff] }
  0x41   :  { %11854 = vmatprep.mubr.msk.f32.mxu0 %vm294_vm1, %v55_v34  ;;  %v119_v34 = vld [vmem:[%s18035_s0 + $0x2e0] sm:$0xff] }
  0x44   :  { %11855 = vmatmul.mubr.msk.f32.gmra.mrb[28].mxu0 %vm294_vm1, %v56_v35  ;;  %v120_v35 = vld [vmem:[%s18035_s0 + $0x2e8] sm:$0xff] }
  0x45   :  { %11857 = vmatprep.mubr.msk.f32.mxu0 %vm294_vm1, %v57_v36  ;;  %v121_v36 = vld [vmem:[%s18035_s0 + $0x2f0] sm:$0xff] }
  0x48   :  { %11858 = vmatmul.mubr.msk.f32.gmra.mrb[30].mxu0 %vm294_vm1, %v58_v37  ;;  %v122_v37 = vld [vmem:[%s18035_s0 + $0x2f8] sm:$0xff] }
  0x49   :  { %11860 = vmatprep.mubr.msk.f32.mxu0 %vm294_vm1, %v59_v38  ;;  %v123_v38 = vld [vmem:[%s18035_s0 + $0x300] sm:$0xff] }
  0x4c   :  { %11861 = vmatmul.mubr.msk.f32.gmra.mrb[32].mxu0 %vm294_vm1, %v60_v39  ;;  %v124_v39 = vld [vmem:[%s18035_s0 + $0x308] sm:$0xff] }
  0x4d   :  { %11863 = vmatprep.mubr.msk.f32.mxu0 %vm294_vm1, %v61_v40  ;;  %v125_v40 = vld [vmem:[%s18035_s0 + $0x310] sm:$0xff] }
  0x50   :  { %11864 = vmatmul.mubr.msk.f32.gmra.mrb[34].mxu0 %vm294_vm1, %v62_v41  ;;  %v126_v41 = vld [vmem:[%s18035_s0 + $0x318] sm:$0xff] }
  0x51   :  { %11866 = vmatprep.mubr.msk.f32.mxu0 %vm294_vm1, %v63_v42  ;;  %v127_v42 = vld [vmem:[%s18035_s0 + $0x320] sm:$0xff] }
  0x54   :  { %11867 = vmatmul.mubr.msk.f32.gmra.mrb[36].mxu0 %vm294_vm1, %v64_v43  ;;  %v128_v43 = vld [vmem:[%s18035_s0 + $0x328] sm:$0xff] }
  0x55   :  { %11869 = vmatprep.mubr.msk.f32.mxu0 %vm294_vm1, %v65_v44  ;;  %v129_v44 = vld [vmem:[%s18035_s0 + $0x330] sm:$0xff] }
  0x58   :  { %11870 = vmatmul.mubr.msk.f32.gmra.mrb[38].mxu0 %vm294_vm1, %v66_v45  ;;  %v130_v45 = vld [vmem:[%s18035_s0 + $0x338] sm:$0xff] }
  0x59   :  { %11872 = vmatprep.mubr.msk.f32.mxu0 %vm294_vm1, %v67_v46  ;;  %v131_v46 = vld [vmem:[%s18035_s0 + $0x340] sm:$0xff] }
  0x5c   :  { %11873 = vmatmul.mubr.msk.f32.gmra.mrb[40].mxu0 %vm294_vm1, %v68_v47  ;;  %v132_v47 = vld [vmem:[%s18035_s0 + $0x348] sm:$0xff] }
  0x5d   :  { %11875 = vmatprep.mubr.msk.f32.mxu0 %vm294_vm1, %v69_v48  ;;  %v133_v48 = vld [vmem:[%s18035_s0 + $0x350] sm:$0xff] }
  0x60   :  { %11876 = vmatmul.mubr.msk.f32.gmra.mrb[42].mxu0 %vm294_vm1, %v70_v49  ;;  %v134_v49 = vld [vmem:[%s18035_s0 + $0x358] sm:$0xff] }
  0x61   :  { %11878 = vmatprep.mubr.msk.f32.mxu0 %vm294_vm1, %v71_v50  ;;  %v135_v50 = vld [vmem:[%s18035_s0 + $0x360] sm:$0xff] }
  0x64   :  { %11879 = vmatmul.mubr.msk.f32.gmra.mrb[44].mxu0 %vm294_vm1, %v72_v51 }
  0x65   :  { %11881 = vmatprep.mubr.msk.f32.mxu0 %vm294_vm1, %v73_v52 }
  0x68   :  { %11882 = vmatmul.mubr.msk.f32.gmra.mrb[46].mxu0 %vm294_vm1, %v74_v53  ;;  %v136_v53 = vld [vmem:[%s18035_s0 + $0x368] sm:$0xff] }
  0x69   :  { %11884 = vmatprep.mubr.msk.f32.mxu0 %vm294_vm1, %v75_v54  ;;  %v137_v54 = vld [vmem:[%s18035_s0 + $0x370] sm:$0xff] }
  0x6c   :  { %11885 = vmatmul.mubr.msk.f32.gmra.mrb[48].mxu0 %vm294_vm1, %v76_v55 }
  0x6d   :  { %11887 = vmatprep.mubr.msk.f32.mxu0 %vm294_vm1, %v77_v56 }
  0x70   :  { %11888 = vmatmul.mubr.msk.f32.gmra.mrb[50].mxu0 %vm294_vm1, %v78_v57  ;;  %v138_v57 = vld [vmem:[%s18035_s0 + $0x378] sm:$0xff] }
  0x71   :  { %11890 = vmatprep.mubr.msk.f32.mxu0 %vm294_vm1, %v79_v58  ;;  %v139_v58 = vld [vmem:[%s18035_s0 + $0x380] sm:$0xff] }
  0x74   :  { %11891 = vmatmul.mubr.msk.f32.gmra.mrb[52].mxu0 %vm294_vm1, %v80_v59 }
  0x75   :  { %11893 = vmatprep.mubr.msk.f32.mxu0 %vm294_vm1, %v81_v60 }
  0x78   :  { %11894 = vmatmul.mubr.msk.f32.gmra.mrb[54].mxu0 %vm294_vm1, %v82_v61  ;;  %v140_v61 = vld [vmem:[%s18035_s0 + $0x388] sm:$0xff] }
  0x79   :  { %11896 = vmatprep.mubr.msk.f32.mxu0 %vm294_vm1, %v83_v62  ;;  %v141_v62 = vld [vmem:[%s18035_s0 + $0x390] sm:$0xff] }
  0x7c   :  { %11897 = vmatmul.mubr.msk.f32.gmra.mrb[56].mxu0 %vm294_vm1, %v84_v63 }
  0x7d   :  { %11899 = vmatprep.mubr.msk.f32.mxu0 %vm294_vm1, %v85_v0 }
  0x80   :  { %11900 = vmatmul.mubr.msk.f32.gmra.mrb[58].mxu0 %vm294_vm1, %v86_v1  ;;  %v142_v1 = vld [vmem:[%s18035_s0 + $0x398] sm:$0xff] }
  0x81   :  { %11902 = vmatprep.mubr.msk.f32.mxu0 %vm294_vm1, %v87_v2  ;;  %v143_v2 = vld [vmem:[%s18035_s0 + $0x3a0] sm:$0xff] }
  0x84   :  { %11903 = vmatmul.mubr.msk.f32.gmra.mrb[60].mxu0 %vm294_vm1, %v88_v3 }
  0x85   :  { %11905 = vmatprep.mubr.msk.f32.mxu0 %vm294_vm1, %v89_v4 }
  0x88   :  { %11906 = vmatmul.mubr.msk.f32.gmra.mrb[62].mxu0 %vm294_vm1, %v90_v5  ;;  %v144_v5 = vld [vmem:[%s18035_s0 + $0x3a8] sm:$0xff] }
  0x89   :  { %11908 = vmatprep.mubr.msk.f32.mxu0 %vm294_vm1, %v91_v6  ;;  %v145_v6 = vld [vmem:[%s18035_s0 + $0x3b0] sm:$0xff] }
  0x8c   :  { %11909 = vmatmul.mubr.msk.f32.gmra.mrb[64].mxu0 %vm294_vm1, %v92_v7 }
  0x8d   :  { %11911 = vmatprep.mubr.msk.f32.mxu0 %vm294_vm1, %v93_v8 }
  0x90   :  { %11912 = vmatmul.mubr.msk.f32.gmra.mrb[66].mxu0 %vm294_vm1, %v94_v9  ;;  %v146_v9 = vld [vmem:[%s18035_s0 + $0x3b8] sm:$0xff] }
  0x91   :  { %11914 = vmatprep.mubr.msk.f32.mxu0 %vm294_vm1, %v95_v10  ;;  %v147_v10 = vld [vmem:[%s18035_s0 + $0x3c0] sm:$0xff] }
  0x94   :  { %11915 = vmatmul.mubr.msk.f32.gmra.mrb[68].mxu0 %vm294_vm1, %v96_v11 }
  0x95   :  { %11917 = vmatprep.mubr.msk.f32.mxu0 %vm294_vm1, %v97_v12 }
  0x98   :  { %11918 = vmatmul.mubr.msk.f32.gmra.mrb[70].mxu0 %vm294_vm1, %v98_v13  ;;  %v148_v13 = vld [vmem:[%s18035_s0 + $0x3c8] sm:$0xff] }
  0x99   :  { %11920 = vmatprep.mubr.msk.f32.mxu0 %vm294_vm1, %v99_v14  ;;  %v149_v14 = vld [vmem:[%s18035_s0 + $0x3d0] sm:$0xff] }
  0x9c   :  { %11921 = vmatmul.mubr.msk.f32.gmra.mrb[72].mxu0 %vm294_vm1, %v100_v15 }
  0x9d   :  { %11923 = vmatprep.mubr.msk.f32.mxu0 %vm294_vm1, %v101_v16 }
  0xa0   :  { %11924 = vmatmul.mubr.msk.f32.gmra.mrb[74].mxu0 %vm294_vm1, %v102_v17  ;;  %v150_v17 = vld [vmem:[%s18035_s0 + $0x3d8] sm:$0xff] }
  0xa1   :  { %11926 = vmatprep.mubr.msk.f32.mxu0 %vm294_vm1, %v103_v18  ;;  %v151_v18 = vld [vmem:[%s18035_s0 + $0x3e0] sm:$0xff] }
  0xa4   :  { %11927 = vmatmul.mubr.msk.f32.gmra.mrb[76].mxu0 %vm294_vm1, %v104_v19 }
  0xa5   :  { %11929 = vmatprep.mubr.msk.f32.mxu0 %vm294_vm1, %v105_v20 }
  0xa8   :  { %11930 = vmatmul.mubr.msk.f32.gmra.mrb[78].mxu0 %vm294_vm1, %v106_v21  ;;  %v152_v21 = vld [vmem:[%s18035_s0 + $0x3e8] sm:$0xff] }
  0xa9   :  { %11932 = vmatprep.mubr.msk.f32.mxu0 %vm294_vm1, %v107_v22  ;;  %v153_v22 = vld [vmem:[%s18035_s0 + $0x3f0] sm:$0xff] }
  0xac   :  { %11933 = vmatmul.mubr.msk.f32.gmra.mrb[80].mxu0 %vm294_vm1, %v108_v23 }
  0xad   :  { %11935 = vmatprep.mubr.msk.f32.mxu0 %vm294_vm1, %v109_v24 }
  0xb0   :  { %11936 = vmatmul.mubr.msk.f32.gmra.mrb[82].mxu0 %vm294_vm1, %v110_v25  ;;  %v154_v25 = vld [vmem:[%s18035_s0 + $0x3f8] sm:$0xff] }
  0xb1   :  { %11938 = vmatprep.mubr.msk.f32.mxu0 %vm294_vm1, %v111_v26  ;;  %v155_v26 = vld [vmem:[%s18035_s0 + $0x400] sm:$0xff] }
  0xb4   :  { %11939 = vmatmul.mubr.msk.f32.gmra.mrb[84].mxu0 %vm294_vm1, %v112_v27 }
  0xb5   :  { %11941 = vmatprep.mubr.msk.f32.mxu0 %vm294_vm1, %v113_v28 }
  0xb8   :  { %11942 = vmatmul.mubr.msk.f32.gmra.mrb[86].mxu0 %vm294_vm1, %v114_v29  ;;  %v156_v29 = vld [vmem:[%s18035_s0 + $0x408] sm:$0xff] }
  0xb9   :  { %11944 = vmatprep.mubr.msk.f32.mxu0 %vm294_vm1, %v115_v30  ;;  %v157_v30 = vld [vmem:[%s18035_s0 + $0x410] sm:$0xff] }
  0xbc   :  { %11945 = vmatmul.mubr.msk.f32.gmra.mrb[88].mxu0 %vm294_vm1, %v116_v31 }
  0xbd   :  { %11947 = vmatprep.mubr.msk.f32.mxu0 %vm294_vm1, %v117_v32 }
  0xc0   :  { %11948 = vmatmul.mubr.msk.f32.gmra.mrb[90].mxu0 %vm294_vm1, %v118_v33  ;;  %v158_v33 = vld [vmem:[%s18035_s0 + $0x418] sm:$0xff] }
  0xc1   :  { %11950 = vmatprep.mubr.msk.f32.mxu0 %vm294_vm1, %v119_v34  ;;  %v159_v34 = vld [vmem:[%s18035_s0 + $0x420] sm:$0xff] }
  0xc4   :  { %11951 = vmatmul.mubr.msk.f32.gmra.mrb[92].mxu0 %vm294_vm1, %v120_v35 }
  0xc5   :  { %11953 = vmatprep.mubr.msk.f32.mxu0 %vm294_vm1, %v121_v36 }
  0xc8   :  { %11954 = vmatmul.mubr.msk.f32.gmra.mrb[94].mxu0 %vm294_vm1, %v122_v37  ;;  %v160_v37 = vld [vmem:[%s18035_s0 + $0x428] sm:$0xff] }
  0xc9   :  { %11956 = vmatprep.mubr.msk.f32.mxu0 %vm294_vm1, %v123_v38  ;;  %v161_v38 = vld [vmem:[%s18035_s0 + $0x430] sm:$0xff] }
  0xcc   :  { %11957 = vmatmul.mubr.msk.f32.gmra.mrb[96].mxu0 %vm294_vm1, %v124_v39 }
  0xcd   :  { %11959 = vmatprep.mubr.msk.f32.mxu0 %vm294_vm1, %v125_v40 }
  0xd0   :  { %11960 = vmatmul.mubr.msk.f32.gmra.mrb[98].mxu0 %vm294_vm1, %v126_v41  ;;  %v162_v41 = vld [vmem:[%s18035_s0 + $0x438] sm:$0xff] }
  0xd1   :  { %11962 = vmatprep.mubr.msk.f32.mxu0 %vm294_vm1, %v127_v42  ;;  %v163_v42 = vld [vmem:[%s18035_s0 + $0x440] sm:$0xff] }
  0xd4   :  { %11963 = vmatmul.mubr.msk.f32.gmra.mrb[100].mxu0 %vm294_vm1, %v128_v43 }
  0xd5   :  { %11965 = vmatprep.mubr.msk.f32.mxu0 %vm294_vm1, %v129_v44 }
  0xd8   :  { %11966 = vmatmul.mubr.msk.f32.gmra.mrb[102].mxu0 %vm294_vm1, %v130_v45  ;;  %v14636_v45 = vld [vmem:[%s18037_s2] ss:$0 sm:$0xff] }
  0xd9   :  { %11968 = vmatprep.mubr.msk.f32.mxu0 %vm294_vm1, %v131_v46  ;;  %v164_v46 = vld [vmem:[%s18035_s0 + $0x448] sm:$0xff] }
  0xdc   :  { %11969 = vmatmul.mubr.msk.f32.gmra.mrb[104].mxu0 %vm294_vm1, %v132_v47  ;;  %v165_v47 = vld [vmem:[%s18035_s0 + $0x450] sm:$0xff] }
  0xdd   :  { %11971 = vmatprep.mubr.msk.f32.mxu0 %vm294_vm1, %v133_v48 }
  0xdf   :  { %v14460_v51 = vpop.f32.mrb[0].mxu0 }
  0xe0   :  { %v14462_v52 = vpop.f32.mrb[1].mxu0  ;;  %11972 = vmatmul.mubr.msk.f32.gmra.mrb[106].mxu0 %vm294_vm1, %v134_v49  ;;  %v1139_v49 = vadd.f32 %v14460_v51, %v14636_v45  ;;  %v167_v51 = vld [vmem:[%s18035_s0 + $0x460] sm:$0xff] }
  0xe1   :  { %11974 = vmatprep.mubr.msk.f32.mxu0 %vm294_vm1, %v135_v50 }
  0xe3   :  { %v14472_v55 = vpop.f32.mrb[2].mxu0 }
  0xe4   :  { %v14474_v56 = vpop.f32.mrb[3].mxu0  ;;  %11975 = vmatmul.mubr.msk.f32.gmra.mrb[108].mxu0 %vm294_vm1, %v136_v53  ;;  %v1134_v53 = vadd.f32 %v14636_v45, %v14462_v52 }
  0xe5   :  { %11977 = vmatprep.mubr.msk.f32.mxu0 %vm294_vm1, %v137_v54  ;;  %v166_v54 = vld [vmem:[%s18035_s0 + $0x458] sm:$0xff] }
  0xe7   :  { %v14484_v59 = vpop.f32.mrb[4].mxu0 }
  0xe8   :  { %v14486_v60 = vpop.f32.mrb[5].mxu0  ;;  %11978 = vmatmul.mubr.msk.f32.gmra.mrb[110].mxu0 %vm294_vm1, %v138_v57  ;;  %v1149_v57 = vadd.f32 %v14472_v55, %v14636_v45  ;;  %v168_v55 = vld [vmem:[%s18035_s0 + $0x468] sm:$0xff] }
  0xe9   :  { %11980 = vmatprep.mubr.msk.f32.mxu0 %vm294_vm1, %v139_v58  ;;  %v1144_v58 = vadd.f32 %v14636_v45, %v14474_v56 }
  0xeb   :  { %v14496_v63 = vpop.f32.mrb[6].mxu0 }
  0xec   :  { %v14498_v0 = vpop.f32.mrb[7].mxu0  ;;  %11981 = vmatmul.mubr.msk.f32.gmra.mrb[112].mxu0 %vm294_vm1, %v140_v61 }
  0xed   :  { %11983 = vmatprep.mubr.msk.f32.mxu0 %vm294_vm1, %v141_v62  ;;  %v2413_v62 = vmax.f32 %v1139_v49, 0.0 }
  0xef   :  { %v14508_v3 = vpop.f32.mrb[8].mxu0 }
  0xf0   :  { %v14510_v4 = vpop.f32.mrb[9].mxu0  ;;  %11984 = vmatmul.mubr.msk.f32.gmra.mrb[114].mxu0 %vm294_vm1, %v142_v1 }
  0xf1   :  { %11986 = vmatprep.mubr.msk.f32.mxu0 %vm294_vm1, %v143_v2  ;;  %v2412_v2 = vmax.f32 %v1134_v53, 0.0  ;;  %v14715_v53 = vadd.f32 %v14496_v63, %v14636_v45  ;;  %v1164_v63 = vadd.f32 %v14636_v45, %v14498_v0 }
  0xf3   :  { %v14520_v7 = vpop.f32.mrb[10].mxu0 }
  0xf4   :  { %v14522_v8 = vpop.f32.mrb[11].mxu0  ;;  %11987 = vmatmul.mubr.msk.f32.gmra.mrb[116].mxu0 %vm294_vm1, %v144_v5 }
  0xf5   :  { %11989 = vmatprep.mubr.msk.f32.mxu0 %vm294_vm1, %v145_v6  ;;  %v169_v6 = vld [vmem:[%s18035_s0 + $0x470] sm:$0xff] }
  0xf7   :  { %v14532_v11 = vpop.f32.mrb[12].mxu0 }
  0xf8   :  { %v14534_v12 = vpop.f32.mrb[13].mxu0  ;;  %11990 = vmatmul.mubr.msk.f32.gmra.mrb[118].mxu0 %vm294_vm1, %v146_v9  ;;  %v2415_v9 = vmax.f32 %v1149_v57, 0.0 }
  0xf9   :  { %11992 = vmatprep.mubr.msk.f32.mxu0 %vm294_vm1, %v147_v10  ;;  %v2414_v10 = vmax.f32 %v1144_v58, 0.0 }
  0xfb   :  { %v14544_v15 = vpop.f32.mrb[14].mxu0 }
  0xfc   :  { %v14546_v16 = vpop.f32.mrb[15].mxu0  ;;  %11993 = vmatmul.mubr.msk.f32.gmra.mrb[120].mxu0 %vm294_vm1, %v148_v13  ;;  %v14677_v13 = vadd.f32 %v14484_v59, %v14636_v45 }
  0xfd   :  { %11995 = vmatprep.mubr.msk.f32.mxu0 %vm294_vm1, %v149_v14 }
  0xfe   :  { %v2417_v49 = vmax.f32 %v14677_v13, 0.0  ;;  %v174_v13 = vld [vmem:[%s18035_s0 + $0x498] sm:$0xff] }
  0xff   :  { %v14556_v19 = vpop.f32.mrb[16].mxu0 }
 0x100   :  { %v14558_v20 = vpop.f32.mrb[17].mxu0  ;;  %11996 = vmatmul.mubr.msk.f32.gmra.mrb[122].mxu0 %vm294_vm1, %v150_v17 }
 0x101   :  { %11998 = vmatprep.mubr.msk.f32.mxu0 %vm294_vm1, %v151_v18  ;;  %v14681_v18 = vadd.f32 %v14636_v45, %v14486_v60  ;;  %v170_v60 = vld [vmem:[%s18035_s0 + $0x478] sm:$0xff] }
 0x103   :  { %v14568_v23 = vpop.f32.mrb[18].mxu0 }
 0x104   :  { %v14570_v24 = vpop.f32.mrb[19].mxu0  ;;  %11999 = vmatmul.mubr.msk.f32.gmra.mrb[124].mxu0 %vm294_vm1, %v152_v21 }
 0x105   :  { %12001 = vmatprep.mubr.msk.f32.mxu0 %vm294_vm1, %v153_v22 }
 0x107   :  { %v14580_v27 = vpop.f32.mrb[20].mxu0 }
 0x108   :  { %v14582_v28 = vpop.f32.mrb[21].mxu0  ;;  %12002 = vmatmul.mubr.msk.f32.gmra.mrb[126].mxu0 %vm294_vm1, %v154_v25 }
 0x109   :  { %12004 = vmatprep.mubr.msk.f32.mxu0 %vm294_vm1, %v155_v26  ;;  %v2676_v26 = vsel %vm2668_vm4, %v2413_v62, 0.0 }
 0x10b   :  { %v14592_v31 = vpop.f32.mrb[22].mxu0 }
 0x10c   :  { %v14594_v32 = vpop.f32.mrb[23].mxu0  ;;  %12005 = vmatmul.mubr.msk.f32.gmra.mrb[128].mxu0 %vm294_vm1, %v156_v29 }
 0x10d   :  { %12007 = vmatprep.mubr.msk.f32.mxu0 %vm294_vm1, %v157_v30 }
 0x10f   :  { %v14604_v35 = vpop.f32.mrb[24].mxu0 }
 0x110   :  { %v14606_v36 = vpop.f32.mrb[25].mxu0  ;;  %12008 = vmatmul.mubr.msk.f32.gmra.mrb[130].mxu0 %vm294_vm1, %v158_v33  ;;  %v2669_v33 = vsel %vm2668_vm4, %v2412_v2, 0.0 }
 0x111   :  { %12010 = vmatprep.mubr.msk.f32.mxu0 %vm294_vm1, %v159_v34 }
 0x113   :  { %v14616_v39 = vpop.f32.mrb[26].mxu0 }
 0x114   :  { %v14618_v40 = vpop.f32.mrb[27].mxu0  ;;  %12011 = vmatmul.mubr.msk.f32.gmra.mrb[132].mxu0 %vm294_vm1, %v160_v37  ;;  %v14701_v37 = vld [vmem:[%s18035_s0 + $0x480] sm:$0xff] }
 0x115   :  { %12013 = vmatprep.mubr.msk.f32.mxu0 %vm294_vm1, %v161_v38  ;;  %v14704_v38 = vsel %vm2668_vm4, %v2415_v9, 0.0 }
 0x117   :  { %v14628_v43 = vpop.f32.mrb[28].mxu0 }
 0x118   :  { %v14630_v44 = vpop.f32.mrb[29].mxu0  ;;  %12014 = vmatmul.mubr.msk.f32.gmra.mrb[134].mxu0 %vm294_vm1, %v162_v41  ;;  %v14707_v41 = vsel %vm2668_vm4, %v2414_v10, 0.0 }
 0x119   :  { %12016 = vmatprep.mubr.msk.f32.mxu0 %vm294_vm1, %v163_v42 }
 0x11b   :  { %v14645_v48 = vpop.f32.mrb[30].mxu0 }
 0x11c   :  { %v14649_v50 = vpop.f32.mrb[31].mxu0  ;;  %12017 = vmatmul.mubr.msk.f32.gmra.mrb[136].mxu0 %vm294_vm1, %v164_v46 }
 0x11d   :  { %12019 = vmatprep.mubr.msk.f32.mxu0 %vm294_vm1, %v165_v47 }
 0x11f   :  { %v11862_v61 = vpop.f32.mrb[32].mxu0 }
 0x120   :  { %v1299_v52 = vadd.f32 %v11862_v61, %v14636_v45  ;;  %v1293_v1 = vpop.f32.mrb[33].mxu0  ;;  %12020 = vmatmul.mubr.msk.f32.gmra.mrb[138].mxu0 %vm294_vm1, %v166_v54  ;;  %v18043_v61 = vmov 0.0  }
 0x121   :  { %v1294_v5 = vadd.f32 %v14636_v45, %v1293_v1  ;;  %12022 = vmatprep.mubr.msk.f32.mxu0 %vm294_vm1, %v167_v51  ;;  %v2416_v51 = vmax.f32 %v14681_v18, 0.0  ;;  %3186 = vst.msk [vmem:[#allocation2 + $0x20] sm:$0xff] %vm2668_vm4, %v18043_v61  ;;  %3181 = vst.msk [vmem:[#allocation2] sm:$0xff] %vm2668_vm4, %v18043_v61  ;;  %v175_v18 = vld [vmem:[%s18035_s0 + $0x4a0] sm:$0xff] }
 0x122   :  { %v2445_v56 = vmax.f32 %v1299_v52, 0.0  ;;  %3187 = vst.msk [vmem:[#allocation2 + $0x28] sm:$0x3] %vm3183_vm5, %v18043_v61  ;;  %3184 = vst.msk [vmem:[#allocation2 + $0x10] sm:$0x3] %vm3183_vm5, %v18043_v61  ;;  %v172_v52 = vld [vmem:[%s18035_s0 + $0x488] sm:$0xff] }
 0x123   :  { %v2444_v14 = vmax.f32 %v1294_v5, 0.0  ;;  %v11865_v17 = vpop.f32.mrb[34].mxu0  ;;  %3182 = vst.msk [vmem:[#allocation2 + $0x8] sm:$0xff] %vm2668_vm4, %v18043_v61  ;;  %3185 = vst.msk [vmem:[#allocation2 + $0x18] sm:$0xff] %vm2668_vm4, %v18043_v61  ;;  %v173_v5 = vld [vmem:[%s18035_s0 + $0x490] sm:$0xff] }
 0x124   :  { %v2677_v21 = vsel %vm2668_vm4, %v2445_v56, 0.0  ;;  %v1309_v22 = vadd.f32 %v11865_v17, %v14636_v45  ;;  %v1303_v25 = vpop.f32.mrb[35].mxu0  ;;  %12023 = vmatmul.mubr.msk.f32.gmra.mrb[140].mxu0 %vm294_vm1, %v168_v55  ;;  %3188 = vst.msk [vmem:[#allocation2 + $0x30] sm:$0xff] %vm2668_vm4, %v18043_v61  ;;  %3189 = vst.msk [vmem:[#allocation2 + $0x38] sm:$0xff] %vm2668_vm4, %v18043_v61  ;;  %v1179_v56 = vadd.f32 %v14508_v3, %v14636_v45  ;;  %v2697_v3 = vsel %vm2668_vm4, %v2416_v51, 0.0 }
 0x125   :  { %v2670_v29 = vsel %vm2668_vm4, %v2444_v14, 0.0  ;;  %v14689_v59 = vadd.f32 %v14636_v45, %v1303_v25  ;;  %12025 = vmatprep.mubr.msk.f32.mxu0 %vm294_vm1, %v169_v6  ;;  %v14695_v30 = vadd.f32 %v2677_v21, %v2676_v26  ;;  %3190 = vst.msk [vmem:[#allocation2 + $0x40] sm:$0x3] %vm3183_vm5, %v18043_v61  ;;  %3193 = vst.msk [vmem:[#allocation2 + $0x58] sm:$0x3] %vm3183_vm5, %v18043_v61  ;;  %v2704_v14 = vsel %vm2668_vm4, %v2417_v49, 0.0 }
 0x126   :  { %v2447_v34 = vmax.f32 %v1309_v22, 0.0  ;;  %v14709_v42 = vadd.f32 %v2670_v29, %v2669_v33  ;;  %3191 = vst.msk [vmem:[#allocation2 + $0x48] sm:$0xff] %vm2668_vm4, %v18043_v61  ;;  %3192 = vst.msk [vmem:[#allocation2 + $0x50] sm:$0xff] %vm2668_vm4, %v18043_v61  ;;  %v1174_v6 = vadd.f32 %v14636_v45, %v14510_v4  ;;  %v2419_v25 = vmax.f32 %v14715_v53, 0.0 }
 0x127   :  { %v2446_v46 = vmax.f32 %v14689_v59, 0.0  ;;  %v11868_v47 = vpop.f32.mrb[36].mxu0  ;;  %3194 = vst.msk [vmem:[#allocation2 + $0x60] sm:$0xff] %vm2668_vm4, %v18043_v61  ;;  %3195 = vst.msk [vmem:[#allocation2 + $0x68] sm:$0xff] %vm2668_vm4, %v18043_v61  ;;  %v2418_v59 = vmax.f32 %v1164_v63, 0.0 }
 0x128   :  { %v14718_v54 = vadd.f32 %v11868_v47, %v14636_v45  ;;  %v14720_v57 = vpop.f32.mrb[37].mxu0  ;;  %12026 = vmatmul.mubr.msk.f32.gmra.mrb[142].mxu0 %vm294_vm1, %v170_v60  ;;  %v14724_v58 = vsel %vm2668_vm4, %v2447_v34, 0.0  ;;  %3196 = vst.msk [vmem:[#allocation2 + $0x70] sm:$0x3] %vm3183_vm5, %v18043_v61  ;;  %3199 = vst.msk [vmem:[#allocation2 + $0x88] sm:$0x3] %vm3183_vm5, %v18043_v61  ;;  %v1189_v34 = vadd.f32 %v14520_v7, %v14636_v45 }
 0x129   :  { %3197 = vst.msk [vmem:[#allocation2 + $0x78] sm:$0xff] %vm2668_vm4, %v18043_v61  ;;  %3198 = vst.msk [vmem:[#allocation2 + $0x80] sm:$0xff] %vm2668_vm4, %v18043_v61  ;;  %v1314_v62 = vadd.f32 %v14636_v45, %v14720_v57  ;;  %12028 = vmatprep.mubr.msk.f32.mxu0 %vm294_vm1, %v14701_v37  ;;  %v14954_v1 = vadd.f32 %v14724_v58, %v14704_v38  ;;  %v2684_v2 = vsel %vm2668_vm4, %v2446_v46, 0.0  ;;  %v2420_v46 = vmax.f32 %v1174_v6, 0.0  ;;  %v176_v7 = vld [vmem:[%s18035_s0 + $0x4a8] sm:$0xff] }
 0x12a   :  { %3200 = vst.msk [vmem:[#allocation2 + $0x90] sm:$0xff] %vm2668_vm4, %v18043_v61  ;;  %3201 = vst.msk [vmem:[#allocation2 + $0x98] sm:$0xff] %vm2668_vm4, %v18043_v61  ;;  %v2449_v0 = vmax.f32 %v14718_v54, 0.0  ;;  %v14964_v55 = vadd.f32 %v2684_v2, %v14707_v41  ;;  %v2421_v41 = vmax.f32 %v1179_v56, 0.0  ;;  %v1184_v47 = vadd.f32 %v14636_v45, %v14522_v8 }
 0x12b   :  { %3202 = vst.msk [vmem:[#allocation2 + $0xa0] sm:$0x3] %vm3183_vm5, %v18043_v61  ;;  %3205 = vst.msk [vmem:[#allocation2 + $0xb8] sm:$0x3] %vm3183_vm5, %v18043_v61  ;;  %v2448_v9 = vmax.f32 %v1314_v62, 0.0  ;;  %v11871_v10 = vpop.f32.mrb[38].mxu0 }
 0x12c   :  { %3203 = vst.msk [vmem:[#allocation2 + $0xa8] sm:$0xff] %vm2668_vm4, %v18043_v61  ;;  %3204 = vst.msk [vmem:[#allocation2 + $0xb0] sm:$0xff] %vm2668_vm4, %v18043_v61  ;;  %v1329_v17 = vadd.f32 %v11871_v10, %v14636_v45  ;;  %v1323_v21 = vpop.f32.mrb[39].mxu0  ;;  %12029 = vmatmul.mubr.msk.f32.gmra.mrb[144].mxu0 %vm294_vm1, %v172_v52  ;;  %v2705_v22 = vsel %vm2668_vm4, %v2449_v0, 0.0  ;;  %v2718_v54 = vsel %vm2668_vm4, %v2419_v25, 0.0  ;;  %v2711_v8 = vsel %vm2668_vm4, %v2418_v59, 0.0 }
 0x12d   :  { %3206 = vst.msk [vmem:[#allocation2 + $0xc0] sm:$0xff] %vm2668_vm4, %v18043_v61  ;;  %3207 = vst.msk [vmem:[#allocation2 + $0xc8] sm:$0xff] %vm2668_vm4, %v18043_v61  ;;  %v1324_v4 = vadd.f32 %v14636_v45, %v1323_v21  ;;  %12031 = vmatprep.mubr.msk.f32.mxu0 %vm294_vm1, %v173_v5  ;;  %v14985_v26 = vadd.f32 %v2705_v22, %v2704_v14  ;;  %v2698_v29 = vsel %vm2668_vm4, %v2448_v9, 0.0  ;;  %v177_v52 = vld [vmem:[%s18035_s0 + $0x4b0] sm:$0xff]  ;;  %v2732_v56 = vsel %vm2668_vm4, %v2421_v41, 0.0  ;;  %v179_v59 = vld [vmem:[%s18035_s0 + $0x4c0] sm:$0xff] }
 0x12e   :  { %3208 = vst.msk [vmem:[#allocation2 + $0xd0] sm:$0x3] %vm3183_vm5, %v18043_v61  ;;  %3211 = vst.msk [vmem:[#allocation2 + $0xe8] sm:$0x3] %vm3183_vm5, %v18043_v61  ;;  %v2451_v60 = vmax.f32 %v1329_v17, 0.0  ;;  %v14991_v33 = vadd.f32 %v2698_v29, %v2697_v3  ;;  %v2725_v6 = vsel %vm2668_vm4, %v2420_v46, 0.0  ;;  %v1199_v10 = vadd.f32 %v14532_v11, %v14636_v45 }
 0x12f   :  { %3209 = vst.msk [vmem:[#allocation2 + $0xd8] sm:$0xff] %vm2668_vm4, %v18043_v61  ;;  %3210 = vst.msk [vmem:[#allocation2 + $0xe0] sm:$0xff] %vm2668_vm4, %v18043_v61  ;;  %v2450_v37 = vmax.f32 %v1324_v4, 0.0  ;;  %v11874_v38 = vpop.f32.mrb[40].mxu0  ;;  %v2423_v9 = vmax.f32 %v1189_v34, 0.0  ;;  %v2422_v22 = vmax.f32 %v1184_v47, 0.0  ;;  %v1194_v3 = vadd.f32 %v14636_v45, %v14534_v12 }
 0x130   :  { %3212 = vst.msk [vmem:[#allocation2 + $0xf0] sm:$0xff] %vm2668_vm4, %v18043_v61  ;;  %3213 = vst.msk [vmem:[#allocation2 + $0xf8] sm:$0xff] %vm2668_vm4, %v18043_v61  ;;  %v1339_v49 = vadd.f32 %v11874_v38, %v14636_v45  ;;  %v1333_v53 = vpop.f32.mrb[41].mxu0  ;;  %12032 = vmatmul.mubr.msk.f32.gmra.mrb[146].mxu0 %vm294_vm1, %v174_v13  ;;  %v2719_v57 = vsel %vm2668_vm4, %v2451_v60, 0.0  ;;  %v178_v4 = vld [vmem:[%s18035_s0 + $0x4b8] sm:$0xff]  ;;  %v1209_v12 = vadd.f32 %v14544_v15, %v14636_v45  ;;  %v180_v15 = vld [vmem:[%s18035_s0 + $0x4c8] sm:$0xff] }
 0x131   :  { %3214 = vst.msk [vmem:[#allocation2 + $0x100] sm:$0x3] %vm3183_vm5, %v18043_v61  ;;  %3217 = vst.msk [vmem:[#allocation2 + $0x118] sm:$0x3] %vm3183_vm5, %v18043_v61  ;;  %v1334_v58 = vadd.f32 %v14636_v45, %v1333_v53  ;;  %12034 = vmatprep.mubr.msk.f32.mxu0 %vm294_vm1, %v175_v18  ;;  %v15006_v51 = vadd.f32 %v2719_v57, %v2718_v54  ;;  %v2712_v63 = vsel %vm2668_vm4, %v2450_v37, 0.0  ;;  %v2746_v38 = vsel %vm2668_vm4, %v2423_v9, 0.0 }
 0x132   :  { %3215 = vst.msk [vmem:[#allocation2 + $0x108] sm:$0xff] %vm2668_vm4, %v18043_v61  ;;  %3216 = vst.msk [vmem:[#allocation2 + $0x110] sm:$0xff] %vm2668_vm4, %v18043_v61  ;;  %v2453_v62 = vmax.f32 %v1339_v49, 0.0  ;;  %v15013_v2 = vadd.f32 %v2712_v63, %v2711_v8  ;;  %v1204_v18 = vadd.f32 %v14636_v45, %v14546_v16  ;;  %v2739_v49 = vsel %vm2668_vm4, %v2422_v22, 0.0  ;;  %v181_v8 = vld [vmem:[%s18035_s0 + $0x4d0] sm:$0xff] }
 0x133   :  { %3218 = vst.msk [vmem:[#allocation2 + $0x120] sm:$0xff] %vm2668_vm4, %v18043_v61  ;;  %3219 = vst.msk [vmem:[#allocation2 + $0x128] sm:$0xff] %vm2668_vm4, %v18043_v61  ;;  %v2452_v0 = vmax.f32 %v1334_v58, 0.0  ;;  %v11877_v5 = vpop.f32.mrb[42].mxu0  ;;  %v2425_v53 = vmax.f32 %v1199_v10, 0.0  ;;  %v2424_v58 = vmax.f32 %v1194_v3, 0.0 }
 0x134   :  { %3220 = vst.msk [vmem:[#allocation2 + $0x130] sm:$0x3] %vm3183_vm5, %v18043_v61  ;;  %3223 = vst.msk [vmem:[#allocation2 + $0x148] sm:$0x3] %vm3183_vm5, %v18043_v61  ;;  %v1349_v14 = vadd.f32 %v11877_v5, %v14636_v45  ;;  %v1343_v17 = vpop.f32.mrb[43].mxu0  ;;  %12035 = vmatmul.mubr.msk.f32.gmra.mrb[148].mxu0 %vm294_vm1, %v176_v7  ;;  %v2733_v21 = vsel %vm2668_vm4, %v2453_v62, 0.0  ;;  %v1219_v62 = vadd.f32 %v14556_v19, %v14636_v45 }
 0x135   :  { %3221 = vst.msk [vmem:[#allocation2 + $0x138] sm:$0xff] %vm2668_vm4, %v18043_v61  ;;  %3222 = vst.msk [vmem:[#allocation2 + $0x140] sm:$0xff] %vm2668_vm4, %v18043_v61  ;;  %v1344_v25 = vadd.f32 %v14636_v45, %v1343_v17  ;;  %12037 = vmatprep.mubr.msk.f32.mxu0 %vm294_vm1, %v177_v52  ;;  %v15029_v11 = vadd.f32 %v2733_v21, %v2732_v56  ;;  %v2726_v13 = vsel %vm2668_vm4, %v2452_v0, 0.0  ;;  %v2427_v5 = vmax.f32 %v1209_v12, 0.0  ;;  %v182_v19 = vld [vmem:[%s18035_s0 + $0x4d8] sm:$0xff] }
 0x136   :  { %3224 = vst.msk [vmem:[#allocation2 + $0x150] sm:$0xff] %vm2668_vm4, %v18043_v61  ;;  %3225 = vst.msk [vmem:[#allocation2 + $0x158] sm:$0xff] %vm2668_vm4, %v18043_v61  ;;  %v2455_v29 = vmax.f32 %v1349_v14, 0.0  ;;  %v15035_v60 = vadd.f32 %v2726_v13, %v2725_v6  ;;  %v2426_v56 = vmax.f32 %v1204_v18, 0.0  ;;  %v1214_v6 = vadd.f32 %v14636_v45, %v14558_v20 }
 0x137   :  { %3226 = vst.msk [vmem:[#allocation2 + $0x160] sm:$0x3] %vm3183_vm5, %v18043_v61  ;;  %3229 = vst.msk [vmem:[#allocation2 + $0x178] sm:$0x3] %vm3183_vm5, %v18043_v61  ;;  %v2454_v34 = vmax.f32 %v1344_v25, 0.0  ;;  %v11880_v37 = vpop.f32.mrb[44].mxu0 }
 0x138   :  { %3227 = vst.msk [vmem:[#allocation2 + $0x168] sm:$0xff] %vm2668_vm4, %v18043_v61  ;;  %3228 = vst.msk [vmem:[#allocation2 + $0x170] sm:$0xff] %vm2668_vm4, %v18043_v61  ;;  %v1359_v41 = vadd.f32 %v11880_v37, %v14636_v45  ;;  %v1353_v46 = vpop.f32.mrb[45].mxu0  ;;  %12038 = vmatmul.mubr.msk.f32.gmra.mrb[150].mxu0 %vm294_vm1, %v178_v4  ;;  %v2747_v47 = vsel %vm2668_vm4, %v2455_v29, 0.0  ;;  %v2760_v14 = vsel %vm2668_vm4, %v2425_v53, 0.0  ;;  %v2753_v20 = vsel %vm2668_vm4, %v2424_v58, 0.0 }
 0x139   :  { %3230 = vst.msk [vmem:[#allocation2 + $0x180] sm:$0xff] %vm2668_vm4, %v18043_v61  ;;  %3231 = vst.msk [vmem:[#allocation2 + $0x188] sm:$0xff] %vm2668_vm4, %v18043_v61  ;;  %v1354_v54 = vadd.f32 %v14636_v45, %v1353_v46  ;;  %12040 = vmatprep.mubr.msk.f32.mxu0 %vm294_vm1, %v179_v59  ;;  %v15051_v16 = vadd.f32 %v2747_v47, %v2746_v38  ;;  %v2740_v57 = vsel %vm2668_vm4, %v2454_v34, 0.0  ;;  %v183_v4 = vld [vmem:[%s18035_s0 + $0x4e0] sm:$0xff]  ;;  %v2774_v12 = vsel %vm2668_vm4, %v2427_v5, 0.0  ;;  %v185_v58 = vld [vmem:[%s18035_s0 + $0x4f0] sm:$0xff] }
 0x13a   :  { %3232 = vst.msk [vmem:[#allocation2 + $0x190] sm:$0x3] %vm3183_vm5, %v18043_v61  ;;  %3235 = vst.msk [vmem:[#allocation2 + $0x1a8] sm:$0x3] %vm3183_vm5, %v18043_v61  ;;  %v2457_v7 = vmax.f32 %v1359_v41, 0.0  ;;  %v15057_v63 = vadd.f32 %v2740_v57, %v2739_v49  ;;  %v2767_v18 = vsel %vm2668_vm4, %v2426_v56, 0.0  ;;  %v1229_v37 = vadd.f32 %v14568_v23, %v14636_v45 }
 0x13b   :  { %3233 = vst.msk [vmem:[#allocation2 + $0x198] sm:$0xff] %vm2668_vm4, %v18043_v61  ;;  %3234 = vst.msk [vmem:[#allocation2 + $0x1a0] sm:$0xff] %vm2668_vm4, %v18043_v61  ;;  %v2456_v52 = vmax.f32 %v1354_v54, 0.0  ;;  %v11883_v0 = vpop.f32.mrb[46].mxu0  ;;  %v2429_v34 = vmax.f32 %v1219_v62, 0.0  ;;  %v2428_v47 = vmax.f32 %v1214_v6, 0.0  ;;  %v1224_v49 = vadd.f32 %v14636_v45, %v14570_v24 }
 0x13c   :  { %3236 = vst.msk [vmem:[#allocation2 + $0x1b0] sm:$0xff] %vm2668_vm4, %v18043_v61  ;;  %3237 = vst.msk [vmem:[#allocation2 + $0x1b8] sm:$0xff] %vm2668_vm4, %v18043_v61  ;;  %v1369_v9 = vadd.f32 %v11883_v0, %v14636_v45  ;;  %v1363_v10 = vpop.f32.mrb[47].mxu0  ;;  %12041 = vmatmul.mubr.msk.f32.gmra.mrb[152].mxu0 %vm294_vm1, %v180_v15  ;;  %v2761_v17 = vsel %vm2668_vm4, %v2457_v7, 0.0  ;;  %v184_v54 = vld [vmem:[%s18035_s0 + $0x4e8] sm:$0xff]  ;;  %v1239_v24 = vadd.f32 %v14580_v27, %v14636_v45  ;;  %v186_v27 = vld [vmem:[%s18035_s0 + $0x4f8] sm:$0xff] }
 0x13d   :  { %3238 = vst.msk [vmem:[#allocation2 + $0x1c0] sm:$0x3] %vm3183_vm5, %v18043_v61  ;;  %3241 = vst.msk [vmem:[#allocation2 + $0x1d8] sm:$0x3] %vm3183_vm5, %v18043_v61  ;;  %v1364_v21 = vadd.f32 %v14636_v45, %v1363_v10  ;;  %12043 = vmatprep.mubr.msk.f32.mxu0 %vm294_vm1, %v181_v8  ;;  %v15072_v22 = vadd.f32 %v2761_v17, %v2760_v14  ;;  %v2754_v3 = vsel %vm2668_vm4, %v2456_v52, 0.0  ;;  %v2788_v0 = vsel %vm2668_vm4, %v2429_v34, 0.0 }
 0x13e   :  { %3239 = vst.msk [vmem:[#allocation2 + $0x1c8] sm:$0xff] %vm2668_vm4, %v18043_v61  ;;  %3240 = vst.msk [vmem:[#allocation2 + $0x1d0] sm:$0xff] %vm2668_vm4, %v18043_v61  ;;  %v2459_v25 = vmax.f32 %v1369_v9, 0.0  ;;  %v15079_v13 = vadd.f32 %v2754_v3, %v2753_v20  ;;  %v1234_v8 = vadd.f32 %v14636_v45, %v14582_v28  ;;  %v2781_v9 = vsel %vm2668_vm4, %v2428_v47, 0.0  ;;  %v187_v20 = vld [vmem:[%s18035_s0 + $0x500] sm:$0xff] }
 0x13f   :  { %3242 = vst.msk [vmem:[#allocation2 + $0x1e0] sm:$0xff] %vm2668_vm4, %v18043_v61  ;;  %3243 = vst.msk [vmem:[#allocation2 + $0x1e8] sm:$0xff] %vm2668_vm4, %v18043_v61  ;;  %v2458_v29 = vmax.f32 %v1364_v21, 0.0  ;;  %v11886_v59 = vpop.f32.mrb[48].mxu0  ;;  %v2431_v10 = vmax.f32 %v1229_v37, 0.0  ;;  %v2430_v21 = vmax.f32 %v1224_v49, 0.0 }
 0x140   :  { %3244 = vst.msk [vmem:[#allocation2 + $0x1f0] sm:$0x3] %vm3183_vm5, %v18043_v61  ;;  %3247 = vst.msk [vmem:[#allocation2 + $0x208] sm:$0x3] %vm3183_vm5, %v18043_v61  ;;  %v1379_v38 = vadd.f32 %v11886_v59, %v14636_v45  ;;  %v1373_v41 = vpop.f32.mrb[49].mxu0  ;;  %12044 = vmatmul.mubr.msk.f32.gmra.mrb[154].mxu0 %vm294_vm1, %v182_v19  ;;  %v2775_v46 = vsel %vm2668_vm4, %v2459_v25, 0.0  ;;  %v1249_v25 = vadd.f32 %v14592_v31, %v14636_v45 }
 0x141   :  { %3245 = vst.msk [vmem:[#allocation2 + $0x1f8] sm:$0xff] %vm2668_vm4, %v18043_v61  ;;  %3246 = vst.msk [vmem:[#allocation2 + $0x200] sm:$0xff] %vm2668_vm4, %v18043_v61  ;;  %v1374_v53 = vadd.f32 %v14636_v45, %v1373_v41  ;;  %12046 = vmatprep.mubr.msk.f32.mxu0 %vm294_vm1, %v183_v4  ;;  %v15095_v23 = vadd.f32 %v2775_v46, %v2774_v12  ;;  %v2768_v15 = vsel %vm2668_vm4, %v2458_v29, 0.0  ;;  %v2433_v59 = vmax.f32 %v1239_v24, 0.0  ;;  %v188_v31 = vld [vmem:[%s18035_s0 + $0x508] sm:$0xff] }
 0x142   :  { %3248 = vst.msk [vmem:[#allocation2 + $0x210] sm:$0xff] %vm2668_vm4, %v18043_v61  ;;  %3249 = vst.msk [vmem:[#allocation2 + $0x218] sm:$0xff] %vm2668_vm4, %v18043_v61  ;;  %v2461_v57 = vmax.f32 %v1379_v38, 0.0  ;;  %v15101_v7 = vadd.f32 %v2768_v15, %v2767_v18  ;;  %v2432_v12 = vmax.f32 %v1234_v8, 0.0  ;;  %v1244_v18 = vadd.f32 %v14636_v45, %v14594_v32 }
 0x143   :  { %3250 = vst.msk [vmem:[#allocation2 + $0x220] sm:$0x3] %vm3183_vm5, %v18043_v61  ;;  %3253 = vst.msk [vmem:[#allocation2 + $0x238] sm:$0x3] %vm3183_vm5, %v18043_v61  ;;  %v2460_v62 = vmax.f32 %v1374_v53, 0.0  ;;  %v11889_v52 = vpop.f32.mrb[50].mxu0 }
 0x144   :  { %3251 = vst.msk [vmem:[#allocation2 + $0x228] sm:$0xff] %vm2668_vm4, %v18043_v61  ;;  %3252 = vst.msk [vmem:[#allocation2 + $0x230] sm:$0xff] %vm2668_vm4, %v18043_v61  ;;  %v1389_v5 = vadd.f32 %v11889_v52, %v14636_v45  ;;  %v1383_v56 = vpop.f32.mrb[51].mxu0  ;;  %12047 = vmatmul.mubr.msk.f32.gmra.mrb[156].mxu0 %vm294_vm1, %v184_v54  ;;  %v2789_v6 = vsel %vm2668_vm4, %v2461_v57, 0.0  ;;  %v2802_v38 = vsel %vm2668_vm4, %v2431_v10, 0.0  ;;  %v2795_v32 = vsel %vm2668_vm4, %v2430_v21, 0.0 }
 0x145   :  { %3254 = vst.msk [vmem:[#allocation2 + $0x240] sm:$0xff] %vm2668_vm4, %v18043_v61  ;;  %3255 = vst.msk [vmem:[#allocation2 + $0x248] sm:$0xff] %vm2668_vm4, %v18043_v61  ;;  %v1384_v14 = vadd.f32 %v14636_v45, %v1383_v56  ;;  %12049 = vmatprep.mubr.msk.f32.mxu0 %vm294_vm1, %v185_v58  ;;  %v15117_v28 = vadd.f32 %v2789_v6, %v2788_v0  ;;  %v2782_v17 = vsel %vm2668_vm4, %v2460_v62, 0.0  ;;  %v189_v54 = vld [vmem:[%s18035_s0 + $0x510] sm:$0xff]  ;;  %v2816_v24 = vsel %vm2668_vm4, %v2433_v59, 0.0  ;;  %v191_v21 = vld [vmem:[%s18035_s0 + $0x520] sm:$0xff] }
 0x146   :  { %3256 = vst.msk [vmem:[#allocation2 + $0x250] sm:$0x3] %vm3183_vm5, %v18043_v61  ;;  %3259 = vst.msk [vmem:[#allocation2 + $0x268] sm:$0x3] %vm3183_vm5, %v18043_v61  ;;  %v2463_v19 = vmax.f32 %v1389_v5, 0.0  ;;  %v15123_v3 = vadd.f32 %v2782_v17, %v2781_v9  ;;  %v2809_v8 = vsel %vm2668_vm4, %v2432_v12, 0.0  ;;  %v1259_v52 = vadd.f32 %v14604_v35, %v14636_v45 }
 0x147   :  { %3257 = vst.msk [vmem:[#allocation2 + $0x258] sm:$0xff] %vm2668_vm4, %v18043_v61  ;;  %3258 = vst.msk [vmem:[#allocation2 + $0x260] sm:$0xff] %vm2668_vm4, %v18043_v61  ;;  %v2462_v4 = vmax.f32 %v1384_v14, 0.0  ;;  %v11892_v29 = vpop.f32.mrb[52].mxu0  ;;  %v2435_v62 = vmax.f32 %v1249_v25, 0.0  ;;  %v2434_v6 = vmax.f32 %v1244_v18, 0.0  ;;  %v1254_v9 = vadd.f32 %v14636_v45, %v14606_v36 }
 0x148   :  { %3260 = vst.msk [vmem:[#allocation2 + $0x270] sm:$0xff] %vm2668_vm4, %v18043_v61  ;;  %3261 = vst.msk [vmem:[#allocation2 + $0x278] sm:$0xff] %vm2668_vm4, %v18043_v61  ;;  %v1399_v34 = vadd.f32 %v11892_v29, %v14636_v45  ;;  %v1393_v37 = vpop.f32.mrb[53].mxu0  ;;  %12050 = vmatmul.mubr.msk.f32.gmra.mrb[158].mxu0 %vm294_vm1, %v186_v27  ;;  %v2803_v41 = vsel %vm2668_vm4, %v2463_v19, 0.0  ;;  %v190_v14 = vld [vmem:[%s18035_s0 + $0x518] sm:$0xff]  ;;  %v1269_v36 = vadd.f32 %v14616_v39, %v14636_v45  ;;  %v192_v39 = vld [vmem:[%s18035_s0 + $0x528] sm:$0xff] }
 0x149   :  { %3262 = vst.msk [vmem:[#allocation2 + $0x280] sm:$0x3] %vm3183_vm5, %v18043_v61  ;;  %3265 = vst.msk [vmem:[#allocation2 + $0x298] sm:$0x3] %vm3183_vm5, %v18043_v61  ;;  %v1394_v46 = vadd.f32 %v14636_v45, %v1393_v37  ;;  %12052 = vmatprep.mubr.msk.f32.mxu0 %vm294_vm1, %v187_v20  ;;  %v15138_v47 = vadd.f32 %v2803_v41, %v2802_v38  ;;  %v2796_v49 = vsel %vm2668_vm4, %v2462_v4, 0.0  ;;  %v2830_v29 = vsel %vm2668_vm4, %v2435_v62, 0.0 }
 0x14a   :  { %3263 = vst.msk [vmem:[#allocation2 + $0x288] sm:$0xff] %vm2668_vm4, %v18043_v61  ;;  %3264 = vst.msk [vmem:[#allocation2 + $0x290] sm:$0xff] %vm2668_vm4, %v18043_v61  ;;  %v2465_v53 = vmax.f32 %v1399_v34, 0.0  ;;  %v15145_v15 = vadd.f32 %v2796_v49, %v2795_v32  ;;  %v1264_v20 = vadd.f32 %v14636_v45, %v14618_v40  ;;  %v2823_v34 = vsel %vm2668_vm4, %v2434_v6, 0.0  ;;  %v193_v32 = vld [vmem:[%s18035_s0 + $0x530] sm:$0xff] }
 0x14b   :  { %3266 = vst.msk [vmem:[#allocation2 + $0x2a0] sm:$0xff] %vm2668_vm4, %v18043_v61  ;;  %3267 = vst.msk [vmem:[#allocation2 + $0x2a8] sm:$0xff] %vm2668_vm4, %v18043_v61  ;;  %v2464_v57 = vmax.f32 %v1394_v46, 0.0  ;;  %v11895_v58 = vpop.f32.mrb[54].mxu0  ;;  %v2437_v37 = vmax.f32 %v1259_v52, 0.0  ;;  %v2436_v46 = vmax.f32 %v1254_v9, 0.0 }
 0x14c   :  { %3268 = vst.msk [vmem:[#allocation2 + $0x2b0] sm:$0x3] %vm3183_vm5, %v18043_v61  ;;  %3271 = vst.msk [vmem:[#allocation2 + $0x2c8] sm:$0x3] %vm3183_vm5, %v18043_v61  ;;  %v1409_v0 = vadd.f32 %v11895_v58, %v14636_v45  ;;  %v1403_v5 = vpop.f32.mrb[55].mxu0  ;;  %12053 = vmatmul.mubr.msk.f32.gmra.mrb[160].mxu0 %vm294_vm1, %v188_v31  ;;  %v2817_v56 = vsel %vm2668_vm4, %v2465_v53, 0.0  ;;  %v1279_v53 = vadd.f32 %v14628_v43, %v14636_v45 }
 0x14d   :  { %3269 = vst.msk [vmem:[#allocation2 + $0x2b8] sm:$0xff] %vm2668_vm4, %v18043_v61  ;;  %3270 = vst.msk [vmem:[#allocation2 + $0x2c0] sm:$0xff] %vm2668_vm4, %v18043_v61  ;;  %v1404_v10 = vadd.f32 %v14636_v45, %v1403_v5  ;;  %12055 = vmatprep.mubr.msk.f32.mxu0 %vm294_vm1, %v189_v54  ;;  %v15161_v35 = vadd.f32 %v2817_v56, %v2816_v24  ;;  %v2810_v27 = vsel %vm2668_vm4, %v2464_v57, 0.0  ;;  %v2439_v58 = vmax.f32 %v1269_v36, 0.0  ;;  %v194_v43 = vld [vmem:[%s18035_s0 + $0x538] sm:$0xff] }
 0x14e   :  { %3272 = vst.msk [vmem:[#allocation2 + $0x2d0] sm:$0xff] %vm2668_vm4, %v18043_v61  ;;  %3273 = vst.msk [vmem:[#allocation2 + $0x2d8] sm:$0xff] %vm2668_vm4, %v18043_v61  ;;  %v2467_v17 = vmax.f32 %v1409_v0, 0.0  ;;  %v15167_v19 = vadd.f32 %v2810_v27, %v2809_v8  ;;  %v2438_v24 = vmax.f32 %v1264_v20, 0.0  ;;  %v1274_v8 = vadd.f32 %v14636_v45, %v14630_v44 }
 0x14f   :  { %3274 = vst.msk [vmem:[#allocation2 + $0x2e0] sm:$0x3] %vm3183_vm5, %v18043_v61  ;;  %3277 = vst.msk [vmem:[#allocation2 + $0x2f8] sm:$0x3] %vm3183_vm5, %v18043_v61  ;;  %v2466_v25 = vmax.f32 %v1404_v10, 0.0  ;;  %v11898_v4 = vpop.f32.mrb[56].mxu0 }
 0x150   :  { %3275 = vst.msk [vmem:[#allocation2 + $0x2e8] sm:$0xff] %vm2668_vm4, %v18043_v61  ;;  %3276 = vst.msk [vmem:[#allocation2 + $0x2f0] sm:$0xff] %vm2668_vm4, %v18043_v61  ;;  %v1419_v59 = vadd.f32 %v11898_v4, %v14636_v45  ;;  %v1413_v12 = vpop.f32.mrb[57].mxu0  ;;  %12056 = vmatmul.mubr.msk.f32.gmra.mrb[162].mxu0 %vm294_vm1, %v190_v14  ;;  %v2831_v18 = vsel %vm2668_vm4, %v2467_v17, 0.0  ;;  %v2844_v0 = vsel %vm2668_vm4, %v2437_v37, 0.0  ;;  %v2837_v44 = vsel %vm2668_vm4, %v2436_v46, 0.0 }
 0x151   :  { %3278 = vst.msk [vmem:[#allocation2 + $0x300] sm:$0xff] %vm2668_vm4, %v18043_v61  ;;  %3279 = vst.msk [vmem:[#allocation2 + $0x308] sm:$0xff] %vm2668_vm4, %v18043_v61  ;;  %v1414_v38 = vadd.f32 %v14636_v45, %v1413_v12  ;;  %12058 = vmatprep.mubr.msk.f32.mxu0 %vm294_vm1, %v191_v21  ;;  %v15183_v40 = vadd.f32 %v2831_v18, %v2830_v29  ;;  %v2824_v41 = vsel %vm2668_vm4, %v2466_v25, 0.0  ;;  %v195_v14 = vld [vmem:[%s18035_s0 + $0x540] sm:$0xff]  ;;  %v2858_v36 = vsel %vm2668_vm4, %v2439_v58, 0.0  ;;  %v197_v46 = vld [vmem:[%s18035_s0 + $0x550] sm:$0xff] }
 0x152   :  { %3280 = vst.msk [vmem:[#allocation2 + $0x310] sm:$0x3] %vm3183_vm5, %v18043_v61  ;;  %3283 = vst.msk [vmem:[#allocation2 + $0x328] sm:$0x3] %vm3183_vm5, %v18043_v61  ;;  %v2469_v31 = vmax.f32 %v1419_v59, 0.0  ;;  %v15189_v49 = vadd.f32 %v2824_v41, %v2823_v34  ;;  %v2851_v20 = vsel %vm2668_vm4, %v2438_v24, 0.0  ;;  %v1289_v4 = vadd.f32 %v14645_v48, %v14636_v45 }
 0x153   :  { %3281 = vst.msk [vmem:[#allocation2 + $0x318] sm:$0xff] %vm2668_vm4, %v18043_v61  ;;  %3282 = vst.msk [vmem:[#allocation2 + $0x320] sm:$0xff] %vm2668_vm4, %v18043_v61  ;;  %v2468_v54 = vmax.f32 %v1414_v38, 0.0  ;;  %v11901_v57 = vpop.f32.mrb[58].mxu0  ;;  %v2441_v25 = vmax.f32 %v1279_v53, 0.0  ;;  %v2440_v18 = vmax.f32 %v1274_v8, 0.0  ;;  %v1284_v34 = vadd.f32 %v14636_v45, %v14649_v50 }
 0x154   :  { %3284 = vst.msk [vmem:[#allocation2 + $0x330] sm:$0xff] %vm2668_vm4, %v18043_v61  ;;  %3285 = vst.msk [vmem:[#allocation2 + $0x338] sm:$0xff] %vm2668_vm4, %v18043_v61  ;;  %v1429_v62 = vadd.f32 %v11901_v57, %v14636_v45  ;;  %v1423_v52 = vpop.f32.mrb[59].mxu0  ;;  %12059 = vmatmul.mubr.msk.f32.gmra.mrb[164].mxu0 %vm294_vm1, %v192_v39  ;;  %v2845_v5 = vsel %vm2668_vm4, %v2469_v31, 0.0  ;;  %v196_v38 = vld [vmem:[%s18035_s0 + $0x548] sm:$0xff]  ;;  %v2443_v8 = vmax.f32 %v1289_v4, 0.0 }
 0x155   :  { %3286 = vst.msk [vmem:[#allocation2 + $0x340] sm:$0x3] %vm3183_vm5, %v18043_v61  ;;  %3289 = vst.msk [vmem:[#allocation2 + $0x358] sm:$0x3] %vm3183_vm5, %v18043_v61  ;;  %v1424_v56 = vadd.f32 %v14636_v45, %v1423_v52  ;;  %12061 = vmatprep.mubr.msk.f32.mxu0 %vm294_vm1, %v193_v32  ;;  %v15204_v6 = vadd.f32 %v2845_v5, %v2844_v0  ;;  %v2838_v9 = vsel %vm2668_vm4, %v2468_v54, 0.0  ;;  %v2872_v53 = vsel %vm2668_vm4, %v2441_v25, 0.0 }
 0x156   :  { %3287 = vst.msk [vmem:[#allocation2 + $0x348] sm:$0xff] %vm2668_vm4, %v18043_v61  ;;  %3288 = vst.msk [vmem:[#allocation2 + $0x350] sm:$0xff] %vm2668_vm4, %v18043_v61  ;;  %v2471_v10 = vmax.f32 %v1429_v62, 0.0  ;;  %v15211_v27 = vadd.f32 %v2838_v9, %v2837_v44  ;;  %v2865_v24 = vsel %vm2668_vm4, %v2440_v18, 0.0  ;;  %v198_v52 = vld [vmem:[%s18035_s0 + $0x558] sm:$0xff]  ;;  %v199_v44 = vld [vmem:[%s18035_s0 + $0x560] sm:$0xff] }
 0x157   :  { %v2470_v17 = vmax.f32 %v1424_v56, 0.0  ;;  %v11904_v21 = vpop.f32.mrb[60].mxu0  ;;  %v2442_v56 = vmax.f32 %v1284_v34, 0.0  ;;  %v200_v4 = vld [vmem:[%s18035_s0 + $0x568] sm:$0xff]  ;;  %v201_v34 = vld [vmem:[%s18035_s0 + $0x570] sm:$0xff] }
 0x158   :  { %v1439_v29 = vadd.f32 %v11904_v21, %v14636_v45  ;;  %v1433_v59 = vpop.f32.mrb[61].mxu0  ;;  %12062 = vmatmul.mubr.msk.f32.gmra.mrb[166].mxu0 %vm294_vm1, %v194_v43  ;;  %v2859_v12 = vsel %vm2668_vm4, %v2471_v10, 0.0 }
 0x159   :  { %v1434_v37 = vadd.f32 %v14636_v45, %v1433_v59  ;;  %12064 = vmatprep.mubr.msk.f32.mxu0 %vm294_vm1, %v195_v14  ;;  %v15227_v48 = vadd.f32 %v2859_v12, %v2858_v36  ;;  %v2852_v39 = vsel %vm2668_vm4, %v2470_v17, 0.0  ;;  %v2886_v36 = vsel %vm2668_vm4, %v2443_v8, 0.0 }
 0x15a   :  { %v2473_v41 = vmax.f32 %v1439_v29, 0.0  ;;  %v15233_v31 = vadd.f32 %v2852_v39, %v2851_v20  ;;  %v2879_v59 = vsel %vm2668_vm4, %v2442_v56, 0.0 }
 0x15b   :  { %v2472_v50 = vmax.f32 %v1434_v37, 0.0  ;;  %v11907_v32 = vpop.f32.mrb[62].mxu0 }
 0x15c   :  { %v1449_v54 = vadd.f32 %v11907_v32, %v14636_v45  ;;  %v1443_v57 = vpop.f32.mrb[63].mxu0  ;;  %12065 = vmatmul.mubr.msk.f32.gmra.mrb[168].mxu0 %vm294_vm1, %v196_v38  ;;  %v2873_v58 = vsel %vm2668_vm4, %v2473_v41, 0.0 }
 0x15d   :  { %v1444_v62 = vadd.f32 %v14636_v45, %v1443_v57  ;;  %12067 = vmatprep.mubr.msk.f32.mxu0 %vm294_vm1, %v197_v46  ;;  %v15245_v0 = vadd.f32 %v2873_v58, %v2872_v53  ;;  %v2866_v5 = vsel %vm2668_vm4, %v2472_v50, 0.0 }
 0x15e   :  { %v2475_v43 = vmax.f32 %v1449_v54, 0.0  ;;  %v15251_v9 = vadd.f32 %v2866_v5, %v2865_v24  ;;  %v202_v54 = vld [vmem:[%s18035_s0 + $0x578] sm:$0xff]  ;;  %v203_v24 = vld [vmem:[%s18035_s0 + $0x580] sm:$0xff] }
 0x15f   :  { %v2474_v10 = vmax.f32 %v1444_v62, 0.0  ;;  %v11910_v14 = vpop.f32.mrb[64].mxu0 }
 0x160   :  { %v1459_v17 = vadd.f32 %v11910_v14, %v14636_v45  ;;  %v1453_v21 = vpop.f32.mrb[65].mxu0  ;;  %12068 = vmatmul.mubr.msk.f32.gmra.mrb[170].mxu0 %vm294_vm1, %v198_v52  ;;  %v2887_v20 = vsel %vm2668_vm4, %v2475_v43, 0.0 }
 0x161   :  { %v1454_v25 = vadd.f32 %v14636_v45, %v1453_v21  ;;  %12070 = vmatprep.mubr.msk.f32.mxu0 %vm294_vm1, %v199_v44  ;;  %v15262_v29 = vadd.f32 %v2887_v20, %v2886_v36  ;;  %v2880_v12 = vsel %vm2668_vm4, %v2474_v10, 0.0  ;;  %v205_v21 = vld [vmem:[%s18035_s0 + $0x590] sm:$0xff] }
 0x162   :  { %v2477_v18 = vmax.f32 %v1459_v17, 0.0  ;;  %v15269_v37 = vadd.f32 %v2880_v12, %v2879_v59 }
 0x163   :  { %v2476_v38 = vmax.f32 %v1454_v25, 0.0  ;;  %v11913_v39 = vpop.f32.mrb[66].mxu0 }
 0x164   :  { %v2679_v41 = vsel %vm2668_vm4, %v2477_v18, 0.0  ;;  %v1469_v46 = vadd.f32 %v11913_v39, %v14636_v45  ;;  %v1463_v50 = vpop.f32.mrb[67].mxu0  ;;  %12071 = vmatmul.mubr.msk.f32.gmra.mrb[172].mxu0 %vm294_vm1, %v200_v4  ;;  %v206_v18 = vld [vmem:[%s18035_s0 + $0x598] sm:$0xff]  ;;  %v207_v39 = vld [vmem:[%s18035_s0 + $0x5a0] sm:$0xff] }
 0x165   :  { %v2672_v32 = vsel %vm2668_vm4, %v2476_v38, 0.0  ;;  %v1464_v53 = vadd.f32 %v14636_v45, %v1463_v50  ;;  %12073 = vmatprep.mubr.msk.f32.mxu0 %vm294_vm1, %v201_v34  ;;  %v15281_v57 = vadd.f32 %v2679_v41, %v14695_v30 }
 0x166   :  { %v2479_v58 = vmax.f32 %v1469_v46, 0.0  ;;  %v15287_v8 = vadd.f32 %v2672_v32, %v14709_v42  ;;  %v204_v42 = vld [vmem:[%s18035_s0 + $0x588] sm:$0xff] }
 0x167   :  { %v2478_v62 = vmax.f32 %v1464_v53, 0.0  ;;  %v11916_v52 = vpop.f32.mrb[68].mxu0 }
 0x168   :  { %v2693_v5 = vsel %vm2668_vm4, %v2479_v58, 0.0  ;;  %v1479_v56 = vadd.f32 %v11916_v52, %v14636_v45  ;;  %v1473_v43 = vpop.f32.mrb[69].mxu0  ;;  %12074 = vmatmul.mubr.msk.f32.gmra.mrb[174].mxu0 %vm294_vm1, %v202_v54  ;;  %v208_v58 = vld [vmem:[%s18035_s0 + $0x5a8] sm:$0xff]  ;;  %v209_v52 = vld [vmem:[%s18035_s0 + $0x5b0] sm:$0xff] }
 0x169   :  { %v15293_v30 = vadd.f32 %v2693_v5, %v14954_v1  ;;  %v2686_v44 = vsel %vm2668_vm4, %v2478_v62, 0.0  ;;  %v1474_v10 = vadd.f32 %v14636_v45, %v1473_v43  ;;  %12076 = vmatprep.mubr.msk.f32.mxu0 %vm294_vm1, %v203_v24 }
 0x16a   :  { %v15302_v14 = vadd.f32 %v2686_v44, %v14964_v55  ;;  %v2481_v17 = vmax.f32 %v1479_v56, 0.0 }
 0x16b   :  { %v2480_v1 = vmax.f32 %v1474_v10, 0.0  ;;  %v11919_v36 = vpop.f32.mrb[70].mxu0 }
 0x16c   :  { %v2707_v20 = vsel %vm2668_vm4, %v2481_v17, 0.0  ;;  %v1489_v25 = vadd.f32 %v11919_v36, %v14636_v45  ;;  %v1483_v4 = vpop.f32.mrb[71].mxu0  ;;  %12077 = vmatmul.mubr.msk.f32.gmra.mrb[176].mxu0 %vm294_vm1, %v204_v42  ;;  %v15353_v42 = vld [vmem:[%s18037_s2] ss:$0 sm:$0xff] }
 0x16d   :  { %v15311_v59 = vadd.f32 %v2707_v20, %v14985_v26  ;;  %v2700_v55 = vsel %vm2668_vm4, %v2480_v1, 0.0  ;;  %v1484_v12 = vadd.f32 %v14636_v45, %v1483_v4  ;;  %12079 = vmatprep.mubr.msk.f32.mxu0 %vm294_vm1, %v205_v21  ;;  %v211_v1 = vld [vmem:[%s18035_s0 + $0x5c0] sm:$0xff] }
 0x16e   :  { %v15320_v34 = vadd.f32 %v2700_v55, %v14991_v33  ;;  %v2483_v38 = vmax.f32 %v1489_v25, 0.0 }
 0x16f   :  { %v2482_v26 = vmax.f32 %v1484_v12, 0.0  ;;  %v11922_v41 = vpop.f32.mrb[72].mxu0 }
 0x170   :  { %v2721_v46 = vsel %vm2668_vm4, %v2483_v38, 0.0  ;;  %v1499_v50 = vadd.f32 %v11922_v41, %v14636_v45  ;;  %v1493_v32 = vpop.f32.mrb[73].mxu0  ;;  %12080 = vmatmul.mubr.msk.f32.gmra.mrb[178].mxu0 %vm294_vm1, %v206_v18  ;;  %v212_v38 = vld [vmem:[%s18035_s0 + $0x5c8] sm:$0xff] }
 0x171   :  { %v15329_v53 = vadd.f32 %v2721_v46, %v15006_v51  ;;  %v2714_v33 = vsel %vm2668_vm4, %v2482_v26, 0.0  ;;  %v1494_v54 = vadd.f32 %v14636_v45, %v1493_v32  ;;  %12082 = vmatprep.mubr.msk.f32.mxu0 %vm294_vm1, %v207_v39  ;;  %v10237_v39 = vld [vmem:[%s18038_s3 + $0x40] sm:$0xff]  ;;  %v10238_v26 = vld [vmem:[%s18038_s3 + $0x48] sm:$0xff]  ;;  %v213_v46 = vld [vmem:[%s18035_s0 + $0x5d0] sm:$0xff] }
 0x172   :  { %v15338_v24 = vadd.f32 %v2714_v33, %v15013_v2  ;;  %v2485_v62 = vmax.f32 %v1499_v50, 0.0  ;;  %v13249_v50 = vpack.c.bf16 %v10238_v26, %v10237_v39  ;;  %v217_v39 = vld [vmem:[%s18035_s0 + $0x5f0] sm:$0xff] }
 0x173   :  { %v2484_v51 = vmax.f32 %v1494_v54, 0.0  ;;  %v11925_v5 = vpop.f32.mrb[74].mxu0 }
 0x174   :  { %v2735_v56 = vsel %vm2668_vm4, %v2485_v62, 0.0  ;;  %v1509_v43 = vadd.f32 %v11925_v5, %v14636_v45  ;;  %v1503_v44 = vpop.f32.mrb[75].mxu0  ;;  %12083 = vmatmul.mubr.msk.f32.gmra.mrb[180].mxu0 %vm294_vm1, %v208_v58  ;;  %v210_v45 = vld [vmem:[%s18035_s0 + $0x5b8] sm:$0xff]  ;;  %13250 = vmatprep.subr.bf16.mxu0 %v13249_v50 }
 0x175   :  { %v15347_v10 = vadd.f32 %v2735_v56, %v15029_v11  ;;  %v2728_v2 = vsel %vm2668_vm4, %v2484_v51, 0.0  ;;  %v1504_v17 = vadd.f32 %v15353_v42, %v1503_v44  ;;  %12085 = vmatprep.mubr.msk.f32.mxu0 %vm294_vm1, %v209_v52  ;;  %v214_v5 = vld [vmem:[%s18035_s0 + $0x5d8] sm:$0xff]  ;;  %13252 = vmatpush3.bf16.msra.mxu0 %v13249_v50  ;;  %v10239_v56 = vld [vmem:[%s18038_s3 + $0x50] sm:$0xff] }
 0x176   :  { %v15361_v21 = vadd.f32 %v2728_v2, %v15035_v60  ;;  %v2487_v11 = vmax.f32 %v1509_v43, 0.0  ;;  %v215_v2 = vld [vmem:[%s18035_s0 + $0x5e0] sm:$0xff] }
 0x177   :  { %v2486_v36 = vmax.f32 %v1504_v17, 0.0  ;;  %v11928_v20 = vpop.f32.mrb[76].mxu0 }
 0x178   :  { %v2749_v25 = vsel %vm2668_vm4, %v2487_v11, 0.0  ;;  %v1519_v4 = vadd.f32 %v15353_v42, %v11928_v20  ;;  %v1513_v55 = vpop.f32.mrb[77].mxu0  ;;  %12086 = vmatmul.mubr.msk.f32.gmra.mrb[182].mxu0 %vm294_vm1, %v210_v45 }
 0x179   :  { %v15370_v12 = vadd.f32 %v2749_v25, %v15051_v16  ;;  %v2742_v60 = vsel %vm2668_vm4, %v2486_v36, 0.0  ;;  %v1514_v18 = vadd.f32 %v15353_v42, %v1513_v55  ;;  %12088 = vmatprep.mubr.msk.f32.mxu0 %vm294_vm1, %v211_v1  ;;  %v216_v55 = vld [vmem:[%s18035_s0 + $0x5e8] sm:$0xff] }
 0x17a   :  { %v15385_v16 = vadd.f32 %v2742_v60, %v15057_v63  ;;  %v2489_v41 = vmax.f32 %v1519_v4, 0.0  ;;  %v10241_v60 = vld [vmem:[%s18038_s3 + $0x60] sm:$0xff] }
 0x17b   :  { %v2488_v32 = vmax.f32 %v1514_v18, 0.0  ;;  %v11931_v33 = vpop.f32.mrb[78].mxu0 }
 0x17c   :  { %v2763_v54 = vsel %vm2668_vm4, %v2489_v41, 0.0  ;;  %v1529_v58 = vadd.f32 %v15353_v42, %v11931_v33  ;;  %v1523_v62 = vpop.f32.mrb[79].mxu0  ;;  %12089 = vmatmul.mubr.msk.f32.gmra.mrb[184].mxu0 %vm294_vm1, %v212_v38 }
 0x17d   :  { %v15394_v52 = vadd.f32 %v2763_v54, %v15072_v22  ;;  %v2756_v63 = vsel %vm2668_vm4, %v2488_v32, 0.0  ;;  %v1524_v51 = vadd.f32 %v15353_v42, %v1523_v62  ;;  %12091 = vmatprep.mubr.msk.f32.mxu0 %vm294_vm1, %v213_v46  ;;  %v10240_v22 = vld [vmem:[%s18038_s3 + $0x58] sm:$0xff] }
 0x17e   :  { %v15409_v43 = vadd.f32 %v2756_v63, %v15079_v13  ;;  %v2491_v44 = vmax.f32 %v1529_v58, 0.0  ;;  %v13253_v17 = vpack.c.bf16 %v10240_v22, %v10239_v56  ;;  %v218_v62 = vld [vmem:[%s18035_s0 + $0x5f8] sm:$0xff]  ;;  %v10243_v63 = vld [vmem:[%s18038_s3 + $0x70] sm:$0xff]  ;;  %v219_v56 = vld [vmem:[%s18035_s0 + $0x600] sm:$0xff] }
 0x17f   :  { %v2490_v45 = vmax.f32 %v1524_v51, 0.0  ;;  %v11934_v11 = vpop.f32.mrb[80].mxu0 }
 0x180   :  { %v2777_v1 = vsel %vm2668_vm4, %v2491_v44, 0.0  ;;  %v1539_v36 = vadd.f32 %v15353_v42, %v11934_v11  ;;  %v1533_v20 = vpop.f32.mrb[81].mxu0  ;;  %12092 = vmatmul.mubr.msk.f32.gmra.mrb[186].mxu0 %vm294_vm1, %v214_v5  ;;  %13254 = vmatprep.subr.bf16.mxu0 %v13253_v17 }
 0x181   :  { %v15418_v25 = vadd.f32 %v2777_v1, %v15095_v23  ;;  %v2770_v13 = vsel %vm2668_vm4, %v2490_v45, 0.0  ;;  %v1534_v4 = vadd.f32 %v15353_v42, %v1533_v20  ;;  %12094 = vmatprep.mubr.msk.f32.mxu0 %vm294_vm1, %v215_v2  ;;  %13256 = vmatpush3.bf16.msra.mxu0 %v13253_v17  ;;  %v10242_v23 = vld [vmem:[%s18038_s3 + $0x68] sm:$0xff] }
 0x182   :  { %v15433_v18 = vadd.f32 %v2770_v13, %v15101_v7  ;;  %v2493_v38 = vmax.f32 %v1539_v36, 0.0  ;;  %v13257_v26 = vpack.c.bf16 %v10242_v23, %v10241_v60  ;;  %v220_v20 = vld [vmem:[%s18035_s0 + $0x608] sm:$0xff] }
 0x183   :  { %v2492_v41 = vmax.f32 %v1534_v4, 0.0  ;;  %v11937_v46 = vpop.f32.mrb[82].mxu0 }
 0x184   :  { %v2791_v50 = vsel %vm2668_vm4, %v2493_v38, 0.0  ;;  %v1549_v32 = vadd.f32 %v15353_v42, %v11937_v46  ;;  %v1543_v33 = vpop.f32.mrb[83].mxu0  ;;  %12095 = vmatmul.mubr.msk.f32.gmra.mrb[188].mxu0 %vm294_vm1, %v216_v55  ;;  %13258 = vmatprep.subr.bf16.mxu0 %v13257_v26  ;;  %v222_v46 = vld [vmem:[%s18035_s0 + $0x618] sm:$0xff] }
 0x185   :  { %v15442_v54 = vadd.f32 %v2791_v50, %v15117_v28  ;;  %v2784_v7 = vsel %vm2668_vm4, %v2492_v41, 0.0  ;;  %v1544_v58 = vadd.f32 %v15353_v42, %v1543_v33  ;;  %12097 = vmatprep.mubr.msk.f32.mxu0 %vm294_vm1, %v217_v39  ;;  %13260 = vmatpush3.bf16.msra.mxu0 %v13257_v26  ;;  %v10244_v28 = vld [vmem:[%s18038_s3 + $0x78] sm:$0xff]  ;;  %v223_v33 = vld [vmem:[%s18035_s0 + $0x620] sm:$0xff] }
 0x186   :  { %v15457_v51 = vadd.f32 %v2784_v7, %v15123_v3  ;;  %v2495_v5 = vmax.f32 %v1549_v32, 0.0  ;;  %v13261_v22 = vpack.c.bf16 %v10244_v28, %v10243_v63 }
 0x187   :  { %v2494_v44 = vmax.f32 %v1544_v58, 0.0  ;;  %v11940_v2 = vpop.f32.mrb[84].mxu0 }
 0x188   :  { %v2805_v17 = vsel %vm2668_vm4, %v2495_v5, 0.0  ;;  %v1559_v45 = vadd.f32 %v15353_v42, %v11940_v2  ;;  %v1553_v11 = vpop.f32.mrb[85].mxu0  ;;  %12098 = vmatmul.mubr.msk.f32.gmra.mrb[190].mxu0 %vm294_vm1, %v218_v62  ;;  %13262 = vmatprep.subr.bf16.mxu0 %v13261_v22  ;;  %v225_v2 = vld [vmem:[%s18035_s0 + $0x630] sm:$0xff] }
 0x189   :  { %v15466_v1 = vadd.f32 %v2805_v17, %v15138_v47  ;;  %v2798_v3 = vsel %vm2668_vm4, %v2494_v44, 0.0  ;;  %v1554_v36 = vadd.f32 %v15353_v42, %v1553_v11  ;;  %12100 = vmatprep.mubr.msk.f32.mxu0 %vm294_vm1, %v219_v56  ;;  %13264 = vmatpush3.bf16.msra.mxu0 %v13261_v22  ;;  %v221_v47 = vld [vmem:[%s18035_s0 + $0x610] sm:$0xff]  ;;  %v224_v56 = vld [vmem:[%s18035_s0 + $0x628] sm:$0xff] }
 0x18a   :  { %v15475_v13 = vadd.f32 %v2798_v3, %v15145_v15  ;;  %v2497_v4 = vmax.f32 %v1559_v45, 0.0 }
 0x18b   :  { %v2496_v55 = vmax.f32 %v1554_v36, 0.0  ;;  %v11943_v60 = vpop.f32.mrb[86].mxu0 }
 0x18c   :  { %v2819_v23 = vsel %vm2668_vm4, %v2497_v4, 0.0  ;;  %v1569_v38 = vadd.f32 %v15353_v42, %v11943_v60  ;;  %v1563_v39 = vpop.f32.mrb[87].mxu0  ;;  %12101 = vmatmul.mubr.msk.f32.gmra.mrb[192].mxu0 %vm294_vm1, %v220_v20  ;;  %v226_v4 = vld [vmem:[%s18035_s0 + $0x638] sm:$0xff]  ;;  %v227_v60 = vld [vmem:[%s18035_s0 + $0x640] sm:$0xff] }
 0x18d   :  { %v15484_v26 = vadd.f32 %v2819_v23, %v15161_v35  ;;  %v2812_v15 = vsel %vm2668_vm4, %v2496_v55, 0.0  ;;  %v1564_v41 = vadd.f32 %v15353_v42, %v1563_v39  ;;  %12103 = vmatprep.mubr.msk.f32.mxu0 %vm294_vm1, %v221_v47 }
 0x18e   :  { %v15493_v50 = vadd.f32 %v2812_v15, %v15167_v19  ;;  %v2499_v32 = vmax.f32 %v1569_v38, 0.0 }
 0x18f   :  { %v2498_v35 = vmax.f32 %v1564_v41, 0.0  ;;  %v11946_v7 = vpop.f32.mrb[88].mxu0 }
 0x190   :  { %v2833_v58 = vsel %vm2668_vm4, %v2499_v32, 0.0  ;;  %v1579_v62 = vadd.f32 %v15353_v42, %v11946_v7  ;;  %v1573_v63 = vpop.f32.mrb[89].mxu0  ;;  %12104 = vmatmul.mubr.msk.f32.gmra.mrb[194].mxu0 %vm294_vm1, %v222_v46  ;;  %v228_v32 = vld [vmem:[%s18035_s0 + $0x648] sm:$0xff]  ;;  %v229_v7 = vld [vmem:[%s18035_s0 + $0x650] sm:$0xff] }
 0x191   :  { %v15502_v28 = vadd.f32 %v2833_v58, %v15183_v40  ;;  %v2826_v19 = vsel %vm2668_vm4, %v2498_v35, 0.0  ;;  %v1574_v5 = vadd.f32 %v15353_v42, %v1573_v63  ;;  %12106 = vmatprep.mubr.msk.f32.mxu0 %vm294_vm1, %v223_v33 }
 0x192   :  { %v15511_v22 = vadd.f32 %v2826_v19, %v15189_v49  ;;  %v2501_v44 = vmax.f32 %v1579_v62, 0.0 }
 0x193   :  { %v2500_v40 = vmax.f32 %v1574_v5, 0.0  ;;  %v11949_v17 = vpop.f32.mrb[90].mxu0 }
 0x194   :  { %v2847_v45 = vsel %vm2668_vm4, %v2501_v44, 0.0  ;;  %v1589_v11 = vadd.f32 %v15353_v42, %v11949_v17  ;;  %v1583_v3 = vpop.f32.mrb[91].mxu0  ;;  %12107 = vmatmul.mubr.msk.f32.gmra.mrb[196].mxu0 %vm294_vm1, %v224_v56  ;;  %v230_v44 = vld [vmem:[%s18035_s0 + $0x658] sm:$0xff]  ;;  %v231_v17 = vld [vmem:[%s18035_s0 + $0x660] sm:$0xff] }
 0x195   :  { %v15520_v36 = vadd.f32 %v2847_v45, %v15204_v6  ;;  %v2840_v49 = vsel %vm2668_vm4, %v2500_v40, 0.0  ;;  %v1584_v20 = vadd.f32 %v15353_v42, %v1583_v3  ;;  %12109 = vmatprep.mubr.msk.f32.mxu0 %vm294_vm1, %v225_v2 }
 0x196   :  { %v15529_v47 = vadd.f32 %v2840_v49, %v15211_v27  ;;  %v2503_v55 = vmax.f32 %v1589_v11, 0.0 }
 0x197   :  { %v2502_v6 = vmax.f32 %v1584_v20, 0.0  ;;  %v11952_v23 = vpop.f32.mrb[92].mxu0 }
 0x198   :  { %v2861_v38 = vsel %vm2668_vm4, %v2503_v55, 0.0  ;;  %v1599_v39 = vadd.f32 %v15353_v42, %v11952_v23  ;;  %v1593_v15 = vpop.f32.mrb[93].mxu0  ;;  %12110 = vmatmul.mubr.msk.f32.gmra.mrb[198].mxu0 %vm294_vm1, %v226_v4  ;;  %v232_v55 = vld [vmem:[%s18035_s0 + $0x668] sm:$0xff]  ;;  %v233_v23 = vld [vmem:[%s18035_s0 + $0x670] sm:$0xff] }
 0x199   :  { %v15538_v41 = vadd.f32 %v2861_v38, %v15227_v48  ;;  %v2854_v27 = vsel %vm2668_vm4, %v2502_v6, 0.0  ;;  %v1594_v46 = vadd.f32 %v15353_v42, %v1593_v15  ;;  %12112 = vmatprep.mubr.msk.f32.mxu0 %vm294_vm1, %v227_v60 }
 0x19a   :  { %v15547_v33 = vadd.f32 %v2854_v27, %v15233_v31  ;;  %v2505_v35 = vmax.f32 %v1599_v39, 0.0 }
 0x19b   :  { %v2504_v48 = vmax.f32 %v1594_v46, 0.0  ;;  %v11955_v58 = vpop.f32.mrb[94].mxu0 }
 0x19c   :  { %v2875_v62 = vsel %vm2668_vm4, %v2505_v35, 0.0  ;;  %v1609_v63 = vadd.f32 %v15353_v42, %v11955_v58  ;;  %v1603_v19 = vpop.f32.mrb[95].mxu0  ;;  %12113 = vmatmul.mubr.msk.f32.gmra.mrb[200].mxu0 %vm294_vm1, %v228_v32  ;;  %v234_v35 = vld [vmem:[%s18035_s0 + $0x678] sm:$0xff]  ;;  %v235_v58 = vld [vmem:[%s18035_s0 + $0x680] sm:$0xff] }
 0x19d   :  { %v15556_v5 = vadd.f32 %v2875_v62, %v15245_v0  ;;  %v2868_v31 = vsel %vm2668_vm4, %v2504_v48, 0.0  ;;  %v1604_v56 = vadd.f32 %v15353_v42, %v1603_v19  ;;  %12115 = vmatprep.mubr.msk.f32.mxu0 %vm294_vm1, %v229_v7 }
 0x19e   :  { %v15565_v2 = vadd.f32 %v2868_v31, %v15251_v9  ;;  %v2507_v40 = vmax.f32 %v1609_v63, 0.0 }
 0x19f   :  { %v2506_v0 = vmax.f32 %v1604_v56, 0.0  ;;  %v11958_v45 = vpop.f32.mrb[96].mxu0 }
 0x1a0   :  { %v2889_v11 = vsel %vm2668_vm4, %v2507_v40, 0.0  ;;  %v1619_v3 = vadd.f32 %v15353_v42, %v11958_v45  ;;  %v1613_v49 = vpop.f32.mrb[97].mxu0  ;;  %12116 = vmatmul.mubr.msk.f32.gmra.mrb[202].mxu0 %vm294_vm1, %v230_v44 }
 0x1a1   :  { %v15574_v20 = vadd.f32 %v2889_v11, %v15262_v29  ;;  %v2882_v9 = vsel %vm2668_vm4, %v2506_v0, 0.0  ;;  %v1614_v4 = vadd.f32 %v15353_v42, %v1613_v49  ;;  %12118 = vmatprep.mubr.msk.f32.mxu0 %vm294_vm1, %v231_v17  ;;  %v236_v0 = vld [vmem:[%s18035_s0 + $0x688] sm:$0xff] }
 0x1a2   :  { %v15583_v60 = vadd.f32 %v2882_v9, %v15269_v37  ;;  %v2509_v6 = vmax.f32 %v1619_v3, 0.0  ;;  %v237_v3 = vld [vmem:[%s18035_s0 + $0x690] sm:$0xff] }
 0x1a3   :  { %v2508_v29 = vmax.f32 %v1614_v4, 0.0  ;;  %v11961_v38 = vpop.f32.mrb[98].mxu0 }
 0x1a4   :  { %v2681_v39 = vsel %vm2668_vm4, %v2509_v6, 0.0  ;;  %v1629_v15 = vadd.f32 %v15353_v42, %v11961_v38  ;;  %v1623_v27 = vpop.f32.mrb[99].mxu0  ;;  %12119 = vmatmul.mubr.msk.f32.gmra.mrb[204].mxu0 %vm294_vm1, %v232_v55 }
 0x1a5   :  { %v2682_v46 = vadd.f32 %v2681_v39, %v15281_v57  ;;  %v2674_v32 = vsel %vm2668_vm4, %v2508_v29, 0.0  ;;  %v1624_v37 = vadd.f32 %v15353_v42, %v1623_v27  ;;  %12121 = vmatprep.mubr.msk.f32.mxu0 %vm294_vm1, %v233_v23  ;;  %v238_v39 = vld [vmem:[%s18035_s0 + $0x698] sm:$0xff] }
 0x1a6   :  { %v2675_v7 = vadd.f32 %v2674_v32, %v15287_v8  ;;  %v2511_v48 = vmax.f32 %v1629_v15, 0.0 }
 0x1a7   :  { %v3118_v62 = vmul.f32 0.25, %v2682_v46  ;;  %v2510_v63 = vmax.f32 %v1624_v37, 0.0  ;;  %v11964_v57 = vpop.f32.mrb[100].mxu0  ;;  %v239_v46 = vld [vmem:[%s18035_s0 + $0x6a0] sm:$0xff] }
 0x1a8   :  { %v3117_v19 = vmul.f32 0.25, %v2675_v7  ;;  %v2695_v31 = vsel %vm2668_vm4, %v2511_v48, 0.0  ;;  %v1639_v56 = vadd.f32 %v15353_v42, %v11964_v57  ;;  %v1633_v44 = vpop.f32.mrb[101].mxu0  ;;  %12122 = vmatmul.mubr.msk.f32.gmra.mrb[206].mxu0 %vm294_vm1, %v234_v35  ;;  %v240_v57 = vld [vmem:[%s18035_s0 + $0x6a8] sm:$0xff] }
 0x1a9   :  { %3292 = vst.msk [vmem:[#allocation2 + $0x21] sm:$0xff] %vm2668_vm4, %v3118_v62  ;;  %v2696_v8 = vadd.f32 %v2695_v31, %v15293_v30  ;;  %v2688_v40 = vsel %vm2668_vm4, %v2510_v63, 0.0  ;;  %v1634_v17 = vadd.f32 %v15353_v42, %v1633_v44  ;;  %12124 = vmatprep.mubr.msk.f32.mxu0 %vm294_vm1, %v235_v58 }
 0x1aa   :  { %3291 = vst.msk [vmem:[#allocation2 + $0x19] sm:$0xff] %vm2668_vm4, %v3117_v19  ;;  %v2689_v45 = vadd.f32 %v2688_v40, %v15302_v14  ;;  %v2513_v11 = vmax.f32 %v1639_v56, 0.0  ;;  %v241_v56 = vld [vmem:[%s18035_s0 + $0x6b0] sm:$0xff] }
 0x1ab   :  { %v3120_v30 = vmul.f32 0.25, %v2696_v8  ;;  %v2512_v49 = vmax.f32 %v1634_v17, 0.0  ;;  %v11967_v9 = vpop.f32.mrb[102].mxu0 }
 0x1ac   :  { %v3119_v4 = vmul.f32 0.25, %v2689_v45  ;;  %v2709_v55 = vsel %vm2668_vm4, %v2513_v11, 0.0  ;;  %v1649_v6 = vadd.f32 %v15353_v42, %v11967_v9  ;;  %v1643_v23 = vpop.f32.mrb[103].mxu0  ;;  %12125 = vmatmul.mubr.msk.f32.gmra.mrb[208].mxu0 %vm294_vm1, %v236_v0 }
 0x1ad   :  { %3294 = vst.msk [vmem:[#allocation2 + $0x39] sm:$0xff] %vm2668_vm4, %v3120_v30  ;;  %v2710_v14 = vadd.f32 %v2709_v55, %v15311_v59  ;;  %v2702_v29 = vsel %vm2668_vm4, %v2512_v49, 0.0  ;;  %v1644_v38 = vadd.f32 %v15353_v42, %v1643_v23  ;;  %12127 = vmatprep.mubr.msk.f32.mxu0 %vm294_vm1, %v237_v3  ;;  %v242_v30 = vld [vmem:[%s18035_s0 + $0x6b8] sm:$0xff] }
 0x1ae   :  { %3293 = vst.msk [vmem:[#allocation2 + $0x31] sm:$0xff] %vm2668_vm4, %v3119_v4  ;;  %v2703_v15 = vadd.f32 %v2702_v29, %v15320_v34  ;;  %v2515_v27 = vmax.f32 %v1649_v6, 0.0  ;;  %v243_v4 = vld [vmem:[%s18035_s0 + $0x6c0] sm:$0xff] }
 0x1af   :  { %v3122_v59 = vmul.f32 0.25, %v2710_v14  ;;  %v2514_v32 = vmax.f32 %v1644_v38, 0.0  ;;  %v11970_v37 = vpop.f32.mrb[104].mxu0 }
 0x1b0   :  { %v3121_v35 = vmul.f32 0.25, %v2703_v15  ;;  %v2723_v7 = vsel %vm2668_vm4, %v2515_v27, 0.0  ;;  %v1659_v48 = vadd.f32 %v15353_v42, %v11970_v37  ;;  %v1653_v58 = vpop.f32.mrb[105].mxu0  ;;  %12128 = vmatmul.mubr.msk.f32.gmra.mrb[210].mxu0 %vm294_vm1, %v238_v39  ;;  %v244_v27 = vld [vmem:[%s18035_s0 + $0x6c8] sm:$0xff] }
 0x1b1   :  { %3296 = vst.msk [vmem:[#allocation2 + $0x51] sm:$0xff] %vm2668_vm4, %v3122_v59  ;;  %v2724_v34 = vadd.f32 %v2723_v7, %v15329_v53  ;;  %v2716_v62 = vsel %vm2668_vm4, %v2514_v32, 0.0  ;;  %v1654_v63 = vadd.f32 %v15353_v42, %v1653_v58  ;;  %12130 = vmatprep.mubr.msk.f32.mxu0 %vm294_vm1, %v239_v46  ;;  %v245_v32 = vld [vmem:[%s18035_s0 + $0x6d0] sm:$0xff] }
 0x1b2   :  { %3295 = vst.msk [vmem:[#allocation2 + $0x49] sm:$0xff] %vm2668_vm4, %v3121_v35  ;;  %v2717_v19 = vadd.f32 %v2716_v62, %v15338_v24  ;;  %v2517_v31 = vmax.f32 %v1659_v48, 0.0 }
 0x1b3   :  { %v3124_v53 = vmul.f32 0.25, %v2724_v34  ;;  %v2516_v44 = vmax.f32 %v1654_v63, 0.0  ;;  %v11973_v8 = vpop.f32.mrb[106].mxu0 }
 0x1b4   :  { %v3123_v40 = vmul.f32 0.25, %v2717_v19  ;;  %v2737_v17 = vsel %vm2668_vm4, %v2517_v31, 0.0  ;;  %v1669_v0 = vadd.f32 %v15353_v42, %v11973_v8  ;;  %v1663_v45 = vpop.f32.mrb[107].mxu0  ;;  %12131 = vmatmul.mubr.msk.f32.gmra.mrb[212].mxu0 %vm294_vm1, %v240_v57  ;;  %v246_v57 = vld [vmem:[%s18035_s0 + $0x6d8] sm:$0xff] }
 0x1b5   :  { %3298 = vst.msk [vmem:[#allocation2 + $0x69] sm:$0xff] %vm2668_vm4, %v3124_v53  ;;  %v2738_v24 = vadd.f32 %v2737_v17, %v15347_v10  ;;  %v2730_v11 = vsel %vm2668_vm4, %v2516_v44, 0.0  ;;  %v1664_v3 = vadd.f32 %v15353_v42, %v1663_v45  ;;  %12133 = vmatprep.mubr.msk.f32.mxu0 %vm294_vm1, %v241_v56  ;;  %v247_v56 = vld [vmem:[%s18035_s0 + $0x6e0] sm:$0xff] }
 0x1b6   :  { %3297 = vst.msk [vmem:[#allocation2 + $0x61] sm:$0xff] %vm2668_vm4, %v3123_v40  ;;  %v2731_v49 = vadd.f32 %v2730_v11, %v15361_v21  ;;  %v2519_v9 = vmax.f32 %v1669_v0, 0.0  ;;  %v248_v11 = vld [vmem:[%s18035_s0 + $0x6e8] sm:$0xff] }
 0x1b7   :  { %v3126_v10 = vmul.f32 0.25, %v2738_v24  ;;  %v2518_v55 = vmax.f32 %v1664_v3, 0.0  ;;  %v11976_v6 = vpop.f32.mrb[108].mxu0 }
 0x1b8   :  { %v3125_v23 = vmul.f32 0.25, %v2731_v49  ;;  %v2751_v14 = vsel %vm2668_vm4, %v2519_v9, 0.0  ;;  %v1679_v29 = vadd.f32 %v15353_v42, %v11976_v6  ;;  %v1673_v38 = vpop.f32.mrb[109].mxu0  ;;  %12134 = vmatmul.mubr.msk.f32.gmra.mrb[214].mxu0 %vm294_vm1, %v242_v30  ;;  %v249_v49 = vld [vmem:[%s18035_s0 + $0x6f0] sm:$0xff] }
 0x1b9   :  { %3300 = vst.msk [vmem:[#allocation2 + $0x81] sm:$0xff] %vm2668_vm4, %v3126_v10  ;;  %v2752_v21 = vadd.f32 %v2751_v14, %v15370_v12  ;;  %v2744_v39 = vsel %vm2668_vm4, %v2518_v55, 0.0  ;;  %v1674_v15 = vadd.f32 %v15353_v42, %v1673_v38  ;;  %12136 = vmatprep.mubr.msk.f32.mxu0 %vm294_vm1, %v243_v4  ;;  %v250_v38 = vld [vmem:[%s18035_s0 + $0x6f8] sm:$0xff] }
 0x1ba   :  { %3299 = vst.msk [vmem:[#allocation2 + $0x79] sm:$0xff] %vm2668_vm4, %v3125_v23  ;;  %v2745_v46 = vadd.f32 %v2744_v39, %v15385_v16  ;;  %v2521_v59 = vmax.f32 %v1679_v29, 0.0 }
 0x1bb   :  { %v3128_v12 = vmul.f32 0.25, %v2752_v21  ;;  %v2520_v37 = vmax.f32 %v1674_v15, 0.0  ;;  %v11979_v35 = vpop.f32.mrb[110].mxu0  ;;  %v251_v15 = vld [vmem:[%s18035_s0 + $0x700] sm:$0xff] }
 0x1bc   :  { %v3127_v7 = vmul.f32 0.25, %v2745_v46  ;;  %v2765_v48 = vsel %vm2668_vm4, %v2521_v59, 0.0  ;;  %v1689_v58 = vadd.f32 %v15353_v42, %v11979_v35  ;;  %v1683_v34 = vpop.f32.mrb[111].mxu0  ;;  %12137 = vmatmul.mubr.msk.f32.gmra.mrb[216].mxu0 %vm294_vm1, %v244_v27 }
 0x1bd   :  { %3302 = vst.msk [vmem:[#allocation2 + $0x99] sm:$0xff] %vm2668_vm4, %v3128_v12  ;;  %v2766_v16 = vadd.f32 %v2765_v48, %v15394_v52  ;;  %v2758_v62 = vsel %vm2668_vm4, %v2520_v37, 0.0  ;;  %v1684_v63 = vadd.f32 %v15353_v42, %v1683_v34  ;;  %12139 = vmatprep.mubr.msk.f32.mxu0 %vm294_vm1, %v245_v32  ;;  %v252_v48 = vld [vmem:[%s18035_s0 + $0x708] sm:$0xff] }
 0x1be   :  { %3301 = vst.msk [vmem:[#allocation2 + $0x91] sm:$0xff] %vm2668_vm4, %v3127_v7  ;;  %v2759_v19 = vadd.f32 %v2758_v62, %v15409_v43  ;;  %v2523_v31 = vmax.f32 %v1689_v58, 0.0 }
 0x1bf   :  { %v3130_v52 = vmul.f32 0.25, %v2766_v16  ;;  %v2522_v53 = vmax.f32 %v1684_v63, 0.0  ;;  %v11982_v44 = vpop.f32.mrb[112].mxu0  ;;  %v253_v16 = vld [vmem:[%s18035_s0 + $0x710] sm:$0xff] }
 0x1c0   :  { %v3129_v8 = vmul.f32 0.25, %v2759_v19  ;;  %v2779_v40 = vsel %vm2668_vm4, %v2523_v31, 0.0  ;;  %v1699_v17 = vadd.f32 %v15353_v42, %v11982_v44  ;;  %v1693_v0 = vpop.f32.mrb[113].mxu0  ;;  %12140 = vmatmul.mubr.msk.f32.gmra.mrb[218].mxu0 %vm294_vm1, %v246_v57  ;;  %v254_v44 = vld [vmem:[%s18035_s0 + $0x718] sm:$0xff] }
 0x1c1   :  { %3304 = vst.msk [vmem:[#allocation2 + $0xb1] sm:$0xff] %vm2668_vm4, %v3130_v52  ;;  %v2780_v43 = vadd.f32 %v2779_v40, %v15418_v25  ;;  %v2772_v45 = vsel %vm2668_vm4, %v2522_v53, 0.0  ;;  %v1694_v24 = vadd.f32 %v15353_v42, %v1693_v0  ;;  %12142 = vmatprep.mubr.msk.f32.mxu0 %vm294_vm1, %v247_v56 }
 0x1c2   :  { %3303 = vst.msk [vmem:[#allocation2 + $0xa9] sm:$0xff] %vm2668_vm4, %v3129_v8  ;;  %v2773_v3 = vadd.f32 %v2772_v45, %v15433_v18  ;;  %v2525_v30 = vmax.f32 %v1699_v17, 0.0  ;;  %v255_v17 = vld [vmem:[%s18035_s0 + $0x720] sm:$0xff] }
 0x1c3   :  { %v3132_v25 = vmul.f32 0.25, %v2780_v43  ;;  %v2524_v9 = vmax.f32 %v1694_v24, 0.0  ;;  %v11985_v4 = vpop.f32.mrb[114].mxu0 }
 0x1c4   :  { %v3131_v10 = vmul.f32 0.25, %v2773_v3  ;;  %v2793_v55 = vsel %vm2668_vm4, %v2525_v30, 0.0  ;;  %v1709_v6 = vadd.f32 %v15353_v42, %v11985_v4  ;;  %v1703_v23 = vpop.f32.mrb[115].mxu0  ;;  %12143 = vmatmul.mubr.msk.f32.gmra.mrb[220].mxu0 %vm294_vm1, %v248_v11 }
 0x1c5   :  { %3306 = vst.msk [vmem:[#allocation2 + $0xc9] sm:$0xff] %vm2668_vm4, %v3132_v25  ;;  %v2794_v18 = vadd.f32 %v2793_v55, %v15442_v54  ;;  %v2786_v14 = vsel %vm2668_vm4, %v2524_v9, 0.0  ;;  %v1704_v29 = vadd.f32 %v15353_v42, %v1703_v23  ;;  %12145 = vmatprep.mubr.msk.f32.mxu0 %vm294_vm1, %v249_v49  ;;  %v256_v25 = vld [vmem:[%s18035_s0 + $0x728] sm:$0xff] }
 0x1c6   :  { %3305 = vst.msk [vmem:[#allocation2 + $0xc1] sm:$0xff] %vm2668_vm4, %v3131_v10  ;;  %v2787_v21 = vadd.f32 %v2786_v14, %v15457_v51  ;;  %v2527_v39 = vmax.f32 %v1709_v6, 0.0  ;;  %v257_v10 = vld [vmem:[%s18035_s0 + $0x730] sm:$0xff] }
 0x1c7   :  { %v3134_v54 = vmul.f32 0.25, %v2794_v18  ;;  %v2526_v27 = vmax.f32 %v1704_v29, 0.0  ;;  %v11988_v46 = vpop.f32.mrb[116].mxu0 }
 0x1c8   :  { %v3133_v59 = vmul.f32 0.25, %v2787_v21  ;;  %v2807_v32 = vsel %vm2668_vm4, %v2527_v39, 0.0  ;;  %v1719_v12 = vadd.f32 %v15353_v42, %v11988_v46  ;;  %v1713_v37 = vpop.f32.mrb[117].mxu0  ;;  %12146 = vmatmul.mubr.msk.f32.gmra.mrb[222].mxu0 %vm294_vm1, %v250_v38  ;;  %v258_v39 = vld [vmem:[%s18035_s0 + $0x738] sm:$0xff] }
 0x1c9   :  { %3308 = vst.msk [vmem:[#allocation2 + $0xe1] sm:$0xff] %vm2668_vm4, %v3134_v54  ;;  %v2808_v51 = vadd.f32 %v2807_v32, %v15466_v1  ;;  %v2800_v35 = vsel %vm2668_vm4, %v2526_v27, 0.0  ;;  %v1714_v7 = vadd.f32 %v15353_v42, %v1713_v37  ;;  %12148 = vmatprep.mubr.msk.f32.mxu0 %vm294_vm1, %v251_v15  ;;  %v259_v27 = vld [vmem:[%s18035_s0 + $0x740] sm:$0xff] }
 0x1ca   :  { %3307 = vst.msk [vmem:[#allocation2 + $0xd9] sm:$0xff] %vm2668_vm4, %v3133_v59  ;;  %v2801_v58 = vadd.f32 %v2800_v35, %v15475_v13  ;;  %v2529_v34 = vmax.f32 %v1719_v12, 0.0 }
 0x1cb   :  { %v3136_v1 = vmul.f32 0.25, %v2808_v51  ;;  %v2528_v62 = vmax.f32 %v1714_v7, 0.0  ;;  %v11991_v63 = vpop.f32.mrb[118].mxu0 }
 0x1cc   :  { %v3135_v57 = vmul.f32 0.25, %v2801_v58  ;;  %v2821_v19 = vsel %vm2668_vm4, %v2529_v34, 0.0  ;;  %v1729_v31 = vadd.f32 %v15353_v42, %v11991_v63  ;;  %v1723_v56 = vpop.f32.mrb[119].mxu0  ;;  %12149 = vmatmul.mubr.msk.f32.gmra.mrb[224].mxu0 %vm294_vm1, %v252_v48  ;;  %v260_v48 = vld [vmem:[%s18035_s0 + $0x748] sm:$0xff] }
 0x1cd   :  { %3310 = vst.msk [vmem:[#allocation2 + $0xf9] sm:$0xff] %vm2668_vm4, %v3136_v1  ;;  %v2822_v13 = vadd.f32 %v2821_v19, %v15484_v26  ;;  %v2814_v52 = vsel %vm2668_vm4, %v2528_v62, 0.0  ;;  %v1724_v53 = vadd.f32 %v15353_v42, %v1723_v56  ;;  %12151 = vmatprep.mubr.msk.f32.mxu0 %vm294_vm1, %v253_v16  ;;  %v261_v16 = vld [vmem:[%s18035_s0 + $0x750] sm:$0xff] }
 0x1ce   :  { %3309 = vst.msk [vmem:[#allocation2 + $0xf1] sm:$0xff] %vm2668_vm4, %v3135_v57  ;;  %v2815_v8 = vadd.f32 %v2814_v52, %v15493_v50  ;;  %v2531_v40 = vmax.f32 %v1729_v31, 0.0  ;;  %v262_v52 = vld [vmem:[%s18035_s0 + $0x758] sm:$0xff] }
 0x1cf   :  { %v3138_v26 = vmul.f32 0.25, %v2822_v13  ;;  %v2530_v0 = vmax.f32 %v1724_v53, 0.0  ;;  %v11994_v43 = vpop.f32.mrb[120].mxu0 }
 0x1d0   :  { %v3137_v45 = vmul.f32 0.25, %v2815_v8  ;;  %v2835_v24 = vsel %vm2668_vm4, %v2531_v40, 0.0  ;;  %v1739_v11 = vadd.f32 %v15353_v42, %v11994_v43  ;;  %v1733_v3 = vpop.f32.mrb[121].mxu0  ;;  %12152 = vmatmul.mubr.msk.f32.gmra.mrb[226].mxu0 %vm294_vm1, %v254_v44  ;;  %v263_v8 = vld [vmem:[%s18035_s0 + $0x760] sm:$0xff] }
 0x1d1   :  { %3312 = vst.msk [vmem:[#allocation2 + $0x111] sm:$0xff] %vm2668_vm4, %v3138_v26  ;;  %v2836_v50 = vadd.f32 %v2835_v24, %v15502_v28  ;;  %v2828_v30 = vsel %vm2668_vm4, %v2530_v0, 0.0  ;;  %v1734_v49 = vadd.f32 %v15353_v42, %v1733_v3  ;;  %12154 = vmatprep.mubr.msk.f32.mxu0 %vm294_vm1, %v255_v17 }
 0x1d2   :  { %3311 = vst.msk [vmem:[#allocation2 + $0x109] sm:$0xff] %vm2668_vm4, %v3137_v45  ;;  %v2829_v9 = vadd.f32 %v2828_v30, %v15511_v22  ;;  %v2533_v4 = vmax.f32 %v1739_v11, 0.0  ;;  %v264_v45 = vld [vmem:[%s18035_s0 + $0x768] sm:$0xff]  ;;  %v265_v11 = vld [vmem:[%s18035_s0 + $0x770] sm:$0xff] }
 0x1d3   :  { %v3140_v28 = vmul.f32 0.25, %v2836_v50  ;;  %v2532_v55 = vmax.f32 %v1734_v49, 0.0  ;;  %v11997_v6 = vpop.f32.mrb[122].mxu0  ;;  %v267_v49 = vld [vmem:[%s18035_s0 + $0x780] sm:$0xff] }
 0x1d4   :  { %v3139_v23 = vmul.f32 0.25, %v2829_v9  ;;  %v2849_v18 = vsel %vm2668_vm4, %v2533_v4, 0.0  ;;  %v1749_v14 = vadd.f32 %v15353_v42, %v11997_v6  ;;  %v1743_v29 = vpop.f32.mrb[123].mxu0  ;;  %12155 = vmatmul.mubr.msk.f32.gmra.mrb[228].mxu0 %vm294_vm1, %v256_v25  ;;  %v268_v4 = vld [vmem:[%s18035_s0 + $0x788] sm:$0xff]  ;;  %v270_v6 = vld [vmem:[%s18035_s0 + $0x798] sm:$0xff] }
 0x1d5   :  { %3314 = vst.msk [vmem:[#allocation2 + $0x129] sm:$0xff] %vm2668_vm4, %v3140_v28  ;;  %v2850_v22 = vadd.f32 %v2849_v18, %v15520_v36  ;;  %v2842_v38 = vsel %vm2668_vm4, %v2532_v55, 0.0  ;;  %v1744_v21 = vadd.f32 %v15353_v42, %v1743_v29  ;;  %12157 = vmatprep.mubr.msk.f32.mxu0 %vm294_vm1, %v257_v10  ;;  %v269_v10 = vld [vmem:[%s18035_s0 + $0x790] sm:$0xff]  ;;  %v272_v29 = vld [vmem:[%s18035_s0 + $0x7a8] sm:$0xff] }
 0x1d6   :  { %3313 = vst.msk [vmem:[#allocation2 + $0x121] sm:$0xff] %vm2668_vm4, %v3139_v23  ;;  %v2843_v15 = vadd.f32 %v2842_v38, %v15529_v47  ;;  %v2535_v54 = vmax.f32 %v1749_v14, 0.0  ;;  %v271_v23 = vld [vmem:[%s18035_s0 + $0x7a0] sm:$0xff] }
 0x1d7   :  { %v3142_v36 = vmul.f32 0.25, %v2850_v22  ;;  %v2534_v46 = vmax.f32 %v1744_v21, 0.0  ;;  %v12000_v59 = vpop.f32.mrb[124].mxu0  ;;  %v273_v22 = vld [vmem:[%s18035_s0 + $0x7b0] sm:$0xff] }
 0x1d8   :  { %v3141_v32 = vmul.f32 0.25, %v2843_v15  ;;  %v2863_v12 = vsel %vm2668_vm4, %v2535_v54, 0.0  ;;  %v1759_v37 = vadd.f32 %v15353_v42, %v12000_v59  ;;  %v1753_v51 = vpop.f32.mrb[125].mxu0  ;;  %12158 = vmatmul.mubr.msk.f32.gmra.mrb[230].mxu0 %vm294_vm1, %v258_v39  ;;  %v274_v39 = vld [vmem:[%s18035_s0 + $0x7b8] sm:$0xff]  ;;  %v275_v15 = vld [vmem:[%s18035_s0 + $0x7c0] sm:$0xff] }
 0x1d9   :  { %3316 = vst.msk [vmem:[#allocation2 + $0x141] sm:$0xff] %vm2668_vm4, %v3142_v36  ;;  %v2864_v47 = vadd.f32 %v2863_v12, %v15538_v41  ;;  %v2856_v35 = vsel %vm2668_vm4, %v2534_v46, 0.0  ;;  %v1754_v7 = vadd.f32 %v15353_v42, %v1753_v51  ;;  %12160 = vmatprep.mubr.msk.f32.mxu0 %vm294_vm1, %v259_v27  ;;  %v276_v36 = vld [vmem:[%s18035_s0 + $0x7c8] sm:$0xff]  ;;  %v277_v46 = vld [vmem:[%s18035_s0 + $0x7d0] sm:$0xff]  ;;  %v278_v12 = vld [vmem:[%s18035_s0 + $0x7d8] sm:$0xff] }
 0x1da   :  { %3315 = vst.msk [vmem:[#allocation2 + $0x139] sm:$0xff] %vm2668_vm4, %v3141_v32  ;;  %v2857_v58 = vadd.f32 %v2856_v35, %v15547_v33  ;;  %v2537_v34 = vmax.f32 %v1759_v37, 0.0  ;;  %v279_v37 = vld [vmem:[%s18035_s0 + $0x7e0] sm:$0xff]  ;;  %v280_v35 = vld [vmem:[%s18035_s0 + $0x7e8] sm:$0xff] }
 0x1db   :  { %v3144_v41 = vmul.f32 0.25, %v2864_v47  ;;  %v2536_v1 = vmax.f32 %v1754_v7, 0.0  ;;  %v12003_v62 = vpop.f32.mrb[126].mxu0  ;;  %v281_v7 = vld [vmem:[%s18035_s0 + $0x7f0] sm:$0xff] }
 0x1dc   :  { %v3143_v63 = vmul.f32 0.25, %v2857_v58  ;;  %v2877_v57 = vsel %vm2668_vm4, %v2537_v34, 0.0  ;;  %v1769_v19 = vadd.f32 %v15353_v42, %v12003_v62  ;;  %v1763_v31 = vpop.f32.mrb[127].mxu0  ;;  %12161 = vmatmul.mubr.msk.f32.gmra.mrb[232].mxu0 %vm294_vm1, %v260_v48  ;;  %v282_v34 = vld [vmem:[%s18035_s0 + $0x7f8] sm:$0xff]  ;;  %v3428_v62 = vld [vmem:[#allocation2 + $0x9] sm:$0xff] }
 0x1dd   :  { %3318 = vst.msk [vmem:[#allocation2 + $0x159] sm:$0xff] %vm2668_vm4, %v3144_v41  ;;  %v2878_v33 = vadd.f32 %v2877_v57, %v15556_v5  ;;  %v2870_v56 = vsel %vm2668_vm4, %v2536_v1, 0.0  ;;  %v1764_v13 = vadd.f32 %v15353_v42, %v1763_v31  ;;  %12163 = vmatprep.mubr.msk.f32.mxu0 %vm294_vm1, %v261_v16  ;;  %v3427_v16 = vld [vmem:[#allocation2 + $0x1] sm:$0xff] }
 0x1de   :  { %3317 = vst.msk [vmem:[#allocation2 + $0x151] sm:$0xff] %vm2668_vm4, %v3143_v63  ;;  %v2871_v53 = vadd.f32 %v2870_v56, %v15565_v2  ;;  %v2539_v44 = vmax.f32 %v1769_v19, 0.0  ;;  %v3429_v19 = vld [vmem:[#allocation2 + $0x19] sm:$0xff] }
 0x1df   :  { %v3146_v5 = vmul.f32 0.25, %v2878_v33  ;;  %v2538_v40 = vmax.f32 %v1764_v13, 0.0  ;;  %v15826_v17 = vpop.f32.mrb[128].mxu0  ;;  %v3430_v33 = vld [vmem:[#allocation2 + $0x21] sm:$0xff]  ;;  %v3431_v13 = vld [vmem:[#allocation2 + $0x31] sm:$0xff] }
 0x1e0   :  { %v3145_v42 = vmul.f32 0.25, %v2871_v53  ;;  %v2891_v26 = vsel %vm2668_vm4, %v2539_v44, 0.0  ;;  %v15829_v0 = vpop.f32.mrb[129].mxu0  ;;  %12164 = vmatmul.mubr.msk.f32.gmra.mrb[234].mxu0 %vm294_vm1, %v262_v52  ;;  %v3432_v53 = vld [vmem:[#allocation2 + $0x39] sm:$0xff] }
 0x1e1   :  { %3320 = vst.msk [vmem:[#allocation2 + $0x171] sm:$0xff] %vm2668_vm4, %v3146_v5  ;;  %v2892_v2 = vadd.f32 %v2891_v26, %v15574_v20  ;;  %v2884_v43 = vsel %vm2668_vm4, %v2538_v40, 0.0  ;;  %12166 = vmatprep.mubr.msk.f32.mxu0 %vm294_vm1, %v263_v8  ;;  %v3433_v8 = vld [vmem:[#allocation2 + $0x49] sm:$0xff]  ;;  %v3434_v40 = vld [vmem:[#allocation2 + $0x51] sm:$0xff]  ;;  %v3435_v26 = vld [vmem:[#allocation2 + $0x61] sm:$0xff] }
 0x1e2   :  { %3319 = vst.msk [vmem:[#allocation2 + $0x169] sm:$0xff] %vm2668_vm4, %v3145_v42  ;;  %v2885_v24 = vadd.f32 %v2884_v43, %v15583_v60  ;;  %v266_v60 = vld [vmem:[%s18035_s0 + $0x778] sm:$0xff]  ;;  %v3436_v43 = vld [vmem:[#allocation2 + $0x69] sm:$0xff] }
 0x1e3   :  { %v3148_v3 = vmul.f32 0.25, %v2892_v2  ;;  %v15844_v50 = vpop.f32.mrb[130].mxu0 }
 0x1e4   :  { %v3147_v20 = vmul.f32 0.25, %v2885_v24  ;;  %v15846_v30 = vpop.f32.mrb[131].mxu0  ;;  %12167 = vmatmul.mubr.msk.f32.gmra.mrb[236].mxu0 %vm294_vm1, %v264_v45  ;;  %v15986_v45 = vld [vmem:[%s18037_s2] ss:$0 sm:$0xff] }
 0x1e5   :  { %3322 = vst.msk [vmem:[#allocation2 + $0x189] sm:$0xff] %vm2668_vm4, %v3148_v3  ;;  %12169 = vmatprep.mubr.msk.f32.mxu0 %vm294_vm1, %v265_v11  ;;  %v1779_v24 = vadd.f32 %v15986_v45, %v15826_v17  ;;  %v1774_v11 = vadd.f32 %v15986_v45, %v15829_v0  ;;  %v1789_v17 = vadd.f32 %v15986_v45, %v15844_v50  ;;  %v10375_v50 = vld [vmem:[%s18038_s3 + $0x90] sm:$0xff] }
 0x1e6   :  { %3321 = vst.msk [vmem:[#allocation2 + $0x181] sm:$0xff] %vm2668_vm4, %v3147_v20  ;;  %v3437_v20 = vld [vmem:[#allocation2 + $0x79] sm:$0xff]  ;;  %v1784_v0 = vadd.f32 %v15986_v45, %v15846_v30 }
 0x1e7   :  { %v15858_v25 = vpop.f32.mrb[132].mxu0  ;;  %v10376_v30 = vld [vmem:[%s18038_s3 + $0x98] sm:$0xff] }
 0x1e8   :  { %v15860_v9 = vpop.f32.mrb[133].mxu0  ;;  %12170 = vmatmul.mubr.msk.f32.gmra.mrb[238].mxu0 %vm294_vm1, %v266_v60  ;;  %v10373_v60 = vld [vmem:[%s18038_s3 + $0x80] sm:$0xff] }
 0x1e9   :  { %12172 = vmatprep.mubr.msk.f32.mxu0 %vm294_vm1, %v267_v49  ;;  %v10374_v49 = vld [vmem:[%s18038_s3 + $0x88] sm:$0xff] }
 0x1eb   :  { %v15870_v28 = vpop.f32.mrb[134].mxu0 }
 0x1ec   :  { %v15872_v55 = vpop.f32.mrb[135].mxu0  ;;  %12173 = vmatmul.mubr.msk.f32.gmra.mrb[240].mxu0 %vm294_vm1, %v268_v4  ;;  %v16002_v4 = vpack.c.bf16 %v10374_v49, %v10373_v60 }
 0x1ed   :  { %12175 = vmatprep.mubr.msk.f32.mxu0 %vm294_vm1, %v269_v10 }
 0x1ee   :  { %13417 = vmatprep.subr.bf16.mxu1 %v16002_v4 }
 0x1ef   :  { %v15882_v18 = vpop.f32.mrb[136].mxu0  ;;  %13421 = vmatpush3.bf16.msra.mxu1 %v16002_v4 }
 0x1f0   :  { %v15884_v14 = vpop.f32.mrb[137].mxu0  ;;  %12176 = vmatmul.mubr.msk.f32.gmra.mrb[242].mxu0 %vm294_vm1, %v270_v6  ;;  %v3438_v6 = vld [vmem:[#allocation2 + $0x81] sm:$0xff] }
 0x1f1   :  { %12178 = vmatprep.mubr.msk.f32.mxu0 %vm294_vm1, %v271_v23  ;;  %v2541_v23 = vmax.f32 %v1779_v24, 0.0 }
 0x1f3   :  { %v15894_v38 = vpop.f32.mrb[138].mxu0 }
 0x1f4   :  { %v15896_v21 = vpop.f32.mrb[139].mxu0  ;;  %12179 = vmatmul.mubr.msk.f32.gmra.mrb[244].mxu0 %vm294_vm1, %v272_v29  ;;  %v2540_v29 = vmax.f32 %v1774_v11, 0.0 }
 0x1f5   :  { %12181 = vmatprep.mubr.msk.f32.mxu0 %vm294_vm1, %v273_v22 }
 0x1f7   :  { %v15906_v54 = vpop.f32.mrb[140].mxu0 }
 0x1f8   :  { %v15908_v27 = vpop.f32.mrb[141].mxu0  ;;  %12182 = vmatmul.mubr.msk.f32.gmra.mrb[246].mxu0 %vm294_vm1, %v274_v39 }
 0x1f9   :  { %12184 = vmatprep.mubr.msk.f32.mxu0 %vm294_vm1, %v275_v15  ;;  %v3439_v15 = vld [vmem:[#allocation2 + $0x91] sm:$0xff] }
 0x1fb   :  { %v15918_v59 = vpop.f32.mrb[142].mxu0 }
 0x1fc   :  { %v15920_v32 = vpop.f32.mrb[143].mxu0  ;;  %12185 = vmatmul.mubr.msk.f32.gmra.mrb[248].mxu0 %vm294_vm1, %v276_v36 }
 0x1fd   :  { %12187 = vmatprep.mubr.msk.f32.mxu0 %vm294_vm1, %v277_v46  ;;  %v16020_v46 = vpack.c.bf16 %v10376_v30, %v10375_v50 }
 0x1ff   :  { %v15930_v51 = vpop.f32.mrb[144].mxu0  ;;  %13418 = vmatprep.subr.bf16.mxu1 %v16020_v46 }
 0x200   :  { %v15932_v47 = vpop.f32.mrb[145].mxu0  ;;  %12188 = vmatmul.mubr.msk.f32.gmra.mrb[250].mxu0 %vm294_vm1, %v278_v12  ;;  %v2543_v12 = vmax.f32 %v1789_v17, 0.0  ;;  %13422 = vmatpush3.bf16.msra.mxu1 %v16020_v46 }
 0x201   :  { %12190 = vmatprep.mubr.msk.f32.mxu0 %vm294_vm1, %v279_v37 }
 0x202   :  { %v2914_v60 = vsel %vm2668_vm4, %v2543_v12, 0.0  ;;  %v3443_v12 = vld [vmem:[#allocation2 + $0xc1] sm:$0xff] }
 0x203   :  { %v15942_v48 = vpop.f32.mrb[146].mxu0 }
 0x204   :  { %v15944_v58 = vpop.f32.mrb[147].mxu0  ;;  %12191 = vmatmul.mubr.msk.f32.gmra.mrb[252].mxu0 %vm294_vm1, %v280_v35  ;;  %v2542_v35 = vmax.f32 %v1784_v0, 0.0 }
 0x205   :  { %12193 = vmatprep.mubr.msk.f32.mxu0 %vm294_vm1, %v281_v7  ;;  %v1799_v7 = vadd.f32 %v15986_v45, %v15858_v25  ;;  %v10377_v25 = vld [vmem:[%s18038_s3 + $0xa0] sm:$0xff] }
 0x206   :  { %v2907_v0 = vsel %vm2668_vm4, %v2542_v35, 0.0 }
 0x207   :  { %v15951_v41 = vpop.f32.mrb[148].mxu0 }
 0x208   :  { %v15953_v1 = vpop.f32.mrb[149].mxu0  ;;  %12194 = vmatmul.mubr.msk.f32.gmra.mrb[254].mxu0 %vm294_vm1, %v282_v34  ;;  %v1794_v34 = vadd.f32 %v15986_v45, %v15860_v9  ;;  %v10378_v9 = vld [vmem:[%s18038_s3 + $0xa8] sm:$0xff] }
 0x209   :  { %12212 = vmatprep.mubr.msk.f32.mxu0 %vm2668_vm4, %v3427_v16 }
 0x20b   :  { %v15957_v63 = vpop.f32.mrb[150].mxu0 }
 0x20c   :  { %v15959_v57 = vpop.f32.mrb[151].mxu0  ;;  %12213 = vmatmul.mubr.msk.f32.vlgmr.msra.gmra.mrb[0].mxu0 %vm2668_vm4, %v3428_v62 }
 0x20d   :  { %12215 = vmatprep.mubr.msk.f32.mxu0 %vm2668_vm4, %v3429_v19  ;;  %v3440_v19 = vld [vmem:[#allocation2 + $0x99] sm:$0xff] }
 0x20f   :  { %v15963_v31 = vpop.f32.mrb[152].mxu0 }
 0x210   :  { %v15965_v56 = vpop.f32.mrb[153].mxu0  ;;  %12216 = vmatmul.mubr.msk.f32.gmra.mrb[2].mxu0 %vm2668_vm4, %v3430_v33  ;;  %v3441_v33 = vld [vmem:[#allocation2 + $0xa9] sm:$0xff] }
 0x211   :  { %12218 = vmatprep.mubr.msk.f32.mxu0 %vm2668_vm4, %v3431_v13  ;;  %v2900_v13 = vsel %vm2668_vm4, %v2541_v23, 0.0 }
 0x213   :  { %v15969_v52 = vpop.f32.mrb[154].mxu0 }
 0x214   :  { %v15971_v44 = vpop.f32.mrb[155].mxu0  ;;  %12219 = vmatmul.mubr.msk.f32.gmra.mrb[4].mxu0 %vm2668_vm4, %v3432_v53  ;;  %v2893_v53 = vsel %vm2668_vm4, %v2540_v29, 0.0 }
 0x215   :  { %12221 = vmatprep.mubr.msk.f32.mxu0 %vm2668_vm4, %v3433_v8 }
 0x217   :  { %v15975_v5 = vpop.f32.mrb[156].mxu0 }
 0x218   :  { %v15977_v42 = vpop.f32.mrb[157].mxu0  ;;  %12222 = vmatmul.mubr.msk.f32.gmra.mrb[6].mxu0 %vm2668_vm4, %v3434_v40 }
 0x219   :  { %12224 = vmatprep.mubr.msk.f32.mxu0 %vm2668_vm4, %v3435_v26 }
 0x21b   :  { %v15981_v2 = vpop.f32.mrb[158].mxu0 }
 0x21c   :  { %v15992_v3 = vpop.f32.mrb[159].mxu0  ;;  %12225 = vmatmul.mubr.msk.f32.gmra.mrb[8].mxu0 %vm2668_vm4, %v3436_v43 }
 0x21d   :  { %12227 = vmatprep.mubr.msk.f32.mxu0 %vm2668_vm4, %v3437_v20  ;;  %v16044_v20 = vpack.c.bf16 %v10378_v9, %v10377_v25 }
 0x21f   :  { %v12054_v10 = vpop.f32.mrb[160].mxu0  ;;  %13419 = vmatprep.subr.bf16.mxu1 %v16044_v20 }
 0x220   :  { %v1939_v22 = vadd.f32 %v15986_v45, %v12054_v10  ;;  %v1933_v39 = vpop.f32.mrb[161].mxu0  ;;  %12228 = vmatmul.mubr.msk.f32.gmra.mrb[10].mxu0 %vm2668_vm4, %v3438_v6  ;;  %v2545_v10 = vmax.f32 %v1799_v7, 0.0  ;;  %v2544_v6 = vmax.f32 %v1794_v34, 0.0  ;;  %13423 = vmatpush3.bf16.msra.mxu1 %v16044_v20 }
 0x221   :  { %v1934_v36 = vadd.f32 %v15986_v45, %v1933_v39  ;;  %12230 = vmatprep.mubr.msk.f32.mxu0 %vm2668_vm4, %v3439_v15  ;;  %v1809_v39 = vadd.f32 %v15986_v45, %v15870_v28  ;;  %v1804_v15 = vadd.f32 %v15986_v45, %v15872_v55  ;;  %v10380_v28 = vld [vmem:[%s18038_s3 + $0xb8] sm:$0xff] }
 0x222   :  { %v2573_v37 = vmax.f32 %v1939_v22, 0.0  ;;  %v3442_v22 = vld [vmem:[#allocation2 + $0xb1] sm:$0xff] }
 0x223   :  { %v2572_v16 = vmax.f32 %v1934_v36, 0.0  ;;  %v12057_v62 = vpop.f32.mrb[162].mxu0  ;;  %v2546_v25 = vmax.f32 %v1804_v15, 0.0 }
 0x224   :  { %v2901_v8 = vsel %vm2668_vm4, %v2573_v37, 0.0  ;;  %v1949_v40 = vadd.f32 %v15986_v45, %v12057_v62  ;;  %v1943_v26 = vpop.f32.mrb[163].mxu0  ;;  %12231 = vmatmul.mubr.msk.f32.gmra.mrb[12].mxu0 %vm2668_vm4, %v3440_v19  ;;  %v10379_v37 = vld [vmem:[%s18038_s3 + $0xb0] sm:$0xff]  ;;  %v2928_v19 = vsel %vm2668_vm4, %v2545_v10, 0.0 }
 0x225   :  { %v16039_v43 = vadd.f32 %v2901_v8, %v2900_v13  ;;  %v2894_v24 = vsel %vm2668_vm4, %v2572_v16, 0.0  ;;  %v1944_v11 = vadd.f32 %v15986_v45, %v1943_v26  ;;  %12233 = vmatprep.mubr.msk.f32.mxu0 %vm2668_vm4, %v3441_v33  ;;  %v16070_v34 = vpack.c.bf16 %v10380_v28, %v10379_v37 }
 0x226   :  { %v16047_v49 = vadd.f32 %v2894_v24, %v2893_v53  ;;  %v2575_v17 = vmax.f32 %v1949_v40, 0.0  ;;  %v2921_v33 = vsel %vm2668_vm4, %v2544_v6, 0.0  ;;  %v1819_v13 = vadd.f32 %v15986_v45, %v15882_v18  ;;  %v3444_v40 = vld [vmem:[#allocation2 + $0xc9] sm:$0xff]  ;;  %v4686_v6 = vld [vmem:[#allocation2 + $0x1b2] sm:$0xff] }
 0x227   :  { %v2574_v23 = vmax.f32 %v1944_v11, 0.0  ;;  %v12060_v29 = vpop.f32.mrb[164].mxu0  ;;  %13420 = vmatprep.subr.bf16.mxu1 %v16070_v34  ;;  %v2547_v26 = vmax.f32 %v1809_v39, 0.0  ;;  %v1814_v18 = vadd.f32 %v15986_v45, %v15884_v14  ;;  %12484 = vmatprep.mubr.msk.f32.mxu1 %vm2668_vm4, %v4686_v6  ;;  %v4687_v39 = vld [vmem:[#allocation2 + $0x1ba] sm:$0xff]  ;;  %v1824_v14 = vadd.f32 %v15986_v45, %v15896_v21  ;;  %v3449_v6 = vld [vmem:[#allocation2 + $0x109] sm:$0xff] }
 0x228   :  { %v2915_v50 = vsel %vm2668_vm4, %v2575_v17, 0.0  ;;  %v1959_v30 = vadd.f32 %v15986_v45, %v12060_v29  ;;  %v1953_v36 = vpop.f32.mrb[165].mxu0  ;;  %12234 = vmatmul.mubr.msk.f32.gmra.mrb[14].mxu0 %vm2668_vm4, %v3442_v22  ;;  %13424 = vmatpush3.bf16.msra.mxu1 %v16070_v34  ;;  %v2549_v15 = vmax.f32 %v1819_v13, 0.0  ;;  %v2935_v37 = vsel %vm2668_vm4, %v2546_v25, 0.0 }
 0x229   :  { %v16065_v35 = vadd.f32 %v2915_v50, %v2914_v60  ;;  %v2908_v55 = vsel %vm2668_vm4, %v2574_v23, 0.0  ;;  %v1954_v7 = vadd.f32 %v15986_v45, %v1953_v36  ;;  %12236 = vmatprep.mubr.msk.f32.mxu0 %vm2668_vm4, %v3443_v12  ;;  %v3445_v60 = vld [vmem:[#allocation2 + $0xd9] sm:$0xff]  ;;  %v1829_v23 = vadd.f32 %v15986_v45, %v15894_v38  ;;  %v3446_v36 = vld [vmem:[#allocation2 + $0xe1] sm:$0xff] }
 0x22a   :  { %v16072_v16 = vadd.f32 %v2908_v55, %v2907_v0  ;;  %v2577_v62 = vmax.f32 %v1959_v30, 0.0  ;;  %v2942_v12 = vsel %vm2668_vm4, %v2547_v26, 0.0  ;;  %v2550_v26 = vmax.f32 %v1824_v14, 0.0 }
 0x22b   :  { %v2576_v53 = vmax.f32 %v1954_v7, 0.0  ;;  %v12063_v8 = vpop.f32.mrb[166].mxu0  ;;  %12485 = vmatmul.mubr.msk.f32.vlgmr.msra.gmra.mrb[0].mxu1 %vm2668_vm4, %v4687_v39  ;;  %v3447_v7 = vld [vmem:[#allocation2 + $0xf1] sm:$0xff]  ;;  %v2551_v13 = vmax.f32 %v1829_v23, 0.0 }
 0x22c   :  { %v2929_v9 = vsel %vm2668_vm4, %v2577_v62, 0.0  ;;  %v1969_v24 = vadd.f32 %v15986_v45, %v12063_v8  ;;  %v1963_v11 = vpop.f32.mrb[167].mxu0  ;;  %12237 = vmatmul.mubr.msk.f32.gmra.mrb[16].mxu0 %vm2668_vm4, %v3444_v40  ;;  %v2548_v62 = vmax.f32 %v1814_v18, 0.0  ;;  %v2956_v40 = vsel %vm2668_vm4, %v2549_v15, 0.0 }
 0x22d   :  { %v16085_v17 = vadd.f32 %v2929_v9, %v2928_v19  ;;  %v2922_v0 = vsel %vm2668_vm4, %v2576_v53, 0.0  ;;  %v1964_v10 = vadd.f32 %v15986_v45, %v1963_v11  ;;  %12239 = vmatprep.mubr.msk.f32.mxu0 %vm2668_vm4, %v3445_v60  ;;  %v1839_v11 = vadd.f32 %v15986_v45, %v15906_v54 }
 0x22e   :  { %v16092_v29 = vadd.f32 %v2922_v0, %v2921_v33  ;;  %v2579_v22 = vmax.f32 %v1969_v24, 0.0  ;;  %v3448_v24 = vld [vmem:[#allocation2 + $0xf9] sm:$0xff]  ;;  %v1834_v60 = vadd.f32 %v15986_v45, %v15908_v27  ;;  %v2949_v23 = vsel %vm2668_vm4, %v2548_v62, 0.0 }
 0x22f   :  { %v2578_v50 = vmax.f32 %v1964_v10, 0.0  ;;  %v12066_v30 = vpop.f32.mrb[168].mxu0  ;;  %v2970_v54 = vsel %vm2668_vm4, %v2551_v13, 0.0 }
 0x230   :  { %v2943_v38 = vsel %vm2668_vm4, %v2579_v22, 0.0  ;;  %v1979_v28 = vadd.f32 %v15986_v45, %v12066_v30  ;;  %v1973_v55 = vpop.f32.mrb[169].mxu0  ;;  %12240 = vmatmul.mubr.msk.f32.gmra.mrb[18].mxu0 %vm2668_vm4, %v3446_v36  ;;  %v10446_v30 = vld [vmem:[%s18038_s3 + $0xc8] sm:$0xff]  ;;  %v2963_v36 = vsel %vm2668_vm4, %v2550_v26, 0.0  ;;  %v2552_v62 = vmax.f32 %v1834_v60, 0.0 }
 0x231   :  { %v16103_v19 = vadd.f32 %v2943_v38, %v2942_v12  ;;  %v2936_v21 = vsel %vm2668_vm4, %v2578_v50, 0.0  ;;  %v1974_v33 = vadd.f32 %v15986_v45, %v1973_v55  ;;  %12242 = vmatprep.mubr.msk.f32.mxu0 %vm2668_vm4, %v3447_v7  ;;  %v10445_v50 = vld [vmem:[%s18038_s3 + $0xc0] sm:$0xff]  ;;  %v1849_v12 = vadd.f32 %v15986_v45, %v15918_v59 }
 0x232   :  { %v16108_v53 = vadd.f32 %v2936_v21, %v2935_v37  ;;  %v2581_v8 = vmax.f32 %v1979_v28, 0.0  ;;  %v3450_v28 = vld [vmem:[#allocation2 + $0x111] sm:$0xff]  ;;  %v13297_v55 = vpack.c.bf16 %v10446_v30, %v10445_v50  ;;  %v2553_v7 = vmax.f32 %v1839_v11, 0.0 }
 0x233   :  { %v2580_v25 = vmax.f32 %v1974_v33, 0.0  ;;  %v12069_v9 = vpop.f32.mrb[170].mxu0  ;;  %v2555_v11 = vmax.f32 %v1849_v12, 0.0  ;;  %v1859_v60 = vadd.f32 %v15986_v45, %v15930_v51 }
 0x234   :  { %v2957_v18 = vsel %vm2668_vm4, %v2581_v8, 0.0  ;;  %v1989_v0 = vadd.f32 %v15986_v45, %v12069_v9  ;;  %v1983_v10 = vpop.f32.mrb[171].mxu0  ;;  %12243 = vmatmul.mubr.msk.f32.gmra.mrb[20].mxu0 %vm2668_vm4, %v3448_v24  ;;  %v3451_v8 = vld [vmem:[#allocation2 + $0x121] sm:$0xff]  ;;  %13298 = vmatprep.subr.bf16.mxu1 %v13297_v55 }
 0x235   :  { %v16119_v22 = vadd.f32 %v2957_v18, %v2956_v40  ;;  %v2950_v39 = vsel %vm2668_vm4, %v2580_v25, 0.0  ;;  %v1984_v15 = vadd.f32 %v15986_v45, %v1983_v10  ;;  %12245 = vmatprep.mubr.msk.f32.mxu0 %vm2668_vm4, %v3449_v6  ;;  %v1844_v40 = vadd.f32 %v15986_v45, %v15920_v32  ;;  %13300 = vmatpush3.bf16.msra.mxu1 %v13297_v55  ;;  %v3452_v10 = vld [vmem:[#allocation2 + $0x129] sm:$0xff] }
 0x236   :  { %v16125_v27 = vadd.f32 %v2950_v39, %v2949_v23  ;;  %v2583_v14 = vmax.f32 %v1989_v0, 0.0  ;;  %v1854_v32 = vadd.f32 %v15986_v45, %v15932_v47  ;;  %v2984_v6 = vsel %vm2668_vm4, %v2553_v7, 0.0 }
 0x237   :  { %v2582_v37 = vmax.f32 %v1984_v15, 0.0  ;;  %v12072_v38 = vpop.f32.mrb[172].mxu0  ;;  %v2977_v23 = vsel %vm2668_vm4, %v2552_v62, 0.0  ;;  %v2554_v50 = vmax.f32 %v1844_v40, 0.0  ;;  %v3454_v62 = vld [vmem:[#allocation2 + $0x141] sm:$0xff] }
 0x238   :  { %v2971_v21 = vsel %vm2668_vm4, %v2583_v14, 0.0  ;;  %v1999_v33 = vadd.f32 %v15986_v45, %v12072_v38  ;;  %v1993_v13 = vpop.f32.mrb[173].mxu0  ;;  %12246 = vmatmul.mubr.msk.f32.gmra.mrb[22].mxu0 %vm2668_vm4, %v3450_v28  ;;  %v3453_v14 = vld [vmem:[#allocation2 + $0x139] sm:$0xff]  ;;  %v2557_v38 = vmax.f32 %v1859_v60, 0.0  ;;  %v2556_v28 = vmax.f32 %v1854_v32, 0.0 }
 0x239   :  { %v16141_v26 = vadd.f32 %v2971_v21, %v2970_v54  ;;  %v2964_v59 = vsel %vm2668_vm4, %v2582_v37, 0.0  ;;  %v1994_v25 = vadd.f32 %v15986_v45, %v1993_v13  ;;  %12248 = vmatprep.mubr.msk.f32.mxu0 %vm2668_vm4, %v3451_v8  ;;  %v2998_v37 = vsel %vm2668_vm4, %v2555_v11, 0.0 }
 0x23a   :  { %v16146_v9 = vadd.f32 %v2964_v59, %v2963_v36  ;;  %v2585_v24 = vmax.f32 %v1999_v33, 0.0  ;;  %v1869_v21 = vadd.f32 %v15986_v45, %v15942_v48  ;;  %v1864_v33 = vadd.f32 %v15986_v45, %v15944_v58  ;;  %v3455_v59 = vld [vmem:[#allocation2 + $0x151] sm:$0xff] }
 0x23b   :  { %v2584_v18 = vmax.f32 %v1994_v25, 0.0  ;;  %v12075_v0 = vpop.f32.mrb[174].mxu0  ;;  %v2991_v25 = vsel %vm2668_vm4, %v2554_v50, 0.0  ;;  %v1879_v48 = vadd.f32 %v15986_v45, %v15951_v41  ;;  %v3457_v41 = vld [vmem:[#allocation2 + $0x169] sm:$0xff] }
 0x23c   :  { %v2985_v39 = vsel %vm2668_vm4, %v2585_v24, 0.0  ;;  %v2009_v15 = vadd.f32 %v15986_v45, %v12075_v0  ;;  %v2003_v54 = vpop.f32.mrb[175].mxu0  ;;  %12249 = vmatmul.mubr.msk.f32.gmra.mrb[24].mxu0 %vm2668_vm4, %v3452_v10  ;;  %v3005_v0 = vsel %vm2668_vm4, %v2556_v28, 0.0 }
 0x23d   :  { %v16157_v51 = vadd.f32 %v2985_v39, %v2984_v6  ;;  %v2978_v47 = vsel %vm2668_vm4, %v2584_v18, 0.0  ;;  %v2004_v30 = vadd.f32 %v15986_v45, %v2003_v54  ;;  %12251 = vmatprep.mubr.msk.f32.mxu0 %vm2668_vm4, %v3453_v14  ;;  %v3012_v18 = vsel %vm2668_vm4, %v2557_v38, 0.0 }
 0x23e   :  { %v16162_v36 = vadd.f32 %v2978_v47, %v2977_v23  ;;  %v2587_v12 = vmax.f32 %v2009_v15, 0.0  ;;  %v3456_v23 = vld [vmem:[#allocation2 + $0x159] sm:$0xff]  ;;  %v2559_v39 = vmax.f32 %v1869_v21, 0.0  ;;  %v2558_v15 = vmax.f32 %v1864_v33, 0.0 }
 0x23f   :  { %v2586_v55 = vmax.f32 %v2004_v30, 0.0  ;;  %v12078_v7 = vpop.f32.mrb[176].mxu0  ;;  %v1874_v47 = vadd.f32 %v15986_v45, %v15953_v1  ;;  %v2561_v38 = vmax.f32 %v1879_v48, 0.0  ;;  %v10448_v1 = vld [vmem:[%s18038_s3 + $0xd8] sm:$0xff]  ;;  %v1889_v21 = vadd.f32 %v15986_v45, %v15957_v63 }
 0x240   :  { %v2999_v13 = vsel %vm2668_vm4, %v2587_v12, 0.0  ;;  %v2019_v8 = vadd.f32 %v15986_v45, %v12078_v7  ;;  %v2013_v40 = vpop.f32.mrb[177].mxu0  ;;  %12252 = vmatmul.mubr.msk.f32.gmra.mrb[26].mxu0 %vm2668_vm4, %v3454_v62  ;;  %v3459_v7 = vld [vmem:[#allocation2 + $0x1b1] sm:$0xff]  ;;  %v1884_v33 = vadd.f32 %v15986_v45, %v15959_v57 }
 0x241   :  { %v16173_v24 = vadd.f32 %v2999_v13, %v2998_v37  ;;  %v2992_v11 = vsel %vm2668_vm4, %v2586_v55, 0.0  ;;  %v2014_v60 = vadd.f32 %v15986_v45, %v2013_v40  ;;  %12254 = vmatprep.mubr.msk.f32.mxu0 %vm2668_vm4, %v3455_v59  ;;  %v10447_v62 = vld [vmem:[%s18038_s3 + $0xd0] sm:$0xff] }
 0x242   :  { %v16180_v58 = vadd.f32 %v2992_v11, %v2991_v25  ;;  %v2589_v32 = vmax.f32 %v2019_v8, 0.0  ;;  %v3458_v40 = vld [vmem:[#allocation2 + $0x171] sm:$0xff]  ;;  %v13301_v59 = vpack.c.bf16 %v10448_v1, %v10447_v62  ;;  %v3026_v25 = vsel %vm2668_vm4, %v2559_v39, 0.0 }
 0x243   :  { %v2588_v10 = vmax.f32 %v2014_v60, 0.0  ;;  %v12081_v6 = vpop.f32.mrb[178].mxu0  ;;  %v3019_v11 = vsel %vm2668_vm4, %v2558_v15, 0.0  ;;  %v3040_v39 = vsel %vm2668_vm4, %v2561_v38, 0.0  ;;  %v2563_v15 = vmax.f32 %v1889_v21, 0.0 }
 0x244   :  { %v3013_v54 = vsel %vm2668_vm4, %v2589_v32, 0.0  ;;  %v2029_v14 = vadd.f32 %v15986_v45, %v12081_v6  ;;  %v2023_v50 = vpop.f32.mrb[179].mxu0  ;;  %12255 = vmatmul.mubr.msk.f32.gmra.mrb[28].mxu0 %vm2668_vm4, %v3456_v23  ;;  %13302 = vmatprep.subr.bf16.mxu1 %v13301_v59 }
 0x245   :  { %v16189_v30 = vadd.f32 %v3013_v54, %v3012_v18  ;;  %v3006_v12 = vsel %vm2668_vm4, %v2588_v10, 0.0  ;;  %v2024_v37 = vadd.f32 %v15986_v45, %v2023_v50  ;;  %12257 = vmatprep.mubr.msk.f32.mxu0 %vm2668_vm4, %v3457_v41  ;;  %v2560_v18 = vmax.f32 %v1874_v47, 0.0  ;;  %v3460_v10 = vld [vmem:[#allocation2 + $0x1b9] sm:$0xff]  ;;  %13304 = vmatpush3.bf16.msra.mxu1 %v13301_v59 }
 0x246   :  { %v16194_v28 = vadd.f32 %v3006_v12, %v3005_v0  ;;  %v2591_v55 = vmax.f32 %v2029_v14, 0.0  ;;  %v2562_v54 = vmax.f32 %v1884_v33, 0.0  ;;  %v1899_v41 = vadd.f32 %v15986_v45, %v15963_v31 }
 0x247   :  { %v2590_v13 = vmax.f32 %v2024_v37, 0.0  ;;  %v12084_v8 = vpop.f32.mrb[180].mxu0  ;;  %v1894_v47 = vadd.f32 %v15986_v45, %v15965_v56  ;;  %v1909_v31 = vadd.f32 %v15986_v45, %v15969_v52  ;;  %v3054_v33 = vsel %vm2668_vm4, %v2563_v15, 0.0 }
 0x248   :  { %v3027_v60 = vsel %vm2668_vm4, %v2591_v55, 0.0  ;;  %v2039_v48 = vadd.f32 %v15986_v45, %v12084_v8  ;;  %v2033_v32 = vpop.f32.mrb[181].mxu0  ;;  %12258 = vmatmul.mubr.msk.f32.gmra.mrb[30].mxu0 %vm2668_vm4, %v3458_v40  ;;  %v2565_v59 = vmax.f32 %v1899_v41, 0.0  ;;  %v1914_v15 = vadd.f32 %v15986_v45, %v15977_v42 }
 0x249   :  { %v16211_v63 = vadd.f32 %v3027_v60, %v3026_v25  ;;  %v3020_v57 = vsel %vm2668_vm4, %v2590_v13, 0.0  ;;  %v2034_v0 = vadd.f32 %v15986_v45, %v2033_v32  ;;  %12260 = vmatprep.mubr.msk.f32.mxu0 %vm2668_vm4, %v3459_v7  ;;  %v3033_v7 = vsel %vm2668_vm4, %v2560_v18, 0.0 }
 0x24a   :  { %v16216_v6 = vadd.f32 %v3020_v57, %v3019_v11  ;;  %v2593_v23 = vmax.f32 %v2039_v48, 0.0  ;;  %v3047_v13 = vsel %vm2668_vm4, %v2562_v54, 0.0  ;;  %v2564_v25 = vmax.f32 %v1894_v47, 0.0 }
 0x24b   :  { %v2592_v14 = vmax.f32 %v2034_v0, 0.0  ;;  %v12087_v50 = vpop.f32.mrb[182].mxu0  ;;  %v1904_v32 = vadd.f32 %v15986_v45, %v15971_v44  ;;  %v2567_v0 = vmax.f32 %v1909_v31, 0.0  ;;  %v3068_v44 = vsel %vm2668_vm4, %v2565_v59, 0.0  ;;  %v10449_v31 = vld [vmem:[%s18038_s3 + $0xe0] sm:$0xff] }
 0x24c   :  { %v3041_v12 = vsel %vm2668_vm4, %v2593_v23, 0.0  ;;  %v2049_v37 = vadd.f32 %v15986_v45, %v12087_v50  ;;  %v2043_v55 = vpop.f32.mrb[183].mxu0  ;;  %12261 = vmatmul.mubr.msk.f32.gmra.mrb[32].mxu0 %vm2668_vm4, %v3460_v10  ;;  %v3061_v50 = vsel %vm2668_vm4, %v2564_v25, 0.0  ;;  %v1929_v25 = vadd.f32 %v15986_v45, %v15981_v2 }
 0x24d   :  { %v16227_v38 = vadd.f32 %v3041_v12, %v3040_v39  ;;  %v3034_v62 = vsel %vm2668_vm4, %v2592_v14, 0.0  ;;  %v2044_v1 = vadd.f32 %v15986_v45, %v2043_v55  ;;  %v1919_v39 = vadd.f32 %v15986_v45, %v15975_v5 }
 0x24e   :  { %v16233_v21 = vadd.f32 %v3034_v62, %v3033_v7  ;;  %v2595_v56 = vmax.f32 %v2049_v37, 0.0  ;;  %v2566_v37 = vmax.f32 %v1904_v32, 0.0  ;;  %v3082_v42 = vsel %vm2668_vm4, %v2567_v0, 0.0 }
 0x24f   :  { %v2594_v8 = vmax.f32 %v2044_v1, 0.0  ;;  %v12090_v40 = vpop.f32.mrb[184].mxu0 }
 0x250   :  { %v3055_v11 = vsel %vm2668_vm4, %v2595_v56, 0.0  ;;  %v2059_v60 = vadd.f32 %v15986_v45, %v12090_v40  ;;  %v2053_v48 = vpop.f32.mrb[185].mxu0  ;;  %v10450_v56 = vld [vmem:[%s18038_s3 + $0xe8] sm:$0xff] }
 0x251   :  { %v16241_v52 = vadd.f32 %v3055_v11, %v3054_v33  ;;  %v3048_v18 = vsel %vm2668_vm4, %v2594_v8, 0.0  ;;  %v2054_v57 = vadd.f32 %v15986_v45, %v2053_v48  ;;  %v2569_v33 = vmax.f32 %v1919_v39, 0.0 }
 0x252   :  { %v16245_v10 = vadd.f32 %v3048_v18, %v3047_v13  ;;  %v2597_v23 = vmax.f32 %v2059_v60, 0.0  ;;  %v2568_v13 = vmax.f32 %v1914_v15, 0.0  ;;  %v13305_v59 = vpack.c.bf16 %v10450_v56, %v10449_v31 }
 0x253   :  { %v2596_v54 = vmax.f32 %v2054_v57, 0.0  ;;  %v12093_v14 = vpop.f32.mrb[186].mxu0  ;;  %v1924_v11 = vadd.f32 %v15986_v45, %v15992_v3  ;;  %v3075_v18 = vsel %vm2668_vm4, %v2566_v37, 0.0  ;;  %v3096_v3 = vsel %vm2668_vm4, %v2569_v33, 0.0  ;;  %v3419_v37 = vld [vmem:[%s18038_s3] sm:$0xff] }
 0x254   :  { %v3069_v41 = vsel %vm2668_vm4, %v2597_v23, 0.0  ;;  %v2069_v47 = vadd.f32 %v15986_v45, %v12093_v14  ;;  %v2063_v12 = vpop.f32.mrb[187].mxu0  ;;  %13306 = vmatprep.subr.bf16.mxu1 %v13305_v59  ;;  %v3089_v15 = vsel %vm2668_vm4, %v2568_v13, 0.0 }
 0x255   :  { %v16255_v55 = vadd.f32 %v3069_v41, %v3068_v44  ;;  %v3062_v7 = vsel %vm2668_vm4, %v2596_v54, 0.0  ;;  %v2064_v5 = vadd.f32 %v15986_v45, %v2063_v12  ;;  %13308 = vmatpush3.bf16.msra.mxu1 %v13305_v59  ;;  %v2571_v44 = vmax.f32 %v1929_v25, 0.0 }
 0x256   :  { %v16260_v62 = vadd.f32 %v3062_v7, %v3061_v50  ;;  %v2599_v1 = vmax.f32 %v2069_v47, 0.0  ;;  %v2570_v50 = vmax.f32 %v1924_v11, 0.0  ;;  %v3420_v7 = vld [vmem:[%s18038_s3 + $0x8] sm:$0xff] }
 0x257   :  { %v2598_v8 = vmax.f32 %v2064_v5, 0.0  ;;  %v12096_v40 = vpop.f32.mrb[188].mxu0  ;;  %v13265_v31 = vpack.c.bf16 %v3420_v7, %v3419_v37 }
 0x258   :  { %v3083_v60 = vsel %vm2668_vm4, %v2599_v1, 0.0  ;;  %v2079_v48 = vadd.f32 %v15986_v45, %v12096_v40  ;;  %v2073_v32 = vpop.f32.mrb[189].mxu0  ;;  %v3110_v40 = vsel %vm2668_vm4, %v2571_v44, 0.0  ;;  %v3103_v59 = vsel %vm2668_vm4, %v2570_v50, 0.0 }
 0x259   :  { %v16275_v57 = vadd.f32 %v3083_v60, %v3082_v42  ;;  %v3076_v0 = vsel %vm2668_vm4, %v2598_v8, 0.0  ;;  %v2074_v23 = vadd.f32 %v15986_v45, %v2073_v32  ;;  %13266 = vmatprep.subr.bf16.mxu0 %v13265_v31  ;;  %v3422_v32 = vld [vmem:[%s18038_s3 + $0x18] sm:$0xff] }
 0x25a   :  { %v16279_v39 = vadd.f32 %v3076_v0, %v3075_v18  ;;  %v2601_v2 = vmax.f32 %v2079_v48, 0.0  ;;  %13268 = vmatpush3.bf16.msra.mxu0 %v13265_v31  ;;  %v3421_v48 = vld [vmem:[%s18038_s3 + $0x10] sm:$0xff] }
 0x25b   :  { %v2600_v54 = vmax.f32 %v2074_v23, 0.0  ;;  %v12099_v14 = vpop.f32.mrb[190].mxu0 }
 0x25c   :  { %v3097_v41 = vsel %vm2668_vm4, %v2601_v2, 0.0  ;;  %v2089_v47 = vadd.f32 %v15986_v45, %v12099_v14  ;;  %v2083_v12 = vpop.f32.mrb[191].mxu0  ;;  %v13269_v2 = vpack.c.bf16 %v3422_v32, %v3421_v48  ;;  %v3426_v48 = vld [vmem:[%s18038_s3 + $0x38] sm:$0xff] }
 0x25d   :  { %v16291_v5 = vadd.f32 %v3097_v41, %v3096_v3  ;;  %v3090_v42 = vsel %vm2668_vm4, %v2600_v54, 0.0  ;;  %v2084_v1 = vadd.f32 %v15986_v45, %v2083_v12  ;;  %v3424_v12 = vld [vmem:[%s18038_s3 + $0x28] sm:$0xff] }
 0x25e   :  { %v16295_v56 = vadd.f32 %v3090_v42, %v3089_v15  ;;  %v2603_v33 = vmax.f32 %v2089_v47, 0.0  ;;  %13270 = vmatprep.subr.bf16.mxu0 %v13269_v2  ;;  %v3423_v47 = vld [vmem:[%s18038_s3 + $0x20] sm:$0xff] }
 0x25f   :  { %v2602_v13 = vmax.f32 %v2084_v1, 0.0  ;;  %v12102_v8 = vpop.f32.mrb[192].mxu0  ;;  %13272 = vmatpush3.bf16.msra.mxu0 %v13269_v2  ;;  %v13273_v1 = vpack.c.bf16 %v3424_v12, %v3423_v47  ;;  %v10517_v47 = vld [vmem:[%s18038_s3 + $0x100] sm:$0xff] }
 0x260   :  { %v3111_v25 = vsel %vm2668_vm4, %v2603_v33, 0.0  ;;  %v2099_v11 = vadd.f32 %v15986_v45, %v12102_v8  ;;  %v2093_v60 = vpop.f32.mrb[193].mxu0  ;;  %v10452_v8 = vld [vmem:[%s18038_s3 + $0xf8] sm:$0xff] }
 0x261   :  { %v16307_v18 = vadd.f32 %v3111_v25, %v3110_v40  ;;  %v3104_v0 = vsel %vm2668_vm4, %v2602_v13, 0.0  ;;  %v2094_v23 = vadd.f32 %v15986_v45, %v2093_v60  ;;  %v10451_v13 = vld [vmem:[%s18038_s3 + $0xf0] sm:$0xff]  ;;  %13274 = vmatprep.subr.bf16.mxu0 %v13273_v1 }
 0x262   :  { %v16311_v3 = vadd.f32 %v3104_v0, %v3103_v59  ;;  %v2605_v15 = vmax.f32 %v2099_v11, 0.0  ;;  %v13309_v59 = vpack.c.bf16 %v10452_v8, %v10451_v13 }
 0x263   :  { %v2604_v54 = vmax.f32 %v2094_v23, 0.0  ;;  %v12105_v14 = vpop.f32.mrb[194].mxu0  ;;  %13276 = vmatpush3.bf16.msra.mxu0 %v13273_v1 }
 0x264   :  { %v2903_v44 = vsel %vm2668_vm4, %v2605_v15, 0.0  ;;  %v2109_v50 = vadd.f32 %v15986_v45, %v12105_v14  ;;  %v2103_v41 = vpop.f32.mrb[195].mxu0  ;;  %13310 = vmatprep.subr.bf16.mxu1 %v13309_v59 }
 0x265   :  { %v16322_v37 = vadd.f32 %v2903_v44, %v16039_v43  ;;  %v2896_v7 = vsel %vm2668_vm4, %v2604_v54, 0.0  ;;  %v2104_v42 = vadd.f32 %v15986_v45, %v2103_v41  ;;  %13312 = vmatpush3.bf16.msra.mxu1 %v13309_v59 }
 0x266   :  { %v16327_v31 = vadd.f32 %v2896_v7, %v16047_v49  ;;  %v2607_v33 = vmax.f32 %v2109_v50, 0.0  ;;  %v3425_v49 = vld [vmem:[%s18038_s3 + $0x30] sm:$0xff] }
 0x267   :  { %v2606_v40 = vmax.f32 %v2104_v42, 0.0  ;;  %v12108_v43 = vpop.f32.mrb[196].mxu0  ;;  %v13277_v2 = vpack.c.bf16 %v3426_v48, %v3425_v49 }
 0x268   :  { %v2917_v25 = vsel %vm2668_vm4, %v2607_v33, 0.0  ;;  %v2119_v11 = vadd.f32 %v15986_v45, %v12108_v43  ;;  %v2113_v60 = vpop.f32.mrb[197].mxu0 }
 0x269   :  { %v16344_v32 = vadd.f32 %v2917_v25, %v16065_v35  ;;  %v2910_v0 = vsel %vm2668_vm4, %v2606_v40, 0.0  ;;  %v2114_v23 = vadd.f32 %v15986_v45, %v2113_v60  ;;  %13278 = vmatprep.subr.bf16.mxu0 %v13277_v2 }
 0x26a   :  { %v16349_v15 = vadd.f32 %v2910_v0, %v16072_v16  ;;  %v2609_v54 = vmax.f32 %v2119_v11, 0.0  ;;  %13280 = vmatpush3.bf16.msra.mxu0 %v13277_v2  ;;  %v10518_v16 = vld [vmem:[%s18038_s3 + $0x108] sm:$0xff] }
 0x26b   :  { %v2608_v14 = vmax.f32 %v2114_v23, 0.0  ;;  %v12111_v44 = vpop.f32.mrb[198].mxu0  ;;  %v16364_v1 = vpack.c.bf16 %v10518_v16, %v10517_v47  ;;  %13282 = vmatprep.subr.bf16.mxu0 %v16002_v4 }
 0x26c   :  { %v2931_v50 = vsel %vm2668_vm4, %v2609_v54, 0.0  ;;  %v2129_v41 = vadd.f32 %v15986_v45, %v12111_v44  ;;  %v2123_v35 = vpop.f32.mrb[199].mxu0 }
 0x26d   :  { %v16360_v12 = vadd.f32 %v2931_v50, %v16085_v17  ;;  %v2924_v7 = vsel %vm2668_vm4, %v2608_v14, 0.0  ;;  %v2124_v42 = vadd.f32 %v15986_v45, %v2123_v35  ;;  %13314 = vmatprep.subr.bf16.mxu1 %v16364_v1 }
 0x26e   :  { %v16368_v33 = vadd.f32 %v2924_v7, %v16092_v29  ;;  %v2611_v13 = vmax.f32 %v2129_v41, 0.0 }
 0x26f   :  { %v2610_v8 = vmax.f32 %v2124_v42, 0.0  ;;  %v12114_v40 = vpop.f32.mrb[200].mxu0 }
 0x270   :  { %v2945_v43 = vsel %vm2668_vm4, %v2611_v13, 0.0  ;;  %v2139_v17 = vadd.f32 %v15986_v45, %v12114_v40  ;;  %v2133_v59 = vpop.f32.mrb[201].mxu0 }
 0x271   :  { %v16374_v25 = vadd.f32 %v2945_v43, %v16103_v19  ;;  %v2938_v11 = vsel %vm2668_vm4, %v2610_v8, 0.0  ;;  %v2134_v60 = vadd.f32 %v15986_v45, %v2133_v59 }
 0x272   :  { %v16379_v29 = vadd.f32 %v2938_v11, %v16108_v53  ;;  %v2613_v49 = vmax.f32 %v2139_v17, 0.0 }
 0x273   :  { %v2612_v48 = vmax.f32 %v2134_v60, 0.0  ;;  %v12117_v0 = vpop.f32.mrb[202].mxu0 }
 0x274   :  { %v2959_v23 = vsel %vm2668_vm4, %v2613_v49, 0.0  ;;  %v2149_v2 = vadd.f32 %v15986_v45, %v12117_v0  ;;  %v2143_v54 = vpop.f32.mrb[203].mxu0 }
 0x275   :  { %v16384_v14 = vadd.f32 %v2959_v23, %v16119_v22  ;;  %v2952_v19 = vsel %vm2668_vm4, %v2612_v48, 0.0  ;;  %v2144_v44 = vadd.f32 %v15986_v45, %v2143_v54 }
 0x276   :  { %v16389_v50 = vadd.f32 %v2952_v19, %v16125_v27  ;;  %v2615_v53 = vmax.f32 %v2149_v2, 0.0 }
 0x277   :  { %v2614_v41 = vmax.f32 %v2144_v44, 0.0  ;;  %v12120_v35 = vpop.f32.mrb[204].mxu0 }
 0x278   :  { %v2973_v47 = vsel %vm2668_vm4, %v2615_v53, 0.0  ;;  %v2159_v16 = vadd.f32 %v15986_v45, %v12120_v35  ;;  %v2153_v7 = vpop.f32.mrb[205].mxu0 }
 0x279   :  { %v16394_v42 = vadd.f32 %v2973_v47, %v16141_v26  ;;  %v2966_v22 = vsel %vm2668_vm4, %v2614_v41, 0.0  ;;  %v2154_v13 = vadd.f32 %v15986_v45, %v2153_v7 }
 0x27a   :  { %v16399_v8 = vadd.f32 %v2966_v22, %v16146_v9  ;;  %v2617_v27 = vmax.f32 %v2159_v16, 0.0 }
 0x27b   :  { %v2616_v40 = vmax.f32 %v2154_v13, 0.0  ;;  %v12123_v43 = vpop.f32.mrb[206].mxu0 }
 0x27c   :  { %v2987_v17 = vsel %vm2668_vm4, %v2617_v27, 0.0  ;;  %v2169_v59 = vadd.f32 %v15986_v45, %v12123_v43  ;;  %v2163_v11 = vpop.f32.mrb[207].mxu0 }
 0x27d   :  { %v16404_v60 = vadd.f32 %v2987_v17, %v16157_v51  ;;  %v2980_v26 = vsel %vm2668_vm4, %v2616_v40, 0.0  ;;  %v2164_v49 = vadd.f32 %v15986_v45, %v2163_v11 }
 0x27e   :  { %v16409_v48 = vadd.f32 %v2980_v26, %v16162_v36  ;;  %v2619_v9 = vmax.f32 %v2169_v59, 0.0 }
 0x27f   :  { %v2618_v0 = vmax.f32 %v2164_v49, 0.0  ;;  %v12126_v23 = vpop.f32.mrb[208].mxu0 }
 0x280   :  { %v3001_v2 = vsel %vm2668_vm4, %v2619_v9, 0.0  ;;  %v2179_v54 = vadd.f32 %v15986_v45, %v12126_v23  ;;  %v2173_v19 = vpop.f32.mrb[209].mxu0 }
 0x281   :  { %v16414_v44 = vadd.f32 %v3001_v2, %v16173_v24  ;;  %v2994_v51 = vsel %vm2668_vm4, %v2618_v0, 0.0  ;;  %v2174_v53 = vadd.f32 %v15986_v45, %v2173_v19 }
 0x282   :  { %v16419_v41 = vadd.f32 %v2994_v51, %v16180_v58  ;;  %v2621_v36 = vmax.f32 %v2179_v54, 0.0 }
 0x283   :  { %v2620_v35 = vmax.f32 %v2174_v53, 0.0  ;;  %v12129_v47 = vpop.f32.mrb[210].mxu0 }
 0x284   :  { %v3015_v16 = vsel %vm2668_vm4, %v2621_v36, 0.0  ;;  %v2189_v7 = vadd.f32 %v15986_v45, %v12129_v47  ;;  %v2183_v22 = vpop.f32.mrb[211].mxu0 }
 0x285   :  { %v16424_v13 = vadd.f32 %v3015_v16, %v16189_v30  ;;  %v3008_v24 = vsel %vm2668_vm4, %v2620_v35, 0.0  ;;  %v2184_v27 = vadd.f32 %v15986_v45, %v2183_v22 }
 0x286   :  { %v16429_v40 = vadd.f32 %v3008_v24, %v16194_v28  ;;  %v2623_v58 = vmax.f32 %v2189_v7, 0.0 }
 0x287   :  { %v2622_v43 = vmax.f32 %v2184_v27, 0.0  ;;  %v12132_v17 = vpop.f32.mrb[212].mxu0 }
 0x288   :  { %v3029_v59 = vsel %vm2668_vm4, %v2623_v58, 0.0  ;;  %v2199_v11 = vadd.f32 %v15986_v45, %v12132_v17  ;;  %v2193_v26 = vpop.f32.mrb[213].mxu0 }
 0x289   :  { %v16434_v49 = vadd.f32 %v3029_v59, %v16211_v63  ;;  %v3022_v30 = vsel %vm2668_vm4, %v2622_v43, 0.0  ;;  %v2194_v9 = vadd.f32 %v15986_v45, %v2193_v26 }
 0x28a   :  { %v16439_v0 = vadd.f32 %v3022_v30, %v16216_v6  ;;  %v2625_v28 = vmax.f32 %v2199_v11, 0.0 }
 0x28b   :  { %v2624_v23 = vmax.f32 %v2194_v9, 0.0  ;;  %v12135_v2 = vpop.f32.mrb[214].mxu0 }
 0x28c   :  { %v3043_v54 = vsel %vm2668_vm4, %v2625_v28, 0.0  ;;  %v2209_v19 = vadd.f32 %v15986_v45, %v12135_v2  ;;  %v2203_v51 = vpop.f32.mrb[215].mxu0 }
 0x28d   :  { %v16444_v53 = vadd.f32 %v3043_v54, %v16227_v38  ;;  %v3036_v63 = vsel %vm2668_vm4, %v2624_v23, 0.0  ;;  %v2204_v36 = vadd.f32 %v15986_v45, %v2203_v51  ;;  %v16475_v51 = vld [vmem:[%s18037_s2] ss:$0 sm:$0xff] }
 0x28e   :  { %v16449_v35 = vadd.f32 %v3036_v63, %v16233_v21  ;;  %v2627_v6 = vmax.f32 %v2209_v19, 0.0 }
 0x28f   :  { %v2626_v47 = vmax.f32 %v2204_v36, 0.0  ;;  %v12138_v16 = vpop.f32.mrb[216].mxu0 }
 0x290   :  { %v3057_v7 = vsel %vm2668_vm4, %v2627_v6, 0.0  ;;  %v2219_v22 = vadd.f32 %v15986_v45, %v12138_v16  ;;  %v2213_v24 = vpop.f32.mrb[217].mxu0 }
 0x291   :  { %v16454_v27 = vadd.f32 %v3057_v7, %v16241_v52  ;;  %v3050_v38 = vsel %vm2668_vm4, %v2626_v47, 0.0  ;;  %v2214_v58 = vadd.f32 %v15986_v45, %v2213_v24 }
 0x292   :  { %v16459_v43 = vadd.f32 %v3050_v38, %v16245_v10  ;;  %v2629_v21 = vmax.f32 %v2219_v22, 0.0 }
 0x293   :  { %v2628_v17 = vmax.f32 %v2214_v58, 0.0  ;;  %v12141_v59 = vpop.f32.mrb[218].mxu0 }
 0x294   :  { %v3071_v11 = vsel %vm2668_vm4, %v2629_v21, 0.0  ;;  %v2229_v26 = vadd.f32 %v15986_v45, %v12141_v59  ;;  %v2223_v30 = vpop.f32.mrb[219].mxu0 }
 0x295   :  { %v16464_v9 = vadd.f32 %v3071_v11, %v16255_v55  ;;  %v3064_v52 = vsel %vm2668_vm4, %v2628_v17, 0.0  ;;  %v2224_v28 = vadd.f32 %v15986_v45, %v2223_v30 }
 0x296   :  { %v16469_v23 = vadd.f32 %v3064_v52, %v16260_v62  ;;  %v2631_v10 = vmax.f32 %v2229_v26, 0.0 }
 0x297   :  { %v2630_v2 = vmax.f32 %v2224_v28, 0.0  ;;  %v12144_v54 = vpop.f32.mrb[220].mxu0 }
 0x298   :  { %v3085_v19 = vsel %vm2668_vm4, %v2631_v10, 0.0  ;;  %v2239_v55 = vadd.f32 %v16475_v51, %v12144_v54  ;;  %v2233_v63 = vpop.f32.mrb[221].mxu0 }
 0x299   :  { %v16479_v36 = vadd.f32 %v3085_v19, %v16275_v57  ;;  %v3078_v45 = vsel %vm2668_vm4, %v2630_v2, 0.0  ;;  %v2234_v62 = vadd.f32 %v16475_v51, %v2233_v63 }
 0x29a   :  { %v16484_v6 = vadd.f32 %v3078_v45, %v16279_v39  ;;  %v2633_v47 = vmax.f32 %v2239_v55, 0.0 }
 0x29b   :  { %v2632_v16 = vmax.f32 %v2234_v62, 0.0  ;;  %v12147_v7 = vpop.f32.mrb[222].mxu0 }
 0x29c   :  { %v3099_v22 = vsel %vm2668_vm4, %v2633_v47, 0.0  ;;  %v2249_v24 = vadd.f32 %v16475_v51, %v12147_v7  ;;  %v2243_v38 = vpop.f32.mrb[223].mxu0 }
 0x29d   :  { %v16489_v58 = vadd.f32 %v3099_v22, %v16291_v5  ;;  %v3092_v57 = vsel %vm2668_vm4, %v2632_v16, 0.0  ;;  %v2244_v21 = vadd.f32 %v16475_v51, %v2243_v38 }
 0x29e   :  { %v16494_v17 = vadd.f32 %v3092_v57, %v16295_v56  ;;  %v2635_v39 = vmax.f32 %v2249_v24, 0.0 }
 0x29f   :  { %v2634_v59 = vmax.f32 %v2244_v21, 0.0  ;;  %v12150_v11 = vpop.f32.mrb[224].mxu0 }
 0x2a0   :  { %v3113_v26 = vsel %vm2668_vm4, %v2635_v39, 0.0  ;;  %v2259_v30 = vadd.f32 %v16475_v51, %v12150_v11  ;;  %v2253_v52 = vpop.f32.mrb[225].mxu0 }
 0x2a1   :  { %v16499_v28 = vadd.f32 %v3113_v26, %v16307_v18  ;;  %v3106_v5 = vsel %vm2668_vm4, %v2634_v59, 0.0  ;;  %v2254_v10 = vadd.f32 %v16475_v51, %v2253_v52 }
 0x2a2   :  { %v16504_v2 = vadd.f32 %v3106_v5, %v16311_v3  ;;  %v2637_v56 = vmax.f32 %v2259_v30, 0.0 }
 0x2a3   :  { %v2636_v54 = vmax.f32 %v2254_v10, 0.0  ;;  %v12153_v19 = vpop.f32.mrb[226].mxu0 }
 0x2a4   :  { %v2905_v55 = vsel %vm2668_vm4, %v2637_v56, 0.0  ;;  %v2269_v63 = vadd.f32 %v16475_v51, %v12153_v19  ;;  %v2263_v45 = vpop.f32.mrb[227].mxu0 }
 0x2a5   :  { %v2906_v62 = vadd.f32 %v2905_v55, %v16322_v37  ;;  %v2898_v18 = vsel %vm2668_vm4, %v2636_v54, 0.0  ;;  %v2264_v47 = vadd.f32 %v16475_v51, %v2263_v45 }
 0x2a6   :  { %v2899_v16 = vadd.f32 %v2898_v18, %v16327_v31  ;;  %v2639_v7 = vmax.f32 %v2269_v63, 0.0 }
 0x2a7   :  { %v3150_v22 = vmul.f32 0.25, %v2906_v62  ;;  %v2638_v3 = vmax.f32 %v2264_v47, 0.0  ;;  %v12156_v24 = vpop.f32.mrb[228].mxu0 }
 0x2a8   :  { %v3149_v38 = vmul.f32 0.25, %v2899_v16  ;;  %v2919_v57 = vsel %vm2668_vm4, %v2639_v7, 0.0  ;;  %v2279_v21 = vadd.f32 %v16475_v51, %v12156_v24  ;;  %v2273_v39 = vpop.f32.mrb[229].mxu0 }
 0x2a9   :  { %3324 = vst.msk [vmem:[#allocation2 + $0x1d1] sm:$0xff] %vm2668_vm4, %v3150_v22  ;;  %v2920_v37 = vadd.f32 %v2919_v57, %v16344_v32  ;;  %v2912_v59 = vsel %vm2668_vm4, %v2638_v3, 0.0  ;;  %v2274_v11 = vadd.f32 %v16475_v51, %v2273_v39 }
 0x2aa   :  { %3323 = vst.msk [vmem:[#allocation2 + $0x1c9] sm:$0xff] %vm2668_vm4, %v3149_v38  ;;  %v2913_v31 = vadd.f32 %v2912_v59, %v16349_v15  ;;  %v2641_v26 = vmax.f32 %v2279_v21, 0.0 }
 0x2ab   :  { %v3152_v30 = vmul.f32 0.25, %v2920_v37  ;;  %v2640_v52 = vmax.f32 %v2274_v11, 0.0  ;;  %v12159_v5 = vpop.f32.mrb[230].mxu0 }
 0x2ac   :  { %v3151_v10 = vmul.f32 0.25, %v2913_v31  ;;  %v2933_v56 = vsel %vm2668_vm4, %v2641_v26, 0.0  ;;  %v2289_v54 = vadd.f32 %v16475_v51, %v12159_v5  ;;  %v2283_v19 = vpop.f32.mrb[231].mxu0 }
 0x2ad   :  { %3326 = vst.msk [vmem:[#allocation2 + $0x1e9] sm:$0xff] %vm2668_vm4, %v3152_v30  ;;  %v2934_v32 = vadd.f32 %v2933_v56, %v16360_v12  ;;  %v2926_v55 = vsel %vm2668_vm4, %v2640_v52, 0.0  ;;  %v2284_v63 = vadd.f32 %v16475_v51, %v2283_v19 }
 0x2ae   :  { %3325 = vst.msk [vmem:[#allocation2 + $0x1e1] sm:$0xff] %vm2668_vm4, %v3151_v10  ;;  %v2927_v15 = vadd.f32 %v2926_v55, %v16368_v33  ;;  %v2643_v45 = vmax.f32 %v2289_v54, 0.0 }
 0x2af   :  { %v3154_v62 = vmul.f32 0.25, %v2934_v32  ;;  %v2642_v18 = vmax.f32 %v2284_v63, 0.0  ;;  %v12162_v47 = vpop.f32.mrb[232].mxu0 }
 0x2b0   :  { %v3153_v16 = vmul.f32 0.25, %v2927_v15  ;;  %v2947_v7 = vsel %vm2668_vm4, %v2643_v45, 0.0  ;;  %v2299_v22 = vadd.f32 %v16475_v51, %v12162_v47  ;;  %v2293_v3 = vpop.f32.mrb[233].mxu0  ;;  %v3462_v37 = vld [vmem:[#allocation2 + $0x1d1] sm:$0xff] }
 0x2b1   :  { %3328 = vst.msk [vmem:[#allocation2 + $0x201] sm:$0xff] %vm2668_vm4, %v3154_v62  ;;  %v2948_v12 = vadd.f32 %v2947_v7, %v16374_v25  ;;  %v2940_v24 = vsel %vm2668_vm4, %v2642_v18, 0.0  ;;  %v2294_v38 = vadd.f32 %v16475_v51, %v2293_v3  ;;  %v3461_v57 = vld [vmem:[#allocation2 + $0x1c9] sm:$0xff]  ;;  %v4689_v59 = vld [vmem:[#allocation2 + $0x1d2] sm:$0xff] }
 0x2b2   :  { %v4688_v33 = vld [vmem:[#allocation2 + $0x1ca] sm:$0xff]  ;;  %3327 = vst.msk [vmem:[#allocation2 + $0x1f9] sm:$0xff] %vm2668_vm4, %v3153_v16  ;;  %v2941_v21 = vadd.f32 %v2940_v24, %v16379_v29  ;;  %v2645_v39 = vmax.f32 %v2299_v22, 0.0  ;;  %12263 = vmatprep.mubr.msk.f32.mxu0 %vm2668_vm4, %v3461_v57 }
 0x2b3   :  { %12487 = vmatprep.mubr.msk.f32.mxu1 %vm2668_vm4, %v4688_v33  ;;  %v3156_v11 = vmul.f32 0.25, %v2948_v12  ;;  %v2644_v31 = vmax.f32 %v2294_v38, 0.0  ;;  %v12165_v25 = vpop.f32.mrb[234].mxu0  ;;  %12264 = vmatmul.mubr.msk.f32.gmra.mrb[34].mxu0 %vm2668_vm4, %v3462_v37 }
 0x2b4   :  { %12488 = vmatmul.mubr.msk.f32.gmra.mrb[2].mxu1 %vm2668_vm4, %v4689_v59  ;;  %v3155_v26 = vmul.f32 0.25, %v2941_v21  ;;  %v2961_v30 = vsel %vm2668_vm4, %v2645_v39, 0.0  ;;  %v2309_v52 = vadd.f32 %v16475_v51, %v12165_v25  ;;  %v2303_v29 = vpop.f32.mrb[235].mxu0  ;;  %v3464_v63 = vld [vmem:[#allocation2 + $0x1e9] sm:$0xff] }
 0x2b5   :  { %3330 = vst.msk [vmem:[#allocation2 + $0x219] sm:$0xff] %vm2668_vm4, %v3156_v11  ;;  %v2962_v5 = vadd.f32 %v2961_v30, %v16384_v14  ;;  %v2954_v10 = vsel %vm2668_vm4, %v2644_v31, 0.0  ;;  %v2304_v56 = vadd.f32 %v16475_v51, %v2303_v29  ;;  %v3463_v54 = vld [vmem:[#allocation2 + $0x1e1] sm:$0xff]  ;;  %v4691_v15 = vld [vmem:[#allocation2 + $0x1ea] sm:$0xff] }
 0x2b6   :  { %v4690_v19 = vld [vmem:[#allocation2 + $0x1e2] sm:$0xff]  ;;  %3329 = vst.msk [vmem:[#allocation2 + $0x211] sm:$0xff] %vm2668_vm4, %v3155_v26  ;;  %v2955_v32 = vadd.f32 %v2954_v10, %v16389_v50  ;;  %v2647_v55 = vmax.f32 %v2309_v52, 0.0  ;;  %12266 = vmatprep.mubr.msk.f32.mxu0 %vm2668_vm4, %v3463_v54 }
 0x2b7   :  { %12490 = vmatprep.mubr.msk.f32.mxu1 %vm2668_vm4, %v4690_v19  ;;  %v3158_v45 = vmul.f32 0.25, %v2962_v5  ;;  %v2646_v62 = vmax.f32 %v2304_v56, 0.0  ;;  %v12168_v14 = vpop.f32.mrb[236].mxu0  ;;  %12267 = vmatmul.mubr.msk.f32.gmra.mrb[36].mxu0 %vm2668_vm4, %v3464_v63 }
 0x2b8   :  { %12491 = vmatmul.mubr.msk.f32.gmra.mrb[4].mxu1 %vm2668_vm4, %v4691_v15  ;;  %v3157_v18 = vmul.f32 0.25, %v2955_v32  ;;  %v2975_v47 = vsel %vm2668_vm4, %v2647_v55, 0.0  ;;  %v2319_v16 = vadd.f32 %v16475_v51, %v12168_v14  ;;  %v2313_v50 = vpop.f32.mrb[237].mxu0  ;;  %v3466_v33 = vld [vmem:[#allocation2 + $0x201] sm:$0xff] }
 0x2b9   :  { %3332 = vst.msk [vmem:[#allocation2 + $0x231] sm:$0xff] %vm2668_vm4, %v3158_v45  ;;  %v2976_v7 = vadd.f32 %v2975_v47, %v16394_v42  ;;  %v2968_v22 = vsel %vm2668_vm4, %v2646_v62, 0.0  ;;  %v2314_v3 = vadd.f32 %v16475_v51, %v2313_v50  ;;  %v3465_v12 = vld [vmem:[#allocation2 + $0x1f9] sm:$0xff]  ;;  %v4693_v21 = vld [vmem:[#allocation2 + $0x202] sm:$0xff] }
 0x2ba   :  { %v4692_v24 = vld [vmem:[#allocation2 + $0x1fa] sm:$0xff]  ;;  %3331 = vst.msk [vmem:[#allocation2 + $0x229] sm:$0xff] %vm2668_vm4, %v3157_v18  ;;  %v2969_v38 = vadd.f32 %v2968_v22, %v16399_v8  ;;  %v2649_v57 = vmax.f32 %v2319_v16, 0.0  ;;  %12269 = vmatprep.mubr.msk.f32.mxu0 %vm2668_vm4, %v3465_v12 }
 0x2bb   :  { %12493 = vmatprep.mubr.msk.f32.mxu1 %vm2668_vm4, %v4692_v24  ;;  %v3160_v39 = vmul.f32 0.25, %v2976_v7  ;;  %v2648_v37 = vmax.f32 %v2314_v3, 0.0  ;;  %v12171_v42 = vpop.f32.mrb[238].mxu0  ;;  %12270 = vmatmul.mubr.msk.f32.gmra.mrb[38].mxu0 %vm2668_vm4, %v3466_v33 }
 0x2bc   :  { %12494 = vmatmul.mubr.msk.f32.gmra.mrb[6].mxu1 %vm2668_vm4, %v4693_v21  ;;  %v3159_v59 = vmul.f32 0.25, %v2969_v38  ;;  %v2989_v11 = vsel %vm2668_vm4, %v2649_v57, 0.0  ;;  %v2329_v31 = vadd.f32 %v16475_v51, %v12171_v42  ;;  %v2323_v8 = vpop.f32.mrb[239].mxu0  ;;  %v3468_v56 = vld [vmem:[#allocation2 + $0x219] sm:$0xff] }
 0x2bd   :  { %3334 = vst.msk [vmem:[#allocation2 + $0x249] sm:$0xff] %vm2668_vm4, %v3160_v39  ;;  %v2990_v25 = vadd.f32 %v2989_v11, %v16404_v60  ;;  %v2982_v26 = vsel %vm2668_vm4, %v2648_v37, 0.0  ;;  %v2324_v30 = vadd.f32 %v16475_v51, %v2323_v8  ;;  %v3467_v52 = vld [vmem:[#allocation2 + $0x211] sm:$0xff]  ;;  %v4695_v54 = vld [vmem:[#allocation2 + $0x21a] sm:$0xff] }
 0x2be   :  { %v4694_v29 = vld [vmem:[#allocation2 + $0x212] sm:$0xff]  ;;  %3333 = vst.msk [vmem:[#allocation2 + $0x241] sm:$0xff] %vm2668_vm4, %v3159_v59  ;;  %v2983_v5 = vadd.f32 %v2982_v26, %v16409_v48  ;;  %v2651_v10 = vmax.f32 %v2329_v31, 0.0  ;;  %12272 = vmatprep.mubr.msk.f32.mxu0 %vm2668_vm4, %v3467_v52 }
 0x2bf   :  { %12496 = vmatprep.mubr.msk.f32.mxu1 %vm2668_vm4, %v4694_v29  ;;  %v3162_v19 = vmul.f32 0.25, %v2990_v25  ;;  %v2650_v32 = vmax.f32 %v2324_v30, 0.0  ;;  %v12174_v60 = vpop.f32.mrb[240].mxu0  ;;  %12273 = vmatmul.mubr.msk.f32.gmra.mrb[40].mxu0 %vm2668_vm4, %v3468_v56 }
 0x2c0   :  { %12497 = vmatmul.mubr.msk.f32.gmra.mrb[8].mxu1 %vm2668_vm4, %v4695_v54  ;;  %v3161_v55 = vmul.f32 0.25, %v2983_v5  ;;  %v3003_v63 = vsel %vm2668_vm4, %v2651_v10, 0.0  ;;  %v2339_v15 = vadd.f32 %v16475_v51, %v12174_v60  ;;  %v2333_v48 = vpop.f32.mrb[241].mxu0  ;;  %v3470_v7 = vld [vmem:[#allocation2 + $0x231] sm:$0xff] }
 0x2c1   :  { %3336 = vst.msk [vmem:[#allocation2 + $0x261] sm:$0xff] %vm2668_vm4, %v3162_v19  ;;  %v3004_v45 = vadd.f32 %v3003_v63, %v16414_v44  ;;  %v2996_v62 = vsel %vm2668_vm4, %v2650_v32, 0.0  ;;  %v2334_v14 = vadd.f32 %v16475_v51, %v2333_v48  ;;  %v3469_v18 = vld [vmem:[#allocation2 + $0x229] sm:$0xff]  ;;  %v4697_v22 = vld [vmem:[#allocation2 + $0x232] sm:$0xff] }
 0x2c2   :  { %v4696_v47 = vld [vmem:[#allocation2 + $0x22a] sm:$0xff]  ;;  %3335 = vst.msk [vmem:[#allocation2 + $0x259] sm:$0xff] %vm2668_vm4, %v3161_v55  ;;  %v2997_v16 = vadd.f32 %v2996_v62, %v16419_v41  ;;  %v2653_v50 = vmax.f32 %v2339_v15, 0.0  ;;  %12275 = vmatprep.mubr.msk.f32.mxu0 %vm2668_vm4, %v3469_v18 }
 0x2c3   :  { %12499 = vmatprep.mubr.msk.f32.mxu1 %vm2668_vm4, %v4696_v47  ;;  %v3164_v3 = vmul.f32 0.25, %v3004_v45  ;;  %v2652_v12 = vmax.f32 %v2334_v14, 0.0  ;;  %v12177_v44 = vpop.f32.mrb[242].mxu0  ;;  %12276 = vmatmul.mubr.msk.f32.gmra.mrb[42].mxu0 %vm2668_vm4, %v3470_v7 }
 0x2c4   :  { %12500 = vmatmul.mubr.msk.f32.gmra.mrb[10].mxu1 %vm2668_vm4, %v4697_v22  ;;  %v3163_v24 = vmul.f32 0.25, %v2997_v16  ;;  %v3017_v38 = vsel %vm2668_vm4, %v2653_v50, 0.0  ;;  %v2349_v57 = vadd.f32 %v16475_v51, %v12177_v44  ;;  %v2343_v41 = vpop.f32.mrb[243].mxu0  ;;  %v3472_v31 = vld [vmem:[#allocation2 + $0x249] sm:$0xff] }
 0x2c5   :  { %3338 = vst.msk [vmem:[#allocation2 + $0x279] sm:$0xff] %vm2668_vm4, %v3164_v3  ;;  %v3018_v33 = vadd.f32 %v3017_v38, %v16424_v13  ;;  %v3010_v21 = vsel %vm2668_vm4, %v2652_v12, 0.0  ;;  %v2344_v39 = vadd.f32 %v16475_v51, %v2343_v41  ;;  %v3471_v37 = vld [vmem:[#allocation2 + $0x241] sm:$0xff]  ;;  %v4699_v8 = vld [vmem:[#allocation2 + $0x24a] sm:$0xff] }
 0x2c6   :  { %v4698_v42 = vld [vmem:[#allocation2 + $0x242] sm:$0xff]  ;;  %3337 = vst.msk [vmem:[#allocation2 + $0x271] sm:$0xff] %vm2668_vm4, %v3163_v24  ;;  %v3011_v59 = vadd.f32 %v3010_v21, %v16429_v40  ;;  %v2655_v11 = vmax.f32 %v2349_v57, 0.0  ;;  %12278 = vmatprep.mubr.msk.f32.mxu0 %vm2668_vm4, %v3471_v37 }
 0x2c7   :  { %12502 = vmatprep.mubr.msk.f32.mxu1 %vm2668_vm4, %v4698_v42  ;;  %v3166_v25 = vmul.f32 0.25, %v3018_v33  ;;  %v2654_v26 = vmax.f32 %v2344_v39, 0.0  ;;  %v12180_v13 = vpop.f32.mrb[244].mxu0  ;;  %12279 = vmatmul.mubr.msk.f32.gmra.mrb[44].mxu0 %vm2668_vm4, %v3472_v31 }
 0x2c8   :  { %12503 = vmatmul.mubr.msk.f32.gmra.mrb[12].mxu1 %vm2668_vm4, %v4699_v8  ;;  %v3165_v30 = vmul.f32 0.25, %v3011_v59  ;;  %v3031_v52 = vsel %vm2668_vm4, %v2655_v11, 0.0  ;;  %v2359_v29 = vadd.f32 %v16475_v51, %v12180_v13  ;;  %v2353_v40 = vpop.f32.mrb[245].mxu0  ;;  %v3474_v55 = vld [vmem:[#allocation2 + $0x261] sm:$0xff] }
 0x2c9   :  { %3340 = vst.msk [vmem:[#allocation2 + $0x291] sm:$0xff] %vm2668_vm4, %v3166_v25  ;;  %v3032_v5 = vadd.f32 %v3031_v52, %v16434_v49  ;;  %v3024_v10 = vsel %vm2668_vm4, %v2654_v26, 0.0  ;;  %v2354_v56 = vadd.f32 %v16475_v51, %v2353_v40  ;;  %v3473_v54 = vld [vmem:[#allocation2 + $0x259] sm:$0xff]  ;;  %v4701_v63 = vld [vmem:[#allocation2 + $0x262] sm:$0xff] }
 0x2ca   :  { %v4700_v19 = vld [vmem:[#allocation2 + $0x25a] sm:$0xff]  ;;  %3339 = vst.msk [vmem:[#allocation2 + $0x289] sm:$0xff] %vm2668_vm4, %v3165_v30  ;;  %v3025_v32 = vadd.f32 %v3024_v10, %v16439_v0  ;;  %v2657_v60 = vmax.f32 %v2359_v29, 0.0  ;;  %12281 = vmatprep.mubr.msk.f32.mxu0 %vm2668_vm4, %v3473_v54 }
 0x2cb   :  { %12505 = vmatprep.mubr.msk.f32.mxu1 %vm2668_vm4, %v4700_v19  ;;  %v3168_v15 = vmul.f32 0.25, %v3032_v5  ;;  %v2656_v48 = vmax.f32 %v2354_v56, 0.0  ;;  %v12183_v49 = vpop.f32.mrb[246].mxu0  ;;  %12282 = vmatmul.mubr.msk.f32.gmra.mrb[46].mxu0 %vm2668_vm4, %v3474_v55 }
 0x2cc   :  { %12506 = vmatmul.mubr.msk.f32.gmra.mrb[14].mxu1 %vm2668_vm4, %v4701_v63  ;;  %v3167_v45 = vmul.f32 0.25, %v3025_v32  ;;  %v3045_v62 = vsel %vm2668_vm4, %v2657_v60, 0.0  ;;  %v2369_v14 = vadd.f32 %v16475_v51, %v12183_v49  ;;  %v2363_v0 = vpop.f32.mrb[247].mxu0  ;;  %v3476_v12 = vld [vmem:[#allocation2 + $0x279] sm:$0xff] }
 0x2cd   :  { %3342 = vst.msk [vmem:[#allocation2 + $0x2a9] sm:$0xff] %vm2668_vm4, %v3168_v15  ;;  %v3046_v18 = vadd.f32 %v3045_v62, %v16444_v53  ;;  %v3038_v47 = vsel %vm2668_vm4, %v2656_v48, 0.0  ;;  %v2364_v16 = vadd.f32 %v16475_v51, %v2363_v0  ;;  %v3475_v50 = vld [vmem:[#allocation2 + $0x271] sm:$0xff]  ;;  %v4703_v44 = vld [vmem:[#allocation2 + $0x27a] sm:$0xff] }
 0x2ce   :  { %v4702_v7 = vld [vmem:[#allocation2 + $0x272] sm:$0xff]  ;;  %3341 = vst.msk [vmem:[#allocation2 + $0x2a1] sm:$0xff] %vm2668_vm4, %v3167_v45  ;;  %v3039_v22 = vadd.f32 %v3038_v47, %v16449_v35  ;;  %v2659_v3 = vmax.f32 %v2369_v14, 0.0  ;;  %12284 = vmatprep.mubr.msk.f32.mxu0 %vm2668_vm4, %v3475_v50 }
 0x2cf   :  { %12508 = vmatprep.mubr.msk.f32.mxu1 %vm2668_vm4, %v4702_v7  ;;  %v3170_v24 = vmul.f32 0.25, %v3046_v18  ;;  %v2658_v38 = vmax.f32 %v2364_v16, 0.0  ;;  %v12186_v53 = vpop.f32.mrb[248].mxu0  ;;  %12285 = vmatmul.mubr.msk.f32.gmra.mrb[48].mxu0 %vm2668_vm4, %v3476_v12 }
 0x2d0   :  { %12509 = vmatmul.mubr.msk.f32.gmra.mrb[16].mxu1 %vm2668_vm4, %v4703_v44  ;;  %v3169_v57 = vmul.f32 0.25, %v3039_v22  ;;  %v3059_v41 = vsel %vm2668_vm4, %v2659_v3, 0.0  ;;  %v2379_v33 = vadd.f32 %v16475_v51, %v12186_v53  ;;  %v2373_v35 = vpop.f32.mrb[249].mxu0  ;;  %v3478_v8 = vld [vmem:[#allocation2 + $0x291] sm:$0xff] }
 0x2d1   :  { %3344 = vst.msk [vmem:[#allocation2 + $0x2c1] sm:$0xff] %vm2668_vm4, %v3170_v24  ;;  %v3060_v21 = vadd.f32 %v3059_v41, %v16454_v27  ;;  %v3052_v39 = vsel %vm2668_vm4, %v2658_v38, 0.0  ;;  %v2374_v37 = vadd.f32 %v16475_v51, %v2373_v35  ;;  %v3477_v42 = vld [vmem:[#allocation2 + $0x289] sm:$0xff]  ;;  %v4705_v25 = vld [vmem:[#allocation2 + $0x292] sm:$0xff] }
 0x2d2   :  { %v4704_v59 = vld [vmem:[#allocation2 + $0x28a] sm:$0xff]  ;;  %3343 = vst.msk [vmem:[#allocation2 + $0x2b9] sm:$0xff] %vm2668_vm4, %v3169_v57  ;;  %v3053_v11 = vadd.f32 %v3052_v39, %v16459_v43  ;;  %v2661_v31 = vmax.f32 %v2379_v33, 0.0  ;;  %12287 = vmatprep.mubr.msk.f32.mxu0 %vm2668_vm4, %v3477_v42 }
 0x2d3   :  { %12511 = vmatprep.mubr.msk.f32.mxu1 %vm2668_vm4, %v4704_v59  ;;  %v3172_v26 = vmul.f32 0.25, %v3060_v21  ;;  %v2660_v13 = vmax.f32 %v2374_v37, 0.0  ;;  %v12189_v27 = vpop.f32.mrb[250].mxu0  ;;  %12288 = vmatmul.mubr.msk.f32.gmra.mrb[50].mxu0 %vm2668_vm4, %v3478_v8 }
 0x2d4   :  { %12512 = vmatmul.mubr.msk.f32.gmra.mrb[18].mxu1 %vm2668_vm4, %v4705_v25  ;;  %v3171_v30 = vmul.f32 0.25, %v3053_v11  ;;  %v3073_v52 = vsel %vm2668_vm4, %v2661_v31, 0.0  ;;  %v2389_v29 = vadd.f32 %v16475_v51, %v12189_v27  ;;  %v2383_v43 = vpop.f32.mrb[251].mxu0  ;;  %v3480_v60 = vld [vmem:[#allocation2 + $0x2a9] sm:$0xff] }
 0x2d5   :  { %3346 = vst.msk [vmem:[#allocation2 + $0x2d9] sm:$0xff] %vm2668_vm4, %v3172_v26  ;;  %v3074_v40 = vadd.f32 %v3073_v52, %v16464_v9  ;;  %v3066_v5 = vsel %vm2668_vm4, %v2660_v13, 0.0  ;;  %v2384_v10 = vadd.f32 %v16475_v51, %v2383_v43  ;;  %v3479_v56 = vld [vmem:[#allocation2 + $0x2a1] sm:$0xff]  ;;  %v4707_v55 = vld [vmem:[#allocation2 + $0x2aa] sm:$0xff] }
 0x2d6   :  { %v4706_v54 = vld [vmem:[#allocation2 + $0x2a2] sm:$0xff]  ;;  %3345 = vst.msk [vmem:[#allocation2 + $0x2d1] sm:$0xff] %vm2668_vm4, %v3171_v30  ;;  %v3067_v19 = vadd.f32 %v3066_v5, %v16469_v23  ;;  %v2663_v32 = vmax.f32 %v2389_v29, 0.0  ;;  %12290 = vmatprep.mubr.msk.f32.mxu0 %vm2668_vm4, %v3479_v56  ;;  %v10519_v56 = vld [vmem:[%s18038_s3 + $0x110] sm:$0xff] }
 0x2d7   :  { %12514 = vmatprep.mubr.msk.f32.mxu1 %vm2668_vm4, %v4706_v54  ;;  %v3174_v63 = vmul.f32 0.25, %v3074_v40  ;;  %v2662_v15 = vmax.f32 %v2384_v10, 0.0  ;;  %v12192_v9 = vpop.f32.mrb[252].mxu0  ;;  %12291 = vmatmul.mubr.msk.f32.gmra.mrb[52].mxu0 %vm2668_vm4, %v3480_v60  ;;  %v3355_v40 = vld [vmem:[#allocation2] sm:$0xff]  ;;  %v5368_v60 = vld [vmem:[#allocation2 + $0x18] sm:$0xff] }
 0x2d8   :  { %12515 = vmatmul.mubr.msk.f32.gmra.mrb[20].mxu1 %vm2668_vm4, %v4707_v55  ;;  %v3173_v48 = vmul.f32 0.25, %v3067_v19  ;;  %v3087_v49 = vsel %vm2668_vm4, %v2663_v32, 0.0  ;;  %v2399_v45 = vadd.f32 %v16475_v51, %v12192_v9  ;;  %v2393_v23 = vpop.f32.mrb[253].mxu0  ;;  %v3482_v7 = vld [vmem:[#allocation2 + $0x2c1] sm:$0xff]  ;;  %v10520_v32 = vld [vmem:[%s18038_s3 + $0x118] sm:$0xff] }
 0x2d9   :  { %3348 = vst.msk [vmem:[#allocation2 + $0x2f1] sm:$0xff] %vm2668_vm4, %v3174_v63  ;;  %v3088_v62 = vadd.f32 %v3087_v49, %v16479_v36  ;;  %v3080_v14 = vsel %vm2668_vm4, %v2662_v15, 0.0  ;;  %v2394_v0 = vadd.f32 %v16475_v51, %v2393_v23  ;;  %v3481_v18 = vld [vmem:[#allocation2 + $0x2b9] sm:$0xff]  ;;  %v4709_v22 = vld [vmem:[#allocation2 + $0x2c2] sm:$0xff]  ;;  %v13317_v63 = vpack.c.bf16 %v10520_v32, %v10519_v56  ;;  %v5370_v49 = vld [vmem:[#allocation2 + $0x30] sm:$0xff] }
 0x2da   :  { %v4708_v47 = vld [vmem:[#allocation2 + $0x2ba] sm:$0xff]  ;;  %3347 = vst.msk [vmem:[#allocation2 + $0x2e9] sm:$0xff] %vm2668_vm4, %v3173_v48  ;;  %v3081_v16 = vadd.f32 %v3080_v14, %v16484_v6  ;;  %v2665_v50 = vmax.f32 %v2399_v45, 0.0  ;;  %12293 = vmatprep.mubr.msk.f32.mxu0 %vm2668_vm4, %v3481_v18  ;;  %v3356_v55 = vld [vmem:[#allocation2 + $0x8] sm:$0xff]  ;;  %v10523_v14 = vld [vmem:[%s18038_s3 + $0x130] sm:$0xff] }
 0x2db   :  { %12517 = vmatprep.mubr.msk.f32.mxu1 %vm2668_vm4, %v4708_v47  ;;  %v3176_v3 = vmul.f32 0.25, %v3088_v62  ;;  %v2664_v12 = vmax.f32 %v2394_v0, 0.0  ;;  %v12195_v36 = vpop.f32.mrb[254].mxu0  ;;  %12294 = vmatmul.mubr.msk.f32.gmra.mrb[54].mxu0 %vm2668_vm4, %v3482_v7  ;;  %v5369_v15 = vld [vmem:[#allocation2 + $0x20] sm:$0xff]  ;;  %v10522_v48 = vld [vmem:[%s18038_s3 + $0x128] sm:$0xff]  ;;  %v5371_v45 = vld [vmem:[#allocation2 + $0x38] sm:$0xff] }
 0x2dc   :  { %12518 = vmatmul.mubr.msk.f32.gmra.mrb[22].mxu1 %vm2668_vm4, %v4709_v22  ;;  %v3175_v44 = vmul.f32 0.25, %v3081_v16  ;;  %v3101_v24 = vsel %vm2668_vm4, %v2665_v50, 0.0  ;;  %v2409_v38 = vadd.f32 %v16475_v51, %v12195_v36  ;;  %v2403_v6 = vpop.f32.mrb[255].mxu0  ;;  %v3484_v37 = vld [vmem:[#allocation2 + $0x2d9] sm:$0xff]  ;;  %v5372_v62 = vld [vmem:[#allocation2 + $0x48] sm:$0xff] }
 0x2dd   :  { %3350 = vst.msk [vmem:[#allocation2 + $0x309] sm:$0xff] %vm2668_vm4, %v3176_v3  ;;  %v3102_v53 = vadd.f32 %v3101_v24, %v16489_v58  ;;  %v3094_v57 = vsel %vm2668_vm4, %v2664_v12, 0.0  ;;  %v2404_v41 = vadd.f32 %v16475_v51, %v2403_v6  ;;  %v3483_v33 = vld [vmem:[#allocation2 + $0x2d1] sm:$0xff]  ;;  %v4711_v42 = vld [vmem:[#allocation2 + $0x2da] sm:$0xff]  ;;  %v10590_v16 = vld [vmem:[%s18038_s3 + $0x148] sm:$0xff] }
 0x2de   :  { %v4710_v35 = vld [vmem:[#allocation2 + $0x2d2] sm:$0xff]  ;;  %3349 = vst.msk [vmem:[#allocation2 + $0x301] sm:$0xff] %vm2668_vm4, %v3175_v44  ;;  %v3095_v21 = vadd.f32 %v3094_v57, %v16494_v17  ;;  %v2667_v39 = vmax.f32 %v2409_v38, 0.0  ;;  %12296 = vmatprep.mubr.msk.f32.mxu0 %vm2668_vm4, %v3483_v33  ;;  %v10521_v9 = vld [vmem:[%s18038_s3 + $0x120] sm:$0xff]  ;;  %v5380_v12 = vld [vmem:[#allocation2 + $0xa8] sm:$0xff] }
 0x2df   :  { %12520 = vmatprep.mubr.msk.f32.mxu1 %vm2668_vm4, %v4710_v35  ;;  %v3178_v59 = vmul.f32 0.25, %v3102_v53  ;;  %v2666_v11 = vmax.f32 %v2404_v41, 0.0  ;;  %12297 = vmatmul.mubr.msk.f32.gmra.mrb[56].mxu0 %vm2668_vm4, %v3484_v37  ;;  %v13321_v23 = vpack.c.bf16 %v10522_v48, %v10521_v9  ;;  %v5374_v18 = vld [vmem:[#allocation2 + $0x60] sm:$0xff]  ;;  %v5376_v7 = vld [vmem:[#allocation2 + $0x78] sm:$0xff]  ;;  %v5383_v44 = vld [vmem:[#allocation2 + $0xc8] sm:$0xff] }
 0x2e0   :  { %12521 = vmatmul.mubr.msk.f32.gmra.mrb[24].mxu1 %vm2668_vm4, %v4711_v42  ;;  %v3177_v51 = vmul.f32 0.25, %v3095_v21  ;;  %v3115_v58 = vsel %vm2668_vm4, %v2667_v39, 0.0  ;;  %v3486_v13 = vld [vmem:[#allocation2 + $0x2f1] sm:$0xff]  ;;  %v10589_v47 = vld [vmem:[%s18038_s3 + $0x140] sm:$0xff]  ;;  %v5388_v57 = vld [vmem:[#allocation2 + $0x108] sm:$0xff] }
 0x2e1   :  { %3352 = vst.msk [vmem:[#allocation2 + $0x321] sm:$0xff] %vm2668_vm4, %v3178_v59  ;;  %v3116_v17 = vadd.f32 %v3115_v58, %v16499_v28  ;;  %v3108_v31 = vsel %vm2668_vm4, %v2666_v11, 0.0  ;;  %v3485_v8 = vld [vmem:[#allocation2 + $0x2e9] sm:$0xff]  ;;  %v4713_v27 = vld [vmem:[#allocation2 + $0x2f2] sm:$0xff]  ;;  %v16748_v50 = vpack.c.bf16 %v10590_v16, %v10589_v47  ;;  %v5377_v22 = vld [vmem:[#allocation2 + $0x80] sm:$0xff] }
 0x2e2   :  { %v4712_v25 = vld [vmem:[#allocation2 + $0x2ea] sm:$0xff]  ;;  %3351 = vst.msk [vmem:[#allocation2 + $0x319] sm:$0xff] %vm2668_vm4, %v3177_v51  ;;  %v3109_v26 = vadd.f32 %v3108_v31, %v16504_v2  ;;  %12299 = vmatprep.mubr.msk.f32.mxu0 %vm2668_vm4, %v3485_v8  ;;  %v5379_v3 = vld [vmem:[#allocation2 + $0x98] sm:$0xff]  ;;  %v5382_v36 = vld [vmem:[#allocation2 + $0xc0] sm:$0xff] }
 0x2e3   :  { %12523 = vmatprep.mubr.msk.f32.mxu1 %vm2668_vm4, %v4712_v25  ;;  %v3180_v30 = vmul.f32 0.25, %v3116_v17  ;;  %12300 = vmatmul.mubr.msk.f32.gmra.mrb[58].mxu0 %vm2668_vm4, %v3486_v13  ;;  %v5384_v24 = vld [vmem:[#allocation2 + $0xd8] sm:$0xff]  ;;  %v5385_v38 = vld [vmem:[#allocation2 + $0xe0] sm:$0xff]  ;;  %v5386_v6 = vld [vmem:[#allocation2 + $0xf0] sm:$0xff] }
 0x2e4   :  { %12524 = vmatmul.mubr.msk.f32.gmra.mrb[26].mxu1 %vm2668_vm4, %v4713_v27  ;;  %v3179_v28 = vmul.f32 0.25, %v3109_v26  ;;  %v16689_v2 = vld [vmem:[#allocation2 + $0x309] sm:$0xff]  ;;  %v5387_v53 = vld [vmem:[#allocation2 + $0xf8] sm:$0xff]  ;;  %v5390_v33 = vld [vmem:[#allocation2 + $0x120] sm:$0xff] }
 0x2e5   :  { %3354 = vst.msk [vmem:[#allocation2 + $0x339] sm:$0xff] %vm2668_vm4, %v3180_v30  ;;  %v16683_v52 = vld [vmem:[#allocation2 + $0x301] sm:$0xff]  ;;  %v4715_v43 = vld [vmem:[#allocation2 + $0x30a] sm:$0xff]  ;;  %v5392_v21 = vld [vmem:[#allocation2 + $0x138] sm:$0xff] }
 0x2e6   :  { %v4714_v29 = vld [vmem:[#allocation2 + $0x302] sm:$0xff]  ;;  %3353 = vst.msk [vmem:[#allocation2 + $0x331] sm:$0xff] %vm2668_vm4, %v3179_v28  ;;  %12302 = vmatprep.mubr.msk.f32.mxu0 %vm2668_vm4, %v16683_v52  ;;  %v5389_v41 = vld [vmem:[#allocation2 + $0x110] sm:$0xff]  ;;  %v5395_v42 = vld [vmem:[#allocation2 + $0x158] sm:$0xff] }
 0x2e7   :  { %12526 = vmatprep.mubr.msk.f32.mxu1 %vm2668_vm4, %v4714_v29  ;;  %12303 = vmatmul.mubr.msk.f32.gmra.mrb[60].mxu0 %vm2668_vm4, %v16689_v2  ;;  %v5391_v35 = vld [vmem:[#allocation2 + $0x128] sm:$0xff]  ;;  %v5393_v39 = vld [vmem:[#allocation2 + $0x140] sm:$0xff]  ;;  %v5394_v37 = vld [vmem:[#allocation2 + $0x150] sm:$0xff] }
 0x2e8   :  { %12527 = vmatmul.mubr.msk.f32.gmra.mrb[28].mxu1 %vm2668_vm4, %v4715_v43  ;;  %v16702_v54 = vld [vmem:[#allocation2 + $0x321] sm:$0xff]  ;;  %v5397_v11 = vld [vmem:[#allocation2 + $0x170] sm:$0xff]  ;;  %v3388_v8 = vld [vmem:[#allocation2 + $0x1b8] sm:$0xff] }
 0x2e9   :  { %v16694_v5 = vld [vmem:[#allocation2 + $0x319] sm:$0xff]  ;;  %v4717_v19 = vld [vmem:[#allocation2 + $0x322] sm:$0xff]  ;;  %v3387_v58 = vld [vmem:[#allocation2 + $0x1b0] sm:$0xff] }
 0x2ea   :  { %v4716_v10 = vld [vmem:[#allocation2 + $0x31a] sm:$0xff]  ;;  %12305 = vmatprep.mubr.msk.f32.mxu0 %vm2668_vm4, %v16694_v5  ;;  %v5396_v59 = vld [vmem:[#allocation2 + $0x168] sm:$0xff]  ;;  %v5401_v25 = vld [vmem:[#allocation2 + $0x1d0] sm:$0xff] }
 0x2eb   :  { %12529 = vmatprep.mubr.msk.f32.mxu1 %vm2668_vm4, %v4716_v10  ;;  %12306 = vmatmul.mubr.msk.f32.gmra.mrb[62].mxu0 %vm2668_vm4, %v16702_v54  ;;  %v5398_v51 = vld [vmem:[#allocation2 + $0x180] sm:$0xff]  ;;  %v5399_v17 = vld [vmem:[#allocation2 + $0x188] sm:$0xff]  ;;  %v5404_v27 = vld [vmem:[#allocation2 + $0x1f8] sm:$0xff] }
 0x2ec   :  { %12530 = vmatmul.mubr.msk.f32.gmra.mrb[30].mxu1 %vm2668_vm4, %v4717_v19  ;;  %12324 = vmatprep.mubr.msk.f32.mxu0 %vm2668_vm4, %v3355_v40  ;;  %v5400_v31 = vld [vmem:[#allocation2 + $0x1c8] sm:$0xff]  ;;  %v5402_v26 = vld [vmem:[#allocation2 + $0x1e0] sm:$0xff]  ;;  %v5406_v28 = vld [vmem:[#allocation2 + $0x210] sm:$0xff] }
 0x2ed   :  { %12548 = vmatprep.mubr.msk.f32.mxu1 %vm2668_vm4, %v5368_v60  ;;  %v5403_v13 = vld [vmem:[#allocation2 + $0x1e8] sm:$0xff]  ;;  %v5405_v30 = vld [vmem:[#allocation2 + $0x200] sm:$0xff]  ;;  %v5407_v29 = vld [vmem:[#allocation2 + $0x218] sm:$0xff] }
 0x2ee   :  { %v5408_v43 = vld [vmem:[#allocation2 + $0x228] sm:$0xff]  ;;  %v5409_v40 = vld [vmem:[#allocation2 + $0x230] sm:$0xff]  ;;  %v5410_v10 = vld [vmem:[#allocation2 + $0x240] sm:$0xff] }
 0x2ef   :  { %12325 = vmatmul.mubr.msk.f32.vlgmr.msra.gmra.mrb[0].mxu0 %vm2668_vm4, %v3356_v55  ;;  %v5411_v56 = vld [vmem:[#allocation2 + $0x248] sm:$0xff]  ;;  %v5412_v19 = vld [vmem:[#allocation2 + $0x258] sm:$0xff]  ;;  %v5413_v32 = vld [vmem:[#allocation2 + $0x260] sm:$0xff] }
 0x2f0   :  { %12549 = vmatmul.mubr.msk.f32.vlgmr.msra.gmra.mrb[32].mxu1 %vm2668_vm4, %v5369_v15  ;;  %12327 = vmatprep.mubr.msk.f32.mxu0 %vm2668_vm4, %v5368_v60  ;;  %v5414_v60 = vld [vmem:[#allocation2 + $0x270] sm:$0xff]  ;;  %v5415_v55 = vld [vmem:[#allocation2 + $0x278] sm:$0xff]  ;;  %v5418_v9 = vld [vmem:[#allocation2 + $0x2a0] sm:$0xff] }
 0x2f1   :  { %13316 = vmatpush3.bf16.msra.mxu1 %v16364_v1  ;;  %12551 = vmatprep.mubr.msk.f32.mxu1 %vm2668_vm4, %v5370_v49  ;;  %v10524_v1 = vld [vmem:[%s18038_s3 + $0x138] sm:$0xff]  ;;  %v5419_v48 = vld [vmem:[#allocation2 + $0x2a8] sm:$0xff]  ;;  %v5429_v47 = vld [vmem:[#allocation2 + $0x320] sm:$0xff] }
 0x2f2   :  { %13318 = vmatprep.subr.bf16.mxu1 %v13317_v63  ;;  %13284 = vmatpush3.bf16.msra.mxu0 %v16002_v4  ;;  %v5373_v4 = vld [vmem:[#allocation2 + $0x50] sm:$0xff]  ;;  %v13325_v0 = vpack.c.bf16 %v10524_v1, %v10523_v14  ;;  %v5424_v14 = vld [vmem:[#allocation2 + $0x2e8] sm:$0xff] }
 0x2f3   :  { %12328 = vmatmul.mubr.msk.f32.gmra.mrb[2].mxu0 %vm2668_vm4, %v5369_v15  ;;  %13286 = vmatprep.subr.bf16.mxu0 %v16020_v46  ;;  %v5417_v15 = vld [vmem:[#allocation2 + $0x290] sm:$0xff] }
 0x2f4   :  { %12552 = vmatmul.mubr.msk.f32.gmra.mrb[34].mxu1 %vm2668_vm4, %v5371_v45  ;;  %12330 = vmatprep.mubr.msk.f32.mxu0 %vm2668_vm4, %v5370_v49  ;;  %v5420_v49 = vld [vmem:[#allocation2 + $0x2b8] sm:$0xff]  ;;  %v5425_v1 = vld [vmem:[#allocation2 + $0x2f0] sm:$0xff] }
 0x2f5   :  { %12554 = vmatprep.mubr.msk.f32.mxu1 %vm2668_vm4, %v5372_v62  ;;  %13320 = vmatpush3.bf16.msra.mxu1 %v13317_v63  ;;  %v5416_v63 = vld [vmem:[#allocation2 + $0x288] sm:$0xff]  ;;  %v5430_v16 = vld [vmem:[#allocation2 + $0x330] sm:$0xff] }
 0x2f6   :  { %13322 = vmatprep.subr.bf16.mxu1 %v13321_v23  ;;  %13288 = vmatpush3.bf16.msra.mxu0 %v16020_v46  ;;  %v5375_v46 = vld [vmem:[#allocation2 + $0x68] sm:$0xff]  ;;  %v17158_v61 = vld [vmem:[#allocation2 + $0x2f1] sm:$0xff] }
 0x2f7   :  { %12331 = vmatmul.mubr.msk.f32.gmra.mrb[4].mxu0 %vm2668_vm4, %v5371_v45  ;;  %13290 = vmatprep.subr.bf16.mxu0 %v16044_v20  ;;  %v5421_v45 = vld [vmem:[#allocation2 + $0x2c0] sm:$0xff] }
 0x2f8   :  { %12555 = vmatmul.mubr.msk.f32.gmra.mrb[36].mxu1 %vm2668_vm4, %v5373_v4  ;;  %12333 = vmatprep.mubr.msk.f32.mxu0 %vm2668_vm4, %v5372_v62  ;;  %v5423_v62 = vld [vmem:[#allocation2 + $0x2d8] sm:$0xff] }
 0x2f9   :  { %12557 = vmatprep.mubr.msk.f32.mxu1 %vm2668_vm4, %v5374_v18  ;;  %13324 = vmatpush3.bf16.msra.mxu1 %v13321_v23  ;;  %v5422_v23 = vld [vmem:[#allocation2 + $0x2d0] sm:$0xff] }
 0x2fa   :  { %13326 = vmatprep.subr.bf16.mxu1 %v13325_v0  ;;  %13292 = vmatpush3.bf16.msra.mxu0 %v16044_v20  ;;  %v5378_v20 = vld [vmem:[#allocation2 + $0x90] sm:$0xff] }
 0x2fb   :  { %12334 = vmatmul.mubr.msk.f32.gmra.mrb[6].mxu0 %vm2668_vm4, %v5373_v4  ;;  %13294 = vmatprep.subr.bf16.mxu0 %v16070_v34  ;;  %v5426_v4 = vld [vmem:[#allocation2 + $0x300] sm:$0xff] }
 0x2fc   :  { %12558 = vmatmul.mubr.msk.f32.gmra.mrb[38].mxu1 %vm2668_vm4, %v5375_v46  ;;  %12336 = vmatprep.mubr.msk.f32.mxu0 %vm2668_vm4, %v5374_v18  ;;  %v5428_v18 = vld [vmem:[#allocation2 + $0x318] sm:$0xff] }
 0x2fd   :  { %12560 = vmatprep.mubr.msk.f32.mxu1 %vm2668_vm4, %v5376_v7  ;;  %13328 = vmatpush3.bf16.msra.mxu1 %v13325_v0  ;;  %v5427_v0 = vld [vmem:[#allocation2 + $0x308] sm:$0xff] }
 0x2fe   :  { %13296 = vmatpush3.bf16.msra.mxu0 %v16070_v34  ;;  %13330 = vmatprep.subr.bf16.mxu1 %v16748_v50  ;;  %v5381_v34 = vld [vmem:[#allocation2 + $0xb0] sm:$0xff] }
 0x2ff   :  { %12337 = vmatmul.mubr.msk.f32.gmra.mrb[8].mxu0 %vm2668_vm4, %v5375_v46  ;;  %v4654_v46 = vld [vmem:[#allocation2 + $0x2] sm:$0xff] }
 0x300   :  { %12561 = vmatmul.mubr.msk.f32.gmra.mrb[40].mxu1 %vm2668_vm4, %v5377_v22  ;;  %12339 = vmatprep.mubr.msk.f32.mxu0 %vm2668_vm4, %v5376_v7  ;;  %v5431_v7 = vld [vmem:[#allocation2 + $0x338] sm:$0xff] }
 0x301   :  { %12563 = vmatprep.mubr.msk.f32.mxu1 %vm2668_vm4, %v5378_v20 }
 0x303   :  { %12340 = vmatmul.mubr.msk.f32.gmra.mrb[10].mxu0 %vm2668_vm4, %v5377_v22  ;;  %v10591_v22 = vld [vmem:[%s18038_s3 + $0x150] sm:$0xff] }
 0x304   :  { %12564 = vmatmul.mubr.msk.f32.gmra.mrb[42].mxu1 %vm2668_vm4, %v5379_v3  ;;  %12342 = vmatprep.mubr.msk.f32.mxu0 %vm2668_vm4, %v5378_v20  ;;  %v10592_v20 = vld [vmem:[%s18038_s3 + $0x158] sm:$0xff] }
 0x305   :  { %12566 = vmatprep.mubr.msk.f32.mxu1 %vm2668_vm4, %v5380_v12 }
 0x307   :  { %12343 = vmatmul.mubr.msk.f32.gmra.mrb[12].mxu0 %vm2668_vm4, %v5379_v3  ;;  %v6082_v3 = vld [vmem:[#allocation2 + $0x19] sm:$0xff] }
 0x308   :  { %12567 = vmatmul.mubr.msk.f32.gmra.mrb[44].mxu1 %vm2668_vm4, %v5381_v34  ;;  %12345 = vmatprep.mubr.msk.f32.mxu0 %vm2668_vm4, %v5380_v12  ;;  %v4655_v12 = vld [vmem:[#allocation2 + $0xa] sm:$0xff] }
 0x309   :  { %12569 = vmatprep.mubr.msk.f32.mxu1 %vm2668_vm4, %v5382_v36 }
 0x30b   :  { %12346 = vmatmul.mubr.msk.f32.gmra.mrb[14].mxu0 %vm2668_vm4, %v5381_v34  ;;  %v13333_v34 = vpack.c.bf16 %v10592_v20, %v10591_v22  ;;  %v17009_v22 = vld [vmem:[#allocation2 + $0x122] sm:$0xff]  ;;  %v6106_v20 = vld [vmem:[#allocation2 + $0x139] sm:$0xff] }
 0x30c   :  { %12570 = vmatmul.mubr.msk.f32.gmra.mrb[46].mxu1 %vm2668_vm4, %v5383_v44  ;;  %12348 = vmatprep.mubr.msk.f32.mxu0 %vm2668_vm4, %v5382_v36  ;;  %v6083_v36 = vld [vmem:[#allocation2 + $0x21] sm:$0xff] }
 0x30d   :  { %12572 = vmatprep.mubr.msk.f32.mxu1 %vm2668_vm4, %v5384_v24 }
 0x30f   :  { %12349 = vmatmul.mubr.msk.f32.gmra.mrb[16].mxu0 %vm2668_vm4, %v5383_v44  ;;  %v16877_v44 = vld [vmem:[#allocation2 + $0x1a] sm:$0xff] }
 0x310   :  { %12573 = vmatmul.mubr.msk.f32.gmra.mrb[48].mxu1 %vm2668_vm4, %v5385_v38  ;;  %12351 = vmatprep.mubr.msk.f32.mxu0 %vm2668_vm4, %v5384_v24  ;;  %v10593_v24 = vld [vmem:[%s18038_s3 + $0x160] sm:$0xff] }
 0x311   :  { %12575 = vmatprep.mubr.msk.f32.mxu1 %vm2668_vm4, %v5386_v6 }
 0x313   :  { %12352 = vmatmul.mubr.msk.f32.gmra.mrb[18].mxu0 %vm2668_vm4, %v5385_v38  ;;  %v10594_v38 = vld [vmem:[%s18038_s3 + $0x168] sm:$0xff] }
 0x314   :  { %12576 = vmatmul.mubr.msk.f32.gmra.mrb[50].mxu1 %vm2668_vm4, %v5387_v53  ;;  %12354 = vmatprep.mubr.msk.f32.mxu0 %vm2668_vm4, %v5386_v6  ;;  %v6084_v6 = vld [vmem:[#allocation2 + $0x31] sm:$0xff] }
 0x315   :  { %12578 = vmatprep.mubr.msk.f32.mxu1 %vm2668_vm4, %v5388_v57 }
 0x317   :  { %12355 = vmatmul.mubr.msk.f32.gmra.mrb[20].mxu0 %vm2668_vm4, %v5387_v53  ;;  %v16889_v53 = vld [vmem:[#allocation2 + $0x22] sm:$0xff] }
 0x318   :  { %12579 = vmatmul.mubr.msk.f32.gmra.mrb[52].mxu1 %vm2668_vm4, %v5389_v41  ;;  %12357 = vmatprep.mubr.msk.f32.mxu0 %vm2668_vm4, %v5388_v57  ;;  %v6085_v57 = vld [vmem:[#allocation2 + $0x39] sm:$0xff] }
 0x319   :  { %12581 = vmatprep.mubr.msk.f32.mxu1 %vm2668_vm4, %v5390_v33 }
 0x31b   :  { %12358 = vmatmul.mubr.msk.f32.gmra.mrb[22].mxu0 %vm2668_vm4, %v5389_v41  ;;  %v16891_v41 = vld [vmem:[#allocation2 + $0x32] sm:$0xff] }
 0x31c   :  { %12582 = vmatmul.mubr.msk.f32.gmra.mrb[54].mxu1 %vm2668_vm4, %v5391_v35  ;;  %12360 = vmatprep.mubr.msk.f32.mxu0 %vm2668_vm4, %v5390_v33  ;;  %v13337_v33 = vpack.c.bf16 %v10594_v38, %v10593_v24  ;;  %v17024_v24 = vld [vmem:[#allocation2 + $0x142] sm:$0xff]  ;;  %v17026_v38 = vld [vmem:[#allocation2 + $0x159] sm:$0xff] }
 0x31d   :  { %12584 = vmatprep.mubr.msk.f32.mxu1 %vm2668_vm4, %v5392_v21 }
 0x31f   :  { %12361 = vmatmul.mubr.msk.f32.gmra.mrb[24].mxu0 %vm2668_vm4, %v5391_v35  ;;  %v6086_v35 = vld [vmem:[#allocation2 + $0x49] sm:$0xff] }
 0x320   :  { %12585 = vmatmul.mubr.msk.f32.gmra.mrb[56].mxu1 %vm2668_vm4, %v5393_v39  ;;  %12363 = vmatprep.mubr.msk.f32.mxu0 %vm2668_vm4, %v5392_v21  ;;  %v10596_v21 = vld [vmem:[%s18038_s3 + $0x178] sm:$0xff] }
 0x321   :  { %12587 = vmatprep.mubr.msk.f32.mxu1 %vm2668_vm4, %v5394_v37 }
 0x323   :  { %12364 = vmatmul.mubr.msk.f32.gmra.mrb[26].mxu0 %vm2668_vm4, %v5393_v39  ;;  %v16905_v39 = vld [vmem:[#allocation2 + $0x3a] sm:$0xff] }
 0x324   :  { %12588 = vmatmul.mubr.msk.f32.gmra.mrb[58].mxu1 %vm2668_vm4, %v5395_v42  ;;  %12366 = vmatprep.mubr.msk.f32.mxu0 %vm2668_vm4, %v5394_v37  ;;  %v6087_v37 = vld [vmem:[#allocation2 + $0x51] sm:$0xff] }
 0x325   :  { %12590 = vmatprep.mubr.msk.f32.mxu1 %vm2668_vm4, %v5396_v59 }
 0x327   :  { %12367 = vmatmul.mubr.msk.f32.gmra.mrb[28].mxu0 %vm2668_vm4, %v5395_v42  ;;  %v16907_v42 = vld [vmem:[#allocation2 + $0x4a] sm:$0xff] }
 0x328   :  { %12591 = vmatmul.mubr.msk.f32.gmra.mrb[60].mxu1 %vm2668_vm4, %v5397_v11  ;;  %12369 = vmatprep.mubr.msk.f32.mxu0 %vm2668_vm4, %v5396_v59 }
 0x329   :  { %12593 = vmatprep.mubr.msk.f32.mxu1 %vm2668_vm4, %v5398_v51  ;;  %v10661_v51 = vld [vmem:[%s18038_s3 + $0x180] sm:$0xff] }
 0x32b   :  { %12370 = vmatmul.mubr.msk.f32.gmra.mrb[30].mxu0 %vm2668_vm4, %v5397_v11  ;;  %v6088_v11 = vld [vmem:[#allocation2 + $0x61] sm:$0xff] }
 0x32c   :  { %12594 = vmatmul.mubr.msk.f32.gmra.mrb[62].mxu1 %vm2668_vm4, %v5399_v17  ;;  %12372 = vmatprep.mubr.msk.f32.mxu0 %vm2668_vm4, %v3387_v58  ;;  %v10662_v58 = vld [vmem:[%s18038_s3 + $0x188] sm:$0xff]  ;;  %v16921_v17 = vld [vmem:[#allocation2 + $0x52] sm:$0xff] }
 0x32d   :  { %12596 = vmatprep.mubr.msk.f32.mxu1 %vm2668_vm4, %v5400_v31 }
 0x32f   :  { %12373 = vmatmul.mubr.msk.f32.gmra.mrb[32].mxu0 %vm2668_vm4, %v3388_v8  ;;  %v16923_v8 = vpack.c.bf16 %v10662_v58, %v10661_v51  ;;  %v6115_v51 = vld [vmem:[#allocation2 + $0x1d1] sm:$0xff]  ;;  %v17066_v58 = vld [vmem:[#allocation2 + $0x1e1] sm:$0xff] }
 0x330   :  { %12597 = vmatmul.mubr.msk.f32.gmra.mrb[0].mxu1 %vm2668_vm4, %v5401_v25  ;;  %12375 = vmatprep.mubr.msk.f32.mxu0 %vm2668_vm4, %v5400_v31  ;;  %v6089_v31 = vld [vmem:[#allocation2 + $0x69] sm:$0xff] }
 0x331   :  { %12599 = vmatprep.mubr.msk.f32.mxu1 %vm2668_vm4, %v5402_v26 }
 0x333   :  { %12376 = vmatmul.mubr.msk.f32.gmra.mrb[34].mxu0 %vm2668_vm4, %v5401_v25  ;;  %v16928_v25 = vld [vmem:[#allocation2 + $0x62] sm:$0xff] }
 0x334   :  { %12600 = vmatmul.mubr.msk.f32.gmra.mrb[2].mxu1 %vm2668_vm4, %v5403_v13  ;;  %12378 = vmatprep.mubr.msk.f32.mxu0 %vm2668_vm4, %v5402_v26  ;;  %v6090_v26 = vld [vmem:[#allocation2 + $0x79] sm:$0xff] }
 0x335   :  { %12602 = vmatprep.mubr.msk.f32.mxu1 %vm2668_vm4, %v5404_v27 }
 0x337   :  { %12379 = vmatmul.mubr.msk.f32.gmra.mrb[36].mxu0 %vm2668_vm4, %v5403_v13  ;;  %v16933_v13 = vld [vmem:[#allocation2 + $0x6a] sm:$0xff] }
 0x338   :  { %12603 = vmatmul.mubr.msk.f32.gmra.mrb[4].mxu1 %vm2668_vm4, %v5405_v30  ;;  %12381 = vmatprep.mubr.msk.f32.mxu0 %vm2668_vm4, %v5404_v27  ;;  %v6091_v27 = vld [vmem:[#allocation2 + $0x81] sm:$0xff] }
 0x339   :  { %12605 = vmatprep.mubr.msk.f32.mxu1 %vm2668_vm4, %v5406_v28 }
 0x33b   :  { %12382 = vmatmul.mubr.msk.f32.gmra.mrb[38].mxu0 %vm2668_vm4, %v5405_v30  ;;  %v16939_v30 = vld [vmem:[#allocation2 + $0x7a] sm:$0xff] }
 0x33c   :  { %12606 = vmatmul.mubr.msk.f32.gmra.mrb[6].mxu1 %vm2668_vm4, %v5407_v29  ;;  %12384 = vmatprep.mubr.msk.f32.mxu0 %vm2668_vm4, %v5406_v28  ;;  %v6092_v28 = vld [vmem:[#allocation2 + $0x91] sm:$0xff] }
 0x33d   :  { %12608 = vmatprep.mubr.msk.f32.mxu1 %vm2668_vm4, %v5408_v43 }
 0x33f   :  { %12385 = vmatmul.mubr.msk.f32.gmra.mrb[40].mxu0 %vm2668_vm4, %v5407_v29  ;;  %v16944_v29 = vld [vmem:[#allocation2 + $0x82] sm:$0xff] }
 0x340   :  { %12609 = vmatmul.mubr.msk.f32.gmra.mrb[8].mxu1 %vm2668_vm4, %v5409_v40  ;;  %12387 = vmatprep.mubr.msk.f32.mxu0 %vm2668_vm4, %v5408_v43  ;;  %v6093_v43 = vld [vmem:[#allocation2 + $0x99] sm:$0xff] }
 0x341   :  { %12611 = vmatprep.mubr.msk.f32.mxu1 %vm2668_vm4, %v5410_v10 }
 0x343   :  { %12388 = vmatmul.mubr.msk.f32.gmra.mrb[42].mxu0 %vm2668_vm4, %v5409_v40  ;;  %v16949_v40 = vld [vmem:[#allocation2 + $0x92] sm:$0xff] }
 0x344   :  { %12612 = vmatmul.mubr.msk.f32.gmra.mrb[10].mxu1 %vm2668_vm4, %v5411_v56  ;;  %12390 = vmatprep.mubr.msk.f32.mxu0 %vm2668_vm4, %v5410_v10  ;;  %v6094_v10 = vld [vmem:[#allocation2 + $0xa9] sm:$0xff] }
 0x345   :  { %12614 = vmatprep.mubr.msk.f32.mxu1 %vm2668_vm4, %v5412_v19 }
 0x347   :  { %12391 = vmatmul.mubr.msk.f32.gmra.mrb[44].mxu0 %vm2668_vm4, %v5411_v56  ;;  %v16954_v56 = vld [vmem:[#allocation2 + $0x9a] sm:$0xff] }
 0x348   :  { %12615 = vmatmul.mubr.msk.f32.gmra.mrb[12].mxu1 %vm2668_vm4, %v5413_v32  ;;  %12393 = vmatprep.mubr.msk.f32.mxu0 %vm2668_vm4, %v5412_v19  ;;  %v6095_v19 = vld [vmem:[#allocation2 + $0xb1] sm:$0xff] }
 0x349   :  { %12617 = vmatprep.mubr.msk.f32.mxu1 %vm2668_vm4, %v5414_v60 }
 0x34b   :  { %12394 = vmatmul.mubr.msk.f32.gmra.mrb[46].mxu0 %vm2668_vm4, %v5413_v32  ;;  %v16959_v32 = vld [vmem:[#allocation2 + $0xaa] sm:$0xff] }
 0x34c   :  { %12618 = vmatmul.mubr.msk.f32.gmra.mrb[14].mxu1 %vm2668_vm4, %v5415_v55  ;;  %12396 = vmatprep.mubr.msk.f32.mxu0 %vm2668_vm4, %v5414_v60  ;;  %v6096_v60 = vld [vmem:[#allocation2 + $0xc1] sm:$0xff] }
 0x34d   :  { %12620 = vmatprep.mubr.msk.f32.mxu1 %vm2668_vm4, %v5416_v63 }
 0x34f   :  { %12397 = vmatmul.mubr.msk.f32.gmra.mrb[48].mxu0 %vm2668_vm4, %v5415_v55  ;;  %v16964_v55 = vld [vmem:[#allocation2 + $0xb2] sm:$0xff] }
 0x350   :  { %12621 = vmatmul.mubr.msk.f32.gmra.mrb[16].mxu1 %vm2668_vm4, %v5417_v15  ;;  %12399 = vmatprep.mubr.msk.f32.mxu0 %vm2668_vm4, %v5416_v63  ;;  %v6097_v63 = vld [vmem:[#allocation2 + $0xc9] sm:$0xff] }
 0x351   :  { %12623 = vmatprep.mubr.msk.f32.mxu1 %vm2668_vm4, %v5418_v9 }
 0x353   :  { %12400 = vmatmul.mubr.msk.f32.gmra.mrb[50].mxu0 %vm2668_vm4, %v5417_v15  ;;  %v16969_v15 = vld [vmem:[#allocation2 + $0xc2] sm:$0xff] }
 0x354   :  { %12624 = vmatmul.mubr.msk.f32.gmra.mrb[18].mxu1 %vm2668_vm4, %v5419_v48  ;;  %12402 = vmatprep.mubr.msk.f32.mxu0 %vm2668_vm4, %v5418_v9  ;;  %v6098_v9 = vld [vmem:[#allocation2 + $0xd9] sm:$0xff] }
 0x355   :  { %12626 = vmatprep.mubr.msk.f32.mxu1 %vm2668_vm4, %v5420_v49 }
 0x357   :  { %12403 = vmatmul.mubr.msk.f32.gmra.mrb[52].mxu0 %vm2668_vm4, %v5419_v48  ;;  %v16974_v48 = vld [vmem:[#allocation2 + $0xca] sm:$0xff] }
 0x358   :  { %12627 = vmatmul.mubr.msk.f32.gmra.mrb[20].mxu1 %vm2668_vm4, %v5421_v45  ;;  %12405 = vmatprep.mubr.msk.f32.mxu0 %vm2668_vm4, %v5420_v49  ;;  %v6099_v49 = vld [vmem:[#allocation2 + $0xe1] sm:$0xff] }
 0x359   :  { %12629 = vmatprep.mubr.msk.f32.mxu1 %vm2668_vm4, %v5422_v23 }
 0x35b   :  { %12406 = vmatmul.mubr.msk.f32.gmra.mrb[54].mxu0 %vm2668_vm4, %v5421_v45  ;;  %v16979_v45 = vld [vmem:[#allocation2 + $0xda] sm:$0xff] }
 0x35c   :  { %12630 = vmatmul.mubr.msk.f32.gmra.mrb[22].mxu1 %vm2668_vm4, %v5423_v62  ;;  %12408 = vmatprep.mubr.msk.f32.mxu0 %vm2668_vm4, %v5422_v23  ;;  %v6100_v23 = vld [vmem:[#allocation2 + $0xf1] sm:$0xff] }
 0x35d   :  { %12632 = vmatprep.mubr.msk.f32.mxu1 %vm2668_vm4, %v5424_v14 }
 0x35f   :  { %12409 = vmatmul.mubr.msk.f32.gmra.mrb[56].mxu0 %vm2668_vm4, %v5423_v62  ;;  %v16984_v62 = vld [vmem:[#allocation2 + $0xe2] sm:$0xff] }
 0x360   :  { %12633 = vmatmul.mubr.msk.f32.gmra.mrb[24].mxu1 %vm2668_vm4, %v5425_v1  ;;  %12411 = vmatprep.mubr.msk.f32.mxu0 %vm2668_vm4, %v5424_v14  ;;  %v6101_v14 = vld [vmem:[#allocation2 + $0xf9] sm:$0xff] }
 0x361   :  { %12635 = vmatprep.mubr.msk.f32.mxu1 %vm2668_vm4, %v5426_v4 }
 0x363   :  { %12412 = vmatmul.mubr.msk.f32.gmra.mrb[58].mxu0 %vm2668_vm4, %v5425_v1  ;;  %v16989_v1 = vld [vmem:[#allocation2 + $0xf2] sm:$0xff] }
 0x364   :  { %12636 = vmatmul.mubr.msk.f32.gmra.mrb[26].mxu1 %vm2668_vm4, %v5427_v0  ;;  %12414 = vmatprep.mubr.msk.f32.mxu0 %vm2668_vm4, %v5426_v4  ;;  %v6102_v4 = vld [vmem:[#allocation2 + $0x109] sm:$0xff] }
 0x365   :  { %12638 = vmatprep.mubr.msk.f32.mxu1 %vm2668_vm4, %v5428_v18 }
 0x367   :  { %12415 = vmatmul.mubr.msk.f32.gmra.mrb[60].mxu0 %vm2668_vm4, %v5427_v0  ;;  %v16994_v0 = vld [vmem:[#allocation2 + $0xfa] sm:$0xff] }
 0x368   :  { %12639 = vmatmul.mubr.msk.f32.gmra.mrb[28].mxu1 %vm2668_vm4, %v5429_v47  ;;  %12417 = vmatprep.mubr.msk.f32.mxu0 %vm2668_vm4, %v5428_v18  ;;  %v6103_v18 = vld [vmem:[#allocation2 + $0x111] sm:$0xff] }
 0x369   :  { %12641 = vmatprep.mubr.msk.f32.mxu1 %vm2668_vm4, %v5430_v16  ;;  %v6104_v16 = vld [vmem:[#allocation2 + $0x121] sm:$0xff] }
 0x36b   :  { %12418 = vmatmul.mubr.msk.f32.gmra.mrb[62].mxu0 %vm2668_vm4, %v5429_v47  ;;  %v16999_v47 = vld [vmem:[#allocation2 + $0x10a] sm:$0xff] }
 0x36c   :  { %12642 = vmatmul.mubr.msk.f32.gmra.mrb[30].mxu1 %vm2668_vm4, %v5431_v7  ;;  %12436 = vmatprep.mubr.msk.f32.mxu0 %vm2668_vm4, %v4654_v46  ;;  %v17004_v46 = vld [vmem:[#allocation2 + $0x112] sm:$0xff]  ;;  %v6105_v7 = vld [vmem:[#allocation2 + $0x129] sm:$0xff] }
 0x36d   :  { %12660 = vmatprep.mubr.msk.f32.mxu1 %vm2668_vm4, %v6082_v3  ;;  %v17014_v3 = vld [vmem:[#allocation2 + $0x12a] sm:$0xff] }
 0x36f   :  { %12437 = vmatmul.mubr.msk.f32.vlgmr.msra.gmra.mrb[0].mxu0 %vm2668_vm4, %v4655_v12  ;;  %v6107_v12 = vld [vmem:[#allocation2 + $0x141] sm:$0xff] }
 0x370   :  { %12661 = vmatmul.mubr.msk.f32.vlgmr.msra.gmra.mrb[32].mxu1 %vm2668_vm4, %v6083_v36  ;;  %12439 = vmatprep.mubr.msk.f32.mxu0 %vm2668_vm4, %v16877_v44  ;;  %v6108_v36 = vld [vmem:[#allocation2 + $0x151] sm:$0xff] }
 0x371   :  { %13332 = vmatpush3.bf16.msra.mxu1 %v16748_v50  ;;  %12663 = vmatprep.mubr.msk.f32.mxu1 %vm2668_vm4, %v6084_v6  ;;  %v10595_v50 = vld [vmem:[%s18038_s3 + $0x170] sm:$0xff] }
 0x372   :  { %13334 = vmatprep.subr.bf16.mxu1 %v13333_v34  ;;  %v13341_v59 = vpack.c.bf16 %v10596_v21, %v10595_v50  ;;  %v17032_v6 = vld [vmem:[#allocation2 + $0x152] sm:$0xff]  ;;  %v17048_v50 = vld [vmem:[#allocation2 + $0x16a] sm:$0xff]  ;;  %v17050_v21 = vld [vmem:[#allocation2 + $0x181] sm:$0xff] }
 0x373   :  { %12440 = vmatmul.mubr.msk.f32.gmra.mrb[2].mxu0 %vm2668_vm4, %v16889_v53 }
 0x374   :  { %12664 = vmatmul.mubr.msk.f32.gmra.mrb[34].mxu1 %vm2668_vm4, %v6085_v57  ;;  %12442 = vmatprep.mubr.msk.f32.mxu0 %vm2668_vm4, %v16891_v41  ;;  %v17034_v57 = vld [vmem:[#allocation2 + $0x169] sm:$0xff] }
 0x375   :  { %12666 = vmatprep.mubr.msk.f32.mxu1 %vm2668_vm4, %v6086_v35  ;;  %13336 = vmatpush3.bf16.msra.mxu1 %v13333_v34  ;;  %v17019_v34 = vld [vmem:[#allocation2 + $0x13a] sm:$0xff]  ;;  %v17042_v35 = vld [vmem:[#allocation2 + $0x171] sm:$0xff] }
 0x376   :  { %13338 = vmatprep.subr.bf16.mxu1 %v13337_v33 }
 0x377   :  { %12443 = vmatmul.mubr.msk.f32.gmra.mrb[4].mxu0 %vm2668_vm4, %v16905_v39 }
 0x378   :  { %12667 = vmatmul.mubr.msk.f32.gmra.mrb[36].mxu1 %vm2668_vm4, %v6087_v37  ;;  %12445 = vmatprep.mubr.msk.f32.mxu0 %vm2668_vm4, %v16907_v42  ;;  %v17056_v37 = vld [vmem:[#allocation2 + $0x172] sm:$0xff] }
 0x379   :  { %12669 = vmatprep.mubr.msk.f32.mxu1 %vm2668_vm4, %v6088_v11  ;;  %13340 = vmatpush3.bf16.msra.mxu1 %v13337_v33  ;;  %v17040_v33 = vld [vmem:[#allocation2 + $0x15a] sm:$0xff]  ;;  %v6114_v11 = vld [vmem:[#allocation2 + $0x1c9] sm:$0xff] }
 0x37a   :  { %13342 = vmatprep.subr.bf16.mxu1 %v13341_v59 }
 0x37b   :  { %12446 = vmatmul.mubr.msk.f32.gmra.mrb[6].mxu0 %vm2668_vm4, %v16921_v17 }
 0x37c   :  { %12670 = vmatmul.mubr.msk.f32.gmra.mrb[38].mxu1 %vm2668_vm4, %v6089_v31  ;;  %12448 = vmatprep.mubr.msk.f32.mxu0 %vm2668_vm4, %v16928_v25  ;;  %v17070_v31 = vld [vmem:[#allocation2 + $0x1e9] sm:$0xff] }
 0x37d   :  { %12672 = vmatprep.mubr.msk.f32.mxu1 %vm2668_vm4, %v6090_v26  ;;  %13344 = vmatpush3.bf16.msra.mxu1 %v13341_v59  ;;  %v17058_v59 = vld [vmem:[#allocation2 + $0x189] sm:$0xff]  ;;  %v17074_v26 = vld [vmem:[#allocation2 + $0x1f9] sm:$0xff] }
 0x37e   :  { %13346 = vmatprep.subr.bf16.mxu1 %v16923_v8 }
 0x37f   :  { %12449 = vmatmul.mubr.msk.f32.gmra.mrb[8].mxu0 %vm2668_vm4, %v16933_v13 }
 0x380   :  { %12673 = vmatmul.mubr.msk.f32.gmra.mrb[40].mxu1 %vm2668_vm4, %v6091_v27  ;;  %12451 = vmatprep.mubr.msk.f32.mxu0 %vm2668_vm4, %v16939_v30  ;;  %v17078_v27 = vld [vmem:[#allocation2 + $0x201] sm:$0xff] }
 0x381   :  { %12675 = vmatprep.mubr.msk.f32.mxu1 %vm2668_vm4, %v6092_v28  ;;  %v17082_v28 = vld [vmem:[#allocation2 + $0x211] sm:$0xff] }
 0x383   :  { %12452 = vmatmul.mubr.msk.f32.gmra.mrb[10].mxu0 %vm2668_vm4, %v16944_v29 }
 0x384   :  { %12676 = vmatmul.mubr.msk.f32.gmra.mrb[42].mxu1 %vm2668_vm4, %v6093_v43  ;;  %12454 = vmatprep.mubr.msk.f32.mxu0 %vm2668_vm4, %v16949_v40  ;;  %v17086_v43 = vld [vmem:[#allocation2 + $0x219] sm:$0xff] }
 0x385   :  { %12678 = vmatprep.mubr.msk.f32.mxu1 %vm2668_vm4, %v6094_v10  ;;  %v17090_v10 = vld [vmem:[#allocation2 + $0x229] sm:$0xff] }
 0x387   :  { %12455 = vmatmul.mubr.msk.f32.gmra.mrb[12].mxu0 %vm2668_vm4, %v16954_v56 }
 0x388   :  { %12679 = vmatmul.mubr.msk.f32.gmra.mrb[44].mxu1 %vm2668_vm4, %v6095_v19  ;;  %12457 = vmatprep.mubr.msk.f32.mxu0 %vm2668_vm4, %v16959_v32  ;;  %v17094_v19 = vld [vmem:[#allocation2 + $0x231] sm:$0xff] }
 0x389   :  { %12681 = vmatprep.mubr.msk.f32.mxu1 %vm2668_vm4, %v6096_v60  ;;  %v17098_v60 = vld [vmem:[#allocation2 + $0x241] sm:$0xff] }
 0x38b   :  { %12458 = vmatmul.mubr.msk.f32.gmra.mrb[14].mxu0 %vm2668_vm4, %v16964_v55 }
 0x38c   :  { %12682 = vmatmul.mubr.msk.f32.gmra.mrb[46].mxu1 %vm2668_vm4, %v6097_v63  ;;  %12460 = vmatprep.mubr.msk.f32.mxu0 %vm2668_vm4, %v16969_v15  ;;  %v17102_v63 = vld [vmem:[#allocation2 + $0x249] sm:$0xff] }
 0x38d   :  { %12684 = vmatprep.mubr.msk.f32.mxu1 %vm2668_vm4, %v6098_v9  ;;  %v17106_v9 = vld [vmem:[#allocation2 + $0x259] sm:$0xff] }
 0x38f   :  { %12461 = vmatmul.mubr.msk.f32.gmra.mrb[16].mxu0 %vm2668_vm4, %v16974_v48 }
 0x390   :  { %12685 = vmatmul.mubr.msk.f32.gmra.mrb[48].mxu1 %vm2668_vm4, %v6099_v49  ;;  %12463 = vmatprep.mubr.msk.f32.mxu0 %vm2668_vm4, %v16979_v45  ;;  %v17110_v49 = vld [vmem:[#allocation2 + $0x261] sm:$0xff] }
 0x391   :  { %12687 = vmatprep.mubr.msk.f32.mxu1 %vm2668_vm4, %v6100_v23  ;;  %v17114_v23 = vld [vmem:[#allocation2 + $0x271] sm:$0xff] }
 0x393   :  { %12464 = vmatmul.mubr.msk.f32.gmra.mrb[18].mxu0 %vm2668_vm4, %v16984_v62 }
 0x394   :  { %12688 = vmatmul.mubr.msk.f32.gmra.mrb[50].mxu1 %vm2668_vm4, %v6101_v14  ;;  %12466 = vmatprep.mubr.msk.f32.mxu0 %vm2668_vm4, %v16989_v1  ;;  %v17118_v14 = vld [vmem:[#allocation2 + $0x279] sm:$0xff] }
 0x395   :  { %12690 = vmatprep.mubr.msk.f32.mxu1 %vm2668_vm4, %v6102_v4  ;;  %v17122_v4 = vld [vmem:[#allocation2 + $0x289] sm:$0xff] }
 0x397   :  { %12467 = vmatmul.mubr.msk.f32.gmra.mrb[20].mxu0 %vm2668_vm4, %v16994_v0 }
 0x398   :  { %12691 = vmatmul.mubr.msk.f32.gmra.mrb[52].mxu1 %vm2668_vm4, %v6103_v18  ;;  %12469 = vmatprep.mubr.msk.f32.mxu0 %vm2668_vm4, %v16999_v47  ;;  %v17126_v18 = vld [vmem:[#allocation2 + $0x291] sm:$0xff] }
 0x399   :  { %12693 = vmatprep.mubr.msk.f32.mxu1 %vm2668_vm4, %v6104_v16  ;;  %v17130_v16 = vld [vmem:[#allocation2 + $0x2a1] sm:$0xff] }
 0x39b   :  { %12470 = vmatmul.mubr.msk.f32.gmra.mrb[22].mxu0 %vm2668_vm4, %v17004_v46 }
 0x39c   :  { %12694 = vmatmul.mubr.msk.f32.gmra.mrb[54].mxu1 %vm2668_vm4, %v6105_v7  ;;  %12472 = vmatprep.mubr.msk.f32.mxu0 %vm2668_vm4, %v17009_v22  ;;  %v17134_v7 = vld [vmem:[#allocation2 + $0x2a9] sm:$0xff] }
 0x39d   :  { %12696 = vmatprep.mubr.msk.f32.mxu1 %vm2668_vm4, %v6106_v20  ;;  %v17138_v20 = vld [vmem:[#allocation2 + $0x2b9] sm:$0xff] }
 0x39f   :  { %12473 = vmatmul.mubr.msk.f32.gmra.mrb[24].mxu0 %vm2668_vm4, %v17014_v3 }
 0x3a0   :  { %12697 = vmatmul.mubr.msk.f32.gmra.mrb[56].mxu1 %vm2668_vm4, %v6107_v12  ;;  %12475 = vmatprep.mubr.msk.f32.mxu0 %vm2668_vm4, %v17019_v34  ;;  %v17142_v12 = vld [vmem:[#allocation2 + $0x2c1] sm:$0xff] }
 0x3a1   :  { %12699 = vmatprep.mubr.msk.f32.mxu1 %vm2668_vm4, %v6108_v36  ;;  %v17146_v36 = vld [vmem:[#allocation2 + $0x2d1] sm:$0xff] }
 0x3a3   :  { %12476 = vmatmul.mubr.msk.f32.gmra.mrb[26].mxu0 %vm2668_vm4, %v17024_v24 }
 0x3a4   :  { %12700 = vmatmul.mubr.msk.f32.gmra.mrb[58].mxu1 %vm2668_vm4, %v17026_v38  ;;  %12478 = vmatprep.mubr.msk.f32.mxu0 %vm2668_vm4, %v17032_v6 }
 0x3a5   :  { %12702 = vmatprep.mubr.msk.f32.mxu1 %vm2668_vm4, %v17034_v57 }
 0x3a7   :  { %12479 = vmatmul.mubr.msk.f32.gmra.mrb[28].mxu0 %vm2668_vm4, %v17040_v33 }
 0x3a8   :  { %12703 = vmatmul.mubr.msk.f32.gmra.mrb[60].mxu1 %vm2668_vm4, %v17042_v35  ;;  %12481 = vmatprep.mubr.msk.f32.mxu0 %vm2668_vm4, %v17048_v50 }
 0x3a9   :  { %12705 = vmatprep.mubr.msk.f32.mxu1 %vm2668_vm4, %v17050_v21 }
 0x3ab   :  { %12482 = vmatmul.mubr.msk.f32.gmra.mrb[30].mxu0 %vm2668_vm4, %v17056_v37 }
 0x3ac   :  { %12706 = vmatmul.mubr.msk.f32.gmra.mrb[62].mxu1 %vm2668_vm4, %v17058_v59 }
 0x3ad   :  { %12708 = vmatprep.mubr.msk.f32.mxu1 %vm2668_vm4, %v6114_v11  ;;  %v17150_v11 = vld [vmem:[#allocation2 + $0x2d9] sm:$0xff] }
 0x3ae   :  { %18055 = vst [vmem:[#allocation6_spill] sm:$0xff] %v17150_v11 }
 0x3b0   :  { %12709 = vmatmul.mubr.msk.f32.gmra.mrb[0].mxu1 %vm2668_vm4, %v6115_v51  ;;  %v17154_v51 = vld [vmem:[#allocation2 + $0x2e9] sm:$0xff] }
 0x3b1   :  { %12711 = vmatprep.mubr.msk.f32.mxu1 %vm2668_vm4, %v17066_v58  ;;  %18056 = vst [vmem:[#allocation7_spill] sm:$0xff] %v17154_v51 }
 0x3b4   :  { %12712 = vmatmul.mubr.msk.f32.gmra.mrb[2].mxu1 %vm2668_vm4, %v17070_v31 }
 0x3b5   :  { %12714 = vmatprep.mubr.msk.f32.mxu1 %vm2668_vm4, %v17074_v26 }
 0x3b8   :  { %12715 = vmatmul.mubr.msk.f32.gmra.mrb[4].mxu1 %vm2668_vm4, %v17078_v27 }
 0x3b9   :  { %12717 = vmatprep.mubr.msk.f32.mxu1 %vm2668_vm4, %v17082_v28 }
 0x3bc   :  { %12718 = vmatmul.mubr.msk.f32.gmra.mrb[6].mxu1 %vm2668_vm4, %v17086_v43 }
 0x3bd   :  { %12720 = vmatprep.mubr.msk.f32.mxu1 %vm2668_vm4, %v17090_v10 }
 0x3c0   :  { %12721 = vmatmul.mubr.msk.f32.gmra.mrb[8].mxu1 %vm2668_vm4, %v17094_v19 }
 0x3c1   :  { %12723 = vmatprep.mubr.msk.f32.mxu1 %vm2668_vm4, %v17098_v60 }
 0x3c4   :  { %12724 = vmatmul.mubr.msk.f32.gmra.mrb[10].mxu1 %vm2668_vm4, %v17102_v63 }
 0x3c5   :  { %12726 = vmatprep.mubr.msk.f32.mxu1 %vm2668_vm4, %v17106_v9 }
 0x3c8   :  { %12727 = vmatmul.mubr.msk.f32.gmra.mrb[12].mxu1 %vm2668_vm4, %v17110_v49 }
 0x3c9   :  { %12729 = vmatprep.mubr.msk.f32.mxu1 %vm2668_vm4, %v17114_v23 }
 0x3cc   :  { %12730 = vmatmul.mubr.msk.f32.gmra.mrb[14].mxu1 %vm2668_vm4, %v17118_v14 }
 0x3cd   :  { %12732 = vmatprep.mubr.msk.f32.mxu1 %vm2668_vm4, %v17122_v4 }
 0x3d0   :  { %12733 = vmatmul.mubr.msk.f32.gmra.mrb[16].mxu1 %vm2668_vm4, %v17126_v18 }
 0x3d1   :  { %12735 = vmatprep.mubr.msk.f32.mxu1 %vm2668_vm4, %v17130_v16 }
 0x3d4   :  { %12736 = vmatmul.mubr.msk.f32.gmra.mrb[18].mxu1 %vm2668_vm4, %v17134_v7 }
 0x3d5   :  { %12738 = vmatprep.mubr.msk.f32.mxu1 %vm2668_vm4, %v17138_v20 }
 0x3d8   :  { %12739 = vmatmul.mubr.msk.f32.gmra.mrb[20].mxu1 %vm2668_vm4, %v17142_v12 }
 0x3d9   :  { %12741 = vmatprep.mubr.msk.f32.mxu1 %vm2668_vm4, %v17146_v36 }
 0x3dc   :  { %12742 = vmatmul.mubr.msk.f32.gmra.mrb[22].mxu1 %vm2668_vm4, %v17150_v11  ;;  %v17170_v11 = vld [vmem:[#allocation2 + $0x331] sm:$0xff] }
 0x3dd   :  { %12744 = vmatprep.mubr.msk.f32.mxu1 %vm2668_vm4, %v17154_v51  ;;  %18057 = vst [vmem:[#allocation8_spill] sm:$0xff] %v17170_v11  ;;  %v17174_v51 = vld [vmem:[#allocation2 + $0x339] sm:$0xff] }
 0x3de   :  { %18058 = vst [vmem:[#allocation9_spill] sm:$0xff] %v17174_v51 }
 0x3e0   :  { %12745 = vmatmul.mubr.msk.f32.gmra.mrb[24].mxu1 %vm2668_vm4, %v17158_v61 }
 0x3e1   :  { %12747 = vmatprep.mubr.msk.f32.mxu1 %vm2668_vm4, %v16683_v52  ;;  %v10663_v52 = vld [vmem:[%s18038_s3 + $0x190] sm:$0xff] }
 0x3e4   :  { %12748 = vmatmul.mubr.msk.f32.gmra.mrb[26].mxu1 %vm2668_vm4, %v16689_v2  ;;  %v10664_v2 = vld [vmem:[%s18038_s3 + $0x198] sm:$0xff] }
 0x3e5   :  { %12750 = vmatprep.mubr.msk.f32.mxu1 %vm2668_vm4, %v16694_v5  ;;  %v13349_v5 = vpack.c.bf16 %v10664_v2, %v10663_v52  ;;  %v10668_v52 = vld [vmem:[%s18038_s3 + $0x1b8] sm:$0xff]  ;;  %v17324_v2 = vld [vmem:[#allocation2 + $0x1e2] sm:$0xff] }
 0x3e8   :  { %12751 = vmatmul.mubr.msk.f32.gmra.mrb[28].mxu1 %vm2668_vm4, %v16702_v54  ;;  %v10665_v54 = vld [vmem:[%s18038_s3 + $0x1a0] sm:$0xff] }
 0x3e9   :  { %12753 = vmatprep.mubr.msk.f32.mxu1 %vm2668_vm4, %v17170_v11  ;;  %v10666_v11 = vld [vmem:[%s18038_s3 + $0x1a8] sm:$0xff] }
 0x3ec   :  { %12754 = vmatmul.mubr.msk.f32.gmra.mrb[30].mxu1 %vm2668_vm4, %v17174_v51  ;;  %v13353_v51 = vpack.c.bf16 %v10666_v11, %v10665_v54  ;;  %v17330_v54 = vld [vmem:[#allocation2 + $0x1ea] sm:$0xff] }
 0x3ed   :  { %12772 = vmatprep.mubr.msk.f32.mxu1 %vm2668_vm4, %v16877_v44  ;;  %v10667_v44 = vld [vmem:[%s18038_s3 + $0x1b0] sm:$0xff] }
 0x3f0   :  { %12773 = vmatmul.mubr.msk.f32.vlgmr.msra.gmra.mrb[32].mxu1 %vm2668_vm4, %v16889_v53  ;;  %v13357_v53 = vpack.c.bf16 %v10668_v52, %v10667_v44  ;;  %v17336_v52 = vld [vmem:[#allocation2 + $0x1fa] sm:$0xff] }
 0x3f1   :  { %13348 = vmatpush3.bf16.msra.mxu1 %v16923_v8  ;;  %12775 = vmatprep.mubr.msk.f32.mxu1 %vm2668_vm4, %v16891_v41  ;;  %v10733_v41 = vld [vmem:[%s18038_s3 + $0x1c0] sm:$0xff]  ;;  %v10734_v8 = vld [vmem:[%s18038_s3 + $0x1c8] sm:$0xff] }
 0x3f2   :  { %13350 = vmatprep.subr.bf16.mxu1 %v13349_v5 }
 0x3f4   :  { %12776 = vmatmul.mubr.msk.f32.gmra.mrb[34].mxu1 %vm2668_vm4, %v16905_v39  ;;  %v17217_v39 = vpack.c.bf16 %v10734_v8, %v10733_v41  ;;  %v17342_v41 = vld [vmem:[#allocation2 + $0x202] sm:$0xff] }
 0x3f5   :  { %12778 = vmatprep.mubr.msk.f32.mxu1 %vm2668_vm4, %v16907_v42  ;;  %13352 = vmatpush3.bf16.msra.mxu1 %v13349_v5 }
 0x3f6   :  { %13354 = vmatprep.subr.bf16.mxu1 %v13353_v51 }
 0x3f8   :  { %12779 = vmatmul.mubr.msk.f32.gmra.mrb[36].mxu1 %vm2668_vm4, %v16921_v17 }
 0x3f9   :  { %12781 = vmatprep.mubr.msk.f32.mxu1 %vm2668_vm4, %v16928_v25  ;;  %13356 = vmatpush3.bf16.msra.mxu1 %v13353_v51 }
 0x3fa   :  { %13358 = vmatprep.subr.bf16.mxu1 %v13357_v53 }
 0x3fc   :  { %12782 = vmatmul.mubr.msk.f32.gmra.mrb[38].mxu1 %vm2668_vm4, %v16933_v13 }
 0x3fd   :  { %12784 = vmatprep.mubr.msk.f32.mxu1 %vm2668_vm4, %v16939_v30  ;;  %13360 = vmatpush3.bf16.msra.mxu1 %v13357_v53 }
 0x3fe   :  { %13362 = vmatprep.subr.bf16.mxu1 %v17217_v39 }
 0x400   :  { %12785 = vmatmul.mubr.msk.f32.gmra.mrb[40].mxu1 %vm2668_vm4, %v16944_v29 }
 0x401   :  { %12787 = vmatprep.mubr.msk.f32.mxu1 %vm2668_vm4, %v16949_v40 }
 0x402   :  { %v17228_v42 = vpop.f32.mrb[32].mxu0 }
 0x403   :  { %18059 = vst [vmem:[#allocation10_spill] sm:$0xff] %v17228_v42  ;;  %v17232_v17 = vpop.f32.mrb[33].mxu0 }
 0x404   :  { %12788 = vmatmul.mubr.msk.f32.gmra.mrb[42].mxu1 %vm2668_vm4, %v16954_v56  ;;  %18060 = vst [vmem:[#allocation11_spill] sm:$0xff] %v17232_v17  ;;  %v17444_v17 = vld [vmem:[#allocation2 + $0x2d2] sm:$0xff] }
 0x405   :  { %12790 = vmatprep.mubr.msk.f32.mxu1 %vm2668_vm4, %v16959_v32 }
 0x406   :  { %v17236_v25 = vpop.f32.mrb[34].mxu0 }
 0x407   :  { %18061 = vst [vmem:[#allocation12_spill] sm:$0xff] %v17236_v25  ;;  %v17238_v13 = vpop.f32.mrb[35].mxu0 }
 0x408   :  { %18062 = vst [vmem:[#allocation13_spill] sm:$0xff] %v17238_v13  ;;  %12791 = vmatmul.mubr.msk.f32.gmra.mrb[44].mxu1 %vm2668_vm4, %v16964_v55  ;;  %v17438_v13 = vld [vmem:[#allocation2 + $0x2c2] sm:$0xff] }
 0x409   :  { %12793 = vmatprep.mubr.msk.f32.mxu1 %vm2668_vm4, %v16969_v15 }
 0x40a   :  { %v17244_v30 = vpop.f32.mrb[36].mxu0 }
 0x40b   :  { %18063 = vst [vmem:[#allocation14_spill] sm:$0xff] %v17244_v30  ;;  %v17246_v29 = vpop.f32.mrb[37].mxu0 }
 0x40c   :  { %18064 = vst [vmem:[#allocation15_spill] sm:$0xff] %v17246_v29  ;;  %12794 = vmatmul.mubr.msk.f32.gmra.mrb[46].mxu1 %vm2668_vm4, %v16974_v48  ;;  %v17432_v29 = vld [vmem:[#allocation2 + $0x2ba] sm:$0xff] }
 0x40d   :  { %12796 = vmatprep.mubr.msk.f32.mxu1 %vm2668_vm4, %v16979_v45 }
 0x40e   :  { %v17252_v40 = vpop.f32.mrb[38].mxu0 }
 0x40f   :  { %18065 = vst [vmem:[#allocation16_spill] sm:$0xff] %v17252_v40  ;;  %v17254_v56 = vpop.f32.mrb[39].mxu0 }
 0x410   :  { %18066 = vst [vmem:[#allocation17_spill] sm:$0xff] %v17254_v56  ;;  %12797 = vmatmul.mubr.msk.f32.gmra.mrb[48].mxu1 %vm2668_vm4, %v16984_v62  ;;  %v17426_v56 = vld [vmem:[#allocation2 + $0x2aa] sm:$0xff] }
 0x411   :  { %12799 = vmatprep.mubr.msk.f32.mxu1 %vm2668_vm4, %v16989_v1 }
 0x412   :  { %v17260_v32 = vpop.f32.mrb[40].mxu0 }
 0x413   :  { %18067 = vst [vmem:[#allocation18_spill] sm:$0xff] %v17260_v32  ;;  %v17262_v55 = vpop.f32.mrb[41].mxu0 }
 0x414   :  { %18068 = vst [vmem:[#allocation19_spill] sm:$0xff] %v17262_v55  ;;  %12800 = vmatmul.mubr.msk.f32.gmra.mrb[50].mxu1 %vm2668_vm4, %v16994_v0  ;;  %v17420_v55 = vld [vmem:[#allocation2 + $0x2a2] sm:$0xff] }
 0x415   :  { %12802 = vmatprep.mubr.msk.f32.mxu1 %vm2668_vm4, %v16999_v47 }
 0x416   :  { %v17268_v15 = vpop.f32.mrb[42].mxu0 }
 0x417   :  { %18069 = vst [vmem:[#allocation20_spill] sm:$0xff] %v17268_v15  ;;  %v17270_v48 = vpop.f32.mrb[43].mxu0 }
 0x418   :  { %18070 = vst [vmem:[#allocation21_spill] sm:$0xff] %v17270_v48  ;;  %12803 = vmatmul.mubr.msk.f32.gmra.mrb[52].mxu1 %vm2668_vm4, %v17004_v46  ;;  %v17414_v48 = vld [vmem:[#allocation2 + $0x292] sm:$0xff] }
 0x419   :  { %12805 = vmatprep.mubr.msk.f32.mxu1 %vm2668_vm4, %v17009_v22 }
 0x41a   :  { %v17276_v45 = vpop.f32.mrb[44].mxu0 }
 0x41b   :  { %18071 = vst [vmem:[#allocation22_spill] sm:$0xff] %v17276_v45  ;;  %v17278_v62 = vpop.f32.mrb[45].mxu0 }
 0x41c   :  { %18072 = vst [vmem:[#allocation23_spill] sm:$0xff] %v17278_v62  ;;  %12806 = vmatmul.mubr.msk.f32.gmra.mrb[54].mxu1 %vm2668_vm4, %v17014_v3  ;;  %v17408_v62 = vld [vmem:[#allocation2 + $0x28a] sm:$0xff] }
 0x41d   :  { %12808 = vmatprep.mubr.msk.f32.mxu1 %vm2668_vm4, %v17019_v34  ;;  %v17306_v34 = vld [vmem:[#allocation2 + $0x182] sm:$0xff] }
 0x41e   :  { %v17284_v1 = vpop.f32.mrb[46].mxu0 }
 0x41f   :  { %18073 = vst [vmem:[#allocation24_spill] sm:$0xff] %v17284_v1  ;;  %v17286_v0 = vpop.f32.mrb[47].mxu0 }
 0x420   :  { %18074 = vst [vmem:[#allocation25_spill] sm:$0xff] %v17286_v0  ;;  %12809 = vmatmul.mubr.msk.f32.gmra.mrb[56].mxu1 %vm2668_vm4, %v17024_v24  ;;  %v17402_v0 = vld [vmem:[#allocation2 + $0x27a] sm:$0xff] }
 0x421   :  { %12811 = vmatprep.mubr.msk.f32.mxu1 %vm2668_vm4, %v17032_v6  ;;  %v17312_v6 = vld [vmem:[#allocation2 + $0x18a] sm:$0xff] }
 0x422   :  { %v17292_v47 = vpop.f32.mrb[48].mxu0 }
 0x423   :  { %18075 = vst [vmem:[#allocation26_spill] sm:$0xff] %v17292_v47  ;;  %v17294_v46 = vpop.f32.mrb[49].mxu0 }
 0x424   :  { %18076 = vst [vmem:[#allocation27_spill] sm:$0xff] %v17294_v46  ;;  %12812 = vmatmul.mubr.msk.f32.gmra.mrb[58].mxu1 %vm2668_vm4, %v17040_v33  ;;  %v17396_v46 = vld [vmem:[#allocation2 + $0x272] sm:$0xff] }
 0x425   :  { %12814 = vmatprep.mubr.msk.f32.mxu1 %vm2668_vm4, %v17048_v50  ;;  %v6828_v50 = vld [vmem:[#allocation2 + $0x1ca] sm:$0xff] }
 0x426   :  { %v17300_v22 = vpop.f32.mrb[50].mxu0 }
 0x427   :  { %18077 = vst [vmem:[#allocation28_spill] sm:$0xff] %v17300_v22  ;;  %v17302_v3 = vpop.f32.mrb[51].mxu0 }
 0x428   :  { %18078 = vst [vmem:[#allocation29_spill] sm:$0xff] %v17302_v3  ;;  %12815 = vmatmul.mubr.msk.f32.gmra.mrb[60].mxu1 %vm2668_vm4, %v17056_v37  ;;  %v6829_v37 = vld [vmem:[#allocation2 + $0x1d2] sm:$0xff]  ;;  %v17390_v3 = vld [vmem:[#allocation2 + $0x262] sm:$0xff] }
 0x429   :  { %12817 = vmatprep.mubr.msk.f32.mxu1 %vm2668_vm4, %v17306_v34 }
 0x42a   :  { %v17310_v24 = vpop.f32.mrb[52].mxu0 }
 0x42b   :  { %18079 = vst [vmem:[#allocation30_spill] sm:$0xff] %v17310_v24  ;;  %v17314_v33 = vpop.f32.mrb[53].mxu0 }
 0x42c   :  { %18080 = vst [vmem:[#allocation31_spill] sm:$0xff] %v17314_v33  ;;  %12818 = vmatmul.mubr.msk.f32.gmra.mrb[62].mxu1 %vm2668_vm4, %v17312_v6 }
 0x42d   :  { %12820 = vmatprep.mubr.msk.f32.mxu1 %vm2668_vm4, %v6828_v50  ;;  %v17348_v50 = vld [vmem:[#allocation2 + $0x212] sm:$0xff] }
 0x42e   :  { %v17319_v11 = vpop.f32.mrb[54].mxu0 }
 0x42f   :  { %18081 = vst [vmem:[#allocation32_spill] sm:$0xff] %v17319_v11  ;;  %v17321_v51 = vpop.f32.mrb[55].mxu0 }
 0x430   :  { %18082 = vst [vmem:[#allocation33_spill] sm:$0xff] %v17321_v51  ;;  %12821 = vmatmul.mubr.msk.f32.gmra.mrb[0].mxu1 %vm2668_vm4, %v6829_v37  ;;  %v17366_v51 = vld [vmem:[#allocation2 + $0x232] sm:$0xff] }
 0x431   :  { %12823 = vmatprep.mubr.msk.f32.mxu1 %vm2668_vm4, %v17324_v2 }
 0x432   :  { %v17328_v5 = vpop.f32.mrb[56].mxu0 }
 0x433   :  { %18083 = vst [vmem:[#allocation34_spill] sm:$0xff] %v17328_v5  ;;  %v17332_v44 = vpop.f32.mrb[57].mxu0 }
 0x434   :  { %18084 = vst [vmem:[#allocation35_spill] sm:$0xff] %v17332_v44  ;;  %12824 = vmatmul.mubr.msk.f32.gmra.mrb[2].mxu1 %vm2668_vm4, %v17330_v54  ;;  %v17354_v44 = vld [vmem:[#allocation2 + $0x21a] sm:$0xff] }
 0x435   :  { %12826 = vmatprep.mubr.msk.f32.mxu1 %vm2668_vm4, %v17336_v52 }
 0x436   :  { %v17340_v53 = vpop.f32.mrb[58].mxu0 }
 0x437   :  { %18085 = vst [vmem:[#allocation36_spill] sm:$0xff] %v17340_v53  ;;  %v17344_v8 = vpop.f32.mrb[59].mxu0  ;;  %v17360_v53 = vld [vmem:[#allocation2 + $0x22a] sm:$0xff] }
 0x438   :  { %18086 = vst [vmem:[#allocation37_spill] sm:$0xff] %v17344_v8  ;;  %12827 = vmatmul.mubr.msk.f32.gmra.mrb[4].mxu1 %vm2668_vm4, %v17342_v41 }
 0x439   :  { %12829 = vmatprep.mubr.msk.f32.mxu1 %vm2668_vm4, %v17348_v50 }
 0x43a   :  { %v17352_v37 = vpop.f32.mrb[60].mxu0 }
 0x43b   :  { %18087 = vst [vmem:[#allocation38_spill] sm:$0xff] %v17352_v37  ;;  %v17356_v5 = vpop.f32.mrb[61].mxu0  ;;  %v17372_v37 = vld [vmem:[#allocation2 + $0x242] sm:$0xff] }
 0x43c   :  { %18088 = vst [vmem:[#allocation39_spill] sm:$0xff] %v17356_v5  ;;  %12830 = vmatmul.mubr.msk.f32.gmra.mrb[6].mxu1 %vm2668_vm4, %v17354_v44  ;;  %v17376_v5 = vld [vmem:[#allocation2 + $0x24a] sm:$0xff] }
 0x43d   :  { %12832 = vmatprep.mubr.msk.f32.mxu1 %vm2668_vm4, %v17360_v53 }
 0x43e   :  { %v17364_v8 = vpop.f32.mrb[62].mxu0 }
 0x43f   :  { %18089 = vst [vmem:[#allocation40_spill] sm:$0xff] %v17364_v8  ;;  %v17368_v11 = vpop.f32.mrb[63].mxu0  ;;  %v17382_v8 = vld [vmem:[#allocation2 + $0x25a] sm:$0xff] }
 0x440   :  { %18090 = vst [vmem:[#allocation41_spill] sm:$0xff] %v17368_v11  ;;  %12833 = vmatmul.mubr.msk.f32.gmra.mrb[8].mxu1 %vm2668_vm4, %v17366_v51 }
 0x441   :  { %12835 = vmatprep.mubr.msk.f32.mxu1 %vm2668_vm4, %v17372_v37 }
 0x442   :  { %v17378_v33 = vpop.f32.mrb[0].mxu0 }
 0x443   :  { %18091 = vst [vmem:[#allocation42_spill] sm:$0xff] %v17378_v33  ;;  %v17384_v24 = vpop.f32.mrb[1].mxu0 }
 0x444   :  { %12836 = vmatmul.mubr.msk.f32.gmra.mrb[10].mxu1 %vm2668_vm4, %v17376_v5  ;;  %18092 = vst [vmem:[#allocation43_spill] sm:$0xff] %v17384_v24  ;;  %v17498_v24 = vld [vmem:[#allocation2 + $0x33a] sm:$0xff] }
 0x445   :  { %12838 = vmatprep.mubr.msk.f32.mxu1 %vm2668_vm4, %v17382_v8  ;;  %18118 = vst [vmem:[#allocation69_spill] sm:$0xff] %v17498_v24 }
 0x446   :  { %v17388_v11 = vpop.f32.mrb[2].mxu0 }
 0x447   :  { %18093 = vst [vmem:[#allocation44_spill] sm:$0xff] %v17388_v11  ;;  %v17392_v22 = vpop.f32.mrb[3].mxu0 }
 0x448   :  { %18094 = vst [vmem:[#allocation45_spill] sm:$0xff] %v17392_v22  ;;  %12839 = vmatmul.mubr.msk.f32.gmra.mrb[12].mxu1 %vm2668_vm4, %v17390_v3  ;;  %v17486_v22 = vld [vmem:[#allocation2 + $0x322] sm:$0xff] }
 0x449   :  { %12841 = vmatprep.mubr.msk.f32.mxu1 %vm2668_vm4, %v17396_v46  ;;  %18114 = vst [vmem:[#allocation65_spill] sm:$0xff] %v17486_v22 }
 0x44a   :  { %v17400_v47 = vpop.f32.mrb[4].mxu0 }
 0x44b   :  { %18095 = vst [vmem:[#allocation46_spill] sm:$0xff] %v17400_v47  ;;  %v17404_v1 = vpop.f32.mrb[5].mxu0 }
 0x44c   :  { %18096 = vst [vmem:[#allocation47_spill] sm:$0xff] %v17404_v1  ;;  %12842 = vmatmul.mubr.msk.f32.gmra.mrb[14].mxu1 %vm2668_vm4, %v17402_v0  ;;  %v17474_v1 = vld [vmem:[#allocation2 + $0x30a] sm:$0xff] }
 0x44d   :  { %12844 = vmatprep.mubr.msk.f32.mxu1 %vm2668_vm4, %v17408_v62  ;;  %18110 = vst [vmem:[#allocation61_spill] sm:$0xff] %v17474_v1 }
 0x44e   :  { %v17412_v45 = vpop.f32.mrb[6].mxu0 }
 0x44f   :  { %18097 = vst [vmem:[#allocation48_spill] sm:$0xff] %v17412_v45  ;;  %v17416_v15 = vpop.f32.mrb[7].mxu0 }
 0x450   :  { %18098 = vst [vmem:[#allocation49_spill] sm:$0xff] %v17416_v15  ;;  %12845 = vmatmul.mubr.msk.f32.gmra.mrb[16].mxu1 %vm2668_vm4, %v17414_v48  ;;  %v17462_v15 = vld [vmem:[#allocation2 + $0x2f2] sm:$0xff] }
 0x451   :  { %12847 = vmatprep.mubr.msk.f32.mxu1 %vm2668_vm4, %v17420_v55  ;;  %18106 = vst [vmem:[#allocation57_spill] sm:$0xff] %v17462_v15 }
 0x452   :  { %v17424_v32 = vpop.f32.mrb[8].mxu0 }
 0x453   :  { %18099 = vst [vmem:[#allocation50_spill] sm:$0xff] %v17424_v32  ;;  %v17428_v40 = vpop.f32.mrb[9].mxu0 }
 0x454   :  { %18100 = vst [vmem:[#allocation51_spill] sm:$0xff] %v17428_v40  ;;  %12848 = vmatmul.mubr.msk.f32.gmra.mrb[18].mxu1 %vm2668_vm4, %v17426_v56  ;;  %v17450_v40 = vld [vmem:[#allocation2 + $0x2da] sm:$0xff] }
 0x455   :  { %12850 = vmatprep.mubr.msk.f32.mxu1 %vm2668_vm4, %v17432_v29 }
 0x456   :  { %v17436_v30 = vpop.f32.mrb[10].mxu0 }
 0x457   :  { %18101 = vst [vmem:[#allocation52_spill] sm:$0xff] %v17436_v30  ;;  %v17440_v25 = vpop.f32.mrb[11].mxu0  ;;  %v17456_v30 = vld [vmem:[#allocation2 + $0x2ea] sm:$0xff] }
 0x458   :  { %18102 = vst [vmem:[#allocation53_spill] sm:$0xff] %v17440_v25  ;;  %12851 = vmatmul.mubr.msk.f32.gmra.mrb[20].mxu1 %vm2668_vm4, %v17438_v13 }
 0x459   :  { %12853 = vmatprep.mubr.msk.f32.mxu1 %vm2668_vm4, %v17444_v17 }
 0x45a   :  { %v17448_v42 = vpop.f32.mrb[12].mxu0 }
 0x45b   :  { %18103 = vst [vmem:[#allocation54_spill] sm:$0xff] %v17448_v42  ;;  %v17452_v32 = vpop.f32.mrb[13].mxu0  ;;  %v17468_v42 = vld [vmem:[#allocation2 + $0x302] sm:$0xff] }
 0x45c   :  { %18104 = vst [vmem:[#allocation55_spill] sm:$0xff] %v17452_v32  ;;  %12854 = vmatmul.mubr.msk.f32.gmra.mrb[22].mxu1 %vm2668_vm4, %v17450_v40  ;;  %18108 = vst [vmem:[#allocation59_spill] sm:$0xff] %v17468_v42 }
 0x45d   :  { %12856 = vmatprep.mubr.msk.f32.mxu1 %vm2668_vm4, %v17456_v30 }
 0x45e   :  { %v17460_v25 = vpop.f32.mrb[14].mxu0 }
 0x45f   :  { %18105 = vst [vmem:[#allocation56_spill] sm:$0xff] %v17460_v25  ;;  %v17464_v45 = vpop.f32.mrb[15].mxu0  ;;  %v17480_v25 = vld [vmem:[#allocation2 + $0x31a] sm:$0xff] }
 0x460   :  { %18107 = vst [vmem:[#allocation58_spill] sm:$0xff] %v17464_v45  ;;  %12857 = vmatmul.mubr.msk.f32.gmra.mrb[24].mxu1 %vm2668_vm4, %v17462_v15  ;;  %18112 = vst [vmem:[#allocation63_spill] sm:$0xff] %v17480_v25 }
 0x461   :  { %12859 = vmatprep.mubr.msk.f32.mxu1 %vm2668_vm4, %v17468_v42  ;;  %v10738_v42 = vld [vmem:[%s18038_s3 + $0x1e8] sm:$0xff] }
 0x462   :  { %v17472_v32 = vpop.f32.mrb[16].mxu0 }
 0x463   :  { %18109 = vst [vmem:[#allocation60_spill] sm:$0xff] %v17472_v32  ;;  %v17476_v47 = vpop.f32.mrb[17].mxu0  ;;  %v17492_v32 = vld [vmem:[#allocation2 + $0x332] sm:$0xff] }
 0x464   :  { %18111 = vst [vmem:[#allocation62_spill] sm:$0xff] %v17476_v47  ;;  %12860 = vmatmul.mubr.msk.f32.gmra.mrb[26].mxu1 %vm2668_vm4, %v17474_v1  ;;  %18116 = vst [vmem:[#allocation67_spill] sm:$0xff] %v17492_v32  ;;  %v10737_v1 = vld [vmem:[%s18038_s3 + $0x1e0] sm:$0xff] }
 0x465   :  { %12862 = vmatprep.mubr.msk.f32.mxu1 %vm2668_vm4, %v17480_v25  ;;  %v7512_v25 = vld [vmem:[#allocation2 + $0x38] sm:$0xff] }
 0x466   :  { %v17484_v45 = vpop.f32.mrb[18].mxu0 }
 0x467   :  { %18113 = vst [vmem:[#allocation64_spill] sm:$0xff] %v17484_v45  ;;  %v17488_v11 = vpop.f32.mrb[19].mxu0  ;;  %v10735_v45 = vld [vmem:[%s18038_s3 + $0x1d0] sm:$0xff] }
 0x468   :  { %18115 = vst [vmem:[#allocation66_spill] sm:$0xff] %v17488_v11  ;;  %12863 = vmatmul.mubr.msk.f32.gmra.mrb[28].mxu1 %vm2668_vm4, %v17486_v22  ;;  %v10736_v11 = vld [vmem:[%s18038_s3 + $0x1d8] sm:$0xff]  ;;  %v7511_v22 = vld [vmem:[#allocation2 + $0x30] sm:$0xff] }
 0x469   :  { %12865 = vmatprep.mubr.msk.f32.mxu1 %vm2668_vm4, %v17492_v32  ;;  %v13365_v32 = vpack.c.bf16 %v10736_v11, %v10735_v45  ;;  %v13369_v45 = vpack.c.bf16 %v10738_v42, %v10737_v1  ;;  %v7514_v11 = vld [vmem:[#allocation2 + $0x50] sm:$0xff]  ;;  %v7516_v1 = vld [vmem:[#allocation2 + $0x68] sm:$0xff] }
 0x46a   :  { %v17496_v47 = vpop.f32.mrb[20].mxu0 }
 0x46b   :  { %18117 = vst [vmem:[#allocation68_spill] sm:$0xff] %v17496_v47  ;;  %v17506_v33 = vpop.f32.mrb[21].mxu0 }
 0x46c   :  { %18119 = vst [vmem:[#allocation70_spill] sm:$0xff] %v17506_v33  ;;  %12866 = vmatmul.mubr.msk.f32.gmra.mrb[30].mxu1 %vm2668_vm4, %v17498_v24  ;;  %v7513_v33 = vld [vmem:[#allocation2 + $0x48] sm:$0xff] }
 0x46d   :  { %12884 = vmatprep.mubr.msk.f32.mxu1 %vm2668_vm4, %v7511_v22 }
 0x46e   :  { %v17511_v47 = vpop.f32.mrb[22].mxu0 }
 0x46f   :  { %18120 = vst [vmem:[#allocation71_spill] sm:$0xff] %v17511_v47  ;;  %v17519_v15 = vpop.f32.mrb[23].mxu0  ;;  %v10739_v47 = vld [vmem:[%s18038_s3 + $0x1f0] sm:$0xff] }
 0x470   :  { %18121 = vst [vmem:[#allocation72_spill] sm:$0xff] %v17519_v15  ;;  %12885 = vmatmul.mubr.msk.f32.vlgmr.msra.gmra.mrb[32].mxu1 %vm2668_vm4, %v7512_v25  ;;  %v10740_v15 = vld [vmem:[%s18038_s3 + $0x1f8] sm:$0xff] }
 0x471   :  { %13364 = vmatpush3.bf16.msra.mxu1 %v17217_v39  ;;  %12887 = vmatprep.mubr.msk.f32.mxu1 %vm2668_vm4, %v7513_v33  ;;  %v7515_v39 = vld [vmem:[#allocation2 + $0x60] sm:$0xff]  ;;  %v13373_v42 = vpack.c.bf16 %v10740_v15, %v10739_v47 }
 0x472   :  { %13366 = vmatprep.subr.bf16.mxu1 %v13365_v32  ;;  %v17524_v22 = vpop.f32.mrb[24].mxu0  ;;  %v10805_v33 = vld [vmem:[%s18038_s3 + $0x200] sm:$0xff] }
 0x473   :  { %18122 = vst [vmem:[#allocation73_spill] sm:$0xff] %v17524_v22  ;;  %v17532_v24 = vpop.f32.mrb[25].mxu0  ;;  %v10806_v22 = vld [vmem:[%s18038_s3 + $0x208] sm:$0xff]  ;;  %v7518_v47 = vld [vmem:[#allocation2 + $0x80] sm:$0xff] }
 0x474   :  { %18123 = vst [vmem:[#allocation74_spill] sm:$0xff] %v17532_v24  ;;  %12888 = vmatmul.mubr.msk.f32.gmra.mrb[34].mxu1 %vm2668_vm4, %v7514_v11  ;;  %v7517_v11 = vld [vmem:[#allocation2 + $0x78] sm:$0xff] }
 0x475   :  { %12890 = vmatprep.mubr.msk.f32.mxu1 %vm2668_vm4, %v7515_v39  ;;  %13368 = vmatpush3.bf16.msra.mxu1 %v13365_v32  ;;  %v17548_v32 = vpack.c.bf16 %v10806_v22, %v10805_v33  ;;  %v7521_v22 = vld [vmem:[#allocation2 + $0xa8] sm:$0xff]  ;;  %v7522_v33 = vld [vmem:[#allocation2 + $0xb0] sm:$0xff] }
 0x476   :  { %13370 = vmatprep.subr.bf16.mxu1 %v13369_v45  ;;  %v17536_v25 = vpop.f32.mrb[26].mxu0 }
 0x477   :  { %18124 = vst [vmem:[#allocation75_spill] sm:$0xff] %v17536_v25  ;;  %v17544_v24 = vpop.f32.mrb[27].mxu0  ;;  %v7519_v25 = vld [vmem:[#allocation2 + $0x90] sm:$0xff] }
 0x478   :  { %12891 = vmatmul.mubr.msk.f32.gmra.mrb[36].mxu1 %vm2668_vm4, %v7516_v1 }
 0x479   :  { %12893 = vmatprep.mubr.msk.f32.mxu1 %vm2668_vm4, %v7517_v11  ;;  %13372 = vmatpush3.bf16.msra.mxu1 %v13369_v45  ;;  %v7520_v11 = vld [vmem:[#allocation2 + $0x98] sm:$0xff] }
 0x47a   :  { %13374 = vmatprep.subr.bf16.mxu1 %v13373_v42  ;;  %v17550_v15 = vpop.f32.mrb[28].mxu0 }
 0x47b   :  { %18125 = vst [vmem:[#allocation76_spill] sm:$0xff] %v17550_v15  ;;  %v17552_v39 = vpop.f32.mrb[29].mxu0  ;;  %v8229_v15 = vld [vmem:[#allocation2 + $0x61] sm:$0xff] }
 0x47c   :  { %18126 = vst [vmem:[#allocation77_spill] sm:$0xff] %v17552_v39  ;;  %12894 = vmatmul.mubr.msk.f32.gmra.mrb[38].mxu1 %vm2668_vm4, %v7518_v47  ;;  %v7523_v47 = vld [vmem:[#allocation2 + $0xc0] sm:$0xff]  ;;  %v8227_v39 = vld [vmem:[#allocation2 + $0x49] sm:$0xff] }
 0x47d   :  { %12896 = vmatprep.mubr.msk.f32.mxu1 %vm2668_vm4, %v7519_v25  ;;  %13376 = vmatpush3.bf16.msra.mxu1 %v13373_v42  ;;  %v7524_v25 = vld [vmem:[#allocation2 + $0xc8] sm:$0xff]  ;;  %v7525_v42 = vld [vmem:[#allocation2 + $0xd8] sm:$0xff] }
 0x47e   :  { %13378 = vmatprep.subr.bf16.mxu1 %v17548_v32  ;;  %v17557_v1 = vpop.f32.mrb[30].mxu0 }
 0x47f   :  { %18127 = vst [vmem:[#allocation78_spill] sm:$0xff] %v17557_v1  ;;  %v17559_v45 = vpop.f32.mrb[31].mxu0  ;;  %v7526_v1 = vld [vmem:[#allocation2 + $0xe0] sm:$0xff] }
 0x480   :  { %18128 = vst [vmem:[#allocation79_spill] sm:$0xff] %v17559_v45  ;;  %12897 = vmatmul.mubr.msk.f32.gmra.mrb[40].mxu1 %vm2668_vm4, %v7520_v11  ;;  %v7527_v45 = vld [vmem:[#allocation2 + $0xf0] sm:$0xff]  ;;  %v7528_v11 = vld [vmem:[#allocation2 + $0xf8] sm:$0xff] }
 0x481   :  { %12899 = vmatprep.mubr.msk.f32.mxu1 %vm2668_vm4, %v7521_v22  ;;  %v7529_v22 = vld [vmem:[#allocation2 + $0x108] sm:$0xff] }
 0x484   :  { %12900 = vmatmul.mubr.msk.f32.gmra.mrb[42].mxu1 %vm2668_vm4, %v7522_v33  ;;  %v7530_v33 = vld [vmem:[#allocation2 + $0x110] sm:$0xff] }
 0x485   :  { %12902 = vmatprep.mubr.msk.f32.mxu1 %vm2668_vm4, %v7523_v47  ;;  %v7531_v47 = vld [vmem:[#allocation2 + $0x120] sm:$0xff] }
 0x488   :  { %12903 = vmatmul.mubr.msk.f32.gmra.mrb[44].mxu1 %vm2668_vm4, %v7524_v25  ;;  %v7532_v25 = vld [vmem:[#allocation2 + $0x128] sm:$0xff] }
 0x489   :  { %12905 = vmatprep.mubr.msk.f32.mxu1 %vm2668_vm4, %v7525_v42  ;;  %v7533_v42 = vld [vmem:[#allocation2 + $0x138] sm:$0xff] }
 0x48c   :  { %12906 = vmatmul.mubr.msk.f32.gmra.mrb[46].mxu1 %vm2668_vm4, %v7526_v1  ;;  %v7534_v1 = vld [vmem:[#allocation2 + $0x140] sm:$0xff] }
 0x48d   :  { %12908 = vmatprep.mubr.msk.f32.mxu1 %vm2668_vm4, %v7527_v45  ;;  %v7535_v45 = vld [vmem:[#allocation2 + $0x150] sm:$0xff] }
 0x490   :  { %12909 = vmatmul.mubr.msk.f32.gmra.mrb[48].mxu1 %vm2668_vm4, %v7528_v11  ;;  %v7536_v11 = vld [vmem:[#allocation2 + $0x158] sm:$0xff] }
 0x491   :  { %12911 = vmatprep.mubr.msk.f32.mxu1 %vm2668_vm4, %v7529_v22  ;;  %v7537_v22 = vld [vmem:[#allocation2 + $0x168] sm:$0xff] }
 0x494   :  { %12912 = vmatmul.mubr.msk.f32.gmra.mrb[50].mxu1 %vm2668_vm4, %v7530_v33  ;;  %v7538_v33 = vld [vmem:[#allocation2 + $0x170] sm:$0xff] }
 0x495   :  { %12914 = vmatprep.mubr.msk.f32.mxu1 %vm2668_vm4, %v7531_v47  ;;  %v7539_v47 = vld [vmem:[#allocation2 + $0x180] sm:$0xff] }
 0x498   :  { %12915 = vmatmul.mubr.msk.f32.gmra.mrb[52].mxu1 %vm2668_vm4, %v7532_v25  ;;  %v7541_v25 = vld [vmem:[#allocation2 + $0x198] sm:$0xff] }
 0x499   :  { %12917 = vmatprep.mubr.msk.f32.mxu1 %vm2668_vm4, %v7533_v42  ;;  %v7540_v42 = vld [vmem:[#allocation2 + $0x188] sm:$0xff] }
 0x49c   :  { %12918 = vmatmul.mubr.msk.f32.gmra.mrb[54].mxu1 %vm2668_vm4, %v7534_v1  ;;  %v7542_v1 = vld [vmem:[#allocation2 + $0x1a0] sm:$0xff] }
 0x49d   :  { %12920 = vmatprep.mubr.msk.f32.mxu1 %vm2668_vm4, %v7535_v45  ;;  %v7543_v45 = vld [vmem:[#allocation2 + $0x1e0] sm:$0xff] }
 0x4a0   :  { %12921 = vmatmul.mubr.msk.f32.gmra.mrb[56].mxu1 %vm2668_vm4, %v7536_v11  ;;  %v7544_v11 = vld [vmem:[#allocation2 + $0x1e8] sm:$0xff] }
 0x4a1   :  { %12923 = vmatprep.mubr.msk.f32.mxu1 %vm2668_vm4, %v7537_v22  ;;  %v7545_v22 = vld [vmem:[#allocation2 + $0x1f8] sm:$0xff] }
 0x4a4   :  { %12924 = vmatmul.mubr.msk.f32.gmra.mrb[58].mxu1 %vm2668_vm4, %v7538_v33  ;;  %v7546_v33 = vld [vmem:[#allocation2 + $0x200] sm:$0xff] }
 0x4a5   :  { %12926 = vmatprep.mubr.msk.f32.mxu1 %vm2668_vm4, %v7539_v47  ;;  %v7547_v47 = vld [vmem:[#allocation2 + $0x210] sm:$0xff] }
 0x4a8   :  { %12927 = vmatmul.mubr.msk.f32.gmra.mrb[60].mxu1 %vm2668_vm4, %v7540_v42  ;;  %v7548_v42 = vld [vmem:[#allocation2 + $0x218] sm:$0xff] }
 0x4a9   :  { %12929 = vmatprep.mubr.msk.f32.mxu1 %vm2668_vm4, %v7541_v25  ;;  %v7549_v25 = vld [vmem:[#allocation2 + $0x228] sm:$0xff] }
 0x4ac   :  { %12930 = vmatmul.mubr.msk.f32.gmra.mrb[62].mxu1 %vm2668_vm4, %v7542_v1  ;;  %v7550_v1 = vld [vmem:[#allocation2 + $0x230] sm:$0xff] }
 0x4ad   :  { %12932 = vmatprep.mubr.msk.f32.mxu1 %vm2668_vm4, %v7543_v45  ;;  %v7551_v45 = vld [vmem:[#allocation2 + $0x240] sm:$0xff] }
 0x4b0   :  { %12933 = vmatmul.mubr.msk.f32.gmra.mrb[0].mxu1 %vm2668_vm4, %v7544_v11  ;;  %v7552_v11 = vld [vmem:[#allocation2 + $0x248] sm:$0xff] }
 0x4b1   :  { %12935 = vmatprep.mubr.msk.f32.mxu1 %vm2668_vm4, %v7545_v22  ;;  %v7553_v22 = vld [vmem:[#allocation2 + $0x258] sm:$0xff] }
 0x4b4   :  { %12936 = vmatmul.mubr.msk.f32.gmra.mrb[2].mxu1 %vm2668_vm4, %v7546_v33  ;;  %v7554_v33 = vld [vmem:[#allocation2 + $0x260] sm:$0xff] }
 0x4b5   :  { %12938 = vmatprep.mubr.msk.f32.mxu1 %vm2668_vm4, %v7547_v47  ;;  %v7555_v47 = vld [vmem:[#allocation2 + $0x270] sm:$0xff] }
 0x4b8   :  { %12939 = vmatmul.mubr.msk.f32.gmra.mrb[4].mxu1 %vm2668_vm4, %v7548_v42  ;;  %v7556_v42 = vld [vmem:[#allocation2 + $0x278] sm:$0xff] }
 0x4b9   :  { %12941 = vmatprep.mubr.msk.f32.mxu1 %vm2668_vm4, %v7549_v25  ;;  %v7557_v25 = vld [vmem:[#allocation2 + $0x288] sm:$0xff] }
 0x4bc   :  { %12942 = vmatmul.mubr.msk.f32.gmra.mrb[6].mxu1 %vm2668_vm4, %v7550_v1  ;;  %v7558_v1 = vld [vmem:[#allocation2 + $0x290] sm:$0xff] }
 0x4bd   :  { %12944 = vmatprep.mubr.msk.f32.mxu1 %vm2668_vm4, %v7551_v45  ;;  %v7559_v45 = vld [vmem:[#allocation2 + $0x2a0] sm:$0xff] }
 0x4c0   :  { %12945 = vmatmul.mubr.msk.f32.gmra.mrb[8].mxu1 %vm2668_vm4, %v7552_v11  ;;  %v7560_v11 = vld [vmem:[#allocation2 + $0x2a8] sm:$0xff] }
 0x4c1   :  { %12947 = vmatprep.mubr.msk.f32.mxu1 %vm2668_vm4, %v7553_v22  ;;  %v7561_v22 = vld [vmem:[#allocation2 + $0x2b8] sm:$0xff] }
 0x4c4   :  { %12948 = vmatmul.mubr.msk.f32.gmra.mrb[10].mxu1 %vm2668_vm4, %v7554_v33  ;;  %v7562_v33 = vld [vmem:[#allocation2 + $0x2c0] sm:$0xff] }
 0x4c5   :  { %12950 = vmatprep.mubr.msk.f32.mxu1 %vm2668_vm4, %v7555_v47  ;;  %v7563_v47 = vld [vmem:[#allocation2 + $0x2d0] sm:$0xff] }
 0x4c8   :  { %12951 = vmatmul.mubr.msk.f32.gmra.mrb[12].mxu1 %vm2668_vm4, %v7556_v42  ;;  %v7564_v42 = vld [vmem:[#allocation2 + $0x2d8] sm:$0xff] }
 0x4c9   :  { %12953 = vmatprep.mubr.msk.f32.mxu1 %vm2668_vm4, %v7557_v25  ;;  %v7565_v25 = vld [vmem:[#allocation2 + $0x2e8] sm:$0xff] }
 0x4cc   :  { %12954 = vmatmul.mubr.msk.f32.gmra.mrb[14].mxu1 %vm2668_vm4, %v7558_v1  ;;  %v7566_v1 = vld [vmem:[#allocation2 + $0x2f0] sm:$0xff] }
 0x4cd   :  { %12956 = vmatprep.mubr.msk.f32.mxu1 %vm2668_vm4, %v7559_v45  ;;  %v7567_v45 = vld [vmem:[#allocation2 + $0x300] sm:$0xff] }
 0x4d0   :  { %12957 = vmatmul.mubr.msk.f32.gmra.mrb[16].mxu1 %vm2668_vm4, %v7560_v11  ;;  %v7568_v11 = vld [vmem:[#allocation2 + $0x308] sm:$0xff] }
 0x4d1   :  { %12959 = vmatprep.mubr.msk.f32.mxu1 %vm2668_vm4, %v7561_v22  ;;  %v7569_v22 = vld [vmem:[#allocation2 + $0x318] sm:$0xff] }
 0x4d4   :  { %12960 = vmatmul.mubr.msk.f32.gmra.mrb[18].mxu1 %vm2668_vm4, %v7562_v33  ;;  %v7570_v33 = vld [vmem:[#allocation2 + $0x320] sm:$0xff] }
 0x4d5   :  { %12962 = vmatprep.mubr.msk.f32.mxu1 %vm2668_vm4, %v7563_v47  ;;  %v7571_v47 = vld [vmem:[#allocation2 + $0x330] sm:$0xff] }
 0x4d8   :  { %12963 = vmatmul.mubr.msk.f32.gmra.mrb[20].mxu1 %vm2668_vm4, %v7564_v42  ;;  %v7573_v42 = vld [vmem:[#allocation2 + $0x348] sm:$0xff] }
 0x4d9   :  { %12965 = vmatprep.mubr.msk.f32.mxu1 %vm2668_vm4, %v7565_v25  ;;  %v7572_v25 = vld [vmem:[#allocation2 + $0x338] sm:$0xff] }
 0x4dc   :  { %12966 = vmatmul.mubr.msk.f32.gmra.mrb[22].mxu1 %vm2668_vm4, %v7566_v1  ;;  %v7574_v1 = vld [vmem:[#allocation2 + $0x350] sm:$0xff] }
 0x4dd   :  { %12968 = vmatprep.mubr.msk.f32.mxu1 %vm2668_vm4, %v7567_v45  ;;  %v10807_v45 = vld [vmem:[%s18038_s3 + $0x210] sm:$0xff] }
 0x4e0   :  { %12969 = vmatmul.mubr.msk.f32.gmra.mrb[24].mxu1 %vm2668_vm4, %v7568_v11  ;;  %v10808_v11 = vld [vmem:[%s18038_s3 + $0x218] sm:$0xff] }
 0x4e1   :  { %12971 = vmatprep.mubr.msk.f32.mxu1 %vm2668_vm4, %v7569_v22  ;;  %v8225_v22 = vld [vmem:[#allocation2 + $0x31] sm:$0xff] }
 0x4e4   :  { %12972 = vmatmul.mubr.msk.f32.gmra.mrb[26].mxu1 %vm2668_vm4, %v7570_v33  ;;  %v13381_v33 = vpack.c.bf16 %v10808_v11, %v10807_v45  ;;  %v10811_v45 = vld [vmem:[%s18038_s3 + $0x230] sm:$0xff]  ;;  %v10812_v11 = vld [vmem:[%s18038_s3 + $0x238] sm:$0xff] }
 0x4e5   :  { %12974 = vmatprep.mubr.msk.f32.mxu1 %vm2668_vm4, %v7571_v47  ;;  %v8226_v47 = vld [vmem:[#allocation2 + $0x39] sm:$0xff] }
 0x4e8   :  { %12975 = vmatmul.mubr.msk.f32.gmra.mrb[28].mxu1 %vm2668_vm4, %v7572_v25  ;;  %v10810_v25 = vld [vmem:[%s18038_s3 + $0x228] sm:$0xff] }
 0x4e9   :  { %12977 = vmatprep.mubr.msk.f32.mxu1 %vm2668_vm4, %v7573_v42  ;;  %v10809_v42 = vld [vmem:[%s18038_s3 + $0x220] sm:$0xff] }
 0x4ec   :  { %12978 = vmatmul.mubr.msk.f32.gmra.mrb[30].mxu1 %vm2668_vm4, %v7574_v1  ;;  %v13385_v1 = vpack.c.bf16 %v10810_v25, %v10809_v42  ;;  %v8232_v42 = vld [vmem:[#allocation2 + $0x81] sm:$0xff]  ;;  %v8233_v25 = vld [vmem:[#allocation2 + $0x91] sm:$0xff] }
 0x4ed   :  { %12996 = vmatprep.mubr.msk.f32.mxu1 %vm2668_vm4, %v8225_v22  ;;  %v8228_v22 = vld [vmem:[#allocation2 + $0x51] sm:$0xff] }
 0x4f0   :  { %12997 = vmatmul.mubr.msk.f32.vlgmr.msra.gmra.mrb[32].mxu1 %vm2668_vm4, %v8226_v47  ;;  %v8231_v47 = vld [vmem:[#allocation2 + $0x79] sm:$0xff] }
 0x4f1   :  { %13380 = vmatpush3.bf16.msra.mxu1 %v17548_v32  ;;  %12999 = vmatprep.mubr.msk.f32.mxu1 %vm2668_vm4, %v8227_v39  ;;  %v13389_v32 = vpack.c.bf16 %v10812_v11, %v10811_v45  ;;  %v8230_v39 = vld [vmem:[#allocation2 + $0x69] sm:$0xff]  ;;  %v8237_v45 = vld [vmem:[#allocation2 + $0xc1] sm:$0xff]  ;;  %v8239_v11 = vld [vmem:[#allocation2 + $0xd9] sm:$0xff] }
 0x4f2   :  { %13382 = vmatprep.subr.bf16.mxu1 %v13381_v33 }
 0x4f4   :  { %13000 = vmatmul.mubr.msk.f32.gmra.mrb[34].mxu1 %vm2668_vm4, %v8228_v22  ;;  %v8234_v22 = vld [vmem:[#allocation2 + $0x99] sm:$0xff] }
 0x4f5   :  { %13002 = vmatprep.mubr.msk.f32.mxu1 %vm2668_vm4, %v8229_v15  ;;  %13384 = vmatpush3.bf16.msra.mxu1 %v13381_v33  ;;  %v8235_v15 = vld [vmem:[#allocation2 + $0xa9] sm:$0xff]  ;;  %v8236_v33 = vld [vmem:[#allocation2 + $0xb1] sm:$0xff] }
 0x4f6   :  { %13386 = vmatprep.subr.bf16.mxu1 %v13385_v1 }
 0x4f8   :  { %13003 = vmatmul.mubr.msk.f32.gmra.mrb[36].mxu1 %vm2668_vm4, %v8230_v39  ;;  %v8240_v39 = vld [vmem:[#allocation2 + $0xe1] sm:$0xff] }
 0x4f9   :  { %13005 = vmatprep.mubr.msk.f32.mxu1 %vm2668_vm4, %v8231_v47  ;;  %13388 = vmatpush3.bf16.msra.mxu1 %v13385_v1  ;;  %v8238_v1 = vld [vmem:[#allocation2 + $0xc9] sm:$0xff]  ;;  %v8242_v47 = vld [vmem:[#allocation2 + $0xf9] sm:$0xff] }
 0x4fa   :  { %13390 = vmatprep.subr.bf16.mxu1 %v13389_v32 }
 0x4fc   :  { %13006 = vmatmul.mubr.msk.f32.gmra.mrb[38].mxu1 %vm2668_vm4, %v8232_v42  ;;  %v8243_v42 = vld [vmem:[#allocation2 + $0x109] sm:$0xff] }
 0x4fd   :  { %13008 = vmatprep.mubr.msk.f32.mxu1 %vm2668_vm4, %v8233_v25  ;;  %13392 = vmatpush3.bf16.msra.mxu1 %v13389_v32  ;;  %v8241_v32 = vld [vmem:[#allocation2 + $0xf1] sm:$0xff] }
 0x4fe   :  { %v8244_v25 = vld [vmem:[#allocation2 + $0x111] sm:$0xff] }
 0x500   :  { %13009 = vmatmul.mubr.msk.f32.gmra.mrb[40].mxu1 %vm2668_vm4, %v8234_v22  ;;  %v8245_v22 = vld [vmem:[#allocation2 + $0x121] sm:$0xff] }
 0x501   :  { %13011 = vmatprep.mubr.msk.f32.mxu1 %vm2668_vm4, %v8235_v15  ;;  %v8246_v15 = vld [vmem:[#allocation2 + $0x129] sm:$0xff] }
 0x504   :  { %13012 = vmatmul.mubr.msk.f32.gmra.mrb[42].mxu1 %vm2668_vm4, %v8236_v33  ;;  %v8247_v33 = vld [vmem:[#allocation2 + $0x139] sm:$0xff] }
 0x505   :  { %13014 = vmatprep.mubr.msk.f32.mxu1 %vm2668_vm4, %v8237_v45  ;;  %v8248_v45 = vld [vmem:[#allocation2 + $0x141] sm:$0xff] }
 0x508   :  { %13015 = vmatmul.mubr.msk.f32.gmra.mrb[44].mxu1 %vm2668_vm4, %v8238_v1  ;;  %v8249_v1 = vld [vmem:[#allocation2 + $0x151] sm:$0xff] }
 0x509   :  { %13017 = vmatprep.mubr.msk.f32.mxu1 %vm2668_vm4, %v8239_v11  ;;  %v8255_v11 = vld [vmem:[#allocation2 + $0x199] sm:$0xff] }
 0x50c   :  { %13018 = vmatmul.mubr.msk.f32.gmra.mrb[46].mxu1 %vm2668_vm4, %v8240_v39  ;;  %v8256_v39 = vld [vmem:[#allocation2 + $0x1a1] sm:$0xff] }
 0x50d   :  { %13020 = vmatprep.mubr.msk.f32.mxu1 %vm2668_vm4, %v8241_v32  ;;  %v8956_v32 = vld [vmem:[#allocation2 + $0xfa] sm:$0xff] }
 0x510   :  { %13021 = vmatmul.mubr.msk.f32.gmra.mrb[48].mxu1 %vm2668_vm4, %v8242_v47  ;;  %v8957_v47 = vld [vmem:[#allocation2 + $0x10a] sm:$0xff] }
 0x511   :  { %13023 = vmatprep.mubr.msk.f32.mxu1 %vm2668_vm4, %v8243_v42  ;;  %v8958_v42 = vld [vmem:[#allocation2 + $0x112] sm:$0xff] }
 0x514   :  { %13024 = vmatmul.mubr.msk.f32.gmra.mrb[50].mxu1 %vm2668_vm4, %v8244_v25  ;;  %v8959_v25 = vld [vmem:[#allocation2 + $0x122] sm:$0xff] }
 0x515   :  { %13026 = vmatprep.mubr.msk.f32.mxu1 %vm2668_vm4, %v8245_v22  ;;  %v8960_v22 = vld [vmem:[#allocation2 + $0x12a] sm:$0xff] }
 0x518   :  { %13027 = vmatmul.mubr.msk.f32.gmra.mrb[52].mxu1 %vm2668_vm4, %v8246_v15  ;;  %v8961_v15 = vld [vmem:[#allocation2 + $0x13a] sm:$0xff] }
 0x519   :  { %13029 = vmatprep.mubr.msk.f32.mxu1 %vm2668_vm4, %v8247_v33  ;;  %v8962_v33 = vld [vmem:[#allocation2 + $0x142] sm:$0xff] }
 0x51c   :  { %13030 = vmatmul.mubr.msk.f32.gmra.mrb[54].mxu1 %vm2668_vm4, %v8248_v45  ;;  %v8963_v45 = vld [vmem:[#allocation2 + $0x152] sm:$0xff] }
 0x51d   :  { %13032 = vmatprep.mubr.msk.f32.mxu1 %vm2668_vm4, %v8249_v1  ;;  %v8964_v1 = vld [vmem:[#allocation2 + $0x15a] sm:$0xff] }
 0x520   :  { %13033 = vmatmul.mubr.msk.f32.gmra.mrb[56].mxu1 %vm2668_vm4, %v17026_v38  ;;  %v18129_v38 = vld [vmem:[#allocation6_spill] sm:$0xff] }
 0x521   :  { %13035 = vmatprep.mubr.msk.f32.mxu1 %vm2668_vm4, %v17034_v57  ;;  %v18130_v57 = vld [vmem:[#allocation7_spill] sm:$0xff] }
 0x524   :  { %13036 = vmatmul.mubr.msk.f32.gmra.mrb[58].mxu1 %vm2668_vm4, %v17042_v35  ;;  %v8281_v35 = vld [vmem:[#allocation2 + $0x301] sm:$0xff] }
 0x525   :  { %13038 = vmatprep.mubr.msk.f32.mxu1 %vm2668_vm4, %v17050_v21  ;;  %v8282_v21 = vld [vmem:[#allocation2 + $0x309] sm:$0xff] }
 0x528   :  { %13039 = vmatmul.mubr.msk.f32.gmra.mrb[60].mxu1 %vm2668_vm4, %v17058_v59  ;;  %v8283_v59 = vld [vmem:[#allocation2 + $0x319] sm:$0xff] }
 0x529   :  { %13041 = vmatprep.mubr.msk.f32.mxu1 %vm2668_vm4, %v8255_v11  ;;  %v8965_v11 = vld [vmem:[#allocation2 + $0x16a] sm:$0xff] }
 0x52c   :  { %13042 = vmatmul.mubr.msk.f32.gmra.mrb[62].mxu1 %vm2668_vm4, %v8256_v39  ;;  %v8966_v39 = vld [vmem:[#allocation2 + $0x172] sm:$0xff] }
 0x52d   :  { %13044 = vmatprep.mubr.msk.f32.mxu1 %vm2668_vm4, %v17066_v58  ;;  %v8284_v58 = vld [vmem:[#allocation2 + $0x321] sm:$0xff] }
 0x530   :  { %13045 = vmatmul.mubr.msk.f32.gmra.mrb[0].mxu1 %vm2668_vm4, %v17070_v31  ;;  %v18131_v31 = vld [vmem:[#allocation8_spill] sm:$0xff] }
 0x531   :  { %13047 = vmatprep.mubr.msk.f32.mxu1 %vm2668_vm4, %v17074_v26  ;;  %v8287_v26 = vld [vmem:[#allocation2 + $0x349] sm:$0xff] }
 0x534   :  { %13048 = vmatmul.mubr.msk.f32.gmra.mrb[2].mxu1 %vm2668_vm4, %v17078_v27  ;;  %v18132_v27 = vld [vmem:[#allocation9_spill] sm:$0xff] }
 0x535   :  { %13050 = vmatprep.mubr.msk.f32.mxu1 %vm2668_vm4, %v17082_v28  ;;  %v8939_v28 = vld [vmem:[#allocation2 + $0x32] sm:$0xff] }
 0x538   :  { %13051 = vmatmul.mubr.msk.f32.gmra.mrb[4].mxu1 %vm2668_vm4, %v17086_v43  ;;  %v8940_v43 = vld [vmem:[#allocation2 + $0x3a] sm:$0xff] }
 0x539   :  { %13053 = vmatprep.mubr.msk.f32.mxu1 %vm2668_vm4, %v17090_v10  ;;  %v8941_v10 = vld [vmem:[#allocation2 + $0x4a] sm:$0xff] }
 0x53c   :  { %13054 = vmatmul.mubr.msk.f32.gmra.mrb[6].mxu1 %vm2668_vm4, %v17094_v19  ;;  %v8942_v19 = vld [vmem:[#allocation2 + $0x52] sm:$0xff] }
 0x53d   :  { %13056 = vmatprep.mubr.msk.f32.mxu1 %vm2668_vm4, %v17098_v60  ;;  %v8943_v60 = vld [vmem:[#allocation2 + $0x62] sm:$0xff] }
 0x540   :  { %13057 = vmatmul.mubr.msk.f32.gmra.mrb[8].mxu1 %vm2668_vm4, %v17102_v63  ;;  %v8944_v63 = vld [vmem:[#allocation2 + $0x6a] sm:$0xff] }
 0x541   :  { %13059 = vmatprep.mubr.msk.f32.mxu1 %vm2668_vm4, %v17106_v9  ;;  %v8945_v9 = vld [vmem:[#allocation2 + $0x7a] sm:$0xff] }
 0x544   :  { %13060 = vmatmul.mubr.msk.f32.gmra.mrb[10].mxu1 %vm2668_vm4, %v17110_v49  ;;  %v8946_v49 = vld [vmem:[#allocation2 + $0x82] sm:$0xff] }
 0x545   :  { %13062 = vmatprep.mubr.msk.f32.mxu1 %vm2668_vm4, %v17114_v23  ;;  %v8947_v23 = vld [vmem:[#allocation2 + $0x92] sm:$0xff] }
 0x548   :  { %13063 = vmatmul.mubr.msk.f32.gmra.mrb[12].mxu1 %vm2668_vm4, %v17118_v14  ;;  %v8948_v14 = vld [vmem:[#allocation2 + $0x9a] sm:$0xff] }
 0x549   :  { %13065 = vmatprep.mubr.msk.f32.mxu1 %vm2668_vm4, %v17122_v4  ;;  %v8949_v4 = vld [vmem:[#allocation2 + $0xaa] sm:$0xff] }
 0x54c   :  { %13066 = vmatmul.mubr.msk.f32.gmra.mrb[14].mxu1 %vm2668_vm4, %v17126_v18  ;;  %v8950_v18 = vld [vmem:[#allocation2 + $0xb2] sm:$0xff] }
 0x54d   :  { %13068 = vmatprep.mubr.msk.f32.mxu1 %vm2668_vm4, %v17130_v16  ;;  %v8951_v16 = vld [vmem:[#allocation2 + $0xc2] sm:$0xff] }
 0x550   :  { %13069 = vmatmul.mubr.msk.f32.gmra.mrb[16].mxu1 %vm2668_vm4, %v17134_v7  ;;  %v8952_v7 = vld [vmem:[#allocation2 + $0xca] sm:$0xff] }
 0x551   :  { %13071 = vmatprep.mubr.msk.f32.mxu1 %vm2668_vm4, %v17138_v20  ;;  %v8953_v20 = vld [vmem:[#allocation2 + $0xda] sm:$0xff] }
 0x554   :  { %13072 = vmatmul.mubr.msk.f32.gmra.mrb[18].mxu1 %vm2668_vm4, %v17142_v12  ;;  %v8954_v12 = vld [vmem:[#allocation2 + $0xe2] sm:$0xff] }
 0x555   :  { %13074 = vmatprep.mubr.msk.f32.mxu1 %vm2668_vm4, %v17146_v36  ;;  %v8955_v36 = vld [vmem:[#allocation2 + $0xf2] sm:$0xff] }
 0x558   :  { %13075 = vmatmul.mubr.msk.f32.gmra.mrb[20].mxu1 %vm2668_vm4, %v18129_v38  ;;  %v8969_v38 = vld [vmem:[#allocation2 + $0x19a] sm:$0xff] }
 0x559   :  { %13077 = vmatprep.mubr.msk.f32.mxu1 %vm2668_vm4, %v18130_v57  ;;  %v8970_v57 = vld [vmem:[#allocation2 + $0x1a2] sm:$0xff] }
 0x55c   :  { %13078 = vmatmul.mubr.msk.f32.gmra.mrb[22].mxu1 %vm2668_vm4, %v17158_v61  ;;  %v8288_v61 = vld [vmem:[#allocation2 + $0x351] sm:$0xff] }
 0x55d   :  { %13080 = vmatprep.mubr.msk.f32.mxu1 %vm2668_vm4, %v8281_v35 }
 0x560   :  { %13081 = vmatmul.mubr.msk.f32.gmra.mrb[24].mxu1 %vm2668_vm4, %v8282_v21  ;;  %v17864_v21 = vld [vmem:[%s18039_s4] ss:$0 sm:$0xff] }
 0x561   :  { %13083 = vmatprep.mubr.msk.f32.mxu1 %vm2668_vm4, %v8283_v59  ;;  %v18140_v59 = vld [vmem:[#allocation42_spill] sm:$0xff] }
 0x564   :  { %13084 = vmatmul.mubr.msk.f32.gmra.mrb[26].mxu1 %vm2668_vm4, %v8284_v58 }
 0x565   :  { %13086 = vmatprep.mubr.msk.f32.mxu1 %vm2668_vm4, %v18131_v31 }
 0x568   :  { %13087 = vmatmul.mubr.msk.f32.gmra.mrb[28].mxu1 %vm2668_vm4, %v18132_v27 }
 0x569   :  { %13089 = vmatprep.mubr.msk.f32.mxu1 %vm2668_vm4, %v8287_v26  ;;  %v18141_v26 = vld [vmem:[#allocation43_spill] sm:$0xff] }
 0x56c   :  { %13090 = vmatmul.mubr.msk.f32.gmra.mrb[30].mxu1 %vm2668_vm4, %v8288_v61 }
 0x56d   :  { %13108 = vmatprep.mubr.msk.f32.mxu1 %vm2668_vm4, %v8939_v28 }
 0x570   :  { %13109 = vmatmul.mubr.msk.f32.vlgmr.msra.gmra.mrb[32].mxu1 %vm2668_vm4, %v8940_v43 }
 0x571   :  { %13111 = vmatprep.mubr.msk.f32.mxu1 %vm2668_vm4, %v8941_v10 }
 0x574   :  { %13112 = vmatmul.mubr.msk.f32.gmra.mrb[34].mxu1 %vm2668_vm4, %v8942_v19  ;;  %v18142_v19 = vld [vmem:[#allocation44_spill] sm:$0xff] }
 0x575   :  { %13114 = vmatprep.mubr.msk.f32.mxu1 %vm2668_vm4, %v8943_v60 }
 0x578   :  { %13115 = vmatmul.mubr.msk.f32.gmra.mrb[36].mxu1 %vm2668_vm4, %v8944_v63 }
 0x579   :  { %13117 = vmatprep.mubr.msk.f32.mxu1 %vm2668_vm4, %v8945_v9 }
 0x57c   :  { %13118 = vmatmul.mubr.msk.f32.gmra.mrb[38].mxu1 %vm2668_vm4, %v8946_v49  ;;  %v18143_v49 = vld [vmem:[#allocation45_spill] sm:$0xff] }
 0x57d   :  { %13120 = vmatprep.mubr.msk.f32.mxu1 %vm2668_vm4, %v8947_v23 }
 0x580   :  { %13121 = vmatmul.mubr.msk.f32.gmra.mrb[40].mxu1 %vm2668_vm4, %v8948_v14 }
 0x581   :  { %13123 = vmatprep.mubr.msk.f32.mxu1 %vm2668_vm4, %v8949_v4 }
 0x584   :  { %13124 = vmatmul.mubr.msk.f32.gmra.mrb[42].mxu1 %vm2668_vm4, %v8950_v18 }
 0x585   :  { %13126 = vmatprep.mubr.msk.f32.mxu1 %vm2668_vm4, %v8951_v16 }
 0x588   :  { %13127 = vmatmul.mubr.msk.f32.gmra.mrb[44].mxu1 %vm2668_vm4, %v8952_v7  ;;  %v18144_v7 = vld [vmem:[#allocation46_spill] sm:$0xff] }
 0x589   :  { %13129 = vmatprep.mubr.msk.f32.mxu1 %vm2668_vm4, %v8953_v20 }
 0x58c   :  { %13130 = vmatmul.mubr.msk.f32.gmra.mrb[46].mxu1 %vm2668_vm4, %v8954_v12 }
 0x58d   :  { %13132 = vmatprep.mubr.msk.f32.mxu1 %vm2668_vm4, %v8955_v36 }
 0x590   :  { %13133 = vmatmul.mubr.msk.f32.gmra.mrb[48].mxu1 %vm2668_vm4, %v8956_v32  ;;  %v18145_v32 = vld [vmem:[#allocation47_spill] sm:$0xff] }
 0x591   :  { %13135 = vmatprep.mubr.msk.f32.mxu1 %vm2668_vm4, %v8957_v47 }
 0x594   :  { %13136 = vmatmul.mubr.msk.f32.gmra.mrb[50].mxu1 %vm2668_vm4, %v8958_v42 }
 0x595   :  { %13138 = vmatprep.mubr.msk.f32.mxu1 %vm2668_vm4, %v8959_v25 }
 0x598   :  { %13139 = vmatmul.mubr.msk.f32.gmra.mrb[52].mxu1 %vm2668_vm4, %v8960_v22 }
 0x599   :  { %13141 = vmatprep.mubr.msk.f32.mxu1 %vm2668_vm4, %v8961_v15 }
 0x59c   :  { %13142 = vmatmul.mubr.msk.f32.gmra.mrb[54].mxu1 %vm2668_vm4, %v8962_v33 }
 0x59d   :  { %13144 = vmatprep.mubr.msk.f32.mxu1 %vm2668_vm4, %v8963_v45  ;;  %v18146_v45 = vld [vmem:[#allocation48_spill] sm:$0xff] }
 0x5a0   :  { %13145 = vmatmul.mubr.msk.f32.gmra.mrb[56].mxu1 %vm2668_vm4, %v8964_v1 }
 0x5a1   :  { %13147 = vmatprep.mubr.msk.f32.mxu1 %vm2668_vm4, %v8965_v11 }
 0x5a4   :  { %13148 = vmatmul.mubr.msk.f32.gmra.mrb[58].mxu1 %vm2668_vm4, %v8966_v39 }
 0x5a5   :  { %13150 = vmatprep.mubr.msk.f32.mxu1 %vm2668_vm4, %v17306_v34 }
 0x5a8   :  { %13151 = vmatmul.mubr.msk.f32.gmra.mrb[60].mxu1 %vm2668_vm4, %v17312_v6  ;;  %v9867_v6 = vld [vmem:[%s18040_s5 + $0x10] sm:$0xff] }
 0x5a9   :  { %13153 = vmatprep.mubr.msk.f32.mxu1 %vm2668_vm4, %v8969_v38 }
 0x5ac   :  { %13154 = vmatmul.mubr.msk.f32.gmra.mrb[62].mxu1 %vm2668_vm4, %v8970_v57  ;;  %v18147_v57 = vld [vmem:[#allocation49_spill] sm:$0xff] }
 0x5ad   :  { %13156 = vmatprep.mubr.msk.f32.mxu1 %vm2668_vm4, %v17324_v2 }
 0x5b0   :  { %13157 = vmatmul.mubr.msk.f32.gmra.mrb[0].mxu1 %vm2668_vm4, %v17330_v54  ;;  %v9870_v54 = vld [vmem:[%s18040_s5 + $0x28] sm:$0xff] }
 0x5b1   :  { %13159 = vmatprep.mubr.msk.f32.mxu1 %vm2668_vm4, %v17336_v52  ;;  %v9871_v52 = vld [vmem:[%s18040_s5 + $0x30] sm:$0xff] }
 0x5b4   :  { %13160 = vmatmul.mubr.msk.f32.gmra.mrb[2].mxu1 %vm2668_vm4, %v17342_v41 }
 0x5b5   :  { %13162 = vmatprep.mubr.msk.f32.mxu1 %vm2668_vm4, %v17348_v50  ;;  %v9874_v50 = vld [vmem:[%s18040_s5 + $0x48] sm:$0xff] }
 0x5b8   :  { %13163 = vmatmul.mubr.msk.f32.gmra.mrb[4].mxu1 %vm2668_vm4, %v17354_v44 }
 0x5b9   :  { %13165 = vmatprep.mubr.msk.f32.mxu1 %vm2668_vm4, %v17360_v53  ;;  %v9872_v53 = vld [vmem:[%s18040_s5 + $0x38] sm:$0xff] }
 0x5ba   :  { %v13403_v41 = vpack.c.bf16 %v9872_v53, %v9871_v52  ;;  %v9875_v52 = vld [vmem:[%s18040_s5 + $0x50] sm:$0xff]  ;;  %v9876_v53 = vld [vmem:[%s18040_s5 + $0x58] sm:$0xff] }
 0x5bc   :  { %13166 = vmatmul.mubr.msk.f32.gmra.mrb[6].mxu1 %vm2668_vm4, %v17366_v51  ;;  %v9868_v51 = vld [vmem:[%s18040_s5 + $0x18] sm:$0xff] }
 0x5bd   :  { %13168 = vmatprep.mubr.msk.f32.mxu1 %vm2668_vm4, %v17372_v37  ;;  %v13397_v2 = vpack.c.bf16 %v9868_v51, %v9867_v6 }
 0x5c0   :  { %13169 = vmatmul.mubr.msk.f32.gmra.mrb[8].mxu1 %vm2668_vm4, %v17376_v5  ;;  %v9869_v5 = vld [vmem:[%s18040_s5 + $0x20] sm:$0xff] }
 0x5c1   :  { %13171 = vmatprep.mubr.msk.f32.mxu1 %vm2668_vm4, %v17382_v8  ;;  %v13400_v44 = vpack.c.bf16 %v9870_v54, %v9869_v5  ;;  %v9873_v8 = vld [vmem:[%s18040_s5 + $0x40] sm:$0xff] }
 0x5c2   :  { %v13406_v37 = vpack.c.bf16 %v9874_v50, %v9873_v8  ;;  %v18150_v8 = vld [vmem:[#allocation52_spill] sm:$0xff] }
 0x5c4   :  { %13172 = vmatmul.mubr.msk.f32.gmra.mrb[10].mxu1 %vm2668_vm4, %v17390_v3  ;;  %v13971_v3 = vmov 0.0|0.0  }
 0x5c5   :  { %13174 = vmatprep.mubr.msk.f32.mxu1 %vm2668_vm4, %v17396_v46  ;;  %v9866_v46 = vld [vmem:[%s18040_s5 + $0x8] sm:$0xff]  ;;  %13393 = vmatprep.subr.bf16.mxu0 %v13971_v3 }
 0x5c8   :  { %13175 = vmatmul.mubr.msk.f32.gmra.mrb[12].mxu1 %vm2668_vm4, %v17402_v0  ;;  %v9865_v0 = vld [vmem:[%s18040_s5] sm:$0xff] }
 0x5c9   :  { %13177 = vmatprep.mubr.msk.f32.mxu1 %vm2668_vm4, %v17408_v62  ;;  %v9002_v62 = vld [vmem:[#allocation2 + $0x352] sm:$0xff]  ;;  %v13394_v34 = vpack.c.bf16 %v9866_v46, %v9865_v0 }
 0x5cb   :  { %13395 = vmatpush3.bf16.msra.mxu0 %v13394_v34  ;;  %v18149_v34 = vld [vmem:[#allocation51_spill] sm:$0xff] }
 0x5cc   :  { %13178 = vmatmul.mubr.msk.f32.gmra.mrb[14].mxu1 %vm2668_vm4, %v17414_v48  ;;  %v18133_v48 = vld [vmem:[#allocation57_spill] sm:$0xff]  ;;  %13396 = vmatprep.subr.bf16.mxu0 %v13971_v3 }
 0x5cd   :  { %13180 = vmatprep.mubr.msk.f32.mxu1 %vm2668_vm4, %v17420_v55  ;;  %v18134_v55 = vld [vmem:[#allocation59_spill] sm:$0xff] }
 0x5cf   :  { %13398 = vmatpush3.bf16.msra.mxu0 %v13397_v2 }
 0x5d0   :  { %13181 = vmatmul.mubr.msk.f32.gmra.mrb[16].mxu1 %vm2668_vm4, %v17426_v56  ;;  %v18135_v56 = vld [vmem:[#allocation61_spill] sm:$0xff]  ;;  %13399 = vmatprep.subr.bf16.mxu0 %v13971_v3 }
 0x5d1   :  { %13183 = vmatprep.mubr.msk.f32.mxu1 %vm2668_vm4, %v17432_v29  ;;  %v18136_v29 = vld [vmem:[#allocation63_spill] sm:$0xff] }
 0x5d3   :  { %13401 = vmatpush3.bf16.msra.mxu0 %v13400_v44 }
 0x5d4   :  { %13184 = vmatmul.mubr.msk.f32.gmra.mrb[18].mxu1 %vm2668_vm4, %v17438_v13  ;;  %v18137_v13 = vld [vmem:[#allocation65_spill] sm:$0xff]  ;;  %13402 = vmatprep.subr.bf16.mxu0 %v13971_v3 }
 0x5d5   :  { %13186 = vmatprep.mubr.msk.f32.mxu1 %vm2668_vm4, %v17444_v17  ;;  %v18138_v17 = vld [vmem:[#allocation67_spill] sm:$0xff] }
 0x5d7   :  { %13404 = vmatpush3.bf16.msra.mxu0 %v13403_v41  ;;  %v9877_v41 = vld [vmem:[%s18040_s5 + $0x60] sm:$0xff] }
 0x5d8   :  { %13187 = vmatmul.mubr.msk.f32.gmra.mrb[20].mxu1 %vm2668_vm4, %v17450_v40  ;;  %v9001_v40 = vld [vmem:[#allocation2 + $0x34a] sm:$0xff]  ;;  %13405 = vmatprep.subr.bf16.mxu0 %v13971_v3 }
 0x5d9   :  { %13189 = vmatprep.mubr.msk.f32.mxu1 %vm2668_vm4, %v17456_v30  ;;  %v18139_v30 = vld [vmem:[#allocation69_spill] sm:$0xff] }
 0x5db   :  { %13407 = vmatpush3.bf16.msra.mxu0 %v13406_v37 }
 0x5dc   :  { %13190 = vmatmul.mubr.msk.f32.gmra.mrb[22].mxu1 %vm2668_vm4, %v18133_v48  ;;  %13408 = vmatprep.subr.bf16.mxu0 %v13971_v3 }
 0x5dd   :  { %13192 = vmatprep.mubr.msk.f32.mxu1 %vm2668_vm4, %v18134_v55 }
 0x5e0   :  { %13193 = vmatmul.mubr.msk.f32.gmra.mrb[24].mxu1 %vm2668_vm4, %v18135_v56 }
 0x5e1   :  { %13195 = vmatprep.mubr.msk.f32.mxu1 %vm2668_vm4, %v18136_v29 }
 0x5e4   :  { %13196 = vmatmul.mubr.msk.f32.gmra.mrb[26].mxu1 %vm2668_vm4, %v18137_v13 }
 0x5e5   :  { %13198 = vmatprep.mubr.msk.f32.mxu1 %vm2668_vm4, %v18138_v17 }
 0x5e8   :  { %13199 = vmatmul.mubr.msk.f32.gmra.mrb[28].mxu1 %vm2668_vm4, %v18139_v30 }
 0x5e9   :  { %13201 = vmatprep.mubr.msk.f32.mxu1 %vm2668_vm4, %v9001_v40  ;;  %v18148_v40 = vld [vmem:[#allocation50_spill] sm:$0xff] }
 0x5ec   :  { %13202 = vmatmul.mubr.msk.f32.gmra.mrb[30].mxu1 %vm2668_vm4, %v9002_v62 }
 0x643   :  { %v13110_v35 = vpop.f32.mrb[32].mxu1 }
 0x644   :  { %v13425_v58 = vadd.f32 %v13110_v35, %v18140_v59  ;;  %v9270_v31 = vpop.f32.mrb[33].mxu1  ;;  %v13409_v35 = vpack.c.bf16 %v9876_v53, %v9875_v52  ;;  %v9878_v59 = vld [vmem:[%s18040_s5 + $0x68] sm:$0xff] }
 0x645   :  { %v13426_v27 = vadd.f32 %v9270_v31, %v18141_v26  ;;  %v18160_v53 = vld [vmem:[#allocation66_spill] sm:$0xff] }
 0x646   :  { %v9661_v61 = vadd.f32 %v13425_v58, %v17864_v21  ;;  %v18151_v58 = vmov 0.0   ;;  %13410 = vmatpush3.bf16.msra.mxu0 %v13409_v35 }
 0x647   :  { %v9660_v28 = vadd.f32 %v13426_v27, %v17864_v21  ;;  %v13113_v43 = vpop.f32.mrb[34].mxu1  ;;  %13236 = vmatprep.mubr.msk.f32.mxu0 %vm13972_vm6, %v18151_v58  ;;  %v18152_v27 = vld [vmem:[#allocation53_spill] sm:$0xff]  ;;  %13411 = vmatprep.subr.bf16.mxu0 %v13971_v3  ;;  %v18161_v58 = vld [vmem:[#allocation68_spill] sm:$0xff] }
 0x648   :  { %v9725_v10 = vmax.f32 %v9661_v61, 0.0  ;;  %v13427_v60 = vadd.f32 %v13113_v43, %v18142_v19  ;;  %v9280_v63 = vpop.f32.mrb[35].mxu1 }
 0x649   :  { %v9724_v9 = vmax.f32 %v9660_v28, 0.0  ;;  %v13428_v23 = vadd.f32 %v9280_v63, %v18143_v49  ;;  %v13412_v28 = vpack.c.bf16 %v9878_v59, %v9877_v41  ;;  %v9880_v49 = vld [vmem:[%s18040_s5 + $0x78] sm:$0xff] }
 0x64a   :  { %v9663_v4 = vadd.f32 %v13427_v60, %v17864_v21 }
 0x64b   :  { %v9788_v14 = vadd.f32 %v9725_v10, %v9724_v9  ;;  %v9662_v18 = vadd.f32 %v13428_v23, %v17864_v21  ;;  %v13116_v16 = vpop.f32.mrb[36].mxu1  ;;  %v9879_v9 = vld [vmem:[%s18040_s5 + $0x70] sm:$0xff]  ;;  %v18153_v23 = vld [vmem:[#allocation54_spill] sm:$0xff]  ;;  %13413 = vmatpush3.bf16.msra.mxu0 %v13412_v28 }
 0x64c   :  { %v13429_v20 = vadd.f32 %v13116_v16, %v18144_v7  ;;  %v9290_v12 = vpop.f32.mrb[37].mxu1  ;;  %v9727_v42 = vmax.f32 %v9663_v4, 0.0  ;;  %v18154_v7 = vld [vmem:[#allocation55_spill] sm:$0xff]  ;;  %13414 = vmatprep.subr.bf16.mxu0 %v13971_v3  ;;  %v18162_v28 = vld [vmem:[#allocation70_spill] sm:$0xff] }
 0x64d   :  { %v9726_v36 = vmax.f32 %v9662_v18, 0.0  ;;  %v13430_v47 = vadd.f32 %v9290_v12, %v18145_v32  ;;  %v13415_v12 = vpack.c.bf16 %v9880_v49, %v9879_v9  ;;  %v18163_v49 = vld [vmem:[#allocation71_spill] sm:$0xff] }
 0x64e   :  { %v9665_v22 = vadd.f32 %v13429_v20, %v17864_v21 }
 0x64f   :  { %v9789_v25 = vadd.f32 %v9788_v14, %v9726_v36  ;;  %v9664_v15 = vadd.f32 %v13430_v47, %v17864_v21  ;;  %v13119_v33 = vpop.f32.mrb[38].mxu1  ;;  %13416 = vmatpush3.bf16.msra.mxu0 %v13415_v12 }
 0x650   :  { %v13431_v1 = vadd.f32 %v13119_v33, %v18146_v45  ;;  %v9300_v11 = vpop.f32.mrb[39].mxu1  ;;  %v9729_v56 = vmax.f32 %v9665_v22, 0.0  ;;  %v18155_v22 = vld [vmem:[#allocation56_spill] sm:$0xff] }
 0x651   :  { %v9728_v39 = vmax.f32 %v9664_v15, 0.0  ;;  %v9790_v38 = vadd.f32 %v9789_v25, %v9727_v42  ;;  %v13432_v48 = vadd.f32 %v9300_v11, %v18147_v57  ;;  %v18156_v11 = vld [vmem:[#allocation58_spill] sm:$0xff] }
 0x652   :  { %v9667_v55 = vadd.f32 %v13431_v1, %v17864_v21 }
 0x653   :  { %v9791_v29 = vadd.f32 %v9790_v38, %v9728_v39  ;;  %v9666_v13 = vadd.f32 %v13432_v48, %v17864_v21  ;;  %v13122_v17 = vpop.f32.mrb[40].mxu1 }
 0x654   :  { %v13433_v30 = vadd.f32 %v13122_v17, %v18148_v40  ;;  %v9310_v62 = vpop.f32.mrb[41].mxu1  ;;  %v9731_v51 = vmax.f32 %v9667_v55, 0.0 }
 0x655   :  { %v9730_v0 = vmax.f32 %v9666_v13, 0.0  ;;  %v9792_v46 = vadd.f32 %v9791_v29, %v9729_v56  ;;  %v13434_v6 = vadd.f32 %v9310_v62, %v18149_v34  ;;  %v18157_v29 = vld [vmem:[#allocation60_spill] sm:$0xff] }
 0x656   :  { %v9669_v5 = vadd.f32 %v13433_v30, %v17864_v21  ;;  %v18158_v30 = vld [vmem:[#allocation62_spill] sm:$0xff] }
 0x657   :  { %v9793_v2 = vadd.f32 %v9792_v46, %v9730_v0  ;;  %v9668_v54 = vadd.f32 %v13434_v6, %v17864_v21  ;;  %v13125_v44 = vpop.f32.mrb[42].mxu1 }
 0x658   :  { %v13435_v50 = vadd.f32 %v13125_v44, %v18150_v8  ;;  %v9320_v37 = vpop.f32.mrb[43].mxu1  ;;  %v9733_v43 = vmax.f32 %v9669_v5, 0.0 }
 0x659   :  { %v9732_v31 = vmax.f32 %v9668_v54, 0.0  ;;  %v9794_v26 = vadd.f32 %v9793_v2, %v9731_v51  ;;  %v13436_v61 = vadd.f32 %v9320_v37, %v18152_v27  ;;  %v18159_v2 = vld [vmem:[#allocation64_spill] sm:$0xff] }
 0x65a   :  { %v9671_v19 = vadd.f32 %v13435_v50, %v17864_v21 }
 0x65b   :  { %v9795_v10 = vadd.f32 %v9794_v26, %v9732_v31  ;;  %v9670_v60 = vadd.f32 %v13436_v61, %v17864_v21  ;;  %v13128_v63 = vpop.f32.mrb[44].mxu1 }
 0x65c   :  { %v13437_v14 = vadd.f32 %v13128_v63, %v18153_v23  ;;  %v9330_v4 = vpop.f32.mrb[45].mxu1  ;;  %v9735_v36 = vmax.f32 %v9671_v19, 0.0 }
 0x65d   :  { %v9734_v18 = vmax.f32 %v9670_v60, 0.0  ;;  %v9796_v16 = vadd.f32 %v9795_v10, %v9733_v43  ;;  %v13438_v20 = vadd.f32 %v9330_v4, %v18154_v7 }
 0x65e   :  { %v9673_v47 = vadd.f32 %v13437_v14, %v17864_v21 }
 0x65f   :  { %v9797_v32 = vadd.f32 %v9796_v16, %v9734_v18  ;;  %v9672_v42 = vadd.f32 %v13438_v20, %v17864_v21  ;;  %v13131_v25 = vpop.f32.mrb[46].mxu1  ;;  %v18164_v16 = vld [vmem:[#allocation72_spill] sm:$0xff] }
 0x660   :  { %v13439_v15 = vadd.f32 %v13131_v25, %v18155_v22  ;;  %v9340_v33 = vpop.f32.mrb[47].mxu1  ;;  %v9737_v38 = vmax.f32 %v9673_v47, 0.0 }
 0x661   :  { %v9736_v45 = vmax.f32 %v9672_v42, 0.0  ;;  %v9798_v1 = vadd.f32 %v9797_v32, %v9735_v36  ;;  %v13440_v39 = vadd.f32 %v9340_v33, %v18156_v11  ;;  %v18165_v42 = vld [vmem:[#allocation73_spill] sm:$0xff] }
 0x662   :  { %v9675_v48 = vadd.f32 %v13439_v15, %v17864_v21 }
 0x663   :  { %v9799_v57 = vadd.f32 %v9798_v1, %v9736_v45  ;;  %v9674_v55 = vadd.f32 %v13440_v39, %v17864_v21  ;;  %v13134_v56 = vpop.f32.mrb[48].mxu1  ;;  %v18166_v45 = vld [vmem:[#allocation74_spill] sm:$0xff] }
 0x664   :  { %v13441_v13 = vadd.f32 %v13134_v56, %v18157_v29  ;;  %v9350_v17 = vpop.f32.mrb[49].mxu1  ;;  %v9739_v0 = vmax.f32 %v9675_v48, 0.0 }
 0x665   :  { %v9738_v40 = vmax.f32 %v9674_v55, 0.0  ;;  %v9800_v3 = vadd.f32 %v9799_v57, %v9737_v38  ;;  %v13442_v62 = vadd.f32 %v9350_v17, %v18158_v30  ;;  %v18167_v55 = vld [vmem:[#allocation75_spill] sm:$0xff] }
 0x666   :  { %v9677_v34 = vadd.f32 %v13441_v13, %v17864_v21 }
 0x667   :  { %v9801_v46 = vadd.f32 %v9800_v3, %v9738_v40  ;;  %v9676_v6 = vadd.f32 %v13442_v62, %v17864_v21  ;;  %v13137_v51 = vpop.f32.mrb[50].mxu1 }
 0x668   :  { %v13443_v5 = vadd.f32 %v13137_v51, %v18159_v2  ;;  %v9360_v54 = vpop.f32.mrb[51].mxu1  ;;  %v9741_v8 = vmax.f32 %v9677_v34, 0.0  ;;  %v18168_v34 = vld [vmem:[#allocation76_spill] sm:$0xff] }
 0x669   :  { %v9740_v44 = vmax.f32 %v9676_v6, 0.0  ;;  %v9802_v52 = vadd.f32 %v9801_v46, %v9739_v0  ;;  %v13444_v41 = vadd.f32 %v9360_v54, %v18160_v53  ;;  %v18169_v54 = vld [vmem:[#allocation77_spill] sm:$0xff] }
 0x66a   :  { %v9679_v37 = vadd.f32 %v13443_v5, %v17864_v21 }
 0x66b   :  { %v9803_v50 = vadd.f32 %v9802_v52, %v9740_v44  ;;  %v9678_v35 = vadd.f32 %v13444_v41, %v17864_v21  ;;  %v13140_v59 = vpop.f32.mrb[52].mxu1 }
 0x66c   :  { %v13445_v31 = vadd.f32 %v13140_v59, %v18161_v58  ;;  %v9370_v26 = vpop.f32.mrb[53].mxu1  ;;  %v9743_v10 = vmax.f32 %v9679_v37, 0.0 }
 0x66d   :  { %v9742_v27 = vmax.f32 %v9678_v35, 0.0  ;;  %v9804_v61 = vadd.f32 %v9803_v50, %v9741_v8  ;;  %v13446_v43 = vadd.f32 %v9370_v26, %v18162_v28  ;;  %v18170_v50 = vld [vmem:[#allocation78_spill] sm:$0xff] }
 0x66e   :  { %v9681_v60 = vadd.f32 %v13445_v31, %v17864_v21  ;;  %v18171_v31 = vld [vmem:[#allocation79_spill] sm:$0xff] }
 0x66f   :  { %v9805_v19 = vadd.f32 %v9804_v61, %v9742_v27  ;;  %v9680_v63 = vadd.f32 %v13446_v43, %v17864_v21  ;;  %v13143_v9 = vpop.f32.mrb[54].mxu1 }
 0x670   :  { %v13447_v23 = vadd.f32 %v13143_v9, %v18163_v49  ;;  %v9380_v14 = vpop.f32.mrb[55].mxu1  ;;  %v9745_v20 = vmax.f32 %v9681_v60, 0.0 }
 0x671   :  { %v9744_v4 = vmax.f32 %v9680_v63, 0.0  ;;  %v9806_v18 = vadd.f32 %v9805_v19, %v9743_v10  ;;  %v13448_v7 = vadd.f32 %v9380_v14, %v18164_v16  ;;  %v18172_v19 = vld [vmem:[#allocation10_spill] sm:$0xff] }
 0x672   :  { %v9683_v36 = vadd.f32 %v13447_v23, %v17864_v21  ;;  %v18173_v23 = vld [vmem:[#allocation11_spill] sm:$0xff] }
 0x673   :  { %v9807_v12 = vadd.f32 %v9806_v18, %v9744_v4  ;;  %v9682_v32 = vadd.f32 %v13448_v7, %v17864_v21  ;;  %v13146_v47 = vpop.f32.mrb[56].mxu1 }
 0x674   :  { %v13449_v25 = vadd.f32 %v13146_v47, %v18165_v42  ;;  %v9390_v22 = vpop.f32.mrb[57].mxu1  ;;  %v9747_v11 = vmax.f32 %v9683_v36, 0.0  ;;  %v18174_v36 = vld [vmem:[#allocation12_spill] sm:$0xff] }
 0x675   :  { %v9746_v15 = vmax.f32 %v9682_v32, 0.0  ;;  %v9808_v33 = vadd.f32 %v9807_v12, %v9745_v20  ;;  %v13450_v1 = vadd.f32 %v9390_v22, %v18166_v45  ;;  %v18175_v22 = vld [vmem:[#allocation13_spill] sm:$0xff] }
 0x676   :  { %v9685_v38 = vadd.f32 %v13449_v25, %v17864_v21 }
 0x677   :  { %v9809_v39 = vadd.f32 %v9808_v33, %v9746_v15  ;;  %v9684_v57 = vadd.f32 %v13450_v1, %v17864_v21  ;;  %v13149_v48 = vpop.f32.mrb[58].mxu1 }
 0x678   :  { %v13451_v56 = vadd.f32 %v13149_v48, %v18167_v55  ;;  %v9400_v29 = vpop.f32.mrb[59].mxu1  ;;  %v9749_v3 = vmax.f32 %v9685_v38, 0.0  ;;  %v18177_v55 = vld [vmem:[#allocation15_spill] sm:$0xff] }
 0x679   :  { %v9748_v13 = vmax.f32 %v9684_v57, 0.0  ;;  %v9810_v17 = vadd.f32 %v9809_v39, %v9747_v11  ;;  %v13452_v40 = vadd.f32 %v9400_v29, %v17544_v24  ;;  %v18176_v39 = vld [vmem:[#allocation14_spill] sm:$0xff] }
 0x67a   :  { %v9687_v62 = vadd.f32 %v13451_v56, %v17864_v21 }
 0x67b   :  { %v9811_v30 = vadd.f32 %v9810_v17, %v9748_v13  ;;  %v9686_v0 = vadd.f32 %v13452_v40, %v17864_v21  ;;  %v13152_v46 = vpop.f32.mrb[60].mxu1 }
 0x67c   :  { %v13453_v6 = vadd.f32 %v13152_v46, %v18168_v34  ;;  %v9410_v51 = vpop.f32.mrb[61].mxu1  ;;  %v9751_v52 = vmax.f32 %v9687_v62, 0.0 }
 0x67d   :  { %v9750_v2 = vmax.f32 %v9686_v0, 0.0  ;;  %v9812_v5 = vadd.f32 %v9811_v30, %v9749_v3  ;;  %v13454_v44 = vadd.f32 %v9410_v51, %v18169_v54  ;;  %v18178_v30 = vld [vmem:[#allocation16_spill] sm:$0xff] }
 0x67e   :  { %v9689_v41 = vadd.f32 %v13453_v6, %v17864_v21  ;;  %v18179_v6 = vld [vmem:[#allocation17_spill] sm:$0xff] }
 0x67f   :  { %v9813_v53 = vadd.f32 %v9812_v5, %v9750_v2  ;;  %v9688_v24 = vadd.f32 %v13454_v44, %v17864_v21  ;;  %v13155_v8 = vpop.f32.mrb[62].mxu1 }
 0x680   :  { %v13455_v37 = vadd.f32 %v13155_v8, %v18170_v50  ;;  %v9420_v35 = vpop.f32.mrb[63].mxu1  ;;  %v9753_v27 = vmax.f32 %v9689_v41, 0.0 }
 0x681   :  { %v9752_v59 = vmax.f32 %v9688_v24, 0.0  ;;  %v9814_v58 = vadd.f32 %v9813_v53, %v9751_v52  ;;  %v13456_v26 = vadd.f32 %v9420_v35, %v18171_v31  ;;  %v18180_v53 = vld [vmem:[#allocation18_spill] sm:$0xff] }
 0x682   :  { %v9691_v28 = vadd.f32 %v13455_v37, %v17864_v21  ;;  %v18181_v37 = vld [vmem:[#allocation19_spill] sm:$0xff] }
 0x683   :  { %v9815_v61 = vadd.f32 %v9814_v58, %v9752_v59  ;;  %v9690_v43 = vadd.f32 %v13456_v26, %v17864_v21  ;;  %v13158_v10 = vpop.f32.mrb[0].mxu1 }
 0x684   :  { %v13457_v60 = vadd.f32 %v13158_v10, %v18172_v19  ;;  %v9430_v63 = vpop.f32.mrb[1].mxu1  ;;  %v9755_v18 = vmax.f32 %v9691_v28, 0.0 }
 0x685   :  { %v9754_v9 = vmax.f32 %v9690_v43, 0.0  ;;  %v9816_v49 = vadd.f32 %v9815_v61, %v9753_v27  ;;  %v13458_v14 = vadd.f32 %v9430_v63, %v18173_v23  ;;  %v18182_v61 = vld [vmem:[#allocation20_spill] sm:$0xff] }
 0x686   :  { %v9693_v4 = vadd.f32 %v13457_v60, %v17864_v21  ;;  %v18183_v60 = vld [vmem:[#allocation21_spill] sm:$0xff] }
 0x687   :  { %v9817_v16 = vadd.f32 %v9816_v49, %v9754_v9  ;;  %v9692_v7 = vadd.f32 %v13458_v14, %v17864_v21  ;;  %v13161_v20 = vpop.f32.mrb[2].mxu1 }
 0x688   :  { %v9757_v12 = vmax.f32 %v9693_v4, 0.0  ;;  %v13459_v32 = vadd.f32 %v13161_v20, %v18174_v36  ;;  %v9440_v47 = vpop.f32.mrb[3].mxu1  ;;  %v18185_v36 = vld [vmem:[#allocation23_spill] sm:$0xff] }
 0x689   :  { %v17957_v42 = vadd.f32 %v9817_v16, %v9755_v18  ;;  %v9756_v25 = vmax.f32 %v9692_v7, 0.0  ;;  %v13460_v15 = vadd.f32 %v9440_v47, %v18175_v22  ;;  %v18184_v18 = vld [vmem:[#allocation22_spill] sm:$0xff] }
 0x68a   :  { %v9695_v45 = vadd.f32 %v13459_v32, %v17864_v21 }
 0x68b   :  { %v9825_v33 = vadd.f32 %v9757_v12, %v9756_v25  ;;  %v9694_v1 = vadd.f32 %v13460_v15, %v17864_v21  ;;  %v13164_v11 = vpop.f32.mrb[4].mxu1 }
 0x68c   :  { %v13461_v38 = vadd.f32 %v13164_v11, %v18176_v39  ;;  %v9450_v57 = vpop.f32.mrb[5].mxu1  ;;  %v9759_v29 = vmax.f32 %v9695_v45, 0.0  ;;  %v18186_v45 = vld [vmem:[#allocation24_spill] sm:$0xff] }
 0x68d   :  { %v9758_v48 = vmax.f32 %v9694_v1, 0.0  ;;  %v13462_v56 = vadd.f32 %v9450_v57, %v18177_v55  ;;  %v18187_v57 = vld [vmem:[#allocation25_spill] sm:$0xff] }
 0x68e   :  { %v9697_v17 = vadd.f32 %v13461_v38, %v17864_v21 }
 0x68f   :  { %v9826_v13 = vadd.f32 %v9825_v33, %v9758_v48  ;;  %v9696_v40 = vadd.f32 %v13462_v56, %v17864_v21  ;;  %v13167_v3 = vpop.f32.mrb[6].mxu1 }
 0x690   :  { %v13463_v62 = vadd.f32 %v13167_v3, %v18178_v30  ;;  %v9460_v0 = vpop.f32.mrb[7].mxu1  ;;  %v9761_v2 = vmax.f32 %v9697_v17, 0.0 }
 0x691   :  { %v9760_v46 = vmax.f32 %v9696_v40, 0.0  ;;  %v9827_v34 = vadd.f32 %v9826_v13, %v9759_v29  ;;  %v13464_v51 = vadd.f32 %v9460_v0, %v18179_v6  ;;  %v18188_v40 = vld [vmem:[#allocation26_spill] sm:$0xff] }
 0x692   :  { %v9699_v54 = vadd.f32 %v13463_v62, %v17864_v21 }
 0x693   :  { %v9828_v5 = vadd.f32 %v9827_v34, %v9760_v46  ;;  %v9698_v44 = vadd.f32 %v13464_v51, %v17864_v21  ;;  %v13170_v52 = vpop.f32.mrb[8].mxu1  ;;  %v18189_v46 = vld [vmem:[#allocation27_spill] sm:$0xff] }
 0x694   :  { %v13465_v41 = vadd.f32 %v13170_v52, %v18180_v53  ;;  %v9470_v24 = vpop.f32.mrb[9].mxu1  ;;  %v9763_v59 = vmax.f32 %v9699_v54, 0.0 }
 0x695   :  { %v9762_v8 = vmax.f32 %v9698_v44, 0.0  ;;  %v9829_v50 = vadd.f32 %v9828_v5, %v9761_v2  ;;  %v13466_v35 = vadd.f32 %v9470_v24, %v18181_v37  ;;  %v18190_v44 = vld [vmem:[#allocation28_spill] sm:$0xff] }
 0x696   :  { %v9701_v31 = vadd.f32 %v13465_v41, %v17864_v21 }
 0x697   :  { %v9830_v58 = vadd.f32 %v9829_v50, %v9762_v8  ;;  %v9700_v26 = vadd.f32 %v13466_v35, %v17864_v21  ;;  %v13173_v27 = vpop.f32.mrb[10].mxu1  ;;  %v18191_v8 = vld [vmem:[#allocation29_spill] sm:$0xff] }
 0x698   :  { %v13467_v28 = vadd.f32 %v13173_v27, %v18182_v61  ;;  %v9480_v43 = vpop.f32.mrb[11].mxu1  ;;  %v9765_v9 = vmax.f32 %v9701_v31, 0.0 }
 0x699   :  { %v9764_v10 = vmax.f32 %v9700_v26, 0.0  ;;  %v9831_v19 = vadd.f32 %v9830_v58, %v9763_v59  ;;  %v13468_v63 = vadd.f32 %v9480_v43, %v18183_v60  ;;  %v18192_v26 = vld [vmem:[#allocation30_spill] sm:$0xff] }
 0x69a   :  { %v9703_v23 = vadd.f32 %v13467_v28, %v17864_v21 }
 0x69b   :  { %v9832_v49 = vadd.f32 %v9831_v19, %v9764_v10  ;;  %v9702_v14 = vadd.f32 %v13468_v63, %v17864_v21  ;;  %v13176_v4 = vpop.f32.mrb[12].mxu1  ;;  %v18193_v10 = vld [vmem:[#allocation31_spill] sm:$0xff] }
 0x69c   :  { %v13469_v16 = vadd.f32 %v13176_v4, %v18184_v18  ;;  %v9490_v7 = vpop.f32.mrb[13].mxu1  ;;  %v9767_v47 = vmax.f32 %v9703_v23, 0.0 }
 0x69d   :  { %v9766_v20 = vmax.f32 %v9702_v14, 0.0  ;;  %v9833_v12 = vadd.f32 %v9832_v49, %v9765_v9  ;;  %v13470_v32 = vadd.f32 %v9490_v7, %v18185_v36  ;;  %v18194_v14 = vld [vmem:[#allocation32_spill] sm:$0xff] }
 0x69e   :  { %v9705_v22 = vadd.f32 %v13469_v16, %v17864_v21 }
 0x69f   :  { %v9834_v25 = vadd.f32 %v9833_v12, %v9766_v20  ;;  %v9704_v15 = vadd.f32 %v13470_v32, %v17864_v21  ;;  %v13179_v33 = vpop.f32.mrb[14].mxu1  ;;  %v18195_v20 = vld [vmem:[#allocation33_spill] sm:$0xff] }
 0x6a0   :  { %v13471_v1 = vadd.f32 %v13179_v33, %v18186_v45  ;;  %v9500_v11 = vpop.f32.mrb[15].mxu1  ;;  %v9769_v55 = vmax.f32 %v9705_v22, 0.0 }
 0x6a1   :  { %v9768_v39 = vmax.f32 %v9704_v15, 0.0  ;;  %v9835_v38 = vadd.f32 %v9834_v25, %v9767_v47  ;;  %v13472_v48 = vadd.f32 %v9500_v11, %v18187_v57  ;;  %v18196_v15 = vld [vmem:[#allocation34_spill] sm:$0xff] }
 0x6a2   :  { %v9707_v29 = vadd.f32 %v13471_v1, %v17864_v21 }
 0x6a3   :  { %v9836_v56 = vadd.f32 %v9835_v38, %v9768_v39  ;;  %v9706_v13 = vadd.f32 %v13472_v48, %v17864_v21  ;;  %v13182_v17 = vpop.f32.mrb[16].mxu1  ;;  %v18197_v39 = vld [vmem:[#allocation35_spill] sm:$0xff] }
 0x6a4   :  { %v13473_v3 = vadd.f32 %v13182_v17, %v18188_v40  ;;  %v9510_v30 = vpop.f32.mrb[17].mxu1  ;;  %v9771_v6 = vmax.f32 %v9707_v29, 0.0 }
 0x6a5   :  { %v9770_v62 = vmax.f32 %v9706_v13, 0.0  ;;  %v9837_v0 = vadd.f32 %v9836_v56, %v9769_v55  ;;  %v13474_v34 = vadd.f32 %v9510_v30, %v18189_v46  ;;  %v18198_v13 = vld [vmem:[#allocation36_spill] sm:$0xff] }
 0x6a6   :  { %v9709_v2 = vadd.f32 %v13473_v3, %v17864_v21 }
 0x6a7   :  { %v9838_v51 = vadd.f32 %v9837_v0, %v9770_v62  ;;  %v9708_v5 = vadd.f32 %v13474_v34, %v17864_v21  ;;  %v13185_v54 = vpop.f32.mrb[18].mxu1  ;;  %v18199_v62 = vld [vmem:[#allocation37_spill] sm:$0xff] }
 0x6a8   :  { %v13475_v52 = vadd.f32 %v13185_v54, %v18190_v44  ;;  %v9520_v53 = vpop.f32.mrb[19].mxu1  ;;  %v9773_v37 = vmax.f32 %v9709_v2, 0.0 }
 0x6a9   :  { %v9772_v41 = vmax.f32 %v9708_v5, 0.0  ;;  %v9839_v24 = vadd.f32 %v9838_v51, %v9771_v6  ;;  %v13476_v50 = vadd.f32 %v9520_v53, %v18191_v8  ;;  %v18200_v5 = vld [vmem:[#allocation38_spill] sm:$0xff]  ;;  %v9819_v8 = vrot.slane %v17957_v42, 4 }
 0x6aa   :  { %v9711_v59 = vadd.f32 %v13475_v52, %v17864_v21 }
 0x6ab   :  { %v9840_v35 = vadd.f32 %v9839_v24, %v9772_v41  ;;  %v9710_v58 = vadd.f32 %v13476_v50, %v17864_v21  ;;  %v13188_v31 = vpop.f32.mrb[20].mxu1  ;;  %v18201_v41 = vld [vmem:[#allocation39_spill] sm:$0xff] }
 0x6ac   :  { %v13477_v27 = vadd.f32 %v13188_v31, %v18192_v26  ;;  %v9530_v61 = vpop.f32.mrb[21].mxu1  ;;  %v9775_v60 = vmax.f32 %v9711_v59, 0.0  ;;  %v18202_v31 = vld [vmem:[#allocation40_spill] sm:$0xff] }
 0x6ad   :  { %v9774_v28 = vmax.f32 %v9710_v58, 0.0  ;;  %v9841_v43 = vadd.f32 %v9840_v35, %v9773_v37  ;;  %v13478_v19 = vadd.f32 %v9530_v61, %v18193_v10 }
 0x6ae   :  { %v9713_v9 = vadd.f32 %v13477_v27, %v17864_v21 }
 0x6af   :  { %v9842_v63 = vadd.f32 %v9841_v43, %v9774_v28  ;;  %v9712_v49 = vadd.f32 %v13478_v19, %v17864_v21  ;;  %v13191_v23 = vpop.f32.mrb[22].mxu1  ;;  %v18203_v43 = vld [vmem:[#allocation41_spill] sm:$0xff]  ;;  %v9820_v19 = vadd.f32 %v9819_v8, %v17957_v42 }
 0x6b0   :  { %v13479_v4 = vadd.f32 %v13191_v23, %v18194_v14  ;;  %v9540_v18 = vpop.f32.mrb[23].mxu1  ;;  %v9777_v36 = vmax.f32 %v9713_v9, 0.0 }
 0x6b1   :  { %v9776_v16 = vmax.f32 %v9712_v49, 0.0  ;;  %v9843_v7 = vadd.f32 %v9842_v63, %v9775_v60  ;;  %v13480_v12 = vadd.f32 %v9540_v18, %v18195_v20 }
 0x6b2   :  { %v9715_v47 = vadd.f32 %v13479_v4, %v17864_v21  ;;  %v9821_v4 = vrot.slane %v9820_v19, 2 }
 0x6b3   :  { %v9844_v32 = vadd.f32 %v9843_v7, %v9776_v16  ;;  %v9714_v25 = vadd.f32 %v13480_v12, %v17864_v21  ;;  %v13194_v22 = vpop.f32.mrb[24].mxu1 }
 0x6b4   :  { %v13481_v33 = vadd.f32 %v13194_v22, %v18196_v15  ;;  %v9550_v45 = vpop.f32.mrb[25].mxu1  ;;  %v9779_v57 = vmax.f32 %v9715_v47, 0.0  ;;  %v9822_v20 = vadd.f32 %v9821_v4, %v9820_v19 }
 0x6b5   :  { %v9778_v1 = vmax.f32 %v9714_v25, 0.0  ;;  %v9845_v11 = vadd.f32 %v9844_v32, %v9777_v36  ;;  %v13482_v38 = vadd.f32 %v9550_v45, %v18197_v39 }
 0x6b6   :  { %v9717_v55 = vadd.f32 %v13481_v33, %v17864_v21  ;;  %v9823_v32 = vrot.slane %v9822_v20, 1 }
 0x6b7   :  { %v9846_v48 = vadd.f32 %v9845_v11, %v9778_v1  ;;  %v9716_v56 = vadd.f32 %v13482_v38, %v17864_v21  ;;  %v13197_v29 = vpop.f32.mrb[26].mxu1 }
 0x6b8   :  { %v13483_v17 = vadd.f32 %v13197_v29, %v18198_v13  ;;  %v9560_v40 = vpop.f32.mrb[27].mxu1  ;;  %v9781_v46 = vmax.f32 %v9717_v55, 0.0  ;;  %v9824_v22 = vadd.f32 %v9823_v32, %v9822_v20 }
 0x6b9   :  { %v9780_v3 = vmax.f32 %v9716_v56, 0.0  ;;  %v9847_v30 = vadd.f32 %v9846_v48, %v9779_v57  ;;  %v13484_v0 = vadd.f32 %v9560_v40, %v18199_v62 }
 0x6ba   :  { %v9719_v6 = vadd.f32 %v13483_v17, %v17864_v21  ;;  %v9863_v33 = vmul.f32 0.00390625, %v9824_v22 }
 0x6bb   :  { %v9848_v34 = vadd.f32 %v9847_v30, %v9780_v3  ;;  %v9718_v51 = vadd.f32 %v13484_v0, %v17864_v21  ;;  %v13200_v2 = vpop.f32.mrb[28].mxu1 }
 0x6bc   :  { %v13485_v54 = vadd.f32 %v13200_v2, %v18200_v5  ;;  %v9570_v44 = vpop.f32.mrb[29].mxu1  ;;  %v9783_v50 = vmax.f32 %v9719_v6, 0.0 }
 0x6bd   :  { %v9782_v52 = vmax.f32 %v9718_v51, 0.0  ;;  %v9849_v53 = vadd.f32 %v9848_v34, %v9781_v46  ;;  %v13486_v24 = vadd.f32 %v9570_v44, %v18201_v41 }
 0x6be   :  { %v9721_v35 = vadd.f32 %v13485_v54, %v17864_v21 }
 0x6bf   :  { %v9850_v37 = vadd.f32 %v9849_v53, %v9782_v52  ;;  %v9720_v59 = vadd.f32 %v13486_v24, %v17864_v21  ;;  %v13203_v58 = vpop.f32.mrb[30].mxu1 }
 0x6c0   :  { %v13487_v26 = vadd.f32 %v13203_v58, %v18202_v31  ;;  %v9580_v27 = vpop.f32.mrb[31].mxu1  ;;  %v9785_v60 = vmax.f32 %v9721_v35, 0.0 }
 0x6c1   :  { %v9784_v61 = vmax.f32 %v9720_v59, 0.0  ;;  %v9851_v28 = vadd.f32 %v9850_v37, %v9783_v50  ;;  %v13488_v10 = vadd.f32 %v9580_v27, %v18203_v43 }
 0x6c2   :  { %v9723_v9 = vadd.f32 %v13487_v26, %v17864_v21 }
 0x6c3   :  { %v9852_v63 = vadd.f32 %v9851_v28, %v9784_v61  ;;  %v9722_v49 = vadd.f32 %v13488_v10, %v17864_v21  ;;  %v10878_v21 = vld [vmem:[%s18041_s6] ss:$0 sm:$0xff] }
 0x6c4   :  { %v9787_v18 = vmax.f32 %v9723_v9, 0.0 }
 0x6c5   :  { %v9786_v23 = vmax.f32 %v9722_v49, 0.0  ;;  %v9853_v14 = vadd.f32 %v9852_v63, %v9785_v60 }
 0x6c7   :  { %v9854_v16 = vadd.f32 %v9853_v14, %v9786_v23 }
 0x6c9   :  { %v9855_v7 = vadd.f32 %v9854_v16, %v9787_v18 }
 0x6cb   :  { %v9856_v12 = vrot.slane %v9855_v7, 4 }
 0x6cd   :  { %v9857_v36 = vadd.f32 %v9856_v12, %v9855_v7 }
 0x6cf   :  { %v9858_v47 = vrot.slane %v9857_v36, 2 }
 0x6d1   :  { %v9859_v25 = vadd.f32 %v9858_v47, %v9857_v36 }
 0x6d3   :  { %v9860_v42 = vrot.slane %v9859_v25, 1 }
 0x6d5   :  { %v9861_v15 = vadd.f32 %v9860_v42, %v9859_v25 }
 0x6d7   :  { %v9864_v45 = vmul.f32 0.00390625, %v9861_v15 }
 0x6d9   :  { %v9891_v1 = vsel %vm9890_vm7, %v9864_v45, %v9863_v33 }
 0x6da   :  { %13237 = vmatmul.mubr.f32.vlgmr.msra.gmra.mrb[64].mxu0 %v9891_v1 }
 0x7ad   :  { %v9959_v11 = vpop.f32.mrb[64].mxu0 }
 0x7ae   :  { %v9960_v39 = vadd.f32 %v10878_v21, %v9959_v11  ;;  %v13238_v38 = vpop.f32.mrb[65].mxu0 }
 0x7b0   :  { %9964 = vst.msk [vmem:[#allocation3] sm:$0x3] %vm9963_vm8, %v9960_v39 }
 0x7b1   :  { %13956 = shalt.err (!%p13953_p4)
}
 0x7b2   :  { %s13957_s25 = scalar_lea.hbm %s18042_s7, 32 }
 0x7b3   :  { %p13958_p5 = scmp.ne.s32.totalorder %s18042_s7, %s13957_s25  ;;  %p13961_p6 = scmp.lt.u32.totalorder %s13957_s25, %s18042_s7 }
 0x7b5   :  { %p13963_p7 = pnand %p13961_p6, %p13958_p5 }
 0x7b7   :  { %13966 = shalt.err (!%p13963_p7)
}
 0x7b8   :  { %9974 = dma.vmem_to_hbm [thread:$0]  %s9972_s21, 32, %s18042_s7, [#allocation4]  }
 0x7b9   :  { %13967 = dma.done.wait [#allocation4], 32  }
 0x7ba   :  { %13968 = vsyncadd [#allocation4], 4294967264 }
 0x7bb   :  { %9978 = vsyncpa [#allocation4], 1 }

</bundles_post_ra>
